<compile_context>
chip_gen: v7x
topology: tpu7x:2x2x1
jax: 0.10.0
libtpu: 0.0.40
codegen_flags: <defaults>
</compile_context>

<pallas_src>
import jax
import jax.numpy as jnp
from jax.experimental import pallas as pl
from jax.experimental.pallas import tpu as pltpu

# ---------------- synthetic "BERT" config (small shapes) ----------------
HIDDEN = 32          # bert.config.hidden_size (embedding_dim in the module)
N_HEADS = 2
HEAD_DIM = HIDDEN // N_HEADS
FFN = 64             # intermediate size
N_LAYERS = 2
VOCAB = 100
MAX_POS = 64
OUTPUT_DIM = 17      # number of POS tags (output_dim)
FC_PAD = 128         # lane-dense padded classifier width
LN_EPS = 1e-12       # BERT layer-norm eps
BF = jnp.bfloat16    # MXU-input dtype (accumulation stays f32)


# ---------------- in-kernel helpers ----------------
def _gelu(x):
    # TODO(synk): HF BERT uses exact erf-GELU; tanh approximation used here (EUP-friendly).
    c = 0.7978845608028654  # sqrt(2/pi)
    return 0.5 * x * (1.0 + jnp.tanh(c * (x + 0.044715 * x * x * x)))


def _layernorm(x, g, b):
    # single-pass variance (E[x^2] - E[x]^2): the two row reductions are independent,
    # removing the dependent (x - mu)^2 second pass from the serial chain.
    mu = jnp.mean(x, axis=-1, keepdims=True)
    ex2 = jnp.mean(x * x, axis=-1, keepdims=True)
    var = jnp.maximum(ex2 - mu * mu, 0.0)
    return (x - mu) * jax.lax.rsqrt(var + LN_EPS) * g + b


def _mm(a, b):
    return jnp.dot(a, b, preferred_element_type=jnp.float32)


# ---------------- fully fused forward kernel ----------------
def fused_bert_tagger_kernel(wemb_ref, emb_aux_ref, wqkv_ref, wo_ref,
                             w1_ref, w2_ref, vech_ref, b1_ref, fc_ref, o_ref):
    BB, S, H = wemb_ref.shape          # batch tile of sentences
    TT = BB * S                        # token rows in this program
    HD = HEAD_DIM
    scale = 1.0 / float(HD) ** 0.5

    # ---- embeddings: word + precomputed (pos + token-type-0) table, then LN ----
    aux = emb_aux_ref[...]                     # (2 + MAX_POS, H) f32
    g0, b0 = aux[0:1], aux[1:2]
    pos_type = aux[2:2 + S]                    # (S, H)

    x = wemb_ref[...].astype(jnp.float32) + pos_type[None, :, :]
    x2 = _layernorm(x.reshape(TT, H), g0, b0)  # flattened activation slab (TT, H)

    # ---- transformer encoder layers (static unroll, weights VMEM-resident) ----
    for l in range(N_LAYERS):
        vec = vech_ref[l]                                  # (9, H) packed per-layer vectors
        bq, bk, bv = vec[0:1], vec[1:2], vec[2:3]
        bo, g1, be1 = vec[3:4], vec[4:5], vec[5:6]
        b2, g2, be2 = vec[6:7], vec[7:8], vec[8:9]

        # one fused QKV projection (96 output lanes) instead of three tiny matmuls
        qkv = _mm(x2.astype(BF), wqkv_ref[l])              # (TT, 3H) f32
        q = (qkv[:, 0:H] + bq) * scale                     # 1/sqrt(HD) folded into q
        k = qkv[:, H:2 * H] + bk
        v = qkv[:, 2 * H:3 * H] + bv

        # fold heads into the leading batch axis -> single batched score/context einsums
        def to_heads(t):
            t3 = t.reshape(BB, S, H)
            return jnp.concatenate(
                [t3[:, :, h * HD:(h + 1) * HD] for h in range(N_HEADS)], axis=0
            ).astype(BF)                                   # (N_HEADS*BB, S, HD)

        qh, kh, vh = to_heads(q), to_heads(k), to_heads(v)
        s = jnp.einsum('bqd,bkd->bqk', qh, kh, preferred_element_type=jnp.float32)
        m = jnp.max(s, axis=-1, keepdims=True)
        p = jnp.exp(s - m)
        p = p * pl.reciprocal(jnp.sum(p, axis=-1, keepdims=True), approx=True)  # EUP
        ctx = jnp.einsum('bqk,bkd->bqd', p.astype(BF), vh,
                         preferred_element_type=jnp.float32)  # (N_HEADS*BB, S, HD)

        # reassemble heads on the lane axis; ONE full-H output projection
        ctx = jnp.concatenate([ctx[h * BB:(h + 1) * BB] for h in range(N_HEADS)],
                              axis=-1)                     # (BB, S, H)
        attn = _mm(ctx.reshape(TT, H).astype(BF), wo_ref[l]) + bo

        h1 = _layernorm(x2 + attn, g1, be1)                # post-LN residual 1
        ff = _mm(_gelu(_mm(h1.astype(BF), w1_ref[l]) + b1_ref[l]).astype(BF),
                 w2_ref[l]) + b2
        x2 = _layernorm(h1 + ff, g2, be2)                  # post-LN residual 2

    # ---- classifier head: dropout(.) twice is identity at inference ----
    # Lane-dense (TT, 128) store; wrapper slices the real OUTPUT_DIM columns.
    o_ref[...] = (_mm(x2.astype(BF), fc_ref[0:H, :])
                  + fc_ref[H:H + 1, :].astype(jnp.float32)).astype(o_ref.dtype)


# ---------------- deterministic parameter init (packed / fused weights) ----------------
def init_params(key):
    keys = iter(jax.random.split(key, 16))
    nrm = lambda shape: (0.02 * jax.random.normal(next(keys), shape)).astype(jnp.float32)
    L, H, F = N_LAYERS, HIDDEN, FFN

    word_emb = nrm((VOCAB, H))
    pos_emb = nrm((MAX_POS, H))
    type_emb = nrm((2, H))
    # packed embedding aux: row0 = LN gamma, row1 = LN beta, rows 2.. = pos + token-type-0
    emb_aux = jnp.concatenate(
        [jnp.ones((1, H), jnp.float32), jnp.zeros((1, H), jnp.float32),
         pos_emb + type_emb[0:1]], axis=0)

    # fused QKV weight (L, H, 3H); matmul weights stored bf16 (f32 accumulation in kernel)
    wqkv = jnp.concatenate([nrm((L, H, H)), nrm((L, H, H)), nrm((L, H, H))],
                           axis=-1).astype(BF)
    wo = nrm((L, H, H)).astype(BF)
    w1 = nrm((L, H, F)).astype(BF)
    w2 = nrm((L, F, H)).astype(BF)

    zer = jnp.zeros((L, 1, H), jnp.float32)
    one = jnp.ones((L, 1, H), jnp.float32)
    # packed per-layer H-wide vectors: [bq, bk, bv, bo, ln1_g, ln1_b, b2, ln2_g, ln2_b]
    vec_h = jnp.concatenate([zer, zer, zer, zer, one, zer, zer, one, zer], axis=1)
    b1 = jnp.zeros((L, 1, F), jnp.float32)

    # classifier head: nn.Linear(embedding_dim, output_dim), padded to 128 lanes once
    # at init; last row carries the bias (zeros here, so the bf16 cast is exact).
    fc_w = nrm((H, OUTPUT_DIM))
    fc_b = jnp.zeros((1, OUTPUT_DIM), jnp.float32)
    fc_packed = jnp.concatenate(
        [jnp.pad(fc_w, ((0, 0), (0, FC_PAD - OUTPUT_DIM))),
         jnp.pad(fc_b, ((0, 0), (0, FC_PAD - OUTPUT_DIM)))], axis=0).astype(BF)

    return {"word_emb": word_emb, "emb_aux": emb_aux, "wqkv": wqkv, "wo": wo,
            "w1": w1, "w2": w2, "vec_h": vec_h, "b1": b1, "fc_packed": fc_packed}


# ---------------- full forward (use_rnn=False branch) ----------------
def bert_pos_tagger_forward(params, text, att_mask):
    # The reference's non-RNN branch calls self.bert(text) WITHOUT att_mask, so HF
    # defaults to an all-ones attention mask; att_mask is accepted but unused and the
    # (structurally zero) additive-mask path is removed entirely.
    del att_mask
    B, S = text.shape
    assert S <= MAX_POS

    # token gather stays in plain JAX (glue); everything else runs in one fused kernel.
    wemb = params["word_emb"][text]                        # (B, S, H) f32

    # batch tile: >=128 token rows per grid step when possible, while exposing >=2
    # "parallel" programs so v7x's second TensorCore is used (neutral on v5e/v6e).
    if B % 2 == 0 and (B // 2) * S >= 128:
        bb = B // 2
    else:
        bb = B
    grid = (B // bb,)

    L, H, F = N_LAYERS, HIDDEN, FFN
    full = lambda shape: pl.BlockSpec(shape, lambda i: (0,) * len(shape))

    logits_pad = pl.pallas_call(
        fused_bert_tagger_kernel,
        grid=grid,
        in_specs=[
            pl.BlockSpec((bb, S, H), lambda i: (i, 0, 0)),   # gathered word embeddings (tiled)
            full((2 + MAX_POS, H)),                          # emb LN params + pos/type table
            full((L, H, 3 * H)),                             # fused QKV weight
            full((L, H, H)),                                 # attention output projection
            full((L, H, F)),                                 # FFN in
            full((L, F, H)),                                 # FFN out
            full((L, 9, H)),                                 # packed biases / LN params
            full((L, 1, F)),                                 # FFN bias 1
            full((H + 1, FC_PAD)),                           # fc weight + bias (padded)
        ],
        out_specs=pl.BlockSpec((bb * S, FC_PAD), lambda i: (i, 0)),
        out_shape=jax.ShapeDtypeStruct((B * S, FC_PAD), jnp.float32),
        compiler_params=pltpu.CompilerParams(dimension_semantics=("parallel",)),
    )(wemb, params["emb_aux"], params["wqkv"], params["wo"],
      params["w1"], params["w2"], params["vec_h"], params["b1"], params["fc_packed"])

    return logits_pad[:, :OUTPUT_DIM].reshape(B, S, OUTPUT_DIM)


if __name__ == "__main__":
    key = jax.random.PRNGKey(0)
    pkey, tkey = jax.random.split(key)
    params = init_params(pkey)

    B, S = 32, 8   # 256 tokens -> two parallel 128-row token tiles
    text = jax.random.randint(tkey, (B, S), 0, VOCAB, dtype=jnp.int32)
    att_mask = jnp.ones((B, S), jnp.int32)

    out = bert_pos_tagger_forward(params, text, att_mask)
    out = jax.block_until_ready(out)
    assert out.shape == (B, S, OUTPUT_DIM)
    assert bool(jnp.all(jnp.isfinite(out)))
    print("KERNEL_OK")
</pallas_src>

<mosaic_0001>
module attributes {stable_mosaic.version = 11 : i64} {
  func.func @fused_bert_tagger_kernel(%arg0: i32, %arg1: memref<16x8x32xf32, #tpu.memory_space<vmem>>, %arg2: memref<66x32xf32, #tpu.memory_space<vmem>>, %arg3: memref<2x32x96xbf16, #tpu.memory_space<vmem>>, %arg4: memref<2x32x32xbf16, #tpu.memory_space<vmem>>, %arg5: memref<2x32x64xbf16, #tpu.memory_space<vmem>>, %arg6: memref<2x64x32xbf16, #tpu.memory_space<vmem>>, %arg7: memref<2x9x32xf32, #tpu.memory_space<vmem>>, %arg8: memref<2x1x64xf32, #tpu.memory_space<vmem>>, %arg9: memref<33x128xbf16, #tpu.memory_space<vmem>>, %arg10: memref<128x128xf32, #tpu.memory_space<vmem>>) attributes {dimension_semantics = [#tpu.dimension_semantics<parallel>], iteration_bounds = array<i64: 2>, scalar_prefetch = 0 : i64, scratch_operands = 0 : i64, tpu.core_type = #tpu.core_type<tc>, window_params = [{transform_indices = @transform_0, window_bounds = array<i64: 16, 8, 32>}, {pipeline_mode = #tpu.pipeline_mode<synchronous>, transform_indices = @transform_1, window_bounds = array<i64: 66, 32>}, {pipeline_mode = #tpu.pipeline_mode<synchronous>, transform_indices = @transform_2, window_bounds = array<i64: 2, 32, 96>}, {pipeline_mode = #tpu.pipeline_mode<synchronous>, transform_indices = @transform_3, window_bounds = array<i64: 2, 32, 32>}, {pipeline_mode = #tpu.pipeline_mode<synchronous>, transform_indices = @transform_4, window_bounds = array<i64: 2, 32, 64>}, {pipeline_mode = #tpu.pipeline_mode<synchronous>, transform_indices = @transform_5, window_bounds = array<i64: 2, 64, 32>}, {pipeline_mode = #tpu.pipeline_mode<synchronous>, transform_indices = @transform_6, window_bounds = array<i64: 2, 9, 32>}, {pipeline_mode = #tpu.pipeline_mode<synchronous>, transform_indices = @transform_7, window_bounds = array<i64: 2, 1, 64>}, {pipeline_mode = #tpu.pipeline_mode<synchronous>, transform_indices = @transform_8, window_bounds = array<i64: 33, 128>}, {transform_indices = @transform_9, window_bounds = array<i64: 128, 128>}]} {
    %c0 = arith.constant 0 : index
    %c0_0 = arith.constant 0 : index
    %0 = vector.load %arg2[%c0, %c0_0] : memref<66x32xf32, #tpu.memory_space<vmem>>, vector<66x32xf32>
    %1 = vector.extract_strided_slice %0 {offsets = [0, 0], sizes = [1, 32], strides = [1, 1]} : vector<66x32xf32> to vector<1x32xf32>
    %2 = vector.extract_strided_slice %0 {offsets = [1, 0], sizes = [1, 32], strides = [1, 1]} : vector<66x32xf32> to vector<1x32xf32>
    %3 = vector.extract_strided_slice %0 {offsets = [2, 0], sizes = [8, 32], strides = [1, 1]} : vector<66x32xf32> to vector<8x32xf32>
    %c0_1 = arith.constant 0 : index
    %c0_2 = arith.constant 0 : index
    %c0_3 = arith.constant 0 : index
    %4 = vector.load %arg1[%c0_1, %c0_2, %c0_3] : memref<16x8x32xf32, #tpu.memory_space<vmem>>, vector<16x8x32xf32>
    %5 = vector.shape_cast %3 : vector<8x32xf32> to vector<1x8x32xf32>
    %6 = vector.broadcast %5 : vector<1x8x32xf32> to vector<16x8x32xf32>
    %7 = arith.addf %4, %6 : vector<16x8x32xf32>
    %8 = vector.shape_cast %7 : vector<16x8x32xf32> to vector<128x32xf32>
    %cst = arith.constant dense<0.000000e+00> : vector<128xf32>
    %9 = vector.multi_reduction <add>, %8, %cst [1] : vector<128x32xf32> to vector<128xf32>
    %10 = vector.shape_cast %9 : vector<128xf32> to vector<128x1xf32>
    %cst_4 = arith.constant 3.200000e+01 : f32
    %11 = vector.broadcast %cst_4 : f32 to vector<128x1xf32>
    %12 = arith.divf %10, %11 : vector<128x1xf32>
    %13 = arith.mulf %8, %8 : vector<128x32xf32>
    %cst_5 = arith.constant dense<0.000000e+00> : vector<128xf32>
    %14 = vector.multi_reduction <add>, %13, %cst_5 [1] : vector<128x32xf32> to vector<128xf32>
    %15 = vector.shape_cast %14 : vector<128xf32> to vector<128x1xf32>
    %cst_6 = arith.constant 3.200000e+01 : f32
    %16 = vector.broadcast %cst_6 : f32 to vector<128x1xf32>
    %17 = arith.divf %15, %16 : vector<128x1xf32>
    %18 = arith.mulf %12, %12 : vector<128x1xf32>
    %19 = arith.subf %17, %18 : vector<128x1xf32>
    %cst_7 = arith.constant 0.000000e+00 : f32
    %20 = vector.broadcast %cst_7 : f32 to vector<128x1xf32>
    %21 = arith.maximumf %19, %20 : vector<128x1xf32>
    %22 = vector.broadcast %12 : vector<128x1xf32> to vector<128x32xf32>
    %23 = arith.subf %8, %22 : vector<128x32xf32>
    %cst_8 = arith.constant 9.99999996E-13 : f32
    %24 = vector.broadcast %cst_8 : f32 to vector<128x1xf32>
    %25 = arith.addf %21, %24 : vector<128x1xf32>
    %26 = math.rsqrt %25 : vector<128x1xf32>
    %27 = vector.broadcast %26 : vector<128x1xf32> to vector<128x32xf32>
    %28 = arith.mulf %23, %27 : vector<128x32xf32>
    %29 = vector.broadcast %1 : vector<1x32xf32> to vector<128x32xf32>
    %30 = arith.mulf %28, %29 : vector<128x32xf32>
    %31 = vector.broadcast %2 : vector<1x32xf32> to vector<128x32xf32>
    %32 = arith.addf %30, %31 : vector<128x32xf32>
    %c0_9 = arith.constant 0 : index
    %c0_10 = arith.constant 0 : index
    %c0_11 = arith.constant 0 : index
    %33 = vector.load %arg7[%c0_9, %c0_10, %c0_11] : memref<2x9x32xf32, #tpu.memory_space<vmem>>, vector<1x9x32xf32>
    %34 = vector.shape_cast %33 : vector<1x9x32xf32> to vector<9x32xf32>
    %35 = vector.extract_strided_slice %34 {offsets = [0, 0], sizes = [1, 32], strides = [1, 1]} : vector<9x32xf32> to vector<1x32xf32>
    %36 = vector.extract_strided_slice %34 {offsets = [1, 0], sizes = [1, 32], strides = [1, 1]} : vector<9x32xf32> to vector<1x32xf32>
    %37 = vector.extract_strided_slice %34 {offsets = [2, 0], sizes = [1, 32], strides = [1, 1]} : vector<9x32xf32> to vector<1x32xf32>
    %38 = vector.extract_strided_slice %34 {offsets = [3, 0], sizes = [1, 32], strides = [1, 1]} : vector<9x32xf32> to vector<1x32xf32>
    %39 = vector.extract_strided_slice %34 {offsets = [4, 0], sizes = [1, 32], strides = [1, 1]} : vector<9x32xf32> to vector<1x32xf32>
    %40 = vector.extract_strided_slice %34 {offsets = [5, 0], sizes = [1, 32], strides = [1, 1]} : vector<9x32xf32> to vector<1x32xf32>
    %41 = vector.extract_strided_slice %34 {offsets = [6, 0], sizes = [1, 32], strides = [1, 1]} : vector<9x32xf32> to vector<1x32xf32>
    %42 = vector.extract_strided_slice %34 {offsets = [7, 0], sizes = [1, 32], strides = [1, 1]} : vector<9x32xf32> to vector<1x32xf32>
    %43 = vector.extract_strided_slice %34 {offsets = [8, 0], sizes = [1, 32], strides = [1, 1]} : vector<9x32xf32> to vector<1x32xf32>
    %44 = arith.truncf %32 : vector<128x32xf32> to vector<128x32xbf16>
    %c0_12 = arith.constant 0 : index
    %c0_13 = arith.constant 0 : index
    %c0_14 = arith.constant 0 : index
    %45 = vector.load %arg3[%c0_12, %c0_13, %c0_14] : memref<2x32x96xbf16, #tpu.memory_space<vmem>>, vector<1x32x96xbf16>
    %46 = vector.shape_cast %45 : vector<1x32x96xbf16> to vector<32x96xbf16>
    %cst_15 = arith.constant dense<0.000000e+00> : vector<128x96xf32>
    %47 = tpu.matmul %44, %46, %cst_15 {dimension_numbers = #tpu.dot_dimension_numbers<[1], [0], [0], [1], [0, 0, 1, 1], [], []>} : vector<128x32xbf16>, vector<32x96xbf16>, vector<128x96xf32> -> vector<128x96xf32>
    %48 = vector.extract_strided_slice %47 {offsets = [0, 0], sizes = [128, 32], strides = [1, 1]} : vector<128x96xf32> to vector<128x32xf32>
    %49 = vector.broadcast %35 : vector<1x32xf32> to vector<128x32xf32>
    %50 = arith.addf %48, %49 : vector<128x32xf32>
    %cst_16 = arith.constant 2.500000e-01 : f32
    %51 = vector.broadcast %cst_16 : f32 to vector<128x32xf32>
    %52 = arith.mulf %50, %51 : vector<128x32xf32>
    %53 = vector.extract_strided_slice %47 {offsets = [0, 32], sizes = [128, 32], strides = [1, 1]} : vector<128x96xf32> to vector<128x32xf32>
    %54 = vector.broadcast %36 : vector<1x32xf32> to vector<128x32xf32>
    %55 = arith.addf %53, %54 : vector<128x32xf32>
    %56 = vector.extract_strided_slice %47 {offsets = [0, 64], sizes = [128, 32], strides = [1, 1]} : vector<128x96xf32> to vector<128x32xf32>
    %57 = vector.broadcast %37 : vector<1x32xf32> to vector<128x32xf32>
    %58 = arith.addf %56, %57 : vector<128x32xf32>
    %59 = vector.shape_cast %52 : vector<128x32xf32> to vector<16x8x32xf32>
    %60 = vector.extract_strided_slice %59 {offsets = [0, 0, 0], sizes = [16, 8, 16], strides = [1, 1, 1]} : vector<16x8x32xf32> to vector<16x8x16xf32>
    %61 = vector.extract_strided_slice %59 {offsets = [0, 0, 16], sizes = [16, 8, 16], strides = [1, 1, 1]} : vector<16x8x32xf32> to vector<16x8x16xf32>
    %62 = tpu.concatenate %60, %61 in 0 : vector<16x8x16xf32>, vector<16x8x16xf32> -> vector<32x8x16xf32>
    %63 = arith.truncf %62 : vector<32x8x16xf32> to vector<32x8x16xbf16>
    %64 = vector.shape_cast %55 : vector<128x32xf32> to vector<16x8x32xf32>
    %65 = vector.extract_strided_slice %64 {offsets = [0, 0, 0], sizes = [16, 8, 16], strides = [1, 1, 1]} : vector<16x8x32xf32> to vector<16x8x16xf32>
    %66 = vector.extract_strided_slice %64 {offsets = [0, 0, 16], sizes = [16, 8, 16], strides = [1, 1, 1]} : vector<16x8x32xf32> to vector<16x8x16xf32>
    %67 = tpu.concatenate %65, %66 in 0 : vector<16x8x16xf32>, vector<16x8x16xf32> -> vector<32x8x16xf32>
    %68 = arith.truncf %67 : vector<32x8x16xf32> to vector<32x8x16xbf16>
    %69 = vector.shape_cast %58 : vector<128x32xf32> to vector<16x8x32xf32>
    %70 = vector.extract_strided_slice %69 {offsets = [0, 0, 0], sizes = [16, 8, 16], strides = [1, 1, 1]} : vector<16x8x32xf32> to vector<16x8x16xf32>
    %71 = vector.extract_strided_slice %69 {offsets = [0, 0, 16], sizes = [16, 8, 16], strides = [1, 1, 1]} : vector<16x8x32xf32> to vector<16x8x16xf32>
    %72 = tpu.concatenate %70, %71 in 0 : vector<16x8x16xf32>, vector<16x8x16xf32> -> vector<32x8x16xf32>
    %73 = arith.truncf %72 : vector<32x8x16xf32> to vector<32x8x16xbf16>
    "tpu.trace_start"() <{level = 10 : i32, message = "bqd,bkd->bqk"}> : () -> ()
    %cst_17 = arith.constant dense<0.000000e+00> : vector<32x8x8xf32>
    %74 = tpu.matmul %63, %68, %cst_17 {dimension_numbers = #tpu.dot_dimension_numbers<[2], [2], [1], [1], [0, 0, 0, 1, 1, 1], [0], [0]>} : vector<32x8x16xbf16>, vector<32x8x16xbf16>, vector<32x8x8xf32> -> vector<32x8x8xf32>
    "tpu.trace_stop"() : () -> ()
    %cst_18 = arith.constant dense<0xFF800000> : vector<32x8xf32>
    %75 = vector.multi_reduction <maximumf>, %74, %cst_18 [2] : vector<32x8x8xf32> to vector<32x8xf32>
    %76 = vector.shape_cast %75 : vector<32x8xf32> to vector<32x8x1xf32>
    %77 = vector.broadcast %76 : vector<32x8x1xf32> to vector<32x8x8xf32>
    %78 = arith.subf %74, %77 : vector<32x8x8xf32>
    %79 = math.exp %78 : vector<32x8x8xf32>
    %cst_19 = arith.constant dense<0.000000e+00> : vector<32x8xf32>
    %80 = vector.multi_reduction <add>, %79, %cst_19 [2] : vector<32x8x8xf32> to vector<32x8xf32>
    %81 = vector.shape_cast %80 : vector<32x8xf32> to vector<32x8x1xf32>
    %82 = tpu.reciprocal %81 {approx = true} : vector<32x8x1xf32> -> vector<32x8x1xf32>
    %83 = vector.broadcast %82 : vector<32x8x1xf32> to vector<32x8x8xf32>
    %84 = arith.mulf %79, %83 : vector<32x8x8xf32>
    %85 = arith.truncf %84 : vector<32x8x8xf32> to vector<32x8x8xbf16>
    "tpu.trace_start"() <{level = 10 : i32, message = "bqk,bkd->bqd"}> : () -> ()
    %cst_20 = arith.constant dense<0.000000e+00> : vector<32x8x16xf32>
    %86 = tpu.matmul %85, %73, %cst_20 {dimension_numbers = #tpu.dot_dimension_numbers<[2], [1], [1], [2], [0, 0, 0, 1, 1, 2], [0], [0]>} : vector<32x8x8xbf16>, vector<32x8x16xbf16>, vector<32x8x16xf32> -> vector<32x8x16xf32>
    "tpu.trace_stop"() : () -> ()
    %87 = vector.extract_strided_slice %86 {offsets = [0, 0, 0], sizes = [16, 8, 16], strides = [1, 1, 1]} : vector<32x8x16xf32> to vector<16x8x16xf32>
    %88 = vector.extract_strided_slice %86 {offsets = [16, 0, 0], sizes = [16, 8, 16], strides = [1, 1, 1]} : vector<32x8x16xf32> to vector<16x8x16xf32>
    %89 = tpu.concatenate %87, %88 in 2 : vector<16x8x16xf32>, vector<16x8x16xf32> -> vector<16x8x32xf32>
    %90 = vector.shape_cast %89 : vector<16x8x32xf32> to vector<128x32xf32>
    %91 = arith.truncf %90 : vector<128x32xf32> to vector<128x32xbf16>
    %c0_21 = arith.constant 0 : index
    %c0_22 = arith.constant 0 : index
    %c0_23 = arith.constant 0 : index
    %92 = vector.load %arg4[%c0_21, %c0_22, %c0_23] : memref<2x32x32xbf16, #tpu.memory_space<vmem>>, vector<1x32x32xbf16>
    %93 = vector.shape_cast %92 : vector<1x32x32xbf16> to vector<32x32xbf16>
    %cst_24 = arith.constant dense<0.000000e+00> : vector<128x32xf32>
    %94 = tpu.matmul %91, %93, %cst_24 {dimension_numbers = #tpu.dot_dimension_numbers<[1], [0], [0], [1], [0, 0, 1, 1], [], []>} : vector<128x32xbf16>, vector<32x32xbf16>, vector<128x32xf32> -> vector<128x32xf32>
    %95 = vector.broadcast %38 : vector<1x32xf32> to vector<128x32xf32>
    %96 = arith.addf %94, %95 : vector<128x32xf32>
    %97 = arith.addf %32, %96 : vector<128x32xf32>
    %cst_25 = arith.constant dense<0.000000e+00> : vector<128xf32>
    %98 = vector.multi_reduction <add>, %97, %cst_25 [1] : vector<128x32xf32> to vector<128xf32>
    %99 = vector.shape_cast %98 : vector<128xf32> to vector<128x1xf32>
    %cst_26 = arith.constant 3.200000e+01 : f32
    %100 = vector.broadcast %cst_26 : f32 to vector<128x1xf32>
    %101 = arith.divf %99, %100 : vector<128x1xf32>
    %102 = arith.mulf %97, %97 : vector<128x32xf32>
    %cst_27 = arith.constant dense<0.000000e+00> : vector<128xf32>
    %103 = vector.multi_reduction <add>, %102, %cst_27 [1] : vector<128x32xf32> to vector<128xf32>
    %104 = vector.shape_cast %103 : vector<128xf32> to vector<128x1xf32>
    %cst_28 = arith.constant 3.200000e+01 : f32
    %105 = vector.broadcast %cst_28 : f32 to vector<128x1xf32>
    %106 = arith.divf %104, %105 : vector<128x1xf32>
    %107 = arith.mulf %101, %101 : vector<128x1xf32>
    %108 = arith.subf %106, %107 : vector<128x1xf32>
    %cst_29 = arith.constant 0.000000e+00 : f32
    %109 = vector.broadcast %cst_29 : f32 to vector<128x1xf32>
    %110 = arith.maximumf %108, %109 : vector<128x1xf32>
    %111 = vector.broadcast %101 : vector<128x1xf32> to vector<128x32xf32>
    %112 = arith.subf %97, %111 : vector<128x32xf32>
    %cst_30 = arith.constant 9.99999996E-13 : f32
    %113 = vector.broadcast %cst_30 : f32 to vector<128x1xf32>
    %114 = arith.addf %110, %113 : vector<128x1xf32>
    %115 = math.rsqrt %114 : vector<128x1xf32>
    %116 = vector.broadcast %115 : vector<128x1xf32> to vector<128x32xf32>
    %117 = arith.mulf %112, %116 : vector<128x32xf32>
    %118 = vector.broadcast %39 : vector<1x32xf32> to vector<128x32xf32>
    %119 = arith.mulf %117, %118 : vector<128x32xf32>
    %120 = vector.broadcast %40 : vector<1x32xf32> to vector<128x32xf32>
    %121 = arith.addf %119, %120 : vector<128x32xf32>
    %122 = arith.truncf %121 : vector<128x32xf32> to vector<128x32xbf16>
    %c0_31 = arith.constant 0 : index
    %c0_32 = arith.constant 0 : index
    %c0_33 = arith.constant 0 : index
    %123 = vector.load %arg5[%c0_31, %c0_32, %c0_33] : memref<2x32x64xbf16, #tpu.memory_space<vmem>>, vector<1x32x64xbf16>
    %124 = vector.shape_cast %123 : vector<1x32x64xbf16> to vector<32x64xbf16>
    %cst_34 = arith.constant dense<0.000000e+00> : vector<128x64xf32>
    %125 = tpu.matmul %122, %124, %cst_34 {dimension_numbers = #tpu.dot_dimension_numbers<[1], [0], [0], [1], [0, 0, 1, 1], [], []>} : vector<128x32xbf16>, vector<32x64xbf16>, vector<128x64xf32> -> vector<128x64xf32>
    %c0_35 = arith.constant 0 : index
    %c0_36 = arith.constant 0 : index
    %c0_37 = arith.constant 0 : index
    %126 = vector.load %arg8[%c0_35, %c0_36, %c0_37] : memref<2x1x64xf32, #tpu.memory_space<vmem>>, vector<1x1x64xf32>
    %127 = vector.shape_cast %126 : vector<1x1x64xf32> to vector<1x64xf32>
    %128 = vector.broadcast %127 : vector<1x64xf32> to vector<128x64xf32>
    %129 = arith.addf %125, %128 : vector<128x64xf32>
    %cst_38 = arith.constant 5.000000e-01 : f32
    %130 = vector.broadcast %cst_38 : f32 to vector<128x64xf32>
    %131 = arith.mulf %130, %129 : vector<128x64xf32>
    %cst_39 = arith.constant 4.471500e-02 : f32
    %132 = vector.broadcast %cst_39 : f32 to vector<128x64xf32>
    %133 = arith.mulf %132, %129 : vector<128x64xf32>
    %134 = arith.mulf %133, %129 : vector<128x64xf32>
    %135 = arith.mulf %134, %129 : vector<128x64xf32>
    %136 = arith.addf %129, %135 : vector<128x64xf32>
    %cst_40 = arith.constant 0.797884583 : f32
    %137 = vector.broadcast %cst_40 : f32 to vector<128x64xf32>
    %138 = arith.mulf %137, %136 : vector<128x64xf32>
    %139 = math.tanh %138 : vector<128x64xf32>
    %cst_41 = arith.constant 1.000000e+00 : f32
    %140 = vector.broadcast %cst_41 : f32 to vector<128x64xf32>
    %141 = arith.addf %140, %139 : vector<128x64xf32>
    %142 = arith.mulf %131, %141 : vector<128x64xf32>
    %143 = arith.truncf %142 : vector<128x64xf32> to vector<128x64xbf16>
    %c0_42 = arith.constant 0 : index
    %c0_43 = arith.constant 0 : index
    %c0_44 = arith.constant 0 : index
    %144 = vector.load %arg6[%c0_42, %c0_43, %c0_44] : memref<2x64x32xbf16, #tpu.memory_space<vmem>>, vector<1x64x32xbf16>
    %145 = vector.shape_cast %144 : vector<1x64x32xbf16> to vector<64x32xbf16>
    %cst_45 = arith.constant dense<0.000000e+00> : vector<128x32xf32>
    %146 = tpu.matmul %143, %145, %cst_45 {dimension_numbers = #tpu.dot_dimension_numbers<[1], [0], [0], [1], [0, 0, 1, 1], [], []>} : vector<128x64xbf16>, vector<64x32xbf16>, vector<128x32xf32> -> vector<128x32xf32>
    %147 = vector.broadcast %41 : vector<1x32xf32> to vector<128x32xf32>
    %148 = arith.addf %146, %147 : vector<128x32xf32>
    %149 = arith.addf %121, %148 : vector<128x32xf32>
    %cst_46 = arith.constant dense<0.000000e+00> : vector<128xf32>
    %150 = vector.multi_reduction <add>, %149, %cst_46 [1] : vector<128x32xf32> to vector<128xf32>
    %151 = vector.shape_cast %150 : vector<128xf32> to vector<128x1xf32>
    %cst_47 = arith.constant 3.200000e+01 : f32
    %152 = vector.broadcast %cst_47 : f32 to vector<128x1xf32>
    %153 = arith.divf %151, %152 : vector<128x1xf32>
    %154 = arith.mulf %149, %149 : vector<128x32xf32>
    %cst_48 = arith.constant dense<0.000000e+00> : vector<128xf32>
    %155 = vector.multi_reduction <add>, %154, %cst_48 [1] : vector<128x32xf32> to vector<128xf32>
    %156 = vector.shape_cast %155 : vector<128xf32> to vector<128x1xf32>
    %cst_49 = arith.constant 3.200000e+01 : f32
    %157 = vector.broadcast %cst_49 : f32 to vector<128x1xf32>
    %158 = arith.divf %156, %157 : vector<128x1xf32>
    %159 = arith.mulf %153, %153 : vector<128x1xf32>
    %160 = arith.subf %158, %159 : vector<128x1xf32>
    %cst_50 = arith.constant 0.000000e+00 : f32
    %161 = vector.broadcast %cst_50 : f32 to vector<128x1xf32>
    %162 = arith.maximumf %160, %161 : vector<128x1xf32>
    %163 = vector.broadcast %153 : vector<128x1xf32> to vector<128x32xf32>
    %164 = arith.subf %149, %163 : vector<128x32xf32>
    %cst_51 = arith.constant 9.99999996E-13 : f32
    %165 = vector.broadcast %cst_51 : f32 to vector<128x1xf32>
    %166 = arith.addf %162, %165 : vector<128x1xf32>
    %167 = math.rsqrt %166 : vector<128x1xf32>
    %168 = vector.broadcast %167 : vector<128x1xf32> to vector<128x32xf32>
    %169 = arith.mulf %164, %168 : vector<128x32xf32>
    %170 = vector.broadcast %42 : vector<1x32xf32> to vector<128x32xf32>
    %171 = arith.mulf %169, %170 : vector<128x32xf32>
    %172 = vector.broadcast %43 : vector<1x32xf32> to vector<128x32xf32>
    %173 = arith.addf %171, %172 : vector<128x32xf32>
    %c1 = arith.constant 1 : index
    %c0_52 = arith.constant 0 : index
    %c0_53 = arith.constant 0 : index
    %174 = vector.load %arg7[%c1, %c0_52, %c0_53] : memref<2x9x32xf32, #tpu.memory_space<vmem>>, vector<1x9x32xf32>
    %175 = vector.shape_cast %174 : vector<1x9x32xf32> to vector<9x32xf32>
    %176 = vector.extract_strided_slice %175 {offsets = [0, 0], sizes = [1, 32], strides = [1, 1]} : vector<9x32xf32> to vector<1x32xf32>
    %177 = vector.extract_strided_slice %175 {offsets = [1, 0], sizes = [1, 32], strides = [1, 1]} : vector<9x32xf32> to vector<1x32xf32>
    %178 = vector.extract_strided_slice %175 {offsets = [2, 0], sizes = [1, 32], strides = [1, 1]} : vector<9x32xf32> to vector<1x32xf32>
    %179 = vector.extract_strided_slice %175 {offsets = [3, 0], sizes = [1, 32], strides = [1, 1]} : vector<9x32xf32> to vector<1x32xf32>
    %180 = vector.extract_strided_slice %175 {offsets = [4, 0], sizes = [1, 32], strides = [1, 1]} : vector<9x32xf32> to vector<1x32xf32>
    %181 = vector.extract_strided_slice %175 {offsets = [5, 0], sizes = [1, 32], strides = [1, 1]} : vector<9x32xf32> to vector<1x32xf32>
    %182 = vector.extract_strided_slice %175 {offsets = [6, 0], sizes = [1, 32], strides = [1, 1]} : vector<9x32xf32> to vector<1x32xf32>
    %183 = vector.extract_strided_slice %175 {offsets = [7, 0], sizes = [1, 32], strides = [1, 1]} : vector<9x32xf32> to vector<1x32xf32>
    %184 = vector.extract_strided_slice %175 {offsets = [8, 0], sizes = [1, 32], strides = [1, 1]} : vector<9x32xf32> to vector<1x32xf32>
    %185 = arith.truncf %173 : vector<128x32xf32> to vector<128x32xbf16>
    %c1_54 = arith.constant 1 : index
    %c0_55 = arith.constant 0 : index
    %c0_56 = arith.constant 0 : index
    %186 = vector.load %arg3[%c1_54, %c0_55, %c0_56] : memref<2x32x96xbf16, #tpu.memory_space<vmem>>, vector<1x32x96xbf16>
    %187 = vector.shape_cast %186 : vector<1x32x96xbf16> to vector<32x96xbf16>
    %cst_57 = arith.constant dense<0.000000e+00> : vector<128x96xf32>
    %188 = tpu.matmul %185, %187, %cst_57 {dimension_numbers = #tpu.dot_dimension_numbers<[1], [0], [0], [1], [0, 0, 1, 1], [], []>} : vector<128x32xbf16>, vector<32x96xbf16>, vector<128x96xf32> -> vector<128x96xf32>
    %189 = vector.extract_strided_slice %188 {offsets = [0, 0], sizes = [128, 32], strides = [1, 1]} : vector<128x96xf32> to vector<128x32xf32>
    %190 = vector.broadcast %176 : vector<1x32xf32> to vector<128x32xf32>
    %191 = arith.addf %189, %190 : vector<128x32xf32>
    %cst_58 = arith.constant 2.500000e-01 : f32
    %192 = vector.broadcast %cst_58 : f32 to vector<128x32xf32>
    %193 = arith.mulf %191, %192 : vector<128x32xf32>
    %194 = vector.extract_strided_slice %188 {offsets = [0, 32], sizes = [128, 32], strides = [1, 1]} : vector<128x96xf32> to vector<128x32xf32>
    %195 = vector.broadcast %177 : vector<1x32xf32> to vector<128x32xf32>
    %196 = arith.addf %194, %195 : vector<128x32xf32>
    %197 = vector.extract_strided_slice %188 {offsets = [0, 64], sizes = [128, 32], strides = [1, 1]} : vector<128x96xf32> to vector<128x32xf32>
    %198 = vector.broadcast %178 : vector<1x32xf32> to vector<128x32xf32>
    %199 = arith.addf %197, %198 : vector<128x32xf32>
    %200 = vector.shape_cast %193 : vector<128x32xf32> to vector<16x8x32xf32>
    %201 = vector.extract_strided_slice %200 {offsets = [0, 0, 0], sizes = [16, 8, 16], strides = [1, 1, 1]} : vector<16x8x32xf32> to vector<16x8x16xf32>
    %202 = vector.extract_strided_slice %200 {offsets = [0, 0, 16], sizes = [16, 8, 16], strides = [1, 1, 1]} : vector<16x8x32xf32> to vector<16x8x16xf32>
    %203 = tpu.concatenate %201, %202 in 0 : vector<16x8x16xf32>, vector<16x8x16xf32> -> vector<32x8x16xf32>
    %204 = arith.truncf %203 : vector<32x8x16xf32> to vector<32x8x16xbf16>
    %205 = vector.shape_cast %196 : vector<128x32xf32> to vector<16x8x32xf32>
    %206 = vector.extract_strided_slice %205 {offsets = [0, 0, 0], sizes = [16, 8, 16], strides = [1, 1, 1]} : vector<16x8x32xf32> to vector<16x8x16xf32>
    %207 = vector.extract_strided_slice %205 {offsets = [0, 0, 16], sizes = [16, 8, 16], strides = [1, 1, 1]} : vector<16x8x32xf32> to vector<16x8x16xf32>
    %208 = tpu.concatenate %206, %207 in 0 : vector<16x8x16xf32>, vector<16x8x16xf32> -> vector<32x8x16xf32>
    %209 = arith.truncf %208 : vector<32x8x16xf32> to vector<32x8x16xbf16>
    %210 = vector.shape_cast %199 : vector<128x32xf32> to vector<16x8x32xf32>
    %211 = vector.extract_strided_slice %210 {offsets = [0, 0, 0], sizes = [16, 8, 16], strides = [1, 1, 1]} : vector<16x8x32xf32> to vector<16x8x16xf32>
    %212 = vector.extract_strided_slice %210 {offsets = [0, 0, 16], sizes = [16, 8, 16], strides = [1, 1, 1]} : vector<16x8x32xf32> to vector<16x8x16xf32>
    %213 = tpu.concatenate %211, %212 in 0 : vector<16x8x16xf32>, vector<16x8x16xf32> -> vector<32x8x16xf32>
    %214 = arith.truncf %213 : vector<32x8x16xf32> to vector<32x8x16xbf16>
    "tpu.trace_start"() <{level = 10 : i32, message = "bqd,bkd->bqk"}> : () -> ()
    %cst_59 = arith.constant dense<0.000000e+00> : vector<32x8x8xf32>
    %215 = tpu.matmul %204, %209, %cst_59 {dimension_numbers = #tpu.dot_dimension_numbers<[2], [2], [1], [1], [0, 0, 0, 1, 1, 1], [0], [0]>} : vector<32x8x16xbf16>, vector<32x8x16xbf16>, vector<32x8x8xf32> -> vector<32x8x8xf32>
    "tpu.trace_stop"() : () -> ()
    %cst_60 = arith.constant dense<0xFF800000> : vector<32x8xf32>
    %216 = vector.multi_reduction <maximumf>, %215, %cst_60 [2] : vector<32x8x8xf32> to vector<32x8xf32>
    %217 = vector.shape_cast %216 : vector<32x8xf32> to vector<32x8x1xf32>
    %218 = vector.broadcast %217 : vector<32x8x1xf32> to vector<32x8x8xf32>
    %219 = arith.subf %215, %218 : vector<32x8x8xf32>
    %220 = math.exp %219 : vector<32x8x8xf32>
    %cst_61 = arith.constant dense<0.000000e+00> : vector<32x8xf32>
    %221 = vector.multi_reduction <add>, %220, %cst_61 [2] : vector<32x8x8xf32> to vector<32x8xf32>
    %222 = vector.shape_cast %221 : vector<32x8xf32> to vector<32x8x1xf32>
    %223 = tpu.reciprocal %222 {approx = true} : vector<32x8x1xf32> -> vector<32x8x1xf32>
    %224 = vector.broadcast %223 : vector<32x8x1xf32> to vector<32x8x8xf32>
    %225 = arith.mulf %220, %224 : vector<32x8x8xf32>
    %226 = arith.truncf %225 : vector<32x8x8xf32> to vector<32x8x8xbf16>
    "tpu.trace_start"() <{level = 10 : i32, message = "bqk,bkd->bqd"}> : () -> ()
    %cst_62 = arith.constant dense<0.000000e+00> : vector<32x8x16xf32>
    %227 = tpu.matmul %226, %214, %cst_62 {dimension_numbers = #tpu.dot_dimension_numbers<[2], [1], [1], [2], [0, 0, 0, 1, 1, 2], [0], [0]>} : vector<32x8x8xbf16>, vector<32x8x16xbf16>, vector<32x8x16xf32> -> vector<32x8x16xf32>
    "tpu.trace_stop"() : () -> ()
    %228 = vector.extract_strided_slice %227 {offsets = [0, 0, 0], sizes = [16, 8, 16], strides = [1, 1, 1]} : vector<32x8x16xf32> to vector<16x8x16xf32>
    %229 = vector.extract_strided_slice %227 {offsets = [16, 0, 0], sizes = [16, 8, 16], strides = [1, 1, 1]} : vector<32x8x16xf32> to vector<16x8x16xf32>
    %230 = tpu.concatenate %228, %229 in 2 : vector<16x8x16xf32>, vector<16x8x16xf32> -> vector<16x8x32xf32>
    %231 = vector.shape_cast %230 : vector<16x8x32xf32> to vector<128x32xf32>
    %232 = arith.truncf %231 : vector<128x32xf32> to vector<128x32xbf16>
    %c1_63 = arith.constant 1 : index
    %c0_64 = arith.constant 0 : index
    %c0_65 = arith.constant 0 : index
    %233 = vector.load %arg4[%c1_63, %c0_64, %c0_65] : memref<2x32x32xbf16, #tpu.memory_space<vmem>>, vector<1x32x32xbf16>
    %234 = vector.shape_cast %233 : vector<1x32x32xbf16> to vector<32x32xbf16>
    %cst_66 = arith.constant dense<0.000000e+00> : vector<128x32xf32>
    %235 = tpu.matmul %232, %234, %cst_66 {dimension_numbers = #tpu.dot_dimension_numbers<[1], [0], [0], [1], [0, 0, 1, 1], [], []>} : vector<128x32xbf16>, vector<32x32xbf16>, vector<128x32xf32> -> vector<128x32xf32>
    %236 = vector.broadcast %179 : vector<1x32xf32> to vector<128x32xf32>
    %237 = arith.addf %235, %236 : vector<128x32xf32>
    %238 = arith.addf %173, %237 : vector<128x32xf32>
    %cst_67 = arith.constant dense<0.000000e+00> : vector<128xf32>
    %239 = vector.multi_reduction <add>, %238, %cst_67 [1] : vector<128x32xf32> to vector<128xf32>
    %240 = vector.shape_cast %239 : vector<128xf32> to vector<128x1xf32>
    %cst_68 = arith.constant 3.200000e+01 : f32
    %241 = vector.broadcast %cst_68 : f32 to vector<128x1xf32>
    %242 = arith.divf %240, %241 : vector<128x1xf32>
    %243 = arith.mulf %238, %238 : vector<128x32xf32>
    %cst_69 = arith.constant dense<0.000000e+00> : vector<128xf32>
    %244 = vector.multi_reduction <add>, %243, %cst_69 [1] : vector<128x32xf32> to vector<128xf32>
    %245 = vector.shape_cast %244 : vector<128xf32> to vector<128x1xf32>
    %cst_70 = arith.constant 3.200000e+01 : f32
    %246 = vector.broadcast %cst_70 : f32 to vector<128x1xf32>
    %247 = arith.divf %245, %246 : vector<128x1xf32>
    %248 = arith.mulf %242, %242 : vector<128x1xf32>
    %249 = arith.subf %247, %248 : vector<128x1xf32>
    %cst_71 = arith.constant 0.000000e+00 : f32
    %250 = vector.broadcast %cst_71 : f32 to vector<128x1xf32>
    %251 = arith.maximumf %249, %250 : vector<128x1xf32>
    %252 = vector.broadcast %242 : vector<128x1xf32> to vector<128x32xf32>
    %253 = arith.subf %238, %252 : vector<128x32xf32>
    %cst_72 = arith.constant 9.99999996E-13 : f32
    %254 = vector.broadcast %cst_72 : f32 to vector<128x1xf32>
    %255 = arith.addf %251, %254 : vector<128x1xf32>
    %256 = math.rsqrt %255 : vector<128x1xf32>
    %257 = vector.broadcast %256 : vector<128x1xf32> to vector<128x32xf32>
    %258 = arith.mulf %253, %257 : vector<128x32xf32>
    %259 = vector.broadcast %180 : vector<1x32xf32> to vector<128x32xf32>
    %260 = arith.mulf %258, %259 : vector<128x32xf32>
    %261 = vector.broadcast %181 : vector<1x32xf32> to vector<128x32xf32>
    %262 = arith.addf %260, %261 : vector<128x32xf32>
    %263 = arith.truncf %262 : vector<128x32xf32> to vector<128x32xbf16>
    %c1_73 = arith.constant 1 : index
    %c0_74 = arith.constant 0 : index
    %c0_75 = arith.constant 0 : index
    %264 = vector.load %arg5[%c1_73, %c0_74, %c0_75] : memref<2x32x64xbf16, #tpu.memory_space<vmem>>, vector<1x32x64xbf16>
    %265 = vector.shape_cast %264 : vector<1x32x64xbf16> to vector<32x64xbf16>
    %cst_76 = arith.constant dense<0.000000e+00> : vector<128x64xf32>
    %266 = tpu.matmul %263, %265, %cst_76 {dimension_numbers = #tpu.dot_dimension_numbers<[1], [0], [0], [1], [0, 0, 1, 1], [], []>} : vector<128x32xbf16>, vector<32x64xbf16>, vector<128x64xf32> -> vector<128x64xf32>
    %c1_77 = arith.constant 1 : index
    %c0_78 = arith.constant 0 : index
    %c0_79 = arith.constant 0 : index
    %267 = vector.load %arg8[%c1_77, %c0_78, %c0_79] : memref<2x1x64xf32, #tpu.memory_space<vmem>>, vector<1x1x64xf32>
    %268 = vector.shape_cast %267 : vector<1x1x64xf32> to vector<1x64xf32>
    %269 = vector.broadcast %268 : vector<1x64xf32> to vector<128x64xf32>
    %270 = arith.addf %266, %269 : vector<128x64xf32>
    %cst_80 = arith.constant 5.000000e-01 : f32
    %271 = vector.broadcast %cst_80 : f32 to vector<128x64xf32>
    %272 = arith.mulf %271, %270 : vector<128x64xf32>
    %cst_81 = arith.constant 4.471500e-02 : f32
    %273 = vector.broadcast %cst_81 : f32 to vector<128x64xf32>
    %274 = arith.mulf %273, %270 : vector<128x64xf32>
    %275 = arith.mulf %274, %270 : vector<128x64xf32>
    %276 = arith.mulf %275, %270 : vector<128x64xf32>
    %277 = arith.addf %270, %276 : vector<128x64xf32>
    %cst_82 = arith.constant 0.797884583 : f32
    %278 = vector.broadcast %cst_82 : f32 to vector<128x64xf32>
    %279 = arith.mulf %278, %277 : vector<128x64xf32>
    %280 = math.tanh %279 : vector<128x64xf32>
    %cst_83 = arith.constant 1.000000e+00 : f32
    %281 = vector.broadcast %cst_83 : f32 to vector<128x64xf32>
    %282 = arith.addf %281, %280 : vector<128x64xf32>
    %283 = arith.mulf %272, %282 : vector<128x64xf32>
    %284 = arith.truncf %283 : vector<128x64xf32> to vector<128x64xbf16>
    %c1_84 = arith.constant 1 : index
    %c0_85 = arith.constant 0 : index
    %c0_86 = arith.constant 0 : index
    %285 = vector.load %arg6[%c1_84, %c0_85, %c0_86] : memref<2x64x32xbf16, #tpu.memory_space<vmem>>, vector<1x64x32xbf16>
    %286 = vector.shape_cast %285 : vector<1x64x32xbf16> to vector<64x32xbf16>
    %cst_87 = arith.constant dense<0.000000e+00> : vector<128x32xf32>
    %287 = tpu.matmul %284, %286, %cst_87 {dimension_numbers = #tpu.dot_dimension_numbers<[1], [0], [0], [1], [0, 0, 1, 1], [], []>} : vector<128x64xbf16>, vector<64x32xbf16>, vector<128x32xf32> -> vector<128x32xf32>
    %288 = vector.broadcast %182 : vector<1x32xf32> to vector<128x32xf32>
    %289 = arith.addf %287, %288 : vector<128x32xf32>
    %290 = arith.addf %262, %289 : vector<128x32xf32>
    %cst_88 = arith.constant dense<0.000000e+00> : vector<128xf32>
    %291 = vector.multi_reduction <add>, %290, %cst_88 [1] : vector<128x32xf32> to vector<128xf32>
    %292 = vector.shape_cast %291 : vector<128xf32> to vector<128x1xf32>
    %cst_89 = arith.constant 3.200000e+01 : f32
    %293 = vector.broadcast %cst_89 : f32 to vector<128x1xf32>
    %294 = arith.divf %292, %293 : vector<128x1xf32>
    %295 = arith.mulf %290, %290 : vector<128x32xf32>
    %cst_90 = arith.constant dense<0.000000e+00> : vector<128xf32>
    %296 = vector.multi_reduction <add>, %295, %cst_90 [1] : vector<128x32xf32> to vector<128xf32>
    %297 = vector.shape_cast %296 : vector<128xf32> to vector<128x1xf32>
    %cst_91 = arith.constant 3.200000e+01 : f32
    %298 = vector.broadcast %cst_91 : f32 to vector<128x1xf32>
    %299 = arith.divf %297, %298 : vector<128x1xf32>
    %300 = arith.mulf %294, %294 : vector<128x1xf32>
    %301 = arith.subf %299, %300 : vector<128x1xf32>
    %cst_92 = arith.constant 0.000000e+00 : f32
    %302 = vector.broadcast %cst_92 : f32 to vector<128x1xf32>
    %303 = arith.maximumf %301, %302 : vector<128x1xf32>
    %304 = vector.broadcast %294 : vector<128x1xf32> to vector<128x32xf32>
    %305 = arith.subf %290, %304 : vector<128x32xf32>
    %cst_93 = arith.constant 9.99999996E-13 : f32
    %306 = vector.broadcast %cst_93 : f32 to vector<128x1xf32>
    %307 = arith.addf %303, %306 : vector<128x1xf32>
    %308 = math.rsqrt %307 : vector<128x1xf32>
    %309 = vector.broadcast %308 : vector<128x1xf32> to vector<128x32xf32>
    %310 = arith.mulf %305, %309 : vector<128x32xf32>
    %311 = vector.broadcast %183 : vector<1x32xf32> to vector<128x32xf32>
    %312 = arith.mulf %310, %311 : vector<128x32xf32>
    %313 = vector.broadcast %184 : vector<1x32xf32> to vector<128x32xf32>
    %314 = arith.addf %312, %313 : vector<128x32xf32>
    %315 = arith.truncf %314 : vector<128x32xf32> to vector<128x32xbf16>
    %c0_94 = arith.constant 0 : index
    %c0_95 = arith.constant 0 : index
    %316 = vector.load %arg9[%c0_94, %c0_95] : memref<33x128xbf16, #tpu.memory_space<vmem>>, vector<32x128xbf16>
    %cst_96 = arith.constant dense<0.000000e+00> : vector<128x128xf32>
    %317 = tpu.matmul %315, %316, %cst_96 {dimension_numbers = #tpu.dot_dimension_numbers<[1], [0], [0], [1], [0, 0, 1, 1], [], []>} : vector<128x32xbf16>, vector<32x128xbf16>, vector<128x128xf32> -> vector<128x128xf32>
    %c32 = arith.constant 32 : index
    %c0_97 = arith.constant 0 : index
    %318 = vector.load %arg9[%c32, %c0_97] : memref<33x128xbf16, #tpu.memory_space<vmem>>, vector<1x128xbf16>
    %319 = arith.extf %318 : vector<1x128xbf16> to vector<1x128xf32>
    %320 = vector.broadcast %319 : vector<1x128xf32> to vector<128x128xf32>
    %321 = arith.addf %317, %320 : vector<128x128xf32>
    %c0_98 = arith.constant 0 : index
    %c0_99 = arith.constant 0 : index
    %322 = vector.load %arg10[%c0_98, %c0_99] : memref<128x128xf32, #tpu.memory_space<vmem>>, vector<128x128xf32>
    tpu.vector_store %arg10[%c0_98, %c0_99], %321 {strides = array<i32>} : memref<128x128xf32, #tpu.memory_space<vmem>>, vector<128x128xf32>,
    return
  }
  func.func @transform_0(%arg0: i32) -> (i32, i32, i32) {
    %c0_i32 = arith.constant 0 : i32
    %c0_i32_0 = arith.constant 0 : i32
    %c0_i32_1 = arith.constant 0 : i32
    return %arg0, %c0_i32, %c0_i32_0 : i32, i32, i32
  }
  func.func @transform_1(%arg0: i32) -> (i32, i32) {
    %c0_i32 = arith.constant 0 : i32
    %c0_i32_0 = arith.constant 0 : i32
    %c0_i32_1 = arith.constant 0 : i32
    return %c0_i32, %c0_i32_0 : i32, i32
  }
  func.func @transform_2(%arg0: i32) -> (i32, i32, i32) {
    %c0_i32 = arith.constant 0 : i32
    %c0_i32_0 = arith.constant 0 : i32
    %c0_i32_1 = arith.constant 0 : i32
    %c0_i32_2 = arith.constant 0 : i32
    return %c0_i32, %c0_i32_0, %c0_i32_1 : i32, i32, i32
  }
  func.func @transform_3(%arg0: i32) -> (i32, i32, i32) {
    %c0_i32 = arith.constant 0 : i32
    %c0_i32_0 = arith.constant 0 : i32
    %c0_i32_1 = arith.constant 0 : i32
    %c0_i32_2 = arith.constant 0 : i32
    return %c0_i32, %c0_i32_0, %c0_i32_1 : i32, i32, i32
  }
  func.func @transform_4(%arg0: i32) -> (i32, i32, i32) {
    %c0_i32 = arith.constant 0 : i32
    %c0_i32_0 = arith.constant 0 : i32
    %c0_i32_1 = arith.constant 0 : i32
    %c0_i32_2 = arith.constant 0 : i32
    return %c0_i32, %c0_i32_0, %c0_i32_1 : i32, i32, i32
  }
  func.func @transform_5(%arg0: i32) -> (i32, i32, i32) {
    %c0_i32 = arith.constant 0 : i32
    %c0_i32_0 = arith.constant 0 : i32
    %c0_i32_1 = arith.constant 0 : i32
    %c0_i32_2 = arith.constant 0 : i32
    return %c0_i32, %c0_i32_0, %c0_i32_1 : i32, i32, i32
  }
  func.func @transform_6(%arg0: i32) -> (i32, i32, i32) {
    %c0_i32 = arith.constant 0 : i32
    %c0_i32_0 = arith.constant 0 : i32
    %c0_i32_1 = arith.constant 0 : i32
    %c0_i32_2 = arith.constant 0 : i32
    return %c0_i32, %c0_i32_0, %c0_i32_1 : i32, i32, i32
  }
  func.func @transform_7(%arg0: i32) -> (i32, i32, i32) {
    %c0_i32 = arith.constant 0 : i32
    %c0_i32_0 = arith.constant 0 : i32
    %c0_i32_1 = arith.constant 0 : i32
    %c0_i32_2 = arith.constant 0 : i32
    return %c0_i32, %c0_i32_0, %c0_i32_1 : i32, i32, i32
  }
  func.func @transform_8(%arg0: i32) -> (i32, i32) {
    %c0_i32 = arith.constant 0 : i32
    %c0_i32_0 = arith.constant 0 : i32
    %c0_i32_1 = arith.constant 0 : i32
    return %c0_i32, %c0_i32_0 : i32, i32
  }
  func.func @transform_9(%arg0: i32) -> (i32, i32) {
    %c0_i32 = arith.constant 0 : i32
    %c0_i32_0 = arith.constant 0 : i32
    return %arg0, %c0_i32 : i32, i32
  }
}

</mosaic_0001>

<bundles_post_ra>
// kernel: tpu_custom_call.1
= control target key start
LH: loop header
LB: loop body
LE: loop exit
PB: predicated region body
PF: predicated region fallthrough
CT: control target
= control target key end

     0   :  { %14 = vsyncpa [#allocation3], 0  ;;  %s18523_s0 = inlined_call_operand.hbm [shape: f32[32,8,32], index: 0, kind: input, shape index: {}]   ;;  %s18524_s1 = inlined_call_operand.vmem [shape: f32[66,32], index: 1, kind: input, shape index: {}]   ;;  %s18525_s2 = inlined_call_operand.vmem [shape: bf16[2,32,96], index: 2, kind: input, shape index: {}]   ;;  %s18526_s3 = inlined_call_operand.vmem [shape: bf16[2,32,32], index: 3, kind: input, shape index: {}]   ;;  %s18527_s4 = inlined_call_operand.vmem [shape: bf16[2,32,64], index: 4, kind: input, shape index: {}]   ;;  %s18528_s5 = inlined_call_operand.vmem [shape: bf16[2,64,32], index: 5, kind: input, shape index: {}]   ;;  %s18529_s6 = inlined_call_operand.vmem [shape: f32[2,9,32], index: 6, kind: input, shape index: {}]   ;;  %s18530_s7 = inlined_call_operand.vmem [shape: f32[2,1,64], index: 7, kind: input, shape index: {}]   ;;  %s18531_s8 = inlined_call_operand.vmem [shape: bf16[33,128], index: 8, kind: input, shape index: {}]   ;;  %s18532_s9 = inlined_call_operand.hbm [shape: f32[256,128], index: 9, kind: output, shape index: {}]  }
   0x1   :  { %16 = vsyncpa [#allocation3 + $0x1], 0 }
   0x2   :  { %17 = vsyncpa [#allocation4], 0 }
   0x3   :  { %19 = vsyncpa [#allocation4 + $0x1], 0  ;;  %s14280_s30 = smov 0   ;;  %s14282_s10 = smov 0  }
   0x4   :  { %s14284_s11 = smov 0   ;;  %s14286_s12 = smov 0  }
   0x5 LB: > { %s14301_s13 = sadd.s32 4294967295, %s14215_s12   ;;  %s11663_s14 = sadd.s32 4294967294, %s14215_s12   ;;  %s14215_s12 = sphi %s14286_s12, %s18754_s12   ;;  %s14211_s11 = sphi %s14284_s11, %s18753_s11   ;;  %s14207_s10 = sphi %s14282_s10, %s18752_s10   ;;  %s14203_s30 = sphi %s14280_s30, %s18751_s30  }
   0x6   : > { %s14305_s15 = sadd.s32 1, %s14215_s12   ;;  %s32_s16 = sadd.s32 1, %s14211_s11 }
   0x7   : > { %s29_s17 = ssub.s32 %s14215_s12, %s14305_s15  ;;  %p39_p0 = scmp.ne.s32.totalorder %s14211_s11, %s14207_s10 }
   0x8   : > { %p30_p1 = scmp.eq.s32.totalorder %s29_s17, 0  ;;  %p40_p2 = scmp.eq.s32.totalorder %s14215_s12, 0 }
   0x9   : > { %p45_p3 = scmp.ne.s32.totalorder %s14207_s10, %s14203_s30  ;;  %p46_p4 = scmp.eq.s32.totalorder %s14301_s13, 0 }
   0xa   : > { %s14317_s18 = scalar_select %p30_p1, %s14211_s11, %s32_s16  }
   0xb   : > { %p14319_p5 = por %p40_p2, %p39_p0  ;;  %p14323_p6 = por %p46_p4, %p45_p3 }
   0xc   : > { %p237_p7 = scmp.eq.s32.totalorder %s14301_s13, 1  ;;  %p243_p8 = scmp.eq.s32.totalorder %s11663_s14, 1 }
   0xd   : > { %p13246_p10 = scmp.lt.s32.totalorder %s14215_s12, 2  ;;  %s287_s23 = sand.u32 1, %s14211_s11  }
   0xe   : > { %p14330_p11 = por %p237_p7, %p39_p0  ;;  %p14334_p12 = por %p243_p8, %p45_p3 }
   0xf   : > { %s11926_s24 = sshll.u32 %s14215_s12, 11  ;;  %s11666_s25 = sshll.u32 %s287_s23, 7 }
  0x10   : > { %s18590_s21 = scalar_select %p14330_p11, 1, 0 }
  0x11   : > { %s18591_s22 = scalar_select %p14334_p12, 1, 0 }
  0x12   : > { %s14343_s28 = scalar_lea.hbm %s18523_s0, %s11926_s24  ;;  %s291_s29 = scalar_lea.vmem [#allocation2], %s11666_s25 }
  0x13   : > { %s298_s14 = sshll.u32 %s291_s29, 4  ;;  %p14347_p13 = pnand %p13246_p10, %p14319_p5  ;;  %s14351_s14 = int_to_ptr.vmem [resolvable:$true] %s298_s14 }
  0x14   : > { %s14353_s17 = scalar_lea.sflag [#allocation3], %s287_s23  ;;  %s14119_s26 = scalar_lea.hbm %s14343_s28, 2048 }
  0x15   : > { %p14120_p0 = scmp.ne.s32.totalorder %s14343_s28, %s14119_s26  ;;  %p14121_p1 = pneg %p14347_p13 }
  0x16   : > { %s14124_s25 = scalar_lea.hbm %s18523_s0, 4096  ;;  %p14125_p4 = scmp.lt.u32.totalorder %s14343_s28, %s18523_s0 }
  0x17   : > { %p14122_p2 = pnand %p14121_p1, %p14120_p0  ;;  %p14126_p5 = scmp.lt.u32.totalorder %s14124_s25, %s14119_s26 }
  0x18   : > { %p14128_p8 = scmp.lt.u32.totalorder %s14119_s26, %s14343_s28 }
  0x19   : > { %p14123_p3 = pneg %p14122_p2  ;;  %p14127_p7 = por %p14126_p5, %p14125_p4 }
  0x1b   : > { %p14129_p10 = por %p14128_p8, %p14127_p7 }
  0x1d   : > { %p14130_p9 = pnand %p14129_p10, %p14123_p3 }
  0x1f   : > { %14133 = shalt.err (!%p14130_p9)
}
  0x20   : > { %s14134_s23 = scalar_lea.vmem %s14351_s14, 2048  ;;  %s14217_s24 = smov [#allocation2]  }
  0x21   : > { %p14135_p0 = scmp.ne.s32.totalorder %s14351_s14, %s14134_s23  ;;  %s14139_s19 = sshll.u32 %s14217_s24, 4  ;;  %s14140_s19 = int_to_ptr.vmem [resolvable:$false] %s14139_s19 }
  0x22   : > { %s14141_s27 = scalar_lea.vmem %s14140_s19, 4096  ;;  %p14142_p11 = scmp.lt.s32.totalorder %s14351_s14, %s14140_s19 }
  0x23   : > { %p14137_p2 = pnand %p14135_p0, %p14121_p1  ;;  %p14143_p4 = scmp.lt.s32.totalorder %s14141_s27, %s14134_s23 }
  0x25   : > { %p14138_p12 = pneg %p14137_p2  ;;  %p14144_p5 = por %p14143_p4, %p14142_p11 }
  0x27   : > { %p14145_p7 = pnand %p14144_p5, %p14138_p12 }
  0x29   : > { %14148 = shalt.err (!%p14145_p7)
}
  0x2a   : > { %s14218_s26 = smov 128   ;;  %s14219_s25 = smov 8  }
  0x2b   : > { %13241 = dma.hbm_to_vmem [thread:$0]  (!%p14347_p13), %s14343_s28, 2048, %s14351_s14, %s14353_s17, %s14218_s26, %s14218_s26, %s14219_s25  }
  0x2c   : > { %p11669_p9 = scmp.ge.s32.totalorder %s14215_s12, 1  ;;  %p306_p1 = scmp.lt.s32.totalorder %s14215_s12, 3 }
  0x2e   : > { %p307_p3 = pnand %p11669_p9, %p306_p1 }
  0x30   : > { %310 = sbr.rel (%p307_p3) target bundleno = 5633 (0x1601), region = 56 }
  0x37   : > { %s14384_s29 = sand.u32 1, %s14207_s10  }
  0x38   : > { %s18559_s23 = sshll.u32 %s14384_s29, 7  ;;  %s313_s24 = scalar_lea.sflag [#allocation3], %s14384_s29 }
  0x39   : > { %s14390_s19 = scalar_lea.vmem [#allocation2], %s18559_s23 }
  0x3a   : > { %14194 = dma.done.wait (%p14323_p6), %s313_s24, 2048  }
  0x3b   : > { %14196 = vsyncadd (%p14323_p6), %s313_s24, 4294965248  ;;  %v14399_v0 = vld [vmem:[%s18524_s1] sm:$0xff]  ;;  %v355_v1 = vld [vmem:[%s18524_s1 + $0x8] sm:$0xff]  ;;  %vm374_vm0 = vcmask 1045504   ;;  %vm395_vm1 = vcmask 261120   ;;  %s14220_s28 = smov 32  }
  0x3c   : > { %v358_v2 = vld [vmem:[%s14390_s19 + $0x10] sm:$0xff]  ;;  %v375_v3 = vrot.slane %v14399_v0, 2  ;;  %v376_v4 = vrot.slane %v355_v1, 2  ;;  %v356_v5 = vld [vmem:[%s14390_s19] sm:$0xff]  ;;  %v359_v6 = vld [vmem:[%s14390_s19 + $0x18] sm:$0xff]  ;;  %vm14222_vm2 = vmmov 0  }
  0x3d   : > { %v357_v7 = vld [vmem:[%s14390_s19 + $0x8] sm:$0xff]  ;;  %v360_v24 = vld [vmem:[%s14390_s19 + $0x20] sm:$0xff]  ;;  %v363_v25 = vld [vmem:[%s14390_s19 + $0x38] sm:$0xff]  ;;  %s14223_s14 = smov 96   ;;  %s14224_s16 = smov 112   ;;  %vm1215_vm3 = vcmask 130048  }
  0x3e   : > { %v14409_v8 = vsel %vm374_vm0, %v375_v3, %v376_v4  ;;  %v361_v23 = vld [vmem:[%s14390_s19 + $0x28] sm:$0xff]  ;;  %v362_v26 = vld [vmem:[%s14390_s19 + $0x30] sm:$0xff]  ;;  %v364_v44 = vld [vmem:[%s14390_s19 + $0x40] sm:$0xff]  ;;  %s18562_s27 = smov 64   ;;  %vm3172_vm4 = vcmask 1043456   ;;  %vm2781_vm5 = vcmask 64512  }
  0x3f   : > { %v14412_v9 = vadd.f32 %v14409_v8, %v358_v2  ;;  %v14415_v10 = vadd.f32 %v14409_v8, %v356_v5  ;;  %v14418_v11 = vadd.f32 %v14409_v8, %v359_v6  ;;  %v14421_v12 = vadd.f32 %v14409_v8, %v357_v7  ;;  %v365_v43 = vld [vmem:[%s14390_s19 + $0x48] sm:$0xff]  ;;  %v367_v49 = vld [vmem:[%s14390_s19 + $0x58] sm:$0xff]  ;;  %v366_v50 = vld [vmem:[%s14390_s19 + $0x50] sm:$0xff]  ;;  %s18560_s17 = smov 16   ;;  %s18723_s26 = smov 16  }
  0x40   : > { %v14448_v29 = vadd.f32 %v14409_v8, %v361_v23  ;;  %v14451_v30 = vadd.f32 %v14409_v8, %v360_v24  ;;  %v14454_v31 = vadd.f32 %v14409_v8, %v363_v25  ;;  %v14457_v32 = vadd.f32 %v14409_v8, %v362_v26  ;;  %v369_v63 = vld [vmem:[%s14390_s19 + $0x68] sm:$0xff]  ;;  %v368_v1 = vld [vmem:[%s14390_s19 + $0x60] sm:$0xff]  ;;  %v371_v6 = vld [vmem:[%s14390_s19 + $0x78] sm:$0xff]  ;;  %p18748_p11 = scmp.ne.s32.totalorder %s18590_s21, 0 }
  0x41   : > { %v402_v13 = vsel %vm395_vm1, %v14412_v9, 0.0  ;;  %v396_v14 = vsel %vm395_vm1, %v14415_v10, 0.0  ;;  %v405_v15 = vsel %vm395_vm1, %v14418_v11, 0.0  ;;  %v399_v16 = vsel %vm395_vm1, %v14421_v12, 0.0  ;;  %v370_v7 = vld [vmem:[%s14390_s19 + $0x70] sm:$0xff] }
  0x42   : > { %403 = vadd.xlane.f32.xlu1 %v402_v13  ;;  %397 = vadd.xlane.f32.xlu0 %v396_v14  ;;  %v462_v17 = vmul.f32 %v14421_v12, %v14421_v12  ;;  %v461_v18 = vmul.f32 %v14415_v10, %v14415_v10  ;;  %v464_v21 = vmul.f32 %v14418_v11, %v14418_v11  ;;  %v411_v33 = vsel %vm395_vm1, %v14448_v29, 0.0  ;;  %v13611_v13 = vld [vmem:[%s18525_s2] sm:$0xff]  }
  0x43   : > { %v463_v22 = vmul.f32 %v14412_v9, %v14412_v9  ;;  %v408_v34 = vsel %vm395_vm1, %v14451_v30, 0.0  ;;  %v417_v35 = vsel %vm395_vm1, %v14454_v31, 0.0  ;;  %v414_v36 = vsel %vm395_vm1, %v14457_v32, 0.0  ;;  %12278 = vmatprep.subr.bf16.mxu0 %v13611_v13 }
  0x44   : > { %v480_v19 = vsel %vm395_vm1, %v462_v17, 0.0  ;;  %v477_v20 = vsel %vm395_vm1, %v461_v18, 0.0  ;;  %v486_v27 = vsel %vm395_vm1, %v464_v21, 0.0  ;;  %v466_v37 = vmul.f32 %v14448_v29, %v14448_v29  ;;  %12279 = vmatpush3.bf16.msra.mxu0 %v13611_v13  ;;  %v13612_v18 = vld [vmem:[%s18525_s2 + $0x8] sm:$0xff]  }
  0x45   : > { %v483_v28 = vsel %vm395_vm1, %v463_v22, 0.0  ;;  %v465_v38 = vmul.f32 %v14451_v30, %v14451_v30  ;;  %v468_v41 = vmul.f32 %v14454_v31, %v14454_v31  ;;  %v467_v42 = vmul.f32 %v14457_v32, %v14457_v32  ;;  %12280 = vmatprep.subr.bf16.mxu0 %v13612_v18 }
  0x46   : > { %406 = vadd.xlane.f32.xlu1 %v405_v15  ;;  %400 = vadd.xlane.f32.xlu0 %v399_v16  ;;  %v492_v39 = vsel %vm395_vm1, %v466_v37, 0.0  ;;  %v14482_v47 = vadd.f32 %v14409_v8, %v365_v43  ;;  %v14485_v48 = vadd.f32 %v14409_v8, %v364_v44  ;;  %v14494_v53 = vadd.f32 %v14409_v8, %v367_v49 }
  0x47   : > { %v489_v40 = vsel %vm395_vm1, %v465_v38, 0.0  ;;  %v498_v45 = vsel %vm395_vm1, %v468_v41, 0.0  ;;  %v495_v46 = vsel %vm395_vm1, %v467_v42, 0.0  ;;  %v14497_v54 = vadd.f32 %v14409_v8, %v366_v50 }
  0x48   : > { %v423_v51 = vsel %vm395_vm1, %v14482_v47, 0.0  ;;  %v420_v52 = vsel %vm395_vm1, %v14485_v48, 0.0  ;;  %v429_v55 = vsel %vm395_vm1, %v14494_v53, 0.0  ;;  %v470_v57 = vmul.f32 %v14482_v47, %v14482_v47  ;;  %12281 = vmatpush3.bf16.msra.mxu0 %v13612_v18 }
  0x49   : > { %v426_v56 = vsel %vm395_vm1, %v14497_v54, 0.0  ;;  %v469_v58 = vmul.f32 %v14485_v48, %v14485_v48  ;;  %v472_v61 = vmul.f32 %v14494_v53, %v14494_v53  ;;  %v471_v62 = vmul.f32 %v14497_v54, %v14497_v54 }
  0x4a   : > { %481 = vadd.xlane.f32.xlu1 %v480_v19  ;;  %478 = vadd.xlane.f32.xlu0 %v477_v20  ;;  %v504_v59 = vsel %vm395_vm1, %v470_v57, 0.0  ;;  %v14518_v4 = vadd.f32 %v14409_v8, %v369_v63  ;;  %v14521_v5 = vadd.f32 %v14409_v8, %v368_v1  ;;  %v14533_v16 = vadd.f32 %v14409_v8, %v371_v6 }
  0x4b   : > { %v501_v60 = vsel %vm395_vm1, %v469_v58, 0.0  ;;  %v510_v2 = vsel %vm395_vm1, %v472_v61, 0.0  ;;  %v507_v3 = vsel %vm395_vm1, %v471_v62, 0.0  ;;  %v14536_v17 = vadd.f32 %v14409_v8, %v370_v7 }
  0x4c   : > { %v435_v14 = vsel %vm395_vm1, %v14518_v4, 0.0  ;;  %v432_v15 = vsel %vm395_vm1, %v14521_v5, 0.0  ;;  %v441_v19 = vsel %vm395_vm1, %v14533_v16, 0.0  ;;  %v474_v21 = vmul.f32 %v14518_v4, %v14518_v4 }
  0x4d   : > { %v438_v20 = vsel %vm395_vm1, %v14536_v17, 0.0  ;;  %v473_v8 = vmul.f32 %v14521_v5, %v14521_v5  ;;  %v476_v24 = vmul.f32 %v14533_v16, %v14533_v16  ;;  %v475_v25 = vmul.f32 %v14536_v17, %v14536_v17 }
  0x4e   : > { %487 = vadd.xlane.f32.xlu1 %v486_v27  ;;  %484 = vadd.xlane.f32.xlu0 %v483_v28  ;;  %v516_v22 = vsel %vm395_vm1, %v474_v21, 0.0  ;;  %v653_v28 = vlaneseq  ;;  %vm5616_vm6 = vcmask 523264  }
  0x4f   : > { %v513_v23 = vsel %vm395_vm1, %v473_v8, 0.0  ;;  %v522_v26 = vsel %vm395_vm1, %v476_v24, 0.0  ;;  %v519_v27 = vsel %vm395_vm1, %v475_v25, 0.0 }
  0x52   : > { %412 = vadd.xlane.f32.xlu1 %v411_v33  ;;  %409 = vadd.xlane.f32.xlu0 %v408_v34  ;;  %v14557_v33 = vshrl.u32 %v653_v28, 7 }
  0x54   : > { %18593 = vst [vmem:[#allocation8_spill] sm:$0xff] %v14557_v33  ;;  %v14560_v34 = vsub.s32 1, %v14557_v33  ;;  %v14587_v24 = vsub.s32 0, %v14557_v33 }
  0x56   : > { %418 = vadd.xlane.f32.xlu1 %v417_v35  ;;  %415 = vadd.xlane.f32.xlu0 %v414_v36  ;;  %18594 = vst [vmem:[#allocation9_spill] sm:$0xff] %v14560_v34  ;;  %v14565_v35 = vld [vmem:[%s18529_s6] sm:$0xff]  ;;  %18595 = vst [vmem:[#allocation10_spill] sm:$0xff] %v14587_v24 }
  0x57   : > { %v879_v36 = vrot.slane %v14565_v35, %v14560_v34 }
  0x5a   : > { %493 = vadd.xlane.f32.xlu1 %v492_v39  ;;  %490 = vadd.xlane.f32.xlu0 %v489_v40 }
  0x5e   : > { %499 = vadd.xlane.f32.xlu1 %v498_v45  ;;  %496 = vadd.xlane.f32.xlu0 %v495_v46 }
  0x62   : > { %424 = vadd.xlane.f32.xlu1 %v423_v51  ;;  %421 = vadd.xlane.f32.xlu0 %v420_v52 }
  0x66   : > { %430 = vadd.xlane.f32.xlu1 %v429_v55  ;;  %427 = vadd.xlane.f32.xlu0 %v426_v56 }
  0x6a   : > { %505 = vadd.xlane.f32.xlu1 %v504_v59  ;;  %502 = vadd.xlane.f32.xlu0 %v501_v60 }
  0x6e   : > { %511 = vadd.xlane.f32.xlu1 %v510_v2  ;;  %508 = vadd.xlane.f32.xlu0 %v507_v3 }
  0x72   : > { %436 = vadd.xlane.f32.xlu1 %v435_v14  ;;  %433 = vadd.xlane.f32.xlu0 %v432_v15 }
  0x76   : > { %442 = vadd.xlane.f32.xlu1 %v441_v19  ;;  %439 = vadd.xlane.f32.xlu0 %v438_v20 }
  0x7a   : > { %517 = vadd.xlane.f32.xlu1 %v516_v22  ;;  %514 = vadd.xlane.f32.xlu0 %v513_v23 }
  0x7e   : > { %523 = vadd.xlane.f32.xlu1 %v522_v26  ;;  %520 = vadd.xlane.f32.xlu0 %v519_v27 }
  0x94   : > { %881 = vrot.lane.b32.xlu0 %v879_v36, %s14220_s28 }
  0xcf   : > { %v404_v37 = vpop.xlane.xlu1 %403  ;;  %v398_v38 = vpop.xlane.xlu0 %397 }
  0xd0   : > { %v14570_v41 = vmul.f32 0.03125, %v398_v38  ;;  %v14572_v43 = vmul.f32 0.03125, %v404_v37 }
  0xd2   : > { %v541_v49 = vmul.f32 %v14570_v41, %v14570_v41  ;;  %v543_v57 = vmul.f32 %v14572_v43, %v14572_v43 }
  0xd3   : > { %v407_v39 = vpop.xlane.xlu1 %406  ;;  %v401_v40 = vpop.xlane.xlu0 %400 }
  0xd4   : > { %v446_v42 = vmul.f32 0.03125, %v401_v40  ;;  %v14574_v44 = vmul.f32 0.03125, %v407_v39  ;;  %v14599_v40 = vrot.slane %v14399_v0, %v14587_v24 }
  0xd6   : > { %v542_v50 = vmul.f32 %v446_v42, %v446_v42  ;;  %v544_v58 = vmul.f32 %v14574_v44, %v14574_v44 }
  0xd7   : > { %v482_v45 = vpop.xlane.xlu1 %481  ;;  %v479_v46 = vpop.xlane.xlu0 %478 }
  0xd8   : > { %v526_v51 = vmul.f32 0.03125, %v482_v45  ;;  %v525_v52 = vmul.f32 0.03125, %v479_v46  ;;  %v590_v45 = vsub.f32 %v14421_v12, %v446_v42 }
  0xda   : > { %v558_v55 = vsub.f32 %v526_v51, %v542_v50  ;;  %v557_v56 = vsub.f32 %v525_v52, %v541_v49  ;;  %v14604_v49 = vrot.slane %v14399_v0, %v14560_v34 }
  0xdb   : > { %v488_v59 = vpop.xlane.xlu1 %487  ;;  %v485_v60 = vpop.xlane.xlu0 %484 }
  0xdc   : > { %v574_v61 = vmax.f32 %v558_v55, 0.0  ;;  %v573_v62 = vmax.f32 %v557_v56, 0.0  ;;  %v528_v63 = vmul.f32 0.03125, %v488_v59  ;;  %v527_v1 = vmul.f32 0.03125, %v485_v60 }
  0xdd   : > { %v589_v55 = vsub.f32 %v14415_v10, %v14570_v41 }
  0xde   : > { %v606_v2 = vadd.f32 1e-12, %v574_v61  ;;  %v605_v3 = vadd.f32 1e-12, %v573_v62  ;;  %v560_v6 = vsub.f32 %v528_v63, %v544_v58  ;;  %v559_v7 = vsub.f32 %v527_v1, %v543_v57 }
  0xdf   : > { %v413_v13 = vpop.xlane.xlu1 %412  ;;  %v410_v14 = vpop.xlane.xlu0 %409  ;;  %v592_v62 = vsub.f32 %v14418_v11, %v14574_v44 }
  0xe0   : > { %13633 = vrsqrt.f32 %v606_v2  ;;  %v576_v15 = vmax.f32 %v560_v6, 0.0  ;;  %v575_v18 = vmax.f32 %v559_v7, 0.0  ;;  %v14582_v22 = vmul.f32 0.03125, %v413_v13 }
  0xe1   : > { %13635 = vrsqrt.f32 %v605_v3  ;;  %v14584_v23 = vmul.f32 0.03125, %v410_v14  ;;  %v591_v13 = vsub.f32 %v14412_v9, %v14572_v43 }
  0xe2   : > { %v608_v19 = vadd.f32 1e-12, %v576_v15  ;;  %v607_v20 = vadd.f32 1e-12, %v575_v18  ;;  %v546_v36 = vmul.f32 %v14582_v22, %v14582_v22 }
  0xe3   : > { %v419_v21 = vpop.xlane.xlu1 %418  ;;  %v416_v8 = vpop.xlane.xlu0 %415  ;;  %v545_v37 = vmul.f32 %v14584_v23, %v14584_v23 }
  0xe4   : > { %13637 = vrsqrt.f32 %v608_v19  ;;  %v14589_v25 = vmul.f32 0.03125, %v419_v21  ;;  %v14591_v26 = vmul.f32 0.03125, %v416_v8 }
  0xe5   : > { %13639 = vrsqrt.f32 %v607_v20 }
  0xe6   : > { %v548_v56 = vmul.f32 %v14589_v25, %v14589_v25  ;;  %v547_v57 = vmul.f32 %v14591_v26, %v14591_v26 }
  0xe7   : > { %v494_v27 = vpop.xlane.xlu1 %493  ;;  %v491_v28 = vpop.xlane.xlu0 %490 }
  0xe8   : > { %v530_v38 = vmul.f32 0.03125, %v494_v27  ;;  %v529_v39 = vmul.f32 0.03125, %v491_v28 }
  0xea   : > { %v13634_v46 = vpop.eup %13633  ;;  %v562_v50 = vsub.f32 %v530_v38, %v546_v36  ;;  %v561_v51 = vsub.f32 %v529_v39, %v545_v37 }
  0xeb   : > { %v13636_v52 = vpop.eup %13635  ;;  %v500_v58 = vpop.xlane.xlu1 %499  ;;  %v638_v12 = vmul.f32 %v13634_v46, %v590_v45 }
  0xec   : > { %v497_v59 = vpop.xlane.xlu0 %496  ;;  %v578_v42 = vmax.f32 %v562_v50, 0.0  ;;  %v577_v60 = vmax.f32 %v561_v51, 0.0  ;;  %v532_v61 = vmul.f32 0.03125, %v500_v58  ;;  %v637_v63 = vmul.f32 %v13636_v52, %v589_v55 }
  0xed   : > { %v531_v0 = vmul.f32 0.03125, %v497_v59  ;;  %v658_v1 = vmul.f32 %v14599_v40, %v638_v12 }
  0xee   : > { %v13638_v10 = vpop.eup %13637  ;;  %v610_v41 = vadd.f32 1e-12, %v578_v42  ;;  %v609_v2 = vadd.f32 1e-12, %v577_v60  ;;  %v564_v3 = vsub.f32 %v532_v61, %v548_v56  ;;  %v657_v18 = vmul.f32 %v14599_v40, %v637_v63 }
  0xef   : > { %v563_v6 = vsub.f32 %v531_v0, %v547_v57  ;;  %v13640_v7 = vpop.eup %13639  ;;  %v425_v14 = vpop.xlane.xlu1 %424  ;;  %v14619_v19 = vadd.f32 %v14604_v49, %v658_v1  ;;  %v640_v20 = vmul.f32 %v13638_v10, %v592_v62  ;;  %v594_v42 = vsub.f32 %v14448_v29, %v14582_v22 }
  0xf0   : > { %v422_v15 = vpop.xlane.xlu0 %421  ;;  %13641 = vrsqrt.f32 %v610_v41  ;;  %v580_v11 = vmax.f32 %v564_v3, 0.0  ;;  %v14622_v21 = vadd.f32 %v14604_v49, %v657_v18  ;;  %v639_v8 = vmul.f32 %v13640_v7, %v591_v13 }
  0xf1   : > { %18596 = vst [vmem:[#allocation11_spill] sm:$0xff] %v14619_v19  ;;  %v579_v44 = vmax.f32 %v563_v6, 0.0  ;;  %13643 = vrsqrt.f32 %v609_v2  ;;  %v14627_v38 = vmul.f32 0.03125, %v425_v14  ;;  %v14629_v39 = vmul.f32 0.03125, %v422_v15 }
  0xf2   : > { %18597 = vst [vmem:[#allocation12_spill] sm:$0xff] %v14622_v21  ;;  %v612_v27 = vadd.f32 1e-12, %v580_v11  ;;  %v695_v9 = vpack.c.bf16 %v14619_v19, %v14622_v21  ;;  %v659_v37 = vmul.f32 %v14599_v40, %v639_v8  ;;  %v660_v45 = vmul.f32 %v14599_v40, %v640_v20 }
  0xf3   : > { %v611_v28 = vadd.f32 1e-12, %v579_v44  ;;  %v431_v36 = vpop.xlane.xlu1 %430  ;;  %v550_v57 = vmul.f32 %v14627_v38, %v14627_v38  ;;  %v549_v58 = vmul.f32 %v14629_v39, %v14629_v39  ;;  %v593_v1 = vsub.f32 %v14451_v30, %v14584_v23 }
  0xf4   : > { %v428_v43 = vpop.xlane.xlu0 %427  ;;  %13645 = vrsqrt.f32 %v612_v27  ;;  %12282 = vmatprep.mubr.msk.bf16.mxu0 %vm395_vm1, %v695_v9  ;;  %v14634_v46 = vadd.f32 %v14604_v49, %v659_v37  ;;  %v14636_v50 = vmul.f32 0.03125, %v431_v36  ;;  %v14641_v55 = vadd.f32 %v14604_v49, %v660_v45 }
  0xf5   : > { %13647 = vrsqrt.f32 %v611_v28  ;;  %v14638_v51 = vmul.f32 0.03125, %v428_v43  ;;  %v596_v14 = vsub.f32 %v14454_v31, %v14589_v25  ;;  %v595_v27 = vsub.f32 %v14457_v32, %v14591_v26 }
  0xf6   : > { %18598 = vst [vmem:[#allocation13_spill] sm:$0xff] %v14634_v46  ;;  %18599 = vst [vmem:[#allocation14_spill] sm:$0xff] %v14641_v55  ;;  %v696_v60 = vpack.c.bf16 %v14641_v55, %v14634_v46  ;;  %v552_v10 = vmul.f32 %v14636_v50, %v14636_v50 }
  0xf7   : > { %v506_v52 = vpop.xlane.xlu1 %505  ;;  %v551_v41 = vmul.f32 %v14638_v51, %v14638_v51 }
  0xf8   : > { %v503_v56 = vpop.xlane.xlu0 %502  ;;  %v534_v59 = vmul.f32 0.03125, %v506_v52  ;;  %12283 = vmatmul.mubr.msk.bf16.vlgmr.msra.gmra.mrb[0].mxu0 %vm395_vm1, %v696_v60 }
  0xf9   : > { %v533_v12 = vmul.f32 0.03125, %v503_v56 }
  0xfa   : > { %v13642_v61 = vpop.eup %13641  ;;  %v566_v0 = vsub.f32 %v534_v59, %v550_v57 }
  0xfb   : > { %v565_v62 = vsub.f32 %v533_v12, %v549_v58  ;;  %v13644_v63 = vpop.eup %13643  ;;  %v512_v2 = vpop.xlane.xlu1 %511  ;;  %v642_v22 = vmul.f32 %v13642_v61, %v594_v42 }
  0xfc   : > { %v509_v29 = vpop.xlane.xlu0 %508  ;;  %v582_v3 = vmax.f32 %v566_v0, 0.0  ;;  %v536_v7 = vmul.f32 0.03125, %v512_v2  ;;  %v641_v15 = vmul.f32 %v13644_v63, %v593_v1 }
  0xfd   : > { %v581_v6 = vmax.f32 %v565_v62, 0.0  ;;  %v535_v13 = vmul.f32 0.03125, %v509_v29  ;;  %v662_v30 = vmul.f32 %v14599_v40, %v642_v22 }
  0xfe   : > { %v13646_v23 = vpop.eup %13645  ;;  %v614_v18 = vadd.f32 1e-12, %v582_v3  ;;  %v568_v44 = vsub.f32 %v536_v7, %v552_v10  ;;  %v661_v9 = vmul.f32 %v14599_v40, %v641_v15  ;;  %v598_v3 = vsub.f32 %v14482_v47, %v14627_v38 }
  0xff   : > { %v613_v11 = vadd.f32 1e-12, %v581_v6  ;;  %v567_v20 = vsub.f32 %v535_v13, %v551_v41  ;;  %v13648_v8 = vpop.eup %13647  ;;  %v437_v28 = vpop.xlane.xlu1 %436  ;;  %v14665_v43 = vadd.f32 %v14604_v49, %v662_v30  ;;  %v644_v37 = vmul.f32 %v13646_v23, %v596_v14 }
 0x100   : > { %v434_v36 = vpop.xlane.xlu0 %433  ;;  %13649 = vrsqrt.f32 %v614_v18  ;;  %v584_v31 = vmax.f32 %v568_v44, 0.0  ;;  %v14668_v45 = vadd.f32 %v14604_v49, %v661_v9  ;;  %v643_v52 = vmul.f32 %v13648_v8, %v595_v27 }
 0x101   : > { %18600 = vst [vmem:[#allocation15_spill] sm:$0xff] %v14665_v43  ;;  %v583_v25 = vmax.f32 %v567_v20, 0.0  ;;  %13651 = vrsqrt.f32 %v613_v11  ;;  %v14673_v12 = vmul.f32 0.03125, %v437_v28  ;;  %v14675_v42 = vmul.f32 0.03125, %v434_v36 }
 0x102   : > { %18601 = vst [vmem:[#allocation16_spill] sm:$0xff] %v14668_v45  ;;  %v616_v56 = vadd.f32 1e-12, %v584_v31  ;;  %v697_v32 = vpack.c.bf16 %v14665_v43, %v14668_v45  ;;  %v663_v59 = vmul.f32 %v14599_v40, %v643_v52  ;;  %v664_v60 = vmul.f32 %v14599_v40, %v644_v37 }
 0x103   : > { %v615_v57 = vadd.f32 1e-12, %v583_v25  ;;  %v443_v58 = vpop.xlane.xlu1 %442  ;;  %v554_v41 = vmul.f32 %v14673_v12, %v14673_v12  ;;  %v553_v2 = vmul.f32 %v14675_v42, %v14675_v42  ;;  %v597_v30 = vsub.f32 %v14485_v48, %v14629_v39 }
 0x104   : > { %v440_v26 = vpop.xlane.xlu0 %439  ;;  %13653 = vrsqrt.f32 %v616_v56  ;;  %12286 = vmatprep.mubr.msk.bf16.mxu0 %vm395_vm1, %v697_v32  ;;  %v14680_v61 = vadd.f32 %v14604_v49, %v663_v59  ;;  %v14682_v0 = vmul.f32 0.03125, %v443_v58  ;;  %v14687_v1 = vadd.f32 %v14604_v49, %v664_v60 }
 0x105   : > { %13655 = vrsqrt.f32 %v615_v57  ;;  %v14684_v62 = vmul.f32 0.03125, %v440_v26  ;;  %v600_v28 = vsub.f32 %v14494_v53, %v14636_v50  ;;  %v599_v48 = vsub.f32 %v14497_v54, %v14638_v51 }
 0x106   : > { %18602 = vst [vmem:[#allocation17_spill] sm:$0xff] %v14680_v61  ;;  %18603 = vst [vmem:[#allocation18_spill] sm:$0xff] %v14687_v1  ;;  %v698_v6 = vpack.c.bf16 %v14687_v1, %v14680_v61  ;;  %v556_v23 = vmul.f32 %v14682_v0, %v14682_v0 }
 0x107   : > { %v518_v63 = vpop.xlane.xlu1 %517  ;;  %v555_v18 = vmul.f32 %v14684_v62, %v14684_v62 }
 0x108   : > { %v515_v10 = vpop.xlane.xlu0 %514  ;;  %v538_v29 = vmul.f32 0.03125, %v518_v63  ;;  %12287 = vmatmul.mubr.msk.bf16.gmra.mrb[4].mxu0 %vm395_vm1, %v698_v6  ;;  %v601_v6 = vsub.f32 %v14521_v5, %v14675_v42 }
 0x109   : > { %v537_v22 = vmul.f32 0.03125, %v515_v10 }
 0x10a   : > { %v13650_v7 = vpop.eup %13649  ;;  %v570_v13 = vsub.f32 %v538_v29, %v554_v41 }
 0x10b   : > { %v569_v14 = vsub.f32 %v537_v22, %v553_v2  ;;  %v13652_v15 = vpop.eup %13651  ;;  %v524_v11 = vpop.xlane.xlu1 %523  ;;  %v646_v38 = vmul.f32 %v13650_v7, %v598_v3  ;;  %v602_v22 = vsub.f32 %v14518_v4, %v14673_v12 }
 0x10c   : > { %v521_v47 = vpop.xlane.xlu0 %520  ;;  %v586_v44 = vmax.f32 %v570_v13, 0.0  ;;  %v540_v8 = vmul.f32 0.03125, %v524_v11  ;;  %v645_v39 = vmul.f32 %v13652_v15, %v597_v30  ;;  %v604_v15 = vsub.f32 %v14533_v16, %v14682_v0 }
 0x10d   : > { %v585_v20 = vmax.f32 %v569_v14, 0.0  ;;  %v539_v27 = vmul.f32 0.03125, %v521_v47  ;;  %v666_v36 = vmul.f32 %v14599_v40, %v646_v38 }
 0x10e   : > { %v13654_v9 = vpop.eup %13653  ;;  %v618_v31 = vadd.f32 1e-12, %v586_v44  ;;  %v572_v37 = vsub.f32 %v540_v8, %v556_v23  ;;  %v665_v57 = vmul.f32 %v14599_v40, %v645_v39 }
 0x10f   : > { %v617_v25 = vadd.f32 1e-12, %v585_v20  ;;  %v571_v52 = vsub.f32 %v539_v27, %v555_v18  ;;  %v13656_v56 = vpop.eup %13655  ;;  %v14711_v58 = vadd.f32 %v14604_v49, %v666_v36  ;;  %v648_v32 = vmul.f32 %v13654_v9, %v600_v28 }
 0x110   : > { %13657 = vrsqrt.f32 %v618_v31  ;;  %v588_v53 = vmax.f32 %v572_v37, 0.0  ;;  %v647_v26 = vmul.f32 %v13656_v56, %v599_v48  ;;  %v14714_v54 = vadd.f32 %v14604_v49, %v665_v57  ;;  %v14766_v8 = vpop.permute.xlu0 %881 }
 0x111   : > { %18604 = vst [vmem:[#allocation19_spill] sm:$0xff] %v14711_v58  ;;  %v587_v50 = vmax.f32 %v571_v52, 0.0  ;;  %13659 = vrsqrt.f32 %v617_v25  ;;  %v668_v51 = vmul.f32 %v14599_v40, %v648_v32  ;;  %v603_v18 = vsub.f32 %v14536_v17, %v14684_v62 }
 0x112   : > { %18605 = vst [vmem:[#allocation20_spill] sm:$0xff] %v14714_v54  ;;  %v620_v59 = vadd.f32 1e-12, %v588_v53  ;;  %v667_v63 = vmul.f32 %v14599_v40, %v647_v26  ;;  %v699_v10 = vpack.c.bf16 %v14711_v58, %v14714_v54  ;;  %v18534_v20 = vmov 0.0  }
 0x113   : > { %v619_v60 = vadd.f32 1e-12, %v587_v50  ;;  %v14721_v41 = vadd.f32 %v14604_v49, %v668_v51  ;;  %12298 = vmatprep.subr.bf16.mxu1 %v18534_v20  ;;  %12322 = vmatprep.subr.bf16.mxu0 %v18534_v20 }
 0x114   : > { %13661 = vrsqrt.f32 %v620_v59  ;;  %v14724_v2 = vadd.f32 %v14604_v49, %v667_v63  ;;  %12290 = vmatprep.mubr.msk.bf16.mxu0 %vm395_vm1, %v699_v10  ;;  %12300 = vmatprep.mubr.msk.bf16.mxu1 %vm14222_vm2, %v18534_v20 }
 0x115   : > { %18606 = vst [vmem:[#allocation21_spill] sm:$0xff] %v14721_v41  ;;  %13663 = vrsqrt.f32 %v619_v60 }
 0x116   : > { %18607 = vst [vmem:[#allocation22_spill] sm:$0xff] %v14724_v2  ;;  %v700_v29 = vpack.c.bf16 %v14721_v41, %v14724_v2 }
 0x118   : > { %12291 = vmatmul.mubr.msk.bf16.gmra.mrb[8].mxu0 %vm395_vm1, %v700_v29 }
 0x11a   : > { %v13658_v3 = vpop.eup %13657 }
 0x11b   : > { %v13660_v7 = vpop.eup %13659  ;;  %v650_v13 = vmul.f32 %v13658_v3, %v602_v22 }
 0x11c   : > { %v649_v14 = vmul.f32 %v13660_v7, %v601_v6 }
 0x11d   : > { %v670_v30 = vmul.f32 %v14599_v40, %v650_v13 }
 0x11e   : > { %v13662_v23 = vpop.eup %13661  ;;  %v669_v11 = vmul.f32 %v14599_v40, %v649_v14 }
 0x11f   : > { %v13664_v47 = vpop.eup %13663  ;;  %v14741_v4 = vadd.f32 %v14604_v49, %v670_v30  ;;  %v652_v12 = vmul.f32 %v13662_v23, %v604_v15 }
 0x120   : > { %v14744_v5 = vadd.f32 %v14604_v49, %v669_v11  ;;  %v651_v42 = vmul.f32 %v13664_v47, %v603_v18 }
 0x121   : > { %18608 = vst [vmem:[#allocation23_spill] sm:$0xff] %v14741_v4  ;;  %v672_v38 = vmul.f32 %v14599_v40, %v652_v12 }
 0x122   : > { %18609 = vst [vmem:[#allocation24_spill] sm:$0xff] %v14744_v5  ;;  %v701_v16 = vpack.c.bf16 %v14741_v4, %v14744_v5  ;;  %v671_v0 = vmul.f32 %v14599_v40, %v651_v42  ;;  %v14764_v40 = vrot.slane %v14565_v35, %v14587_v24 }
 0x123   : > { %v14751_v17 = vadd.f32 %v14604_v49, %v672_v38 }
 0x124   : > { %12294 = vmatprep.mubr.msk.bf16.mxu0 %vm395_vm1, %v701_v16  ;;  %v14755_v62 = vadd.f32 %v14604_v49, %v671_v0 }
 0x125   : > { %18610 = vst [vmem:[#allocation25_spill] sm:$0xff] %v14751_v17 }
 0x126   : > { %18611 = vst [vmem:[#allocation26_spill] sm:$0xff] %v14755_v62  ;;  %v702_v44 = vpack.c.bf16 %v14751_v17, %v14755_v62 }
 0x128   : > { %12295 = vmatmul.mubr.msk.bf16.gmra.mrb[12].mxu0 %vm395_vm1, %v702_v44 }
 0x129   : > { %12324 = vmatprep.mubr.msk.bf16.mxu0 %vm14222_vm2, %v18534_v20 }
 0x1cb   : > { %v14768_v27 = vpop.f32.mrb[0].mxu0 }
 0x1cc   : > { %v14774_v49 = vpop.f32.mrb[1].mxu0  ;;  %v846_v28 = vadd.f32 %v14768_v27, %v14764_v40  ;;  %v886_v9 = vadd.f32 %v14768_v27, %v14766_v8 }
 0x1cd   : > { %v844_v35 = vadd.f32 %v14764_v40, %v14774_v49  ;;  %v14780_v48 = vpop.f32.mrb[2].mxu0  ;;  %v884_v39 = vadd.f32 %v14766_v8, %v14774_v49 }
 0x1ce   : > { %v14784_v36 = vpop.f32.mrb[3].mxu0  ;;  %v887_v31 = vadd.f32 %v14780_v48, %v14766_v8  ;;  %v847_v25 = vadd.f32 %v14780_v48, %v14764_v40  ;;  %v14796_v32 = vmul.f32 0.25, %v846_v28  ;;  %v1086_v10 = vpack.c.bf16 %v886_v9, %v886_v9 }
 0x1cf   : > { %v1084_v37 = vpack.c.bf16 %v884_v39, %v884_v39  ;;  %v885_v52 = vadd.f32 %v14766_v8, %v14784_v36  ;;  %v845_v56 = vadd.f32 %v14764_v40, %v14784_v36  ;;  %v14800_v50 = vmul.f32 0.25, %v844_v35 }
 0x1d0   : > { %v13296_v57 = vpack.i.bf16 %v887_v31, %v886_v9  ;;  %v14798_v53 = vmul.f32 0.25, %v847_v25  ;;  %v1087_v22 = vpack.c.bf16 %v887_v31, %v887_v31 }
 0x1d1   : > { %1213 = vrot.lane.b32.xlu1 %v1084_v37, %s14223_s14  ;;  %v13291_v26 = vpack.i.bf16 %v885_v52, %v884_v39  ;;  %v14803_v51 = vmul.f32 0.25, %v845_v56  ;;  %v1085_v60 = vpack.c.bf16 %v885_v52, %v885_v52 }
 0x1d3   : > { %13292 = vrot.lane.b32.xlu0 %v13291_v26, %s14224_s16 }
 0x1d5   : > { %1263 = vrot.lane.b32.xlu1 %v1085_v60, %s14223_s14 }
 0x1d7   : > { %13297 = vrot.lane.b32.xlu0 %v13296_v57, %s14224_s16 }
 0x1d9   : > { %1312 = vrot.lane.b32.xlu1 %v1086_v10, %s14223_s14 }
 0x1db   : > { %v14813_v29 = vpop.f32.mrb[4].mxu0 }
 0x1dc   : > { %v850_v3 = vadd.f32 %v14813_v29, %v14764_v40  ;;  %v14817_v6 = vpop.f32.mrb[5].mxu0  ;;  %v890_v30 = vadd.f32 %v14813_v29, %v14766_v8 }
 0x1dd   : > { %v848_v7 = vadd.f32 %v14764_v40, %v14817_v6  ;;  %v14821_v13 = vpop.f32.mrb[6].mxu0  ;;  %1361 = vrot.lane.b32.xlu1 %v1087_v22, %s14223_s14  ;;  %v888_v14 = vadd.f32 %v14766_v8, %v14817_v6 }
 0x1de   : > { %v14826_v15 = vpop.f32.mrb[7].mxu0  ;;  %v891_v23 = vadd.f32 %v14821_v13, %v14766_v8  ;;  %v851_v18 = vadd.f32 %v14821_v13, %v14764_v40  ;;  %v14838_v42 = vmul.f32 0.25, %v850_v3  ;;  %v1090_v31 = vpack.c.bf16 %v890_v30, %v890_v30 }
 0x1df   : > { %v1088_v11 = vpack.c.bf16 %v888_v14, %v888_v14  ;;  %v889_v47 = vadd.f32 %v14766_v8, %v14826_v15  ;;  %v849_v12 = vadd.f32 %v14764_v40, %v14826_v15  ;;  %v14842_v0 = vmul.f32 0.25, %v848_v7 }
 0x1e0   : > { %v13306_v38 = vpack.i.bf16 %v891_v23, %v890_v30  ;;  %v14840_v16 = vmul.f32 0.25, %v851_v18  ;;  %v1091_v25 = vpack.c.bf16 %v891_v23, %v891_v23 }
 0x1e1   : > { %1410 = vrot.lane.b32.xlu1 %v1088_v11, %s14223_s14  ;;  %v1089_v44 = vpack.c.bf16 %v889_v47, %v889_v47  ;;  %v13301_v28 = vpack.i.bf16 %v889_v47, %v888_v14  ;;  %v14845_v35 = vmul.f32 0.25, %v849_v12 }
 0x1e3   : > { %1459 = vrot.lane.b32.xlu0 %v1089_v44, %s14223_s14 }
 0x1e5   : > { %13302 = vrot.lane.b32.xlu1 %v13301_v28, %s14224_s16 }
 0x1e7   : > { %1508 = vrot.lane.b32.xlu0 %v1090_v31, %s14223_s14 }
 0x1e9   : > { %1557 = vrot.lane.b32.xlu1 %v1091_v25, %s14223_s14 }
 0x1eb   : > { %v14854_v37 = vpop.f32.mrb[8].mxu0  ;;  %13307 = vrot.lane.b32.xlu0 %v13306_v38, %s14224_s16 }
 0x1ec   : > { %v854_v52 = vadd.f32 %v14854_v37, %v14764_v40  ;;  %v14859_v56 = vpop.f32.mrb[9].mxu0  ;;  %v894_v22 = vadd.f32 %v14854_v37, %v14766_v8 }
 0x1ed   : > { %v852_v57 = vadd.f32 %v14764_v40, %v14859_v56  ;;  %v14863_v26 = vpop.f32.mrb[10].mxu0  ;;  %v892_v60 = vadd.f32 %v14766_v8, %v14859_v56 }
 0x1ee   : > { %v14868_v10 = vpop.f32.mrb[11].mxu0  ;;  %v895_v3 = vadd.f32 %v14863_v26, %v14766_v8  ;;  %v855_v7 = vadd.f32 %v14863_v26, %v14764_v40  ;;  %v14880_v18 = vmul.f32 0.25, %v854_v52  ;;  %v1094_v52 = vpack.c.bf16 %v894_v22, %v894_v22 }
 0x1ef   : > { %v1092_v14 = vpack.c.bf16 %v892_v60, %v892_v60  ;;  %v893_v30 = vadd.f32 %v14766_v8, %v14868_v10  ;;  %v853_v23 = vadd.f32 %v14764_v40, %v14868_v10  ;;  %v14884_v12 = vmul.f32 0.25, %v852_v57 }
 0x1f0   : > { %v13316_v11 = vpack.i.bf16 %v895_v3, %v894_v22  ;;  %v14882_v47 = vmul.f32 0.25, %v855_v7  ;;  %v1095_v57 = vpack.c.bf16 %v895_v3, %v895_v3 }
 0x1f1   : > { %1606 = vrot.lane.b32.xlu1 %v1092_v14, %s14223_s14  ;;  %v1093_v38 = vpack.c.bf16 %v893_v30, %v893_v30  ;;  %v13311_v44 = vpack.i.bf16 %v893_v30, %v892_v60  ;;  %v14887_v28 = vmul.f32 0.25, %v853_v23 }
 0x1f3   : > { %1655 = vrot.lane.b32.xlu0 %v1093_v38, %s14223_s14 }
 0x1f5   : > { %13312 = vrot.lane.b32.xlu1 %v13311_v44, %s14224_s16 }
 0x1f7   : > { %1704 = vrot.lane.b32.xlu0 %v1094_v52, %s14223_s14 }
 0x1f9   : > { %1753 = vrot.lane.b32.xlu1 %v1095_v57, %s14223_s14 }
 0x1fb   : > { %v14897_v7 = vpop.f32.mrb[12].mxu0  ;;  %13317 = vrot.lane.b32.xlu0 %v13316_v11, %s14224_s16 }
 0x1fc   : > { %v858_v60 = vadd.f32 %v14897_v7, %v14764_v40  ;;  %v14902_v14 = vpop.f32.mrb[13].mxu0  ;;  %v898_v38 = vadd.f32 %v14897_v7, %v14766_v8 }
 0x1fd   : > { %v856_v30 = vadd.f32 %v14764_v40, %v14902_v14  ;;  %v14906_v23 = vpop.f32.mrb[14].mxu0  ;;  %v896_v22 = vadd.f32 %v14766_v8, %v14902_v14 }
 0x1fe   : > { %v14910_v3 = vpop.f32.mrb[15].mxu0  ;;  %v899_v11 = vadd.f32 %v14906_v23, %v14766_v8  ;;  %v859_v44 = vadd.f32 %v14906_v23, %v14764_v40  ;;  %v14922_v25 = vmul.f32 0.25, %v858_v60 }
 0x1ff   : > { %v1096_v52 = vpack.c.bf16 %v896_v22, %v896_v22  ;;  %v897_v57 = vadd.f32 %v14766_v8, %v14910_v3  ;;  %v857_v31 = vadd.f32 %v14764_v40, %v14910_v3  ;;  %v14926_v59 = vmul.f32 0.25, %v856_v30 }
 0x200   : > { %v13326_v39 = vpack.i.bf16 %v899_v11, %v898_v38  ;;  %v14924_v9 = vmul.f32 0.25, %v859_v44  ;;  %v1098_v8 = vpack.c.bf16 %v898_v38, %v898_v38  ;;  %v1099_v60 = vpack.c.bf16 %v899_v11, %v899_v11 }
 0x201   : > { %1802 = vrot.lane.b32.xlu1 %v1096_v52, %s14223_s14  ;;  %v1097_v63 = vpack.c.bf16 %v897_v57, %v897_v57  ;;  %v13321_v20 = vpack.i.bf16 %v897_v57, %v896_v22  ;;  %v14929_v24 = vmul.f32 0.25, %v857_v31  ;;  %v18612_v52 = vmov 0.0  }
 0x203   : > { %1851 = vrot.lane.b32.xlu0 %v1097_v63, %s14223_s14  ;;  %v13361_v40 = vpack.i.bf16 %v14929_v24, %v14926_v59 }
 0x205   : > { %13322 = vrot.lane.b32.xlu1 %v13321_v20, %s14224_s16 }
 0x207   : > { %1900 = vrot.lane.b32.xlu0 %v1098_v8, %s14223_s14 }
 0x209   : > { %1949 = vrot.lane.b32.xlu1 %v1099_v60, %s14223_s14 }
 0x20b   : > { %13327 = vrot.lane.b32.xlu0 %v13326_v39, %s14224_s16  ;;  %v988_v39 = vpack.c.bf16 %v14800_v50, %v14800_v50 }
 0x243   : > { %v1214_v31 = vpop.permute.xlu1 %1213 }
 0x244   : > { %v1220_v30 = vsel %vm1215_vm3, %v1214_v31, 0 }
 0x245   : > { %v13293_v22 = vpop.permute.xlu0 %13292  ;;  %12299 = vmatpush3.bf16.xpose.msra.mxu1 %v1220_v30 }
 0x246   : > { %v13295_v63 = vunpack.i.h.bf16 %v13293_v22  ;;  %v13294_v44 = vunpack.i.l.bf16 %v13293_v22  ;;  %12304 = vmatprep.subr.bf16.mxu1 %v18612_v52  ;;  %v18613_v22 = vpack.i.bf16 %v14803_v51, %v14800_v50 }
 0x247   : > { %v1264_v57 = vpop.permute.xlu1 %1263 }
 0x248   : > { %v1101_v20 = vpack.c.bf16 %v13295_v63, %v13295_v63  ;;  %v1100_v38 = vpack.c.bf16 %v13294_v44, %v13294_v44  ;;  %v1269_v60 = vsel %vm1215_vm3, %v1264_v57, 0  ;;  %v18614_v57 = vpack.i.bf16 %v14798_v53, %v14796_v32 }
 0x249   : > { %v13298_v34 = vpop.permute.xlu0 %13297 }
 0x24a   : > { %v13299_v8 = vunpack.i.l.bf16 %v13298_v34  ;;  %2047 = vrot.lane.b32.xlu0 %v1101_v20, %s14223_s14  ;;  %1998 = vrot.lane.b32.xlu1 %v1100_v38, %s14223_s14  ;;  %v13300_v31 = vunpack.i.h.bf16 %v13298_v34  ;;  %v989_v34 = vpack.c.bf16 %v14803_v51, %v14803_v51 }
 0x24b   : > { %v1313_v11 = vpop.permute.xlu1 %1312 }
 0x24c   : > { %12301 = vmatmul.mubr.msk.bf16.vlgmr.msra.gmra.mrb[0].mxu1 %vm1215_vm3, %v988_v39  ;;  %v1102_v30 = vpack.c.bf16 %v13299_v8, %v13299_v8  ;;  %v1103_v44 = vpack.c.bf16 %v13300_v31, %v13300_v31  ;;  %v1318_v38 = vsel %vm1215_vm3, %v1313_v11, 0  ;;  %v992_v11 = vpack.c.bf16 %v14842_v0, %v14842_v0 }
 0x24d   : > { %12305 = vmatpush3.bf16.xpose.msra.mxu1 %v1269_v60  ;;  %12306 = vmatprep.mubr.msk.bf16.mxu1 %vm14222_vm2, %v18612_v52 }
 0x24e   : > { %2096 = vrot.lane.b32.xlu0 %v1102_v30, %s14223_s14  ;;  %13332 = vrot.lane.b32.xlu1 %v18613_v22, %s14224_s16  ;;  %v990_v30 = vpack.c.bf16 %v14796_v32, %v14796_v32 }
 0x24f   : > { %v1362_v63 = vpop.permute.xlu1 %1361  ;;  %12310 = vmatprep.subr.bf16.mxu1 %v18612_v52 }
 0x252   : > { %13337 = vrot.lane.b32.xlu0 %v18614_v57, %s14224_s16  ;;  %2145 = vrot.lane.b32.xlu1 %v1103_v44, %s14223_s14  ;;  %v1367_v57 = vsel %vm1215_vm3, %v1362_v63, 0  ;;  %v18615_v63 = vpack.i.bf16 %v14845_v35, %v14842_v0 }
 0x253   : > { %v1411_v20 = vpop.permute.xlu1 %1410 }
 0x254   : > { %v1416_v50 = vsel %vm1215_vm3, %v1411_v20, 0  ;;  %12307 = vmatmul.mubr.msk.bf16.vlgmr.msra.gmra.mrb[4].mxu1 %vm1215_vm3, %v989_v34 }
 0x255   : > { %v1460_v8 = vpop.permute.xlu0 %1459  ;;  %12311 = vmatpush3.bf16.xpose.msra.mxu1 %v1318_v38  ;;  %12323 = vmatpush3.bf16.xpose.msra.mxu0 %v1416_v50 }
 0x256   : > { %12312 = vmatprep.mubr.msk.bf16.mxu1 %vm14222_vm2, %v18612_v52  ;;  %12316 = vmatprep.subr.bf16.mxu1 %v18612_v52 }
 0x257   : > { %v13303_v51 = vpop.permute.xlu1 %13302  ;;  %12334 = vmatprep.subr.bf16.mxu0 %v18612_v52 }
 0x258   : > { %v13305_v39 = vunpack.i.h.bf16 %v13303_v51  ;;  %v13304_v60 = vunpack.i.l.bf16 %v13303_v51 }
 0x259   : > { %v1509_v31 = vpop.permute.xlu0 %1508 }
 0x25a   : > { %v1105_v22 = vpack.c.bf16 %v13305_v39, %v13305_v39  ;;  %v1104_v44 = vpack.c.bf16 %v13304_v60, %v13304_v60  ;;  %v1514_v20 = vsel %vm1215_vm3, %v1509_v31, 0  ;;  %v994_v31 = vpack.c.bf16 %v14838_v42, %v14838_v42 }
 0x25b   : > { %v1558_v34 = vpop.permute.xlu1 %1557 }
 0x25c   : > { %12313 = vmatmul.mubr.msk.bf16.vlgmr.msra.gmra.mrb[8].mxu1 %vm1215_vm3, %v990_v30  ;;  %12325 = vmatmul.mubr.msk.bf16.vlgmr.msra.gmra.mrb[16].mxu0 %vm1215_vm3, %v992_v11  ;;  %v991_v11 = vpack.c.bf16 %v14798_v53, %v14798_v53  ;;  %v18616_v53 = vpack.i.bf16 %v14840_v16, %v14838_v42 }
 0x25d   : > { %2243 = vrot.lane.b32.xlu0 %v1105_v22, %s14223_s14  ;;  %2194 = vrot.lane.b32.xlu1 %v1104_v44, %s14223_s14  ;;  %v13308_v38 = vpop.permute.xlu0 %13307 }
 0x25e   : > { %v13309_v50 = vunpack.i.l.bf16 %v13308_v38  ;;  %12317 = vmatpush3.bf16.xpose.msra.mxu1 %v1367_v57  ;;  %12335 = vmatpush3.bf16.xpose.msra.mxu0 %v1514_v20  ;;  %v13310_v32 = vunpack.i.h.bf16 %v13308_v38  ;;  %v1465_v57 = vsel %vm1215_vm3, %v1460_v8, 0 }
 0x25f   : > { %12318 = vmatprep.mubr.msk.bf16.mxu1 %vm14222_vm2, %v18612_v52  ;;  %12336 = vmatprep.mubr.msk.bf16.mxu0 %vm14222_vm2, %v18612_v52 }
 0x260   : > { %v1106_v51 = vpack.c.bf16 %v13309_v50, %v13309_v50  ;;  %12328 = vmatprep.subr.bf16.mxu1 %v18612_v52  ;;  %12346 = vmatprep.subr.bf16.mxu0 %v18612_v52  ;;  %v1107_v22 = vpack.c.bf16 %v13310_v32, %v13310_v32 }
 0x261   : > { %13342 = vrot.lane.b32.xlu1 %v18615_v63, %s14224_s16 }
 0x262   : > { %2292 = vrot.lane.b32.xlu0 %v1106_v51, %s14223_s14  ;;  %v993_v51 = vpack.c.bf16 %v14845_v35, %v14845_v35  ;;  %v18617_v35 = vpack.i.bf16 %v14887_v28, %v14884_v12 }
 0x263   : > { %v1607_v39 = vpop.permute.xlu1 %1606 }
 0x264   : > { %v1612_v30 = vsel %vm1215_vm3, %v1607_v39, 0  ;;  %v996_v39 = vpack.c.bf16 %v14884_v12, %v14884_v12  ;;  %v998_v12 = vpack.c.bf16 %v14880_v18, %v14880_v18 }
 0x265   : > { %v1656_v60 = vpop.permute.xlu0 %1655  ;;  %12319 = vmatmul.mubr.msk.bf16.vlgmr.msra.gmra.mrb[12].mxu1 %vm1215_vm3, %v991_v11  ;;  %12337 = vmatmul.mubr.msk.bf16.vlgmr.msra.gmra.mrb[20].mxu0 %vm1215_vm3, %v994_v31  ;;  %v1563_v31 = vsel %vm1215_vm3, %v1558_v34, 0 }
 0x266   : > { %2341 = vrot.lane.b32.xlu1 %v1107_v22, %s14223_s14  ;;  %12329 = vmatpush3.bf16.xpose.msra.mxu1 %v1465_v57 }
 0x267   : > { %v13313_v44 = vpop.permute.xlu1 %13312  ;;  %12347 = vmatpush3.bf16.xpose.msra.mxu0 %v1612_v30  ;;  %13347 = vrot.lane.b32.xlu0 %v18616_v53, %s14224_s16 }
 0x268   : > { %v13315_v0 = vunpack.i.h.bf16 %v13313_v44  ;;  %v13314_v20 = vunpack.i.l.bf16 %v13313_v44  ;;  %12330 = vmatprep.mubr.msk.bf16.mxu1 %vm14222_vm2, %v18612_v52  ;;  %12348 = vmatprep.mubr.msk.bf16.mxu0 %vm14222_vm2, %v18612_v52 }
 0x269   : > { %v1705_v38 = vpop.permute.xlu0 %1704  ;;  %12340 = vmatprep.subr.bf16.mxu1 %v18612_v52  ;;  %12358 = vmatprep.subr.bf16.mxu0 %v18612_v52 }
 0x26a   : > { %v1109_v50 = vpack.c.bf16 %v13315_v0, %v13315_v0  ;;  %v1108_v32 = vpack.c.bf16 %v13314_v20, %v13314_v20  ;;  %v1710_v22 = vsel %vm1215_vm3, %v1705_v38, 0  ;;  %v995_v0 = vpack.c.bf16 %v14840_v16, %v14840_v16 }
 0x26b   : > { %v1754_v63 = vpop.permute.xlu1 %1753  ;;  %v18618_v38 = vpack.i.bf16 %v14882_v47, %v14880_v18 }
 0x26c   : > { %2390 = vrot.lane.b32.xlu1 %v1108_v32, %s14223_s14  ;;  %2439 = vrot.lane.b32.xlu0 %v1109_v50, %s14223_s14  ;;  %v1661_v50 = vsel %vm1215_vm3, %v1656_v60, 0  ;;  %v997_v60 = vpack.c.bf16 %v14887_v28, %v14887_v28  ;;  %v18539_v28 = vsub.s32 2, %v14557_v33 }
 0x26d   : > { %v13318_v8 = vpop.permute.xlu0 %13317  ;;  %12331 = vmatmul.mubr.msk.bf16.vlgmr.msra.gmra.mrb[16].mxu1 %vm1215_vm3, %v993_v51 }
 0x26e   : > { %v13319_v42 = vunpack.i.l.bf16 %v13318_v8  ;;  %v13320_v11 = vunpack.i.h.bf16 %v13318_v8  ;;  %12349 = vmatmul.mubr.msk.bf16.vlgmr.msra.gmra.mrb[24].mxu0 %vm1215_vm3, %v996_v39  ;;  %12341 = vmatpush3.bf16.xpose.msra.mxu1 %v1563_v31  ;;  %v1000_v31 = vpack.c.bf16 %v14926_v59, %v14926_v59  ;;  %v14113_v59 = vld [vmem:[%s18529_s6] sm:$0xff] }
 0x26f   : > { %12359 = vmatpush3.bf16.xpose.msra.mxu0 %v1710_v22  ;;  %12342 = vmatprep.mubr.msk.bf16.mxu1 %vm14222_vm2, %v18612_v52 }
 0x270   : > { %v1110_v30 = vpack.c.bf16 %v13319_v42, %v13319_v42  ;;  %13352 = vrot.lane.b32.xlu1 %v18617_v35, %s14224_s16  ;;  %12360 = vmatprep.mubr.msk.bf16.mxu0 %vm14222_vm2, %v18612_v52  ;;  %v1111_v44 = vpack.c.bf16 %v13320_v11, %v13320_v11  ;;  %v1759_v11 = vsel %vm1215_vm3, %v1754_v63, 0 }
 0x271   : > { %12352 = vmatprep.subr.bf16.mxu1 %v18612_v52  ;;  %12370 = vmatprep.subr.bf16.mxu0 %v18612_v52 }
 0x272   : > { %2488 = vrot.lane.b32.xlu0 %v1110_v30, %s14223_s14 }
 0x273   : > { %v1803_v34 = vpop.permute.xlu1 %1802 }
 0x274   : > { %2537 = vrot.lane.b32.xlu1 %v1111_v44, %s14223_s14  ;;  %v1808_v20 = vsel %vm1215_vm3, %v1803_v34, 0  ;;  %v999_v34 = vpack.c.bf16 %v14882_v47, %v14882_v47  ;;  %v1002_v44 = vpack.c.bf16 %v14922_v25, %v14922_v25 }
 0x275   : > { %v1852_v57 = vpop.permute.xlu0 %1851  ;;  %12343 = vmatmul.mubr.msk.bf16.vlgmr.msra.gmra.mrb[20].mxu1 %vm1215_vm3, %v995_v0  ;;  %v18619_v0 = vpack.i.bf16 %v14924_v9, %v14922_v25  ;;  %v1001_v25 = vpack.c.bf16 %v14929_v24, %v14929_v24 }
 0x276   : > { %13357 = vrot.lane.b32.xlu0 %v18618_v38, %s14224_s16  ;;  %12361 = vmatmul.mubr.msk.bf16.vlgmr.msra.gmra.mrb[28].mxu0 %vm1215_vm3, %v998_v12  ;;  %v1857_v12 = vsel %vm1215_vm3, %v1852_v57, 0 }
 0x277   : > { %v13323_v53 = vpop.permute.xlu1 %13322  ;;  %12353 = vmatpush3.bf16.xpose.msra.mxu1 %v1661_v50  ;;  %12371 = vmatpush3.bf16.xpose.msra.mxu0 %v1808_v20  ;;  %v1003_v20 = vpack.c.bf16 %v14924_v9, %v14924_v9 }
 0x278   : > { %v13325_v32 = vunpack.i.h.bf16 %v13323_v53  ;;  %v13324_v8 = vunpack.i.l.bf16 %v13323_v53  ;;  %12354 = vmatprep.mubr.msk.bf16.mxu1 %vm14222_vm2, %v18612_v52  ;;  %12372 = vmatprep.mubr.msk.bf16.mxu0 %vm14222_vm2, %v18612_v52 }
 0x279   : > { %v1901_v16 = vpop.permute.xlu0 %1900  ;;  %12364 = vmatprep.subr.bf16.mxu1 %v18612_v52  ;;  %12382 = vmatprep.subr.bf16.mxu0 %v18612_v52 }
 0x27a   : > { %v1113_v51 = vpack.c.bf16 %v13325_v32, %v13325_v32  ;;  %v1112_v42 = vpack.c.bf16 %v13324_v8, %v13324_v8  ;;  %v1906_v35 = vsel %vm1215_vm3, %v1901_v16, 0 }
 0x27b   : > { %v1950_v47 = vpop.permute.xlu1 %1949 }
 0x27c   : > { %2635 = vrot.lane.b32.xlu0 %v1113_v51, %s14223_s14  ;;  %2586 = vrot.lane.b32.xlu1 %v1112_v42, %s14223_s14  ;;  %v1955_v57 = vsel %vm1215_vm3, %v1950_v47, 0 }
 0x27d   : > { %v13328_v18 = vpop.permute.xlu0 %13327 }
 0x27e   : > { %v13329_v39 = vunpack.i.l.bf16 %v13328_v18  ;;  %12355 = vmatmul.mubr.msk.bf16.vlgmr.msra.gmra.mrb[24].mxu1 %vm1215_vm3, %v997_v60  ;;  %v13330_v30 = vunpack.i.h.bf16 %v13328_v18  ;;  %12373 = vmatmul.mubr.msk.bf16.vlgmr.msra.gmra.mrb[32].mxu0 %vm1215_vm3, %v1000_v31 }
 0x27f   : > { %12365 = vmatpush3.bf16.xpose.msra.mxu1 %v1759_v11  ;;  %12383 = vmatpush3.bf16.xpose.msra.mxu0 %v1906_v35 }
 0x280   : > { %v1114_v22 = vpack.c.bf16 %v13329_v39, %v13329_v39  ;;  %13362 = vrot.lane.b32.xlu1 %v13361_v40, %s14224_s16  ;;  %12366 = vmatprep.mubr.msk.bf16.mxu1 %vm14222_vm2, %v18612_v52  ;;  %v1115_v63 = vpack.c.bf16 %v13330_v30, %v13330_v30  ;;  %v903_v40 = vrot.slane %v14113_v59, %v18539_v28 }
 0x281   : > { %12384 = vmatprep.mubr.msk.bf16.mxu0 %vm14222_vm2, %v18612_v52  ;;  %12376 = vmatprep.subr.bf16.mxu1 %v18612_v52 }
 0x282   : > { %2684 = vrot.lane.b32.xlu0 %v1114_v22, %s14223_s14  ;;  %12394 = vmatprep.subr.bf16.mxu0 %v18612_v52 }
 0x284   : > { %2733 = vrot.lane.b32.xlu1 %v1115_v63, %s14223_s14 }
 0x286   : > { %13367 = vrot.lane.b32.xlu0 %v18619_v0, %s14224_s16  ;;  %12367 = vmatmul.mubr.msk.bf16.vlgmr.msra.gmra.mrb[28].mxu1 %vm1215_vm3, %v999_v34 }
 0x287   : > { %12385 = vmatmul.mubr.msk.bf16.vlgmr.msra.gmra.mrb[36].mxu0 %vm1215_vm3, %v1002_v44  ;;  %12377 = vmatpush3.bf16.xpose.msra.mxu1 %v1857_v12 }
 0x288   : > { %905 = vrot.lane.b32.xlu1 %v903_v40, %s18562_s27  ;;  %12378 = vmatprep.mubr.msk.bf16.mxu1 %vm14222_vm2, %v18612_v52 }
 0x289   : > { %12388 = vmatprep.subr.bf16.mxu1 %v18612_v52  ;;  %12396 = vmatprep.mubr.msk.bf16.mxu0 %vm14222_vm2, %v18612_v52 }
 0x28e   : > { %12379 = vmatmul.mubr.msk.bf16.vlgmr.msra.gmra.mrb[32].mxu1 %vm1215_vm3, %v1001_v25 }
 0x28f   : > { %12389 = vmatpush3.bf16.xpose.msra.mxu1 %v1955_v57  ;;  %12390 = vmatprep.mubr.msk.bf16.mxu1 %vm14222_vm2, %v18612_v52 }
 0x290   : > { %12400 = vmatprep.subr.bf16.mxu1 %v18612_v52 }
 0x296   : > { %12391 = vmatmul.mubr.msk.bf16.vlgmr.msra.gmra.mrb[36].mxu1 %vm1215_vm3, %v1003_v20 }
 0x297   : > { %12402 = vmatprep.mubr.msk.bf16.mxu1 %vm14222_vm2, %v18612_v52 }
 0x2bc   : > { %v2048_v38 = vpop.permute.xlu0 %2047  ;;  %v1999_v24 = vpop.permute.xlu1 %1998 }
 0x2bd   : > { %v2053_v53 = vsel %vm1215_vm3, %v2048_v38, 0  ;;  %v2004_v50 = vsel %vm1215_vm3, %v1999_v24, 0 }
 0x2be   : > { %12395 = vmatpush3.bf16.xpose.msra.mxu0 %v2004_v50  ;;  %12401 = vmatpush3.bf16.xpose.msra.mxu1 %v2053_v53 }
 0x2bf   : > { %12406 = vmatprep.subr.bf16.mxu0 %v18612_v52  ;;  %12412 = vmatprep.subr.bf16.mxu1 %v18612_v52 }
 0x2c0   : > { %v2097_v32 = vpop.permute.xlu0 %2096  ;;  %v13333_v8 = vpop.permute.xlu1 %13332 }
 0x2c1   : > { %v13335_v9 = vunpack.i.h.bf16 %v13333_v8  ;;  %v13334_v16 = vunpack.i.l.bf16 %v13333_v8  ;;  %v2102_v39 = vsel %vm1215_vm3, %v2097_v32, 0 }
 0x2c3   : > { %v1005_v51 = vpack.c.bf16 %v13335_v9, %v13335_v9  ;;  %v1004_v42 = vpack.c.bf16 %v13334_v16, %v13334_v16 }
 0x2c4   : > { %v13338_v18 = vpop.permute.xlu0 %13337  ;;  %v2146_v60 = vpop.permute.xlu1 %2145 }
 0x2c5   : > { %v2151_v31 = vsel %vm1215_vm3, %v2146_v60, 0  ;;  %12397 = vmatmul.mubr.msk.bf16.vlgmr.msra.gmra.mrb[40].mxu0 %vm1215_vm3, %v1004_v42  ;;  %12403 = vmatmul.mubr.msk.bf16.vlgmr.msra.gmra.mrb[40].mxu1 %vm1215_vm3, %v1005_v51  ;;  %v13340_v11 = vunpack.i.h.bf16 %v13338_v18  ;;  %v13339_v30 = vunpack.i.l.bf16 %v13338_v18 }
 0x2c6   : > { %12407 = vmatpush3.bf16.xpose.msra.mxu0 %v2102_v39  ;;  %12413 = vmatpush3.bf16.xpose.msra.mxu1 %v2151_v31 }
 0x2c7   : > { %12408 = vmatprep.mubr.msk.bf16.mxu0 %vm14222_vm2, %v18612_v52  ;;  %12414 = vmatprep.mubr.msk.bf16.mxu1 %vm14222_vm2, %v18612_v52  ;;  %v1007_v22 = vpack.c.bf16 %v13340_v11, %v13340_v11  ;;  %v1006_v35 = vpack.c.bf16 %v13339_v30, %v13339_v30 }
 0x2c8   : > { %12418 = vmatprep.subr.bf16.mxu0 %v18612_v52  ;;  %12424 = vmatprep.subr.bf16.mxu1 %v18612_v52 }
 0x2cd   : > { %12409 = vmatmul.mubr.msk.bf16.vlgmr.msra.gmra.mrb[44].mxu0 %vm1215_vm3, %v1006_v35  ;;  %12415 = vmatmul.mubr.msk.bf16.vlgmr.msra.gmra.mrb[44].mxu1 %vm1215_vm3, %v1007_v22 }
 0x2ce   : > { %12420 = vmatprep.mubr.msk.bf16.mxu0 %vm14222_vm2, %v18612_v52  ;;  %12426 = vmatprep.mubr.msk.bf16.mxu1 %vm14222_vm2, %v18612_v52 }
 0x2cf   : > { %v2244_v63 = vpop.permute.xlu0 %2243  ;;  %v2195_v34 = vpop.permute.xlu1 %2194 }
 0x2d0   : > { %v2249_v59 = vsel %vm1215_vm3, %v2244_v63, 0  ;;  %v2200_v40 = vsel %vm1215_vm3, %v2195_v34, 0 }
 0x2d1   : > { %12419 = vmatpush3.bf16.xpose.msra.mxu0 %v2200_v40  ;;  %12425 = vmatpush3.bf16.xpose.msra.mxu1 %v2249_v59 }
 0x2d2   : > { %12430 = vmatprep.subr.bf16.mxu0 %v18612_v52  ;;  %12436 = vmatprep.subr.bf16.mxu1 %v18612_v52 }
 0x2d3   : > { %v13343_v44 = vpop.permute.xlu1 %13342 }
 0x2d4   : > { %v13345_v0 = vunpack.i.h.bf16 %v13343_v44  ;;  %v13344_v12 = vunpack.i.l.bf16 %v13343_v44  ;;  %v2293_v47 = vpop.permute.xlu0 %2292 }
 0x2d5   : > { %v2298_v20 = vsel %vm1215_vm3, %v2293_v47, 0 }
 0x2d6   : > { %v1009_v25 = vpack.c.bf16 %v13345_v0, %v13345_v0  ;;  %v1008_v57 = vpack.c.bf16 %v13344_v12, %v13344_v12 }
 0x2d8   : > { %v2342_v38 = vpop.permute.xlu1 %2341  ;;  %12421 = vmatmul.mubr.msk.bf16.vlgmr.msra.gmra.mrb[48].mxu0 %vm1215_vm3, %v1008_v57  ;;  %12427 = vmatmul.mubr.msk.bf16.vlgmr.msra.gmra.mrb[48].mxu1 %vm1215_vm3, %v1009_v25 }
 0x2d9   : > { %v2347_v24 = vsel %vm1215_vm3, %v2342_v38, 0  ;;  %v13348_v53 = vpop.permute.xlu0 %13347  ;;  %12431 = vmatpush3.bf16.xpose.msra.mxu0 %v2298_v20  ;;  %12432 = vmatprep.mubr.msk.bf16.mxu0 %vm14222_vm2, %v18612_v52 }
 0x2da   : > { %v13349_v50 = vunpack.i.l.bf16 %v13348_v53  ;;  %12437 = vmatpush3.bf16.xpose.msra.mxu1 %v2347_v24  ;;  %12438 = vmatprep.mubr.msk.bf16.mxu1 %vm14222_vm2, %v18612_v52  ;;  %v13350_v32 = vunpack.i.h.bf16 %v13348_v53 }
 0x2db   : > { %12442 = vmatprep.subr.bf16.mxu0 %v18612_v52  ;;  %12448 = vmatprep.subr.bf16.mxu1 %v18612_v52 }
 0x2dc   : > { %v1010_v16 = vpack.c.bf16 %v13349_v50, %v13349_v50  ;;  %v1011_v42 = vpack.c.bf16 %v13350_v32, %v13350_v32 }
 0x2de   : > { %v2391_v8 = vpop.permute.xlu1 %2390  ;;  %v2440_v9 = vpop.permute.xlu0 %2439 }
 0x2df   : > { %v2396_v51 = vsel %vm1215_vm3, %v2391_v8, 0  ;;  %v2445_v18 = vsel %vm1215_vm3, %v2440_v9, 0 }
 0x2e0   : > { %12433 = vmatmul.mubr.msk.bf16.vlgmr.msra.gmra.mrb[52].mxu0 %vm1215_vm3, %v1010_v16 }
 0x2e1   : > { %12439 = vmatmul.mubr.msk.bf16.vlgmr.msra.gmra.mrb[52].mxu1 %vm1215_vm3, %v1011_v42  ;;  %12443 = vmatpush3.bf16.xpose.msra.mxu0 %v2396_v51 }
 0x2e2   : > { %v13353_v60 = vpop.permute.xlu1 %13352  ;;  %12449 = vmatpush3.bf16.xpose.msra.mxu1 %v2445_v18  ;;  %12444 = vmatprep.mubr.msk.bf16.mxu0 %vm14222_vm2, %v18612_v52 }
 0x2e3   : > { %v13355_v39 = vunpack.i.h.bf16 %v13353_v60  ;;  %v13354_v31 = vunpack.i.l.bf16 %v13353_v60  ;;  %12450 = vmatprep.mubr.msk.bf16.mxu1 %vm14222_vm2, %v18612_v52  ;;  %12454 = vmatprep.subr.bf16.mxu0 %v18612_v52 }
 0x2e4   : > { %v2489_v11 = vpop.permute.xlu0 %2488  ;;  %12460 = vmatprep.subr.bf16.mxu1 %v18612_v52 }
 0x2e5   : > { %v1012_v30 = vpack.c.bf16 %v13354_v31, %v13354_v31  ;;  %v1013_v22 = vpack.c.bf16 %v13355_v39, %v13355_v39  ;;  %v2494_v59 = vsel %vm1215_vm3, %v2489_v11, 0 }
 0x2e6   : > { %v2538_v35 = vpop.permute.xlu1 %2537 }
 0x2e7   : > { %v2543_v63 = vsel %vm1215_vm3, %v2538_v35, 0 }
 0x2e8   : > { %v13358_v34 = vpop.permute.xlu0 %13357  ;;  %12445 = vmatmul.mubr.msk.bf16.vlgmr.msra.gmra.mrb[56].mxu0 %vm1215_vm3, %v1012_v30 }
 0x2e9   : > { %12451 = vmatmul.mubr.msk.bf16.vlgmr.msra.gmra.mrb[56].mxu1 %vm1215_vm3, %v1013_v22  ;;  %12455 = vmatpush3.bf16.xpose.msra.mxu0 %v2494_v59  ;;  %v13359_v40 = vunpack.i.l.bf16 %v13358_v34  ;;  %v13360_v44 = vunpack.i.h.bf16 %v13358_v34 }
 0x2ea   : > { %12461 = vmatpush3.bf16.xpose.msra.mxu1 %v2543_v63  ;;  %12456 = vmatprep.mubr.msk.bf16.mxu0 %vm14222_vm2, %v18612_v52 }
 0x2eb   : > { %12462 = vmatprep.mubr.msk.bf16.mxu1 %vm14222_vm2, %v18612_v52  ;;  %12466 = vmatprep.subr.bf16.mxu0 %v18612_v52  ;;  %v1014_v47 = vpack.c.bf16 %v13359_v40, %v13359_v40  ;;  %v1015_v57 = vpack.c.bf16 %v13360_v44, %v13360_v44 }
 0x2ec   : > { %12472 = vmatprep.subr.bf16.mxu1 %v18612_v52 }
 0x2ee   : > { %v2636_v0 = vpop.permute.xlu0 %2635  ;;  %v2587_v12 = vpop.permute.xlu1 %2586 }
 0x2ef   : > { %v2592_v25 = vsel %vm1215_vm3, %v2587_v12, 0  ;;  %v2641_v20 = vsel %vm1215_vm3, %v2636_v0, 0 }
 0x2f0   : > { %12457 = vmatmul.mubr.msk.bf16.vlgmr.msra.gmra.mrb[60].mxu0 %vm1215_vm3, %v1014_v47 }
 0x2f1   : > { %12463 = vmatmul.mubr.msk.bf16.vlgmr.msra.gmra.mrb[60].mxu1 %vm1215_vm3, %v1015_v57  ;;  %12467 = vmatpush3.bf16.xpose.msra.mxu0 %v2592_v25 }
 0x2f2   : > { %v13363_v38 = vpop.permute.xlu1 %13362  ;;  %12473 = vmatpush3.bf16.xpose.msra.mxu1 %v2641_v20  ;;  %12468 = vmatprep.mubr.msk.bf16.mxu0 %vm14222_vm2, %v18612_v52 }
 0x2f3   : > { %v13365_v24 = vunpack.i.h.bf16 %v13363_v38  ;;  %v13364_v53 = vunpack.i.l.bf16 %v13363_v38  ;;  %12474 = vmatprep.mubr.msk.bf16.mxu1 %vm14222_vm2, %v18612_v52  ;;  %12478 = vmatprep.subr.bf16.mxu0 %v18612_v52 }
 0x2f4   : > { %v2685_v50 = vpop.permute.xlu0 %2684  ;;  %12484 = vmatprep.subr.bf16.mxu1 %v18612_v52 }
 0x2f5   : > { %v1016_v32 = vpack.c.bf16 %v13364_v53, %v13364_v53  ;;  %v1017_v8 = vpack.c.bf16 %v13365_v24, %v13365_v24  ;;  %v2690_v42 = vsel %vm1215_vm3, %v2685_v50, 0 }
 0x2f6   : > { %v2734_v9 = vpop.permute.xlu1 %2733 }
 0x2f7   : > { %v2739_v51 = vsel %vm1215_vm3, %v2734_v9, 0 }
 0x2f8   : > { %v13368_v16 = vpop.permute.xlu0 %13367  ;;  %12469 = vmatmul.mubr.msk.bf16.vlgmr.msra.gmra.mrb[64].mxu0 %vm1215_vm3, %v1016_v32 }
 0x2f9   : > { %12475 = vmatmul.mubr.msk.bf16.vlgmr.msra.gmra.mrb[64].mxu1 %vm1215_vm3, %v1017_v8  ;;  %v13370_v18 = vunpack.i.h.bf16 %v13368_v16  ;;  %12479 = vmatpush3.bf16.xpose.msra.mxu0 %v2690_v42  ;;  %v13369_v39 = vunpack.i.l.bf16 %v13368_v16 }
 0x2fa   : > { %v906_v60 = vpop.permute.xlu1 %905  ;;  %12485 = vmatpush3.bf16.xpose.msra.mxu1 %v2739_v51  ;;  %12480 = vmatprep.mubr.msk.bf16.mxu0 %vm14222_vm2, %v18612_v52 }
 0x2fb   : > { %v909_v31 = vadd.f32 %v906_v60, %v14784_v36  ;;  %v908_v11 = vadd.f32 %v906_v60, %v14774_v49  ;;  %v910_v30 = vadd.f32 %v14768_v27, %v906_v60  ;;  %12486 = vmatprep.mubr.msk.bf16.mxu1 %vm14222_vm2, %v18612_v52  ;;  %v912_v22 = vadd.f32 %v906_v60, %v14817_v6 }
 0x2fc   : > { %v911_v35 = vadd.f32 %v14780_v48, %v906_v60  ;;  %v913_v63 = vadd.f32 %v906_v60, %v14826_v15  ;;  %12490 = vmatprep.subr.bf16.mxu0 %v18612_v52  ;;  %v914_v49 = vadd.f32 %v14813_v29, %v906_v60  ;;  %12496 = vmatprep.subr.bf16.mxu1 %v18612_v52 }
 0x2fd   : > { %v1181_v34 = vpack.c.bf16 %v909_v31, %v909_v31  ;;  %v1180_v59 = vpack.c.bf16 %v908_v11, %v908_v11  ;;  %v13371_v40 = vpack.i.bf16 %v909_v31, %v908_v11  ;;  %v1019_v27 = vpack.c.bf16 %v13370_v18, %v13370_v18 }
 0x2fe   : > { %v13381_v44 = vpack.i.bf16 %v913_v63, %v912_v22  ;;  %v13376_v36 = vpack.i.bf16 %v911_v35, %v910_v30  ;;  %v1018_v0 = vpack.c.bf16 %v13369_v39, %v13369_v39  ;;  %v916_v48 = vadd.f32 %v906_v60, %v14859_v56 }
 0x2ff   : > { %3217 = vrot.lane.b32.xlu0 %v1181_v34, %s18562_s27  ;;  %3167 = vrot.lane.b32.xlu1 %v1180_v59, %s18562_s27  ;;  %v915_v6 = vadd.f32 %v14821_v13, %v906_v60  ;;  %v917_v15 = vadd.f32 %v906_v60, %v14868_v10  ;;  %v918_v12 = vadd.f32 %v14854_v37, %v906_v60 }
 0x300   : > { %v920_v47 = vadd.f32 %v906_v60, %v14902_v14  ;;  %12481 = vmatmul.mubr.msk.bf16.vlgmr.msra.gmra.mrb[68].mxu0 %vm1215_vm3, %v1018_v0  ;;  %v1182_v29 = vpack.c.bf16 %v910_v30, %v910_v30  ;;  %v919_v25 = vadd.f32 %v14863_v26, %v906_v60  ;;  %v921_v57 = vadd.f32 %v906_v60, %v14910_v3 }
 0x301   : > { %12487 = vmatmul.mubr.msk.bf16.vlgmr.msra.gmra.mrb[68].mxu1 %vm1215_vm3, %v1019_v27  ;;  %v13391_v20 = vpack.i.bf16 %v917_v15, %v916_v48  ;;  %v13386_v38 = vpack.i.bf16 %v915_v6, %v914_v49  ;;  %v922_v13 = vadd.f32 %v14897_v7, %v906_v60  ;;  %12492 = vmatprep.mubr.msk.bf16.mxu0 %vm14222_vm2, %v18612_v52 }
 0x302   : > { %v13401_v37 = vpack.i.bf16 %v921_v57, %v920_v47  ;;  %v13396_v56 = vpack.i.bf16 %v919_v25, %v918_v12  ;;  %v1184_v10 = vpack.c.bf16 %v912_v22, %v912_v22  ;;  %v1183_v14 = vpack.c.bf16 %v911_v35, %v911_v35  ;;  %12498 = vmatprep.mubr.msk.bf16.mxu1 %vm14222_vm2, %v18612_v52 }
 0x303   : > { %3266 = vrot.lane.b32.xlu0 %v1182_v29, %s18562_s27  ;;  %13372 = vrot.lane.b32.xlu1 %v13371_v40, %s14224_s16  ;;  %v923_v26 = vadd.f32 %v14906_v23, %v906_v60  ;;  %v1186_v7 = vpack.c.bf16 %v914_v49, %v914_v49  ;;  %v1185_v24 = vpack.c.bf16 %v913_v63, %v913_v63 }
 0x304   : > { %v1188_v53 = vpack.c.bf16 %v916_v48, %v916_v48  ;;  %v1187_v23 = vpack.c.bf16 %v915_v6, %v915_v6  ;;  %v1190_v50 = vpack.c.bf16 %v918_v12, %v918_v12  ;;  %v1189_v32 = vpack.c.bf16 %v917_v15, %v917_v15 }
 0x305   : > { %v13406_v3 = vpack.i.bf16 %v923_v26, %v922_v13  ;;  %v1192_v8 = vpack.c.bf16 %v920_v47, %v920_v47  ;;  %v1191_v9 = vpack.c.bf16 %v919_v25, %v919_v25  ;;  %v1194_v60 = vpack.c.bf16 %v922_v13, %v922_v13 }
 0x306   : > { %v1193_v39 = vpack.c.bf16 %v921_v57, %v921_v57  ;;  %v1195_v30 = vpack.c.bf16 %v923_v26, %v923_v26 }
 0x307   : > { %3364 = vrot.lane.b32.xlu0 %v1184_v10, %s18562_s27  ;;  %3315 = vrot.lane.b32.xlu1 %v1183_v14, %s18562_s27 }
 0x30b   : > { %13382 = vrot.lane.b32.xlu0 %v13381_v44, %s14224_s16  ;;  %13377 = vrot.lane.b32.xlu1 %v13376_v36, %s14224_s16 }
 0x30f   : > { %3462 = vrot.lane.b32.xlu0 %v1186_v7, %s18562_s27  ;;  %3413 = vrot.lane.b32.xlu1 %v1185_v24, %s18562_s27 }
 0x313   : > { %3560 = vrot.lane.b32.xlu0 %v1188_v53, %s18562_s27  ;;  %3511 = vrot.lane.b32.xlu1 %v1187_v23, %s18562_s27 }
 0x317   : > { %13392 = vrot.lane.b32.xlu0 %v13391_v20, %s14224_s16  ;;  %13387 = vrot.lane.b32.xlu1 %v13386_v38, %s14224_s16 }
 0x31b   : > { %3658 = vrot.lane.b32.xlu0 %v1190_v50, %s18562_s27  ;;  %3609 = vrot.lane.b32.xlu1 %v1189_v32, %s18562_s27 }
 0x31f   : > { %3756 = vrot.lane.b32.xlu0 %v1192_v8, %s18562_s27  ;;  %3707 = vrot.lane.b32.xlu1 %v1191_v9, %s18562_s27  ;;  %v15221_v16 = vpop.f32.mrb[0].mxu1 }
 0x320   : > { %v12302_v51 = vpop.f32.mrb[1].mxu1 }
 0x321   : > { %v1259_v42 = vpop.f32.mrb[2].mxu1 }
 0x322   : > { %v12303_v18 = vpop.f32.mrb[3].mxu1 }
 0x323   : > { %13402 = vrot.lane.b32.xlu0 %v13401_v37, %s14224_s16  ;;  %13397 = vrot.lane.b32.xlu1 %v13396_v56, %s14224_s16 }
 0x327   : > { %3854 = vrot.lane.b32.xlu0 %v1194_v60, %s18562_s27  ;;  %3805 = vrot.lane.b32.xlu1 %v1193_v39, %s18562_s27  ;;  %v15227_v31 = vpop.f32.mrb[4].mxu1 }
 0x328   : > { %v12308_v11 = vpop.f32.mrb[5].mxu1 }
 0x329   : > { %v1308_v22 = vpop.f32.mrb[6].mxu1 }
 0x32a   : > { %v12309_v35 = vpop.f32.mrb[7].mxu1 }
 0x32b   : > { %3903 = vrot.lane.b32.xlu1 %v1195_v30, %s18562_s27 }
 0x32f   : > { %13407 = vrot.lane.b32.xlu1 %v13406_v3, %s14224_s16  ;;  %v15231_v63 = vpop.f32.mrb[8].mxu1  ;;  %v15233_v34 = vpop.f32.mrb[16].mxu0 }
 0x330   : > { %v12314_v59 = vpop.f32.mrb[9].mxu1  ;;  %v12326_v40 = vpop.f32.mrb[17].mxu0 }
 0x331   : > { %v1357_v44 = vpop.f32.mrb[10].mxu1  ;;  %v1455_v36 = vpop.f32.mrb[18].mxu0 }
 0x332   : > { %v12315_v49 = vpop.f32.mrb[11].mxu1  ;;  %v12327_v27 = vpop.f32.mrb[19].mxu0 }
 0x338   : > { %v15235_v0 = vpop.f32.mrb[12].mxu1  ;;  %v15237_v48 = vpop.f32.mrb[20].mxu0 }
 0x339   : > { %v12320_v6 = vpop.f32.mrb[13].mxu1  ;;  %v12338_v15 = vpop.f32.mrb[21].mxu0 }
 0x33a   : > { %v1406_v12 = vpop.f32.mrb[14].mxu1  ;;  %v1553_v47 = vpop.f32.mrb[22].mxu0 }
 0x33b   : > { %v12321_v29 = vpop.f32.mrb[15].mxu1  ;;  %v12339_v25 = vpop.f32.mrb[23].mxu0 }
 0x340   : > { %v15239_v57 = vpop.f32.mrb[16].mxu1 }
 0x341   : > { %v15241_v20 = vpop.f32.mrb[24].mxu0  ;;  %v12332_v38 = vpop.f32.mrb[17].mxu1 }
 0x342   : > { %v12350_v13 = vpop.f32.mrb[25].mxu0  ;;  %v1504_v37 = vpop.f32.mrb[18].mxu1 }
 0x343   : > { %v1651_v56 = vpop.f32.mrb[26].mxu0  ;;  %v12333_v10 = vpop.f32.mrb[19].mxu1 }
 0x344   : > { %v12351_v14 = vpop.f32.mrb[27].mxu0 }
 0x348   : > { %v15243_v26 = vpop.f32.mrb[20].mxu1 }
 0x349   : > { %v15245_v3 = vpop.f32.mrb[28].mxu0  ;;  %v12344_v7 = vpop.f32.mrb[21].mxu1 }
 0x34a   : > { %v12362_v24 = vpop.f32.mrb[29].mxu0  ;;  %v1602_v53 = vpop.f32.mrb[22].mxu1 }
 0x34b   : > { %v1749_v23 = vpop.f32.mrb[30].mxu0  ;;  %v12345_v50 = vpop.f32.mrb[23].mxu1 }
 0x34c   : > { %v12363_v32 = vpop.f32.mrb[31].mxu0 }
 0x351   : > { %v15247_v8 = vpop.f32.mrb[24].mxu1  ;;  %v15249_v9 = vpop.f32.mrb[32].mxu0 }
 0x352   : > { %v12356_v51 = vpop.f32.mrb[25].mxu1  ;;  %v12374_v42 = vpop.f32.mrb[33].mxu0 }
 0x353   : > { %v1700_v18 = vpop.f32.mrb[26].mxu1  ;;  %v1847_v60 = vpop.f32.mrb[34].mxu0 }
 0x354   : > { %v12357_v39 = vpop.f32.mrb[27].mxu1  ;;  %v12375_v11 = vpop.f32.mrb[35].mxu0 }
 0x359   : > { %v15251_v30 = vpop.f32.mrb[28].mxu1 }
 0x35a   : > { %v15253_v22 = vpop.f32.mrb[36].mxu0  ;;  %v12368_v35 = vpop.f32.mrb[29].mxu1 }
 0x35b   : > { %v12386_v59 = vpop.f32.mrb[37].mxu0  ;;  %v1798_v40 = vpop.f32.mrb[30].mxu1 }
 0x35c   : > { %v1945_v44 = vpop.f32.mrb[38].mxu0  ;;  %v12369_v36 = vpop.f32.mrb[31].mxu1 }
 0x35d   : > { %v12387_v49 = vpop.f32.mrb[39].mxu0 }
 0x361   : > { %v15255_v27 = vpop.f32.mrb[32].mxu1 }
 0x362   : > { %v12380_v6 = vpop.f32.mrb[33].mxu1 }
 0x363   : > { %v1896_v15 = vpop.f32.mrb[34].mxu1 }
 0x364   : > { %v12381_v12 = vpop.f32.mrb[35].mxu1 }
 0x369   : > { %v15257_v47 = vpop.f32.mrb[36].mxu1 }
 0x36a   : > { %v12392_v29 = vpop.f32.mrb[37].mxu1 }
 0x36b   : > { %v1994_v25 = vpop.f32.mrb[38].mxu1 }
 0x36c   : > { %v12393_v38 = vpop.f32.mrb[39].mxu1 }
 0x371   : > { %v3218_v13 = vpop.permute.xlu0 %3217  ;;  %v3168_v37 = vpop.permute.xlu1 %3167 }
 0x372   : > { %v3223_v56 = vsel %vm3172_vm4, %v3218_v13, 0  ;;  %v3174_v10 = vsel %vm3172_vm4, %v3168_v37, 0 }
 0x373   : > { %12491 = vmatpush3.bf16.msra.mxu0 %v3174_v10  ;;  %12497 = vmatpush3.bf16.msra.mxu1 %v3223_v56 }
 0x374   : > { %12502 = vmatprep.subr.bf16.mxu0 %v18612_v52  ;;  %12508 = vmatprep.subr.bf16.mxu1 %v18612_v52 }
 0x375   : > { %v15263_v14 = vpop.permute.xlu0 %3266  ;;  %v13373_v7 = vpop.permute.xlu1 %13372 }
 0x376   : > { %v13375_v24 = vunpack.i.h.bf16 %v13373_v7  ;;  %v13374_v53 = vunpack.i.l.bf16 %v13373_v7 }
 0x378   : > { %v1197_v23 = vpack.c.bf16 %v13375_v24, %v13375_v24  ;;  %v1196_v50 = vpack.c.bf16 %v13374_v53, %v13374_v53 }
 0x379   : > { %v15265_v32 = vpop.permute.xlu0 %3364  ;;  %v15267_v51 = vpop.permute.xlu1 %3315 }
 0x37a   : > { %4001 = vrot.lane.b32.xlu1 %v1197_v23, %s18562_s27  ;;  %3952 = vrot.lane.b32.xlu0 %v1196_v50, %s18562_s27 }
 0x37d   : > { %v13383_v42 = vpop.permute.xlu0 %13382  ;;  %v13378_v18 = vpop.permute.xlu1 %13377 }
 0x37e   : > { %v13380_v60 = vunpack.i.h.bf16 %v13378_v18  ;;  %v13379_v39 = vunpack.i.l.bf16 %v13378_v18  ;;  %v13385_v11 = vunpack.i.h.bf16 %v13383_v42  ;;  %v13384_v35 = vunpack.i.l.bf16 %v13383_v42 }
 0x380   : > { %v1199_v59 = vpack.c.bf16 %v13380_v60, %v13380_v60  ;;  %v1198_v40 = vpack.c.bf16 %v13379_v39, %v13379_v39  ;;  %v1201_v49 = vpack.c.bf16 %v13385_v11, %v13385_v11  ;;  %v1200_v6 = vpack.c.bf16 %v13384_v35, %v13384_v35 }
 0x381   : > { %v15271_v44 = vpop.permute.xlu0 %3462  ;;  %v15273_v36 = vpop.permute.xlu1 %3413 }
 0x382   : > { %4099 = vrot.lane.b32.xlu1 %v1199_v59, %s18562_s27  ;;  %4050 = vrot.lane.b32.xlu0 %v1198_v40, %s18562_s27 }
 0x385   : > { %v15277_v15 = vpop.permute.xlu0 %3560  ;;  %v15279_v12 = vpop.permute.xlu1 %3511 }
 0x386   : > { %4197 = vrot.lane.b32.xlu1 %v1201_v49, %s18562_s27  ;;  %4148 = vrot.lane.b32.xlu0 %v1200_v6, %s18562_s27 }
 0x389   : > { %v15283_v29 = vpop.permute.xlu0 %13392  ;;  %v13388_v25 = vpop.permute.xlu1 %13387 }
 0x38a   : > { %v13390_v38 = vunpack.i.h.bf16 %v13388_v25  ;;  %v13389_v13 = vunpack.i.l.bf16 %v13388_v25  ;;  %v13394_v37 = vunpack.i.l.bf16 %v15283_v29 }
 0x38c   : > { %v1203_v56 = vpack.c.bf16 %v13390_v38, %v13390_v38  ;;  %v1202_v10 = vpack.c.bf16 %v13389_v13, %v13389_v13  ;;  %v1204_v7 = vpack.c.bf16 %v13394_v37, %v13394_v37 }
 0x38e   : > { %4295 = vrot.lane.b32.xlu1 %v1203_v56, %s18562_s27  ;;  %4246 = vrot.lane.b32.xlu0 %v1202_v10, %s18562_s27 }
 0x392   : > { %4344 = vrot.lane.b32.xlu0 %v1204_v7, %s18562_s27 }
 0x398   : > { %v15289_v24 = vpop.f32.mrb[40].mxu0  ;;  %v15291_v53 = vpop.f32.mrb[40].mxu1 }
 0x399   : > { %v12398_v23 = vpop.f32.mrb[41].mxu0  ;;  %v12404_v50 = vpop.f32.mrb[41].mxu1 }
 0x39a   : > { %v2043_v42 = vpop.f32.mrb[42].mxu0  ;;  %v2092_v18 = vpop.f32.mrb[42].mxu1 }
 0x39b   : > { %v12399_v60 = vpop.f32.mrb[43].mxu0  ;;  %v12405_v39 = vpop.f32.mrb[43].mxu1  ;;  %v2785_v18 = vsel %vm2781_vm5, %v15227_v31, -inf }
 0x39c   : > { %v2782_v60 = vsel %vm2781_vm5, %v15221_v16, -inf }
 0x3a0   : > { %v15293_v11 = vpop.f32.mrb[44].mxu0  ;;  %v15295_v35 = vpop.f32.mrb[44].mxu1 }
 0x3a1   : > { %v12410_v59 = vpop.f32.mrb[45].mxu0  ;;  %v12416_v40 = vpop.f32.mrb[45].mxu1 }
 0x3a2   : > { %v2141_v49 = vpop.f32.mrb[46].mxu0  ;;  %v2190_v6 = vpop.f32.mrb[46].mxu1  ;;  %v2788_v59 = vsel %vm2781_vm5, %v15231_v63, -inf }
 0x3a3   : > { %v12411_v25 = vpop.f32.mrb[47].mxu0  ;;  %v12417_v38 = vpop.f32.mrb[47].mxu1 }
 0x3ab   : > { %v15297_v13 = vpop.f32.mrb[48].mxu0  ;;  %v15299_v37 = vpop.f32.mrb[48].mxu1 }
 0x3ac   : > { %v12422_v56 = vpop.f32.mrb[49].mxu0  ;;  %v12428_v10 = vpop.f32.mrb[49].mxu1 }
 0x3ad   : > { %v2239_v7 = vpop.f32.mrb[50].mxu0  ;;  %v2288_v23 = vpop.f32.mrb[50].mxu1 }
 0x3ae   : > { %v12423_v50 = vpop.f32.mrb[51].mxu0  ;;  %v12429_v42 = vpop.f32.mrb[51].mxu1  ;;  %v2791_v7 = vsel %vm2781_vm5, %v15235_v0, -inf }
 0x3af   : > { %v2797_v50 = vsel %vm2781_vm5, %v15239_v57, -inf  ;;  %v13395_v42 = vunpack.i.h.bf16 %v15283_v29  ;;  %v2809_v29 = vsel %vm2781_vm5, %v15247_v8, -inf }
 0x3b1   : > { %2786 = vmax.xlane.f32.xlu0 %v2785_v18 }
 0x3b2   : > { %2783 = vmax.xlane.f32.xlu1 %v2782_v60 }
 0x3b3   : > { %v15305_v39 = vpop.f32.mrb[52].mxu0 }
 0x3b4   : > { %v15309_v40 = vpop.f32.mrb[52].mxu1  ;;  %v12434_v49 = vpop.f32.mrb[53].mxu0 }
 0x3b5   : > { %2789 = vmax.xlane.f32.xlu0 %v2788_v59  ;;  %v12440_v6 = vpop.f32.mrb[53].mxu1  ;;  %v2337_v25 = vpop.f32.mrb[54].mxu0 }
 0x3b6   : > { %v2386_v38 = vpop.f32.mrb[54].mxu1  ;;  %v12435_v56 = vpop.f32.mrb[55].mxu0 }
 0x3b7   : > { %v12441_v10 = vpop.f32.mrb[55].mxu1  ;;  %v2803_v56 = vsel %vm2781_vm5, %v15243_v26, -inf }
 0x3b8   : > { %v1205_v10 = vpack.c.bf16 %v13395_v42, %v13395_v42  ;;  %v2824_v42 = vsel %vm2781_vm5, %v15253_v22, -inf }
 0x3b9   : > { %2792 = vmax.xlane.f32.xlu0 %v2791_v7 }
 0x3bb   : > { %v15313_v23 = vpop.f32.mrb[56].mxu0 }
 0x3bc   : > { %v15318_v18 = vpop.f32.mrb[56].mxu1  ;;  %v12446_v60 = vpop.f32.mrb[57].mxu0 }
 0x3bd   : > { %2798 = vmax.xlane.f32.xlu0 %v2797_v50  ;;  %v12452_v59 = vpop.f32.mrb[57].mxu1  ;;  %v2435_v49 = vpop.f32.mrb[58].mxu0 }
 0x3be   : > { %v2484_v6 = vpop.f32.mrb[58].mxu1  ;;  %v12447_v25 = vpop.f32.mrb[59].mxu0 }
 0x3bf   : > { %v12453_v38 = vpop.f32.mrb[59].mxu1 }
 0x3c1   : > { %2804 = vmax.xlane.f32.xlu0 %v2803_v56  ;;  %v2815_v56 = vsel %vm2781_vm5, %v15251_v30, -inf }
 0x3c3   : > { %4393 = vrot.lane.b32.xlu1 %v1205_v10, %s18562_s27  ;;  %v15323_v7 = vpop.f32.mrb[60].mxu0 }
 0x3c4   : > { %v15327_v28 = vpop.f32.mrb[60].mxu1  ;;  %v12458_v50 = vpop.f32.mrb[61].mxu0 }
 0x3c5   : > { %2810 = vmax.xlane.f32.xlu0 %v2809_v29  ;;  %v12464_v60 = vpop.f32.mrb[61].mxu1  ;;  %v2533_v59 = vpop.f32.mrb[62].mxu0 }
 0x3c6   : > { %v2582_v49 = vpop.f32.mrb[62].mxu1  ;;  %v12459_v6 = vpop.f32.mrb[63].mxu0 }
 0x3c7   : > { %v12465_v25 = vpop.f32.mrb[63].mxu1  ;;  %v2821_v6 = vsel %vm2781_vm5, %v15255_v27, -inf }
 0x3c9   : > { %2825 = vmax.xlane.f32.xlu0 %v2824_v42  ;;  %v2827_v42 = vsel %vm2781_vm5, %v15257_v47, -inf }
 0x3cb   : > { %v15331_v38 = vpop.f32.mrb[64].mxu0 }
 0x3cc   : > { %v15335_v10 = vpop.f32.mrb[64].mxu1  ;;  %v12470_v4 = vpop.f32.mrb[65].mxu0 }
 0x3cd   : > { %2816 = vmax.xlane.f32.xlu0 %v2815_v56  ;;  %v12476_v50 = vpop.f32.mrb[65].mxu1  ;;  %v2631_v29 = vpop.f32.mrb[66].mxu0 }
 0x3ce   : > { %v2680_v60 = vpop.f32.mrb[66].mxu1  ;;  %v12471_v59 = vpop.f32.mrb[67].mxu0 }
 0x3cf   : > { %v12477_v49 = vpop.f32.mrb[67].mxu1  ;;  %v2830_v59 = vsel %vm2781_vm5, %v15289_v24, -inf }
 0x3d0   : > { %v2833_v49 = vsel %vm2781_vm5, %v15291_v53, -inf }
 0x3d1   : > { %2822 = vmax.xlane.f32.xlu0 %v2821_v6  ;;  %v2839_v6 = vsel %vm2781_vm5, %v15295_v35, -inf }
 0x3d3   : > { %v15339_v25 = vpop.f32.mrb[68].mxu0 }
 0x3d4   : > { %v15343_v17 = vpop.f32.mrb[68].mxu1  ;;  %v12482_v5 = vpop.f32.mrb[69].mxu0 }
 0x3d5   : > { %2828 = vmax.xlane.f32.xlu0 %v2827_v42  ;;  %v12488_v4 = vpop.f32.mrb[69].mxu1  ;;  %v2729_v56 = vpop.f32.mrb[70].mxu0  ;;  %v2842_v5 = vsel %vm2781_vm5, %v15297_v13, -inf  ;;  %v2794_v42 = vsel %vm2781_vm5, %v15233_v34, -inf }
 0x3d6   : > { %v2778_v50 = vpop.f32.mrb[70].mxu1  ;;  %v12483_v29 = vpop.f32.mrb[71].mxu0  ;;  %v2845_v4 = vsel %vm2781_vm5, %v15299_v37, -inf  ;;  %v2800_v56 = vsel %vm2781_vm5, %v15237_v48, -inf }
 0x3d7   : > { %v12489_v60 = vpop.f32.mrb[71].mxu1  ;;  %v2848_v50 = vsel %vm2781_vm5, %v15305_v39, -inf  ;;  %v2806_v29 = vsel %vm2781_vm5, %v15241_v20, -inf }
 0x3d8   : > { %v2851_v60 = vsel %vm2781_vm5, %v15309_v40, -inf }
 0x3d9   : > { %2831 = vmax.xlane.f32.xlu0 %v2830_v59  ;;  %v2812_v59 = vsel %vm2781_vm5, %v15245_v3, -inf }
 0x3dd   : > { %2834 = vmax.xlane.f32.xlu0 %v2833_v49  ;;  %v2854_v49 = vsel %vm2781_vm5, %v15313_v23, -inf }
 0x3e1   : > { %2840 = vmax.xlane.f32.xlu0 %v2839_v6  ;;  %v2818_v6 = vsel %vm2781_vm5, %v15249_v9, -inf }
 0x3e5   : > { %2843 = vmax.xlane.f32.xlu0 %v2842_v5  ;;  %v2857_v5 = vsel %vm2781_vm5, %v15318_v18, -inf }
 0x3e7   : > { %2795 = vmax.xlane.f32.xlu1 %v2794_v42  ;;  %v2836_v42 = vsel %vm2781_vm5, %v15293_v11, -inf }
 0x3e9   : > { %2846 = vmax.xlane.f32.xlu0 %v2845_v4  ;;  %v2863_v4 = vsel %vm2781_vm5, %v15327_v28, -inf }
 0x3eb   : > { %2801 = vmax.xlane.f32.xlu1 %v2800_v56  ;;  %v2860_v56 = vsel %vm2781_vm5, %v15323_v7, -inf }
 0x3ed   : > { %2849 = vmax.xlane.f32.xlu0 %v2848_v50  ;;  %v2866_v50 = vsel %vm2781_vm5, %v15331_v38, -inf }
 0x3ef   : > { %2807 = vmax.xlane.f32.xlu1 %v2806_v29  ;;  %v15381_v29 = vpop.permute.xlu1 %3609 }
 0x3f1   : > { %2852 = vmax.xlane.f32.xlu0 %v2851_v60  ;;  %v15383_v60 = vpop.permute.xlu0 %3658 }
 0x3f2   : > { %18620 = vst [vmem:[#allocation27_spill] sm:$0xff] %v15383_v60 }
 0x3f3   : > { %2813 = vmax.xlane.f32.xlu1 %v2812_v59  ;;  %v15385_v59 = vpop.permute.xlu1 %3707 }
 0x3f4   : > { %18621 = vst [vmem:[#allocation28_spill] sm:$0xff] %v15385_v59 }
 0x3f5   : > { %2855 = vmax.xlane.f32.xlu0 %v2854_v49  ;;  %v15387_v49 = vpop.permute.xlu0 %3756 }
 0x3f6   : > { %18622 = vst [vmem:[#allocation29_spill] sm:$0xff] %v15387_v49 }
 0x3f7   : > { %2819 = vmax.xlane.f32.xlu1 %v2818_v6  ;;  %v15389_v6 = vpop.permute.xlu1 %13397 }
 0x3f9   : > { %2858 = vmax.xlane.f32.xlu0 %v2857_v5  ;;  %v15391_v5 = vpop.permute.xlu0 %13402 }
 0x3fb   : > { %2837 = vmax.xlane.f32.xlu1 %v2836_v42  ;;  %v15393_v42 = vpop.permute.xlu1 %3805 }
 0x3fc   : > { %18623 = vst [vmem:[#allocation30_spill] sm:$0xff] %v15393_v42 }
 0x3fd   : > { %2864 = vmax.xlane.f32.xlu0 %v2863_v4  ;;  %v15395_v4 = vpop.permute.xlu0 %3854 }
 0x3fe   : > { %18624 = vst [vmem:[#allocation31_spill] sm:$0xff] %v15395_v4 }
 0x3ff   : > { %2861 = vmax.xlane.f32.xlu1 %v2860_v56  ;;  %v15397_v56 = vpop.permute.xlu1 %3903 }
 0x400   : > { %18625 = vst [vmem:[#allocation32_spill] sm:$0xff] %v15397_v56 }
 0x401   : > { %v15399_v62 = vpop.permute.xlu0 %3952 }
 0x402   : > { %18626 = vst [vmem:[#allocation33_spill] sm:$0xff] %v15399_v62 }
 0x403   : > { %2867 = vmax.xlane.f32.xlu1 %v2866_v50  ;;  %v15401_v50 = vpop.permute.xlu1 %13407 }
 0x405   : > { %v15403_v58 = vpop.permute.xlu0 %4050 }
 0x406   : > { %18627 = vst [vmem:[#allocation34_spill] sm:$0xff] %v15403_v58 }
 0x407   : > { %v15405_v41 = vpop.permute.xlu1 %4001 }
 0x408   : > { %18628 = vst [vmem:[#allocation35_spill] sm:$0xff] %v15405_v41 }
 0x409   : > { %v15407_v54 = vpop.permute.xlu0 %4148 }
 0x40a   : > { %18629 = vst [vmem:[#allocation36_spill] sm:$0xff] %v15407_v54 }
 0x40b   : > { %v15409_v2 = vpop.permute.xlu1 %4099 }
 0x40c   : > { %18630 = vst [vmem:[#allocation37_spill] sm:$0xff] %v15409_v2 }
 0x40d   : > { %v15411_v43 = vpop.permute.xlu0 %4246 }
 0x40e   : > { %18631 = vst [vmem:[#allocation38_spill] sm:$0xff] %v15411_v43 }
 0x40f   : > { %v15413_v1 = vpop.permute.xlu1 %4197 }
 0x410   : > { %18632 = vst [vmem:[#allocation39_spill] sm:$0xff] %v15413_v1 }
 0x411   : > { %v15415_v45 = vpop.permute.xlu0 %4344 }
 0x412   : > { %18633 = vst [vmem:[#allocation40_spill] sm:$0xff] %v15415_v45 }
 0x413   : > { %v15417_v61 = vpop.permute.xlu1 %4295 }
 0x414   : > { %18634 = vst [vmem:[#allocation41_spill] sm:$0xff] %v15417_v61 }
 0x43e   : > { %v2787_v55 = vpop.xlane.xlu0 %2786 }
 0x43f   : > { %v2784_v19 = vpop.xlane.xlu1 %2783  ;;  %v2879_v46 = vsub.f32 %v15227_v31, %v2787_v55 }
 0x440   : > { %v2878_v21 = vsub.f32 %v15221_v16, %v2784_v19  ;;  %v2869_v19 = vsel %vm2781_vm5, %v15335_v10, -inf }
 0x441   : > { %v2912_v54 = vmul.f32 1.442695, %v2879_v46 }
 0x442   : > { %v2910_v33 = vmul.f32 1.442695, %v2878_v21  ;;  %v2790_v41 = vpop.xlane.xlu0 %2789  ;;  %v2875_v21 = vsel %vm2781_vm5, %v15343_v17, -inf }
 0x443   : > { %v2880_v31 = vsub.f32 %v15231_v63, %v2790_v41 }
 0x444   : > { %13665 = vpow2.f32 %v2910_v33 }
 0x445   : > { %13667 = vpow2.f32 %v2912_v54  ;;  %v2914_v45 = vmul.f32 1.442695, %v2880_v31 }
 0x446   : > { %v2793_v56 = vpop.xlane.xlu0 %2792 }
 0x447   : > { %v2881_v2 = vsub.f32 %v15235_v0, %v2793_v56 }
 0x449   : > { %v2916_v1 = vmul.f32 1.442695, %v2881_v2 }
 0x44a   : > { %v2799_v54 = vpop.xlane.xlu0 %2798 }
 0x44b   : > { %13669 = vpow2.f32 %v2916_v1  ;;  %v15438_v1 = vpop.permute.xlu1 %4393 }
 0x44c   : > { %18635 = vst [vmem:[#allocation42_spill] sm:$0xff] %v15438_v1 }
 0x44e   : > { %v15422_v43 = vpop.eup %13665 }
 0x44f   : > { %v2974_v61 = vsel %vm2781_vm5, %v15422_v43, 0.0  ;;  %v15428_v55 = vpop.eup %13667 }
 0x450   : > { %2975 = vadd.xlane.f32.xlu0 %v2974_v61  ;;  %v2977_v33 = vsel %vm2781_vm5, %v15428_v55, 0.0 }
 0x454   : > { %2870 = vmax.xlane.f32.xlu0 %v2869_v19  ;;  %v2805_v19 = vpop.xlane.xlu0 %2804 }
 0x455   : > { %v15434_v46 = vpop.eup %13669 }
 0x456   : > { %v2983_v61 = vsel %vm2781_vm5, %v15434_v46, 0.0 }
 0x458   : > { %2978 = vadd.xlane.f32.xlu0 %v2977_v33  ;;  %v2883_v33 = vsub.f32 %v15239_v57, %v2799_v54  ;;  %v2811_v1 = vpop.xlane.xlu0 %2810  ;;  %v2885_v57 = vsub.f32 %v15243_v26, %v2805_v19 }
 0x45a   : > { %v2920_v42 = vmul.f32 1.442695, %v2883_v33 }
 0x45c   : > { %2876 = vmax.xlane.f32.xlu0 %v2875_v21 }
 0x460   : > { %2984 = vadd.xlane.f32.xlu0 %v2983_v61 }
 0x474   : > { %v2796_v2 = vpop.xlane.xlu1 %2795 }
 0x475   : > { %v2882_v16 = vsub.f32 %v15233_v34, %v2796_v2 }
 0x477   : > { %v2918_v0 = vmul.f32 1.442695, %v2882_v16 }
 0x478   : > { %v2802_v56 = vpop.xlane.xlu1 %2801 }
 0x479   : > { %13671 = vpow2.f32 %v2918_v0  ;;  %v2884_v21 = vsub.f32 %v15237_v48, %v2802_v56 }
 0x47a   : > { %13673 = vpow2.f32 %v2914_v45  ;;  %v2924_v45 = vmul.f32 1.442695, %v2885_v57 }
 0x47b   : > { %v2922_v62 = vmul.f32 1.442695, %v2884_v21 }
 0x47c   : > { %v2808_v58 = vpop.xlane.xlu1 %2807 }
 0x47d   : > { %v2886_v61 = vsub.f32 %v15241_v20, %v2808_v58  ;;  %v2826_v58 = vpop.xlane.xlu0 %2825  ;;  %v2872_v20 = vsel %vm2781_vm5, %v15339_v25, -inf }
 0x47e   : > { %v2892_v49 = vsub.f32 %v15253_v22, %v2826_v58 }
 0x47f   : > { %v2926_v59 = vmul.f32 1.442695, %v2886_v61 }
 0x480   : > { %v2814_v34 = vpop.xlane.xlu1 %2813 }
 0x481   : > { %13675 = vpow2.f32 %v2926_v59  ;;  %v2888_v41 = vsub.f32 %v15245_v3, %v2814_v34 }
 0x482   : > { %13677 = vpow2.f32 %v2920_v42  ;;  %v2817_v42 = vpop.xlane.xlu0 %2816 }
 0x483   : > { %v15446_v63 = vpop.eup %13671  ;;  %13679 = vpow2.f32 %v2922_v62  ;;  %v2930_v54 = vmul.f32 1.442695, %v2888_v41  ;;  %v13400_v41 = vunpack.i.h.bf16 %v15389_v6 }
 0x484   : > { %v2986_v48 = vsel %vm2781_vm5, %v15446_v63, 0.0  ;;  %v15453_v59 = vpop.eup %13673 }
 0x485   : > { %2987 = vadd.xlane.f32.xlu1 %v2986_v48  ;;  %13681 = vpow2.f32 %v2930_v54  ;;  %v2980_v2 = vsel %vm2781_vm5, %v15453_v59, 0.0  ;;  %v1207_v54 = vpack.c.bf16 %v13400_v41, %v13400_v41 }
 0x486   : > { %13683 = vpow2.f32 %v2924_v45  ;;  %v2823_v19 = vpop.xlane.xlu0 %2822  ;;  %v13399_v45 = vunpack.i.l.bf16 %v15389_v6 }
 0x487   : > { %v2891_v6 = vsub.f32 %v15255_v27, %v2823_v19 }
 0x489   : > { %2873 = vmax.xlane.f32.xlu1 %v2872_v20 }
 0x48a   : > { %v2829_v61 = vpop.xlane.xlu0 %2828 }
 0x48b   : > { %v15455_v3 = vpop.eup %13675 }
 0x48c   : > { %v15457_v26 = vpop.eup %13677  ;;  %v2998_v62 = vsel %vm2781_vm5, %v15455_v3, 0.0 }
 0x48d   : > { %v15463_v16 = vpop.eup %13679  ;;  %2999 = vadd.xlane.f32.xlu0 %v2998_v62  ;;  %2981 = vadd.xlane.f32.xlu1 %v2980_v2  ;;  %v2989_v31 = vsel %vm2781_vm5, %v15457_v26, 0.0  ;;  %v1206_v62 = vpack.c.bf16 %v13399_v45, %v13399_v45  ;;  %v2820_v2 = vpop.xlane.xlu1 %2819 }
 0x48e   : > { %v2992_v0 = vsel %vm2781_vm5, %v15463_v16, 0.0  ;;  %v2832_v57 = vpop.xlane.xlu0 %2831 }
 0x48f   : > { %v15469_v56 = vpop.eup %13681 }
 0x490   : > { %18636 = vst [vmem:[#allocation43_spill] sm:$0xff] %v15469_v56  ;;  %v3004_v33 = vsel %vm2781_vm5, %v15469_v56, 0.0  ;;  %v15473_v21 = vpop.eup %13683  ;;  %v2938_v56 = vmul.f32 1.442695, %v2892_v49 }
 0x491   : > { %2990 = vadd.xlane.f32.xlu0 %v2989_v31  ;;  %2993 = vadd.xlane.f32.xlu1 %v2992_v0  ;;  %v2995_v34 = vsel %vm2781_vm5, %v15473_v21, 0.0  ;;  %v2890_v0 = vsub.f32 %v15249_v9, %v2820_v2  ;;  %v2936_v9 = vmul.f32 1.442695, %v2891_v6  ;;  %v2838_v2 = vpop.xlane.xlu1 %2837 }
 0x492   : > { %v2835_v48 = vpop.xlane.xlu0 %2834 }
 0x493   : > { %v2895_v22 = vsub.f32 %v15291_v53, %v2835_v48 }
 0x495   : > { %3005 = vadd.xlane.f32.xlu0 %v3004_v33  ;;  %v2887_v33 = vsub.f32 %v15247_v8, %v2811_v1  ;;  %v2894_v8 = vsub.f32 %v15289_v24, %v2832_v57 }
 0x496   : > { %v2841_v20 = vpop.xlane.xlu0 %2840 }
 0x497   : > { %v2928_v41 = vmul.f32 1.442695, %v2887_v33  ;;  %v2942_v49 = vmul.f32 1.442695, %v2894_v8  ;;  %v2897_v27 = vsub.f32 %v15295_v35, %v2841_v20 }
 0x499   : > { %2996 = vadd.xlane.f32.xlu0 %v2995_v34  ;;  %v2934_v34 = vmul.f32 1.442695, %v2890_v0  ;;  %v2948_v53 = vmul.f32 1.442695, %v2897_v27 }
 0x49a   : > { %v2844_v31 = vpop.xlane.xlu0 %2843 }
 0x49b   : > { %13685 = vpow2.f32 %v2934_v34 }
 0x49c   : > { %13687 = vpow2.f32 %v2928_v41 }
 0x49d   : > { %13689 = vpow2.f32 %v2938_v56 }
 0x49e   : > { %v2847_v4 = vpop.xlane.xlu0 %2846 }
 0x4a2   : > { %4491 = vrot.lane.b32.xlu1 %v1207_v54, %s18562_s27  ;;  %v2889_v54 = vsub.f32 %v15251_v30, %v2817_v42  ;;  %v2850_v45 = vpop.xlane.xlu0 %2849  ;;  %v2944_v42 = vmul.f32 1.442695, %v2895_v22 }
 0x4a3   : > { %v2900_v0 = vsub.f32 %v15305_v39, %v2850_v45 }
 0x4a4   : > { %v2932_v60 = vmul.f32 1.442695, %v2889_v54 }
 0x4a5   : > { %v15489_v30 = vpop.eup %13685  ;;  %v2954_v54 = vmul.f32 1.442695, %v2900_v0 }
 0x4a6   : > { %13691 = vpow2.f32 %v2932_v60  ;;  %v2853_v58 = vpop.xlane.xlu0 %2852  ;;  %v3010_v56 = vsel %vm2781_vm5, %v15489_v30, 0.0  ;;  %v15495_v24 = vpop.eup %13687  ;;  %v2898_v60 = vsub.f32 %v15297_v13, %v2844_v31 }
 0x4a7   : > { %13693 = vpow2.f32 %v2936_v9  ;;  %v15499_v35 = vpop.eup %13689  ;;  %v2901_v13 = vsub.f32 %v15309_v40, %v2853_v58 }
 0x4a8   : > { %v2950_v20 = vmul.f32 1.442695, %v2898_v60 }
 0x4a9   : > { %v2956_v40 = vmul.f32 1.442695, %v2901_v13 }
 0x4aa   : > { %v2856_v19 = vpop.xlane.xlu0 %2855 }
 0x4ab   : > { %v2902_v39 = vsub.f32 %v15313_v23, %v2856_v19 }
 0x4ad   : > { %v2958_v22 = vmul.f32 1.442695, %v2902_v39 }
 0x4af   : > { %4442 = vrot.lane.b32.xlu0 %v1206_v62, %s18562_s27  ;;  %v2893_v62 = vsub.f32 %v15257_v47, %v2829_v61  ;;  %v2896_v47 = vsub.f32 %v15293_v11, %v2838_v2  ;;  %v2899_v61 = vsub.f32 %v15299_v37, %v2847_v4  ;;  %v3001_v11 = vsel %vm2781_vm5, %v15495_v24, 0.0  ;;  %v2859_v37 = vpop.xlane.xlu0 %2858 }
 0x4b0   : > { %v15503_v48 = vpop.eup %13691  ;;  %v3016_v4 = vsel %vm2781_vm5, %v15499_v35, 0.0  ;;  %v2903_v6 = vsub.f32 %v15318_v18, %v2859_v37 }
 0x4b1   : > { %v2940_v1 = vmul.f32 1.442695, %v2893_v62  ;;  %v2946_v57 = vmul.f32 1.442695, %v2896_v47  ;;  %v2952_v33 = vmul.f32 1.442695, %v2899_v61  ;;  %v15507_v31 = vpop.eup %13693  ;;  %v2862_v62 = vpop.xlane.xlu1 %2861 }
 0x4b2   : > { %v3007_v34 = vsel %vm2781_vm5, %v15503_v48, 0.0  ;;  %v3013_v9 = vsel %vm2781_vm5, %v15507_v31, 0.0  ;;  %v2960_v23 = vmul.f32 1.442695, %v2903_v6  ;;  %v2904_v58 = vsub.f32 %v15323_v7, %v2862_v62 }
 0x4b3   : > { %13695 = vpow2.f32 %v2940_v1 }
 0x4b4   : > { %13697 = vpow2.f32 %v2942_v49 }
 0x4b5   : > { %13699 = vpow2.f32 %v2944_v42  ;;  %v2962_v42 = vmul.f32 1.442695, %v2904_v58 }
 0x4b6   : > { %13701 = vpow2.f32 %v2948_v53 }
 0x4b7   : > { %13703 = vpow2.f32 %v2946_v57 }
 0x4b8   : > { %13705 = vpow2.f32 %v2950_v20 }
 0x4b9   : > { %13707 = vpow2.f32 %v2952_v33 }
 0x4ba   : > { %13709 = vpow2.f32 %v2954_v54 }
 0x4bb   : > { %13711 = vpow2.f32 %v2956_v40 }
 0x4bc   : > { %13713 = vpow2.f32 %v2958_v22 }
 0x4bd   : > { %v15513_v41 = vpop.eup %13695  ;;  %13715 = vpow2.f32 %v2960_v23  ;;  %v3272_v23 = vsel %vm3172_vm4, %v15263_v14, 0  ;;  %v3321_v14 = vsel %vm3172_vm4, %v15267_v51, 0 }
 0x4be   : > { %v15517_v45 = vpop.eup %13697  ;;  %v3019_v8 = vsel %vm2781_vm5, %v15513_v41, 0.0  ;;  %13717 = vpow2.f32 %v2962_v42 }
 0x4bf   : > { %v15523_v1 = vpop.eup %13699  ;;  %v3022_v49 = vsel %vm2781_vm5, %v15517_v45, 0.0 }
 0x4c0   : > { %v15526_v18 = vpop.eup %13701  ;;  %v3025_v2 = vsel %vm2781_vm5, %v15523_v1, 0.0 }
 0x4c1   : > { %v15532_v27 = vpop.eup %13703  ;;  %v3031_v53 = vsel %vm2781_vm5, %v15526_v18, 0.0 }
 0x4c2   : > { %v15534_v47 = vpop.eup %13705  ;;  %v3028_v7 = vsel %vm2781_vm5, %v15532_v27, 0.0 }
 0x4c3   : > { %v15542_v60 = vpop.eup %13707 }
 0x4c4   : > { %v15544_v19 = vpop.eup %13709  ;;  %v3037_v57 = vsel %vm2781_vm5, %v15542_v60, 0.0 }
 0x4c5   : > { %v15550_v20 = vpop.eup %13711  ;;  %v3040_v13 = vsel %vm2781_vm5, %v15544_v19, 0.0 }
 0x4c6   : > { %3011 = vadd.xlane.f32.xlu1 %v3010_v56  ;;  %v15536_v56 = vpop.xlane.xlu0 %2864  ;;  %v15552_v0 = vpop.eup %13713  ;;  %v3043_v37 = vsel %vm2781_vm5, %v15550_v20, 0.0 }
 0x4c7   : > { %v3046_v54 = vsel %vm2781_vm5, %v15552_v0, 0.0 }
 0x4ca   : > { %3002 = vadd.xlane.f32.xlu1 %v3001_v11  ;;  %v3034_v11 = vsel %vm2781_vm5, %v15534_v47, 0.0 }
 0x4ce   : > { %3017 = vadd.xlane.f32.xlu0 %v3016_v4  ;;  %3008 = vadd.xlane.f32.xlu1 %v3007_v34  ;;  %v15558_v4 = vpop.eup %13715 }
 0x4cf   : > { %v3049_v39 = vsel %vm2781_vm5, %v15558_v4, 0.0  ;;  %v15564_v40 = vpop.eup %13717 }
 0x4d2   : > { %3014 = vadd.xlane.f32.xlu0 %v3013_v9  ;;  %3020 = vadd.xlane.f32.xlu1 %v3019_v8  ;;  %v3052_v9 = vsel %vm2781_vm5, %v15564_v40, 0.0 }
 0x4d6   : > { %3026 = vadd.xlane.f32.xlu0 %v3025_v2  ;;  %3023 = vadd.xlane.f32.xlu1 %v3022_v49  ;;  %v13405_v49 = vunpack.i.h.bf16 %v15391_v5 }
 0x4da   : > { %3029 = vadd.xlane.f32.xlu0 %v3028_v7  ;;  %3032 = vadd.xlane.f32.xlu1 %v3031_v53  ;;  %v1209_v7 = vpack.c.bf16 %v13405_v49, %v13405_v49 }
 0x4dd   : > { %v2976_v61 = vpop.xlane.xlu0 %2975 }
 0x4de   : > { %13719 = vrcp.f32 %v2976_v61  ;;  %3038 = vadd.xlane.f32.xlu0 %v3037_v57  ;;  %3035 = vadd.xlane.f32.xlu1 %v3034_v11  ;;  %v13404_v61 = vunpack.i.l.bf16 %v15391_v5  ;;  %v3419_v11 = vsel %vm3172_vm4, %v15273_v36, 0  ;;  %v2905_v5 = vsub.f32 %v15327_v28, %v15536_v56 }
 0x4e0   : > { %v1208_v51 = vpack.c.bf16 %v13404_v61, %v13404_v61 }
 0x4e1   : > { %v2871_v33 = vpop.xlane.xlu0 %2870 }
 0x4e2   : > { %3041 = vadd.xlane.f32.xlu0 %v3040_v13  ;;  %3044 = vadd.xlane.f32.xlu1 %v3043_v37  ;;  %v2868_v13 = vpop.xlane.xlu1 %2867  ;;  %v2964_v37 = vmul.f32 1.442695, %v2905_v5  ;;  %v2907_v36 = vsub.f32 %v15335_v10, %v2871_v33 }
 0x4e5   : > { %v2979_v34 = vpop.xlane.xlu0 %2978 }
 0x4e6   : > { %3047 = vadd.xlane.f32.xlu0 %v3046_v54  ;;  %3050 = vadd.xlane.f32.xlu1 %v3049_v39  ;;  %13721 = vrcp.f32 %v2979_v34  ;;  %v2968_v54 = vmul.f32 1.442695, %v2907_v36 }
 0x4e8   : > { %v13720_v6 = vpop.eup %13719 }
 0x4e9   : > { %v2877_v62 = vpop.xlane.xlu0 %2876  ;;  %v3102_v8 = vmul.f32 %v13720_v6, %v15422_v43 }
 0x4ea   : > { %3053 = vadd.xlane.f32.xlu0 %v3052_v9  ;;  %v2909_v39 = vsub.f32 %v15343_v17, %v2877_v62 }
 0x4eb   : > { %v3134_v22 = vpack.c.bf16 %v3102_v8, %v3102_v8 }
 0x4ec   : > { %v2972_v6 = vmul.f32 1.442695, %v2909_v39  ;;  %v3468_v39 = vsel %vm3172_vm4, %v15271_v44, 0  ;;  %v13409_v44 = vunpack.i.l.bf16 %v15401_v50 }
 0x4ed   : > { %12493 = vmatmul.mubr.msk.bf16.vlgmr.msra.gmra.mrb[72].mxu0 %vm2781_vm5, %v3134_v22  ;;  %v2985_v58 = vpop.xlane.xlu0 %2984 }
 0x4ee   : > { %12503 = vmatpush3.bf16.msra.mxu0 %v3272_v23  ;;  %12504 = vmatprep.mubr.msk.bf16.mxu0 %vm14222_vm2, %v18612_v52  ;;  %13723 = vrcp.f32 %v2985_v58 }
 0x4ef   : > { %12514 = vmatprep.subr.bf16.mxu0 %v18612_v52  ;;  %13725 = vpow2.f32 %v2964_v37  ;;  %v3517_v37 = vsel %vm3172_vm4, %v15279_v12, 0 }
 0x4f0   : > { %v13722_v2 = vpop.eup %13721 }
 0x4f1   : > { %v3103_v43 = vmul.f32 %v13722_v2, %v15428_v55 }
 0x4f3   : > { %v3135_v42 = vpack.c.bf16 %v3103_v43, %v3103_v43 }
 0x4f5   : > { %12499 = vmatmul.mubr.msk.bf16.vlgmr.msra.gmra.mrb[72].mxu1 %vm2781_vm5, %v3135_v42 }
 0x4f6   : > { %12509 = vmatpush3.bf16.msra.mxu1 %v3321_v14  ;;  %12510 = vmatprep.mubr.msk.bf16.mxu1 %vm14222_vm2, %v18612_v52 }
 0x4f7   : > { %4589 = vrot.lane.b32.xlu1 %v1209_v7, %s18562_s27  ;;  %12520 = vmatprep.subr.bf16.mxu1 %v18612_v52 }
 0x4f8   : > { %v13724_v53 = vpop.eup %13723 }
 0x4f9   : > { %v3105_v55 = vmul.f32 %v13724_v53, %v15434_v46  ;;  %v2906_v46 = vsub.f32 %v15331_v38, %v2868_v13  ;;  %v15598_v22 = vpop.eup %13725  ;;  %v3370_v13 = vsel %vm3172_vm4, %v15265_v32, 0 }
 0x4fa   : > { %v3055_v33 = vsel %vm2781_vm5, %v15598_v22, 0.0 }
 0x4fb   : > { %v3137_v57 = vpack.c.bf16 %v3105_v55, %v3105_v55  ;;  %v2966_v34 = vmul.f32 1.442695, %v2906_v46 }
 0x4fd   : > { %12511 = vmatmul.mubr.msk.bf16.vlgmr.msra.gmra.mrb[76].mxu1 %vm2781_vm5, %v3137_v57  ;;  %13727 = vpow2.f32 %v2966_v34 }
 0x4fe   : > { %12521 = vmatpush3.bf16.msra.mxu1 %v3419_v11  ;;  %12522 = vmatprep.mubr.msk.bf16.mxu1 %vm14222_vm2, %v18612_v52  ;;  %13729 = vpow2.f32 %v2968_v54 }
 0x4ff   : > { %12532 = vmatprep.subr.bf16.mxu1 %v18612_v52  ;;  %13731 = vpow2.f32 %v2972_v6  ;;  %v3615_v6 = vsel %vm3172_vm4, %v15381_v29, 0  ;;  %v3566_v29 = vsel %vm3172_vm4, %v15277_v15, 0  ;;  %v18638_v15 = vld [vmem:[#allocation43_spill] sm:$0xff] }
 0x500   : > { %4540 = vrot.lane.b32.xlu0 %v1208_v51, %s18562_s27 }
 0x507   : > { %v15601_v38 = vpop.eup %13727 }
 0x508   : > { %v15605_v58 = vpop.eup %13729  ;;  %v3058_v62 = vsel %vm2781_vm5, %v15601_v38, 0.0 }
 0x509   : > { %v15611_v2 = vpop.eup %13731 }
 0x50a   : > { %v3067_v43 = vsel %vm2781_vm5, %v15611_v2, 0.0 }
 0x512   : > { %v2988_v9 = vpop.xlane.xlu1 %2987 }
 0x516   : > { %v2874_v8 = vpop.xlane.xlu1 %2873 }
 0x517   : > { %v2908_v28 = vsub.f32 %v15339_v25, %v2874_v8  ;;  %v3061_v25 = vsel %vm2781_vm5, %v15605_v58, 0.0 }
 0x519   : > { %v2970_v56 = vmul.f32 1.442695, %v2908_v28  ;;  %v1210_v28 = vpack.c.bf16 %v13409_v44, %v13409_v44 }
 0x51a   : > { %v3000_v23 = vpop.xlane.xlu0 %2999  ;;  %v2982_v10 = vpop.xlane.xlu1 %2981 }
 0x51b   : > { %13733 = vpow2.f32 %v2970_v56  ;;  %3056 = vadd.xlane.f32.xlu1 %v3055_v33 }
 0x51c   : > { %13735 = vrcp.f32 %v2982_v10 }
 0x51e   : > { %v2991_v17 = vpop.xlane.xlu0 %2990  ;;  %v2994_v7 = vpop.xlane.xlu1 %2993 }
 0x51f   : > { %13737 = vrcp.f32 %v2991_v17  ;;  %3059 = vadd.xlane.f32.xlu0 %v3058_v62  ;;  %3062 = vadd.xlane.f32.xlu1 %v3061_v25  ;;  %v18639_v62 = vld [vmem:[#allocation29_spill] sm:$0xff] }
 0x520   : > { %13739 = vrcp.f32 %v2988_v9  ;;  %v3762_v25 = vsel %vm3172_vm4, %v18639_v62, 0 }
 0x522   : > { %v3006_v49 = vpop.xlane.xlu0 %3005 }
 0x523   : > { %3068 = vadd.xlane.f32.xlu1 %v3067_v43 }
 0x525   : > { %v15615_v42 = vpop.eup %13733 }
 0x526   : > { %v2997_v14 = vpop.xlane.xlu0 %2996  ;;  %v3064_v53 = vsel %vm2781_vm5, %v15615_v42, 0.0  ;;  %v13736_v61 = vpop.eup %13735 }
 0x527   : > { %13741 = vrcp.f32 %v2997_v14  ;;  %3065 = vadd.xlane.f32.xlu0 %v3064_v53  ;;  %v3104_v55 = vmul.f32 %v13736_v61, %v15453_v59  ;;  %v13410_v59 = vunpack.i.h.bf16 %v15401_v50 }
 0x528   : > { %13743 = vrcp.f32 %v2994_v7 }
 0x529   : > { %v13738_v57 = vpop.eup %13737  ;;  %v3136_v11 = vpack.c.bf16 %v3104_v55, %v3104_v55  ;;  %13745 = vrcp.f32 %v3000_v23  ;;  %v1211_v36 = vpack.c.bf16 %v13410_v59, %v13410_v59  ;;  %v18637_v23 = vld [vmem:[#allocation27_spill] sm:$0xff] }
 0x52a   : > { %v3107_v51 = vmul.f32 %v13738_v57, %v15457_v26  ;;  %v13740_v5 = vpop.eup %13739  ;;  %13747 = vrcp.f32 %v3006_v49  ;;  %v3664_v10 = vsel %vm3172_vm4, %v18637_v23, 0  ;;  %v15674_v43 = vpop.permute.xlu0 %4442 }
 0x52b   : > { %12505 = vmatmul.mubr.msk.bf16.vlgmr.msra.gmra.mrb[76].mxu0 %vm2781_vm5, %v3136_v11  ;;  %v3106_v26 = vmul.f32 %v13740_v5, %v15446_v63 }
 0x52c   : > { %v3139_v46 = vpack.c.bf16 %v3107_v51, %v3107_v51  ;;  %12515 = vmatpush3.bf16.msra.mxu0 %v3370_v13  ;;  %12516 = vmatprep.mubr.msk.bf16.mxu0 %vm14222_vm2, %v18612_v52  ;;  %v18640_v13 = vld [vmem:[#allocation31_spill] sm:$0xff] }
 0x52d   : > { %12526 = vmatprep.subr.bf16.mxu0 %v18612_v52  ;;  %v3138_v34 = vpack.c.bf16 %v3106_v26, %v3106_v26 }
 0x52e   : > { %12523 = vmatmul.mubr.msk.bf16.vlgmr.msra.gmra.mrb[80].mxu1 %vm2781_vm5, %v3139_v46  ;;  %v3860_v46 = vsel %vm3172_vm4, %v18640_v13, 0 }
 0x52f   : > { %12533 = vmatpush3.bf16.msra.mxu1 %v3517_v37  ;;  %12534 = vmatprep.mubr.msk.bf16.mxu1 %vm14222_vm2, %v18612_v52 }
 0x530   : > { %12544 = vmatprep.subr.bf16.mxu1 %v18612_v52 }
 0x531   : > { %v13742_v32 = vpop.eup %13741 }
 0x532   : > { %v3109_v12 = vmul.f32 %v13742_v32, %v15473_v21  ;;  %v13744_v54 = vpop.eup %13743 }
 0x533   : > { %12517 = vmatmul.mubr.msk.bf16.vlgmr.msra.gmra.mrb[80].mxu0 %vm2781_vm5, %v3138_v34  ;;  %v3108_v21 = vmul.f32 %v13744_v54, %v15463_v16  ;;  %v13746_v8 = vpop.eup %13745  ;;  %v18641_v34 = vld [vmem:[#allocation28_spill] sm:$0xff] }
 0x534   : > { %4687 = vrot.lane.b32.xlu1 %v1211_v36, %s18562_s27  ;;  %v3141_v63 = vpack.c.bf16 %v3109_v12, %v3109_v12  ;;  %12527 = vmatpush3.bf16.msra.mxu0 %v3468_v39  ;;  %v3110_v50 = vmul.f32 %v13746_v8, %v15455_v3  ;;  %v13748_v56 = vpop.eup %13747  ;;  %v15672_v3 = vpop.permute.xlu1 %4491  ;;  %v3713_v12 = vsel %vm3172_vm4, %v18641_v34, 0 }
 0x535   : > { %12528 = vmatprep.mubr.msk.bf16.mxu0 %vm14222_vm2, %v18612_v52  ;;  %12538 = vmatprep.subr.bf16.mxu0 %v18612_v52  ;;  %v3140_v9 = vpack.c.bf16 %v3108_v21, %v3108_v21  ;;  %v3112_v33 = vmul.f32 %v13748_v56, %v18638_v15  ;;  %v18642_v21 = vld [vmem:[#allocation33_spill] sm:$0xff]  ;;  %v18644_v15 = vld [vmem:[#allocation34_spill] sm:$0xff] }
 0x536   : > { %12535 = vmatmul.mubr.msk.bf16.vlgmr.msra.gmra.mrb[84].mxu1 %vm2781_vm5, %v3141_v63  ;;  %v3142_v16 = vpack.c.bf16 %v3110_v50, %v3110_v50  ;;  %v3958_v44 = vsel %vm3172_vm4, %v18642_v21, 0 }
 0x537   : > { %12545 = vmatpush3.bf16.msra.mxu1 %v3615_v6  ;;  %12546 = vmatprep.mubr.msk.bf16.mxu1 %vm14222_vm2, %v18612_v52  ;;  %v3144_v17 = vpack.c.bf16 %v3112_v33, %v3112_v33  ;;  %v4056_v33 = vsel %vm3172_vm4, %v18644_v15, 0 }
 0x538   : > { %12556 = vmatprep.subr.bf16.mxu1 %v18612_v52 }
 0x53b   : > { %12529 = vmatmul.mubr.msk.bf16.vlgmr.msra.gmra.mrb[84].mxu0 %vm2781_vm5, %v3140_v9 }
 0x53c   : > { %12539 = vmatpush3.bf16.msra.mxu0 %v3566_v29  ;;  %12540 = vmatprep.mubr.msk.bf16.mxu0 %vm14222_vm2, %v18612_v52  ;;  %v18643_v29 = vld [vmem:[#allocation30_spill] sm:$0xff] }
 0x53d   : > { %4638 = vrot.lane.b32.xlu0 %v1210_v28, %s18562_s27  ;;  %12550 = vmatprep.subr.bf16.mxu0 %v18612_v52  ;;  %v3811_v50 = vsel %vm3172_vm4, %v18643_v29, 0 }
 0x543   : > { %12541 = vmatmul.mubr.msk.bf16.vlgmr.msra.gmra.mrb[88].mxu0 %vm2781_vm5, %v3142_v16 }
 0x544   : > { %12551 = vmatpush3.bf16.msra.mxu0 %v3664_v10  ;;  %12552 = vmatprep.mubr.msk.bf16.mxu0 %vm14222_vm2, %v18612_v52 }
 0x545   : > { %12562 = vmatprep.subr.bf16.mxu0 %v18612_v52 }
 0x54b   : > { %12553 = vmatmul.mubr.msk.bf16.vlgmr.msra.gmra.mrb[92].mxu0 %vm2781_vm5, %v3144_v17 }
 0x54c   : > { %12563 = vmatpush3.bf16.msra.mxu0 %v3762_v25  ;;  %12564 = vmatprep.mubr.msk.bf16.mxu0 %vm14222_vm2, %v18612_v52 }
 0x54d   : > { %12574 = vmatprep.subr.bf16.mxu0 %v18612_v52 }
 0x553   : > { %v3012_v49 = vpop.xlane.xlu1 %3011 }
 0x554   : > { %13749 = vrcp.f32 %v3012_v49 }
 0x557   : > { %v3003_v7 = vpop.xlane.xlu1 %3002 }
 0x558   : > { %13751 = vrcp.f32 %v3003_v7 }
 0x55b   : > { %v3018_v14 = vpop.xlane.xlu0 %3017  ;;  %v3009_v53 = vpop.xlane.xlu1 %3008 }
 0x55c   : > { %13753 = vrcp.f32 %v3018_v14 }
 0x55d   : > { %13755 = vrcp.f32 %v3009_v53 }
 0x55e   : > { %v13750_v61 = vpop.eup %13749 }
 0x55f   : > { %v3015_v55 = vpop.xlane.xlu0 %3014  ;;  %v3021_v57 = vpop.xlane.xlu1 %3020  ;;  %v3114_v11 = vmul.f32 %v13750_v61, %v15489_v30  ;;  %v18646_v61 = vld [vmem:[#allocation36_spill] sm:$0xff] }
 0x560   : > { %13757 = vrcp.f32 %v3015_v55  ;;  %v4154_v55 = vsel %vm3172_vm4, %v18646_v61, 0 }
 0x561   : > { %v3146_v51 = vpack.c.bf16 %v3114_v11, %v3114_v11 }
 0x562   : > { %v13752_v5 = vpop.eup %13751 }
 0x563   : > { %v3027_v37 = vpop.xlane.xlu0 %3026  ;;  %12565 = vmatmul.mubr.msk.bf16.vlgmr.msra.gmra.mrb[96].mxu0 %vm2781_vm5, %v3146_v51  ;;  %v3024_v59 = vpop.xlane.xlu1 %3023  ;;  %v3111_v26 = vmul.f32 %v13752_v5, %v15495_v24 }
 0x564   : > { %12575 = vmatpush3.bf16.msra.mxu0 %v3860_v46  ;;  %12576 = vmatprep.mubr.msk.bf16.mxu0 %vm14222_vm2, %v18612_v52  ;;  %13759 = vrcp.f32 %v3024_v59  ;;  %v18648_v59 = vld [vmem:[#allocation38_spill] sm:$0xff] }
 0x565   : > { %v3143_v32 = vpack.c.bf16 %v3111_v26, %v3111_v26  ;;  %12586 = vmatprep.subr.bf16.mxu0 %v18612_v52  ;;  %v4252_v26 = vsel %vm3172_vm4, %v18648_v59, 0 }
 0x566   : > { %v13754_v30 = vpop.eup %13753 }
 0x567   : > { %v13756_v36 = vpop.eup %13755  ;;  %v3030_v54 = vpop.xlane.xlu0 %3029  ;;  %12547 = vmatmul.mubr.msk.bf16.vlgmr.msra.gmra.mrb[88].mxu1 %vm2781_vm5, %v3143_v32  ;;  %v3116_v39 = vmul.f32 %v13754_v30, %v15499_v35 }
 0x568   : > { %12557 = vmatpush3.bf16.msra.mxu1 %v3713_v12  ;;  %v3033_v24 = vpop.xlane.xlu1 %3032  ;;  %12558 = vmatprep.mubr.msk.bf16.mxu1 %vm14222_vm2, %v18612_v52  ;;  %13761 = vrcp.f32 %v3030_v54  ;;  %v3113_v6 = vmul.f32 %v13756_v36, %v15503_v48 }
 0x569   : > { %v3148_v63 = vpack.c.bf16 %v3116_v39, %v3116_v39  ;;  %12568 = vmatprep.subr.bf16.mxu1 %v18612_v52  ;;  %13763 = vrcp.f32 %v3021_v57 }
 0x56a   : > { %v3145_v35 = vpack.c.bf16 %v3113_v6, %v3113_v6  ;;  %v13758_v9 = vpop.eup %13757 }
 0x56b   : > { %12577 = vmatmul.mubr.msk.bf16.vlgmr.msra.gmra.mrb[100].mxu0 %vm2781_vm5, %v3148_v63  ;;  %v3039_v48 = vpop.xlane.xlu0 %3038  ;;  %v3115_v56 = vmul.f32 %v13758_v9, %v15507_v31  ;;  %v18645_v31 = vld [vmem:[#allocation32_spill] sm:$0xff] }
 0x56c   : > { %12587 = vmatpush3.bf16.msra.mxu0 %v3958_v44  ;;  %12588 = vmatprep.mubr.msk.bf16.mxu0 %vm14222_vm2, %v18612_v52  ;;  %v3036_v8 = vpop.xlane.xlu1 %3035  ;;  %v3909_v49 = vsel %vm3172_vm4, %v18645_v31, 0  ;;  %v18650_v63 = vld [vmem:[#allocation40_spill] sm:$0xff]  ;;  %v4497_v31 = vsel %vm3172_vm4, %v15672_v3, 0 }
 0x56d   : > { %12598 = vmatprep.subr.bf16.mxu0 %v18612_v52  ;;  %13765 = vrcp.f32 %v3036_v8  ;;  %v3147_v17 = vpack.c.bf16 %v3115_v56, %v3115_v56  ;;  %v18652_v56 = vld [vmem:[#allocation41_spill] sm:$0xff] }
 0x56e   : > { %v13760_v28 = vpop.eup %13759  ;;  %13767 = vrcp.f32 %v3027_v37 }
 0x56f   : > { %12559 = vmatmul.mubr.msk.bf16.vlgmr.msra.gmra.mrb[92].mxu1 %vm2781_vm5, %v3145_v35  ;;  %v3118_v16 = vmul.f32 %v13760_v28, %v15517_v45  ;;  %v3042_v62 = vpop.xlane.xlu0 %3041  ;;  %v18651_v35 = vld [vmem:[#allocation39_spill] sm:$0xff] }
 0x570   : > { %12569 = vmatpush3.bf16.msra.mxu1 %v3811_v50  ;;  %12570 = vmatprep.mubr.msk.bf16.mxu1 %vm14222_vm2, %v18612_v52  ;;  %13769 = vrcp.f32 %v3042_v62  ;;  %v3045_v12 = vpop.xlane.xlu1 %3044  ;;  %v4448_v50 = vsel %vm3172_vm4, %v15674_v43, 0 }
 0x571   : > { %12580 = vmatprep.subr.bf16.mxu1 %v18612_v52  ;;  %v3150_v23 = vpack.c.bf16 %v3118_v16, %v3118_v16  ;;  %13771 = vrcp.f32 %v3033_v24 }
 0x572   : > { %v13762_v10 = vpop.eup %13761 }
 0x573   : > { %12589 = vmatmul.mubr.msk.bf16.vlgmr.msra.gmra.mrb[104].mxu0 %vm2781_vm5, %v3150_v23  ;;  %v13764_v45 = vpop.eup %13763  ;;  %v3120_v25 = vmul.f32 %v13762_v10, %v15532_v27  ;;  %v3048_v11 = vpop.xlane.xlu0 %3047 }
 0x574   : > { %12599 = vmatpush3.bf16.msra.mxu0 %v4056_v33  ;;  %12600 = vmatprep.mubr.msk.bf16.mxu0 %vm14222_vm2, %v18612_v52  ;;  %v3117_v7 = vmul.f32 %v13764_v45, %v15513_v41  ;;  %v18647_v41 = vld [vmem:[#allocation35_spill] sm:$0xff]  ;;  %13773 = vrcp.f32 %v3048_v11  ;;  %v3051_v9 = vpop.xlane.xlu1 %3050 }
 0x575   : > { %12610 = vmatprep.subr.bf16.mxu0 %v18612_v52  ;;  %v3152_v14 = vpack.c.bf16 %v3120_v25, %v3120_v25  ;;  %v4007_v5 = vsel %vm3172_vm4, %v18647_v41, 0  ;;  %13775 = vrcp.f32 %v3039_v48 }
 0x576   : > { %v3149_v27 = vpack.c.bf16 %v3117_v7, %v3117_v7 }
 0x577   : > { %12571 = vmatmul.mubr.msk.bf16.vlgmr.msra.gmra.mrb[96].mxu1 %vm2781_vm5, %v3147_v17  ;;  %v13766_v53 = vpop.eup %13765  ;;  %v3054_v30 = vpop.xlane.xlu0 %3053  ;;  %v18653_v17 = vld [vmem:[#allocation42_spill] sm:$0xff] }
 0x578   : > { %12581 = vmatpush3.bf16.msra.mxu1 %v3909_v49  ;;  %12582 = vmatprep.mubr.msk.bf16.mxu1 %vm14222_vm2, %v18612_v52  ;;  %v13768_v57 = vpop.eup %13767  ;;  %v3122_v51 = vmul.f32 %v13766_v53, %v15534_v47  ;;  %13777 = vrcp.f32 %v3054_v30  ;;  %v4399_v45 = vsel %vm3172_vm4, %v18653_v17, 0  ;;  %v4590_v62 = vpop.permute.xlu1 %4589 }
 0x579   : > { %12592 = vmatprep.subr.bf16.mxu1 %v18612_v52  ;;  %v3119_v13 = vmul.f32 %v13768_v57, %v15523_v1  ;;  %v18649_v1 = vld [vmem:[#allocation37_spill] sm:$0xff]  ;;  %13779 = vrcp.f32 %v3045_v12  ;;  %v4595_v11 = vsel %vm3172_vm4, %v4590_v62, 0 }
 0x57a   : > { %v3154_v46 = vpack.c.bf16 %v3122_v51, %v3122_v51  ;;  %v13770_v37 = vpop.eup %13769  ;;  %v4105_v34 = vsel %vm3172_vm4, %v18649_v1, 0  ;;  %13781 = vrcp.f32 %v3051_v9 }
 0x57b   : > { %12601 = vmatmul.mubr.msk.bf16.vlgmr.msra.gmra.mrb[108].mxu0 %vm2781_vm5, %v3152_v14  ;;  %v3151_v47 = vpack.c.bf16 %v3119_v13, %v3119_v13  ;;  %v13772_v32 = vpop.eup %13771  ;;  %v3124_v36 = vmul.f32 %v13770_v37, %v15544_v19  ;;  %v4350_v19 = vsel %vm3172_vm4, %v18650_v63, 0  ;;  %v4541_v43 = vpop.permute.xlu0 %4540 }
 0x57c   : > { %12611 = vmatpush3.bf16.msra.mxu0 %v4154_v55  ;;  %12612 = vmatprep.mubr.msk.bf16.mxu0 %vm14222_vm2, %v18612_v52  ;;  %v3121_v54 = vmul.f32 %v13772_v32, %v15526_v18  ;;  %v4203_v18 = vsel %vm3172_vm4, %v18651_v35, 0  ;;  %v4546_v15 = vsel %vm3172_vm4, %v4541_v43, 0 }
 0x57d   : > { %12622 = vmatprep.subr.bf16.mxu0 %v18612_v52  ;;  %v3156_v39 = vpack.c.bf16 %v3124_v36, %v3124_v36 }
 0x57e   : > { %v13774_v24 = vpop.eup %13773  ;;  %v3153_v6 = vpack.c.bf16 %v3121_v54, %v3121_v54 }
 0x57f   : > { %12583 = vmatmul.mubr.msk.bf16.vlgmr.msra.gmra.mrb[100].mxu1 %vm2781_vm5, %v3149_v27  ;;  %v13776_v21 = vpop.eup %13775  ;;  %v3126_v44 = vmul.f32 %v13774_v24, %v15552_v0 }
 0x580   : > { %12593 = vmatpush3.bf16.msra.mxu1 %v4007_v5  ;;  %12594 = vmatprep.mubr.msk.bf16.mxu1 %vm14222_vm2, %v18612_v52  ;;  %v3123_v8 = vmul.f32 %v13776_v21, %v15542_v60  ;;  %v4301_v60 = vsel %vm3172_vm4, %v18652_v56, 0 }
 0x581   : > { %12604 = vmatprep.subr.bf16.mxu1 %v18612_v52  ;;  %v3158_v28 = vpack.c.bf16 %v3126_v44, %v3126_v44 }
 0x582   : > { %v13778_v29 = vpop.eup %13777  ;;  %v3155_v0 = vpack.c.bf16 %v3123_v8, %v3123_v8 }
 0x583   : > { %12613 = vmatmul.mubr.msk.bf16.vlgmr.msra.gmra.mrb[112].mxu0 %vm2781_vm5, %v3154_v46  ;;  %v13780_v48 = vpop.eup %13779  ;;  %v3128_v16 = vmul.f32 %v13778_v29, %v15564_v40 }
 0x584   : > { %12623 = vmatpush3.bf16.msra.mxu0 %v4252_v26  ;;  %12624 = vmatprep.mubr.msk.bf16.mxu0 %vm14222_vm2, %v18612_v52  ;;  %v3125_v23 = vmul.f32 %v13780_v48, %v15550_v20  ;;  %v13782_v33 = vpop.eup %13781 }
 0x585   : > { %12634 = vmatprep.subr.bf16.mxu0 %v18612_v52  ;;  %v3160_v10 = vpack.c.bf16 %v3128_v16, %v3128_v16  ;;  %v3127_v20 = vmul.f32 %v13782_v33, %v15558_v4 }
 0x586   : > { %v3157_v40 = vpack.c.bf16 %v3125_v23, %v3125_v23 }
 0x587   : > { %12595 = vmatmul.mubr.msk.bf16.vlgmr.msra.gmra.mrb[104].mxu1 %vm2781_vm5, %v3151_v47  ;;  %v3159_v25 = vpack.c.bf16 %v3127_v20, %v3127_v20 }
 0x588   : > { %12605 = vmatpush3.bf16.msra.mxu1 %v4105_v34  ;;  %12606 = vmatprep.mubr.msk.bf16.mxu1 %vm14222_vm2, %v18612_v52 }
 0x589   : > { %12616 = vmatprep.subr.bf16.mxu1 %v18612_v52 }
 0x58b   : > { %12625 = vmatmul.mubr.msk.bf16.vlgmr.msra.gmra.mrb[116].mxu0 %vm2781_vm5, %v3156_v39 }
 0x58c   : > { %12635 = vmatpush3.bf16.msra.mxu0 %v4350_v19  ;;  %12636 = vmatprep.mubr.msk.bf16.mxu0 %vm14222_vm2, %v18612_v52 }
 0x58d   : > { %12646 = vmatprep.subr.bf16.mxu0 %v18612_v52 }
 0x58f   : > { %12607 = vmatmul.mubr.msk.bf16.vlgmr.msra.gmra.mrb[108].mxu1 %vm2781_vm5, %v3153_v6 }
 0x590   : > { %12617 = vmatpush3.bf16.msra.mxu1 %v4203_v18  ;;  %12618 = vmatprep.mubr.msk.bf16.mxu1 %vm14222_vm2, %v18612_v52 }
 0x591   : > { %12628 = vmatprep.subr.bf16.mxu1 %v18612_v52 }
 0x593   : > { %12637 = vmatmul.mubr.msk.bf16.vlgmr.msra.gmra.mrb[120].mxu0 %vm2781_vm5, %v3158_v28 }
 0x594   : > { %12647 = vmatpush3.bf16.msra.mxu0 %v4448_v50  ;;  %12648 = vmatprep.mubr.msk.bf16.mxu0 %vm14222_vm2, %v18612_v52 }
 0x595   : > { %12658 = vmatprep.subr.bf16.mxu0 %v18612_v52 }
 0x597   : > { %12619 = vmatmul.mubr.msk.bf16.vlgmr.msra.gmra.mrb[112].mxu1 %vm2781_vm5, %v3155_v0 }
 0x598   : > { %12629 = vmatpush3.bf16.msra.mxu1 %v4301_v60  ;;  %12630 = vmatprep.mubr.msk.bf16.mxu1 %vm14222_vm2, %v18612_v52 }
 0x599   : > { %12640 = vmatprep.subr.bf16.mxu1 %v18612_v52 }
 0x59b   : > { %12649 = vmatmul.mubr.msk.bf16.vlgmr.msra.gmra.mrb[124].mxu0 %vm2781_vm5, %v3160_v10 }
 0x59c   : > { %12659 = vmatpush3.bf16.msra.mxu0 %v4546_v15  ;;  %12660 = vmatprep.mubr.msk.bf16.mxu0 %vm14222_vm2, %v18612_v52 }
 0x59d   : > { %12670 = vmatprep.subr.bf16.mxu0 %v18612_v52 }
 0x59f   : > { %12631 = vmatmul.mubr.msk.bf16.vlgmr.msra.gmra.mrb[116].mxu1 %vm2781_vm5, %v3157_v40 }
 0x5a0   : > { %12641 = vmatpush3.bf16.msra.mxu1 %v4399_v45  ;;  %12642 = vmatprep.mubr.msk.bf16.mxu1 %vm14222_vm2, %v18612_v52 }
 0x5a1   : > { %12652 = vmatprep.subr.bf16.mxu1 %v18612_v52 }
 0x5a7   : > { %12643 = vmatmul.mubr.msk.bf16.vlgmr.msra.gmra.mrb[120].mxu1 %vm2781_vm5, %v3159_v25 }
 0x5a8   : > { %12653 = vmatpush3.bf16.msra.mxu1 %v4497_v31  ;;  %v3057_v49 = vpop.xlane.xlu1 %3056  ;;  %12654 = vmatprep.mubr.msk.bf16.mxu1 %vm14222_vm2, %v18612_v52 }
 0x5a9   : > { %13783 = vrcp.f32 %v3057_v49  ;;  %12664 = vmatprep.subr.bf16.mxu1 %v18612_v52 }
 0x5ac   : > { %v3060_v7 = vpop.xlane.xlu0 %3059  ;;  %v3063_v14 = vpop.xlane.xlu1 %3062 }
 0x5ad   : > { %13785 = vrcp.f32 %v3060_v7 }
 0x5ae   : > { %13787 = vrcp.f32 %v3063_v14 }
 0x5b0   : > { %v3069_v4 = vpop.xlane.xlu1 %3068 }
 0x5b1   : > { %13789 = vrcp.f32 %v3069_v4 }
 0x5b3   : > { %v13784_v53 = vpop.eup %13783 }
 0x5b4   : > { %v3066_v61 = vpop.xlane.xlu0 %3065  ;;  %v3129_v3 = vmul.f32 %v13784_v53, %v15598_v22  ;;  %v4688_v46 = vpop.permute.xlu1 %4687 }
 0x5b5   : > { %13791 = vrcp.f32 %v3066_v61  ;;  %v4693_v26 = vsel %vm3172_vm4, %v4688_v46, 0 }
 0x5b6   : > { %v3161_v55 = vpack.c.bf16 %v3129_v3, %v3129_v3 }
 0x5b7   : > { %v13786_v27 = vpop.eup %13785 }
 0x5b8   : > { %v13788_v57 = vpop.eup %13787  ;;  %12655 = vmatmul.mubr.msk.bf16.vlgmr.msra.gmra.mrb[124].mxu1 %vm2781_vm5, %v3161_v55  ;;  %v3130_v51 = vmul.f32 %v13786_v27, %v15601_v38  ;;  %v4639_v41 = vpop.permute.xlu0 %4638 }
 0x5b9   : > { %12665 = vmatpush3.bf16.msra.mxu1 %v4595_v11  ;;  %12666 = vmatprep.mubr.msk.bf16.mxu1 %vm14222_vm2, %v18612_v52  ;;  %v3131_v22 = vmul.f32 %v13788_v57, %v15605_v58  ;;  %v4644_v13 = vsel %vm3172_vm4, %v4639_v41, 0 }
 0x5ba   : > { %v3162_v5 = vpack.c.bf16 %v3130_v51, %v3130_v51  ;;  %12676 = vmatprep.subr.bf16.mxu1 %v18612_v52 }
 0x5bb   : > { %v13790_v38 = vpop.eup %13789  ;;  %v3163_v37 = vpack.c.bf16 %v3131_v22, %v3131_v22 }
 0x5bc   : > { %12661 = vmatmul.mubr.msk.bf16.vlgmr.msra.gmra.mrb[128].mxu0 %vm2781_vm5, %v3162_v5  ;;  %v3133_v1 = vmul.f32 %v13790_v38, %v15611_v2 }
 0x5bd   : > { %12671 = vmatpush3.bf16.msra.mxu0 %v4644_v13  ;;  %12672 = vmatprep.mubr.msk.bf16.mxu0 %vm14222_vm2, %v18612_v52 }
 0x5be   : > { %v3165_v12 = vpack.c.bf16 %v3133_v1, %v3133_v1 }
 0x5bf   : > { %v13792_v59 = vpop.eup %13791 }
 0x5c0   : > { %v15807_v47 = vpop.f32.mrb[72].mxu0  ;;  %12667 = vmatmul.mubr.msk.bf16.vlgmr.msra.gmra.mrb[128].mxu1 %vm2781_vm5, %v3163_v37  ;;  %v3132_v58 = vmul.f32 %v13792_v59, %v15615_v42 }
 0x5c1   : > { %12677 = vmatpush3.bf16.msra.mxu1 %v4693_v26  ;;  %v12494_v32 = vpop.f32.mrb[73].mxu0  ;;  %12678 = vmatprep.mubr.msk.bf16.mxu1 %vm14222_vm2, %v18612_v52 }
 0x5c2   : > { %v3213_v30 = vpop.f32.mrb[74].mxu0  ;;  %v3164_v36 = vpack.c.bf16 %v3132_v58, %v3132_v58 }
 0x5c3   : > { %v12495_v34 = vpop.f32.mrb[75].mxu0 }
 0x5c4   : > { %12673 = vmatmul.mubr.msk.bf16.vlgmr.msra.gmra.mrb[132].mxu0 %vm2781_vm5, %v3164_v36 }
 0x5c8   : > { %12679 = vmatmul.mubr.msk.bf16.vlgmr.msra.gmra.mrb[132].mxu1 %vm2781_vm5, %v3165_v12  ;;  %v15816_v54 = vpop.f32.mrb[72].mxu1 }
 0x5c9   : > { %v12500_v39 = vpop.f32.mrb[73].mxu1 }
 0x5ca   : > { %v3262_v24 = vpop.f32.mrb[74].mxu1 }
 0x5cb   : > { %v12501_v42 = vpop.f32.mrb[75].mxu1 }
 0x5d0   : > { %v15818_v63 = vpop.f32.mrb[76].mxu1 }
 0x5d1   : > { %v12512_v19 = vpop.f32.mrb[77].mxu1 }
 0x5d2   : > { %v3360_v6 = vpop.f32.mrb[78].mxu1  ;;  %v13613_v19 = vld [vmem:[%s18526_s3] sm:$0xff]  }
 0x5d3   : > { %v12513_v21 = vpop.f32.mrb[79].mxu1  ;;  %12682 = vmatprep.subr.bf16.mxu0 %v13613_v19 }
 0x5d4   : > { %12683 = vmatpush3.bf16.msra.mxu0 %v13613_v19 }
 0x5fe   : > { %v15820_v44 = vpop.f32.mrb[76].mxu0 }
 0x5ff   : > { %v12506_v35 = vpop.f32.mrb[77].mxu0 }
 0x600   : > { %v3311_v2 = vpop.f32.mrb[78].mxu0 }
 0x601   : > { %v15822_v18 = vpop.f32.mrb[80].mxu1  ;;  %v12507_v9 = vpop.f32.mrb[79].mxu0 }
 0x602   : > { %v12524_v8 = vpop.f32.mrb[81].mxu1 }
 0x603   : > { %v3458_v28 = vpop.f32.mrb[82].mxu1 }
 0x604   : > { %v12525_v29 = vpop.f32.mrb[83].mxu1 }
 0x606   : > { %v15824_v50 = vpop.f32.mrb[80].mxu0 }
 0x607   : > { %v12518_v0 = vpop.f32.mrb[81].mxu0 }
 0x608   : > { %v3409_v48 = vpop.f32.mrb[82].mxu0 }
 0x609   : > { %v15826_v16 = vpop.f32.mrb[84].mxu1  ;;  %v12519_v56 = vpop.f32.mrb[83].mxu0 }
 0x60a   : > { %v12536_v60 = vpop.f32.mrb[85].mxu1  ;;  %v13614_v56 = vld [vmem:[%s18526_s3 + $0x8] sm:$0xff]  }
 0x60b   : > { %v3556_v43 = vpop.f32.mrb[86].mxu1  ;;  %12684 = vmatprep.subr.bf16.mxu0 %v13614_v56 }
 0x60c   : > { %v12537_v23 = vpop.f32.mrb[87].mxu1  ;;  %12685 = vmatpush3.bf16.msra.mxu0 %v13614_v56 }
 0x60e   : > { %v15828_v10 = vpop.f32.mrb[84].mxu0 }
 0x60f   : > { %v12530_v15 = vpop.f32.mrb[85].mxu0 }
 0x610   : > { %v3507_v40 = vpop.f32.mrb[86].mxu0 }
 0x611   : > { %v12531_v33 = vpop.f32.mrb[87].mxu0 }
 0x616   : > { %v15830_v17 = vpop.f32.mrb[88].mxu0 }
 0x617   : > { %v12542_v45 = vpop.f32.mrb[89].mxu0 }
 0x618   : > { %v3605_v20 = vpop.f32.mrb[90].mxu0 }
 0x619   : > { %v12543_v62 = vpop.f32.mrb[91].mxu0 }
 0x61e   : > { %v15832_v25 = vpop.f32.mrb[92].mxu0 }
 0x61f   : > { %v12554_v31 = vpop.f32.mrb[93].mxu0 }
 0x620   : > { %v3703_v49 = vpop.f32.mrb[94].mxu0 }
 0x621   : > { %v12555_v7 = vpop.f32.mrb[95].mxu0 }
 0x636   : > { %v15834_v14 = vpop.f32.mrb[96].mxu0 }
 0x637   : > { %v12566_v4 = vpop.f32.mrb[97].mxu0 }
 0x638   : > { %v3801_v53 = vpop.f32.mrb[98].mxu0 }
 0x639   : > { %v12567_v61 = vpop.f32.mrb[99].mxu0 }
 0x63a   : > { %v15836_v3 = vpop.f32.mrb[88].mxu1 }
 0x63b   : > { %v12548_v55 = vpop.f32.mrb[89].mxu1 }
 0x63c   : > { %v3654_v27 = vpop.f32.mrb[90].mxu1 }
 0x63d   : > { %v12549_v57 = vpop.f32.mrb[91].mxu1 }
 0x63e   : > { %v15838_v11 = vpop.f32.mrb[100].mxu0 }
 0x63f   : > { %v12578_v51 = vpop.f32.mrb[101].mxu0 }
 0x640   : > { %v3899_v41 = vpop.f32.mrb[102].mxu0 }
 0x641   : > { %v12579_v5 = vpop.f32.mrb[103].mxu0 }
 0x642   : > { %v15840_v22 = vpop.f32.mrb[92].mxu1 }
 0x643   : > { %v12560_v13 = vpop.f32.mrb[93].mxu1 }
 0x644   : > { %v3752_v46 = vpop.f32.mrb[94].mxu1 }
 0x645   : > { %v12561_v38 = vpop.f32.mrb[95].mxu1 }
 0x646   : > { %v3994_v37 = vpop.f32.mrb[104].mxu0 }
 0x647   : > { %v12590_v59 = vpop.f32.mrb[105].mxu0 }
 0x648   : > { %v3997_v26 = vpop.f32.mrb[106].mxu0 }
 0x649   : > { %v12591_v58 = vpop.f32.mrb[107].mxu0 }
 0x64a   : > { %v15842_v32 = vpop.f32.mrb[96].mxu1 }
 0x64b   : > { %v12572_v30 = vpop.f32.mrb[97].mxu1 }
 0x64c   : > { %v3850_v36 = vpop.f32.mrb[98].mxu1 }
 0x64d   : > { %v12573_v1 = vpop.f32.mrb[99].mxu1 }
 0x64e   : > { %v4092_v34 = vpop.f32.mrb[108].mxu0 }
 0x64f   : > { %v12602_v12 = vpop.f32.mrb[109].mxu0 }
 0x650   : > { %v4095_v39 = vpop.f32.mrb[110].mxu0 }
 0x651   : > { %v12603_v24 = vpop.f32.mrb[111].mxu0 }
 0x652   : > { %v15844_v42 = vpop.f32.mrb[100].mxu1 }
 0x653   : > { %v12584_v6 = vpop.f32.mrb[101].mxu1 }
 0x654   : > { %v3948_v21 = vpop.f32.mrb[102].mxu1 }
 0x655   : > { %v12585_v35 = vpop.f32.mrb[103].mxu1 }
 0x656   : > { %v4190_v2 = vpop.f32.mrb[112].mxu0 }
 0x657   : > { %v12614_v9 = vpop.f32.mrb[113].mxu0 }
 0x658   : > { %v4193_v8 = vpop.f32.mrb[114].mxu0 }
 0x659   : > { %v12615_v28 = vpop.f32.mrb[115].mxu0 }
 0x65a   : > { %v4043_v29 = vpop.f32.mrb[104].mxu1 }
 0x65b   : > { %v13411_v0 = vpack.i.bf16 %v4043_v29, %v3994_v37  ;;  %v12596_v48 = vpop.f32.mrb[105].mxu1 }
 0x65c   : > { %v4046_v60 = vpop.f32.mrb[106].mxu1 }
 0x65d   : > { %v12597_v43 = vpop.f32.mrb[107].mxu1  ;;  %13412 = vrot.lane.b32.xlu0 %v13411_v0, %s18560_s17 }
 0x65e   : > { %v4288_v23 = vpop.f32.mrb[116].mxu0 }
 0x65f   : > { %v12626_v15 = vpop.f32.mrb[117].mxu0 }
 0x660   : > { %v4291_v40 = vpop.f32.mrb[118].mxu0 }
 0x661   : > { %v12627_v33 = vpop.f32.mrb[119].mxu0 }
 0x662   : > { %v4141_v45 = vpop.f32.mrb[108].mxu1 }
 0x663   : > { %v13416_v20 = vpack.i.bf16 %v4141_v45, %v4092_v34  ;;  %v12608_v62 = vpop.f32.mrb[109].mxu1 }
 0x664   : > { %v4144_v31 = vpop.f32.mrb[110].mxu1 }
 0x665   : > { %v12609_v49 = vpop.f32.mrb[111].mxu1  ;;  %13417 = vrot.lane.b32.xlu1 %v13416_v20, %s18560_s17 }
 0x666   : > { %v4386_v7 = vpop.f32.mrb[120].mxu0 }
 0x667   : > { %v12638_v4 = vpop.f32.mrb[121].mxu0 }
 0x668   : > { %v4389_v53 = vpop.f32.mrb[122].mxu0 }
 0x669   : > { %v12639_v61 = vpop.f32.mrb[123].mxu0 }
 0x66a   : > { %v4239_v55 = vpop.f32.mrb[112].mxu1 }
 0x66b   : > { %v13421_v27 = vpack.i.bf16 %v4239_v55, %v4190_v2  ;;  %v12620_v57 = vpop.f32.mrb[113].mxu1 }
 0x66c   : > { %v4242_v51 = vpop.f32.mrb[114].mxu1 }
 0x66d   : > { %v12621_v41 = vpop.f32.mrb[115].mxu1  ;;  %13422 = vrot.lane.b32.xlu0 %v13421_v27, %s18560_s17 }
 0x66e   : > { %v4484_v5 = vpop.f32.mrb[124].mxu0 }
 0x66f   : > { %v12650_v13 = vpop.f32.mrb[125].mxu0 }
 0x670   : > { %v4487_v46 = vpop.f32.mrb[126].mxu0 }
 0x671   : > { %v12651_v38 = vpop.f32.mrb[127].mxu0 }
 0x672   : > { %v4337_v37 = vpop.f32.mrb[116].mxu1 }
 0x673   : > { %v13426_v59 = vpack.i.bf16 %v4337_v37, %v4288_v23  ;;  %v12632_v26 = vpop.f32.mrb[117].mxu1 }
 0x674   : > { %v4340_v58 = vpop.f32.mrb[118].mxu1 }
 0x675   : > { %v12633_v30 = vpop.f32.mrb[119].mxu1  ;;  %13427 = vrot.lane.b32.xlu1 %v13426_v59, %s18560_s17 }
 0x67a   : > { %v4435_v36 = vpop.f32.mrb[120].mxu1 }
 0x67b   : > { %v13431_v1 = vpack.i.bf16 %v4435_v36, %v4386_v7  ;;  %v12644_v34 = vpop.f32.mrb[121].mxu1 }
 0x67c   : > { %v4438_v12 = vpop.f32.mrb[122].mxu1 }
 0x67d   : > { %v12645_v39 = vpop.f32.mrb[123].mxu1  ;;  %13432 = vrot.lane.b32.xlu0 %v13431_v1, %s18560_s17 }
 0x68b   : > { %v4533_v24 = vpop.f32.mrb[124].mxu1 }
 0x68c   : > { %v13436_v19 = vpack.i.bf16 %v4533_v24, %v4484_v5  ;;  %v12656_v6 = vpop.f32.mrb[125].mxu1 }
 0x68d   : > { %v4536_v21 = vpop.f32.mrb[126].mxu1 }
 0x68e   : > { %v12657_v35 = vpop.f32.mrb[127].mxu1  ;;  %13437 = vrot.lane.b32.xlu1 %v13436_v19, %s18560_s17 }
 0x68f   : > { %v4582_v2 = vpop.f32.mrb[128].mxu0 }
 0x690   : > { %v12662_v9 = vpop.f32.mrb[129].mxu0 }
 0x691   : > { %v4585_v8 = vpop.f32.mrb[130].mxu0 }
 0x692   : > { %v12663_v28 = vpop.f32.mrb[131].mxu0 }
 0x693   : > { %v4631_v29 = vpop.f32.mrb[128].mxu1 }
 0x694   : > { %v13441_v0 = vpack.i.bf16 %v4631_v29, %v4582_v2  ;;  %v12668_v48 = vpop.f32.mrb[129].mxu1 }
 0x695   : > { %v4634_v56 = vpop.f32.mrb[130].mxu1 }
 0x696   : > { %v12669_v60 = vpop.f32.mrb[131].mxu1  ;;  %13442 = vrot.lane.b32.xlu0 %v13441_v0, %s18560_s17  ;;  %v18654_v56 = vld [vmem:[#allocation8_spill] sm:$0xff] }
 0x697   : > { %v4680_v43 = vpop.f32.mrb[132].mxu0 }
 0x698   : > { %v12674_v23 = vpop.f32.mrb[133].mxu0 }
 0x699   : > { %v4683_v15 = vpop.f32.mrb[134].mxu0 }
 0x69a   : > { %v12675_v40 = vpop.f32.mrb[135].mxu0 }
 0x69b   : > { %v4729_v33 = vpop.f32.mrb[132].mxu1  ;;  %v18655_v40 = vld [vmem:[#allocation13_spill] sm:$0xff] }
 0x69c   : > { %v13446_v45 = vpack.i.bf16 %v4729_v33, %v4680_v43  ;;  %v12680_v20 = vpop.f32.mrb[133].mxu1 }
 0x69d   : > { %v4732_v62 = vpop.f32.mrb[134].mxu1  ;;  %v18656_v20 = vld [vmem:[#allocation12_spill] sm:$0xff] }
 0x69e   : > { %v12681_v31 = vpop.f32.mrb[135].mxu1  ;;  %13447 = vrot.lane.b32.xlu1 %v13446_v45, %s18560_s17  ;;  %s18747_s17 = sshll.u32 %s14384_s29, 7 }
 0x6cf   : > { %v13413_v49 = vpop.permute.xlu0 %13412 }
 0x6d0   : > { %v13415_v7 = vunpack.i.h.bf16 %v13413_v49  ;;  %v13414_v4 = vunpack.i.l.bf16 %v13413_v49 }
 0x6d2   : > { %v4800_v53 = vsel %vm1215_vm3, %v15816_v54, %v13415_v7  ;;  %v4799_v61 = vsel %vm1215_vm3, %v15807_v47, %v13414_v4  ;;  %v18657_v4 = vld [vmem:[#allocation11_spill] sm:$0xff] }
 0x6d3   : > { %v4815_v55 = vpack.c.bf16 %v4800_v53, %v4799_v61 }
 0x6d5   : > { %12686 = vmatprep.mubr.msk.bf16.mxu0 %vm395_vm1, %v4815_v55 }
 0x6d7   : > { %v13418_v27 = vpop.permute.xlu1 %13417 }
 0x6d8   : > { %v13420_v57 = vunpack.i.h.bf16 %v13418_v27  ;;  %v13419_v51 = vunpack.i.l.bf16 %v13418_v27  ;;  %v18658_v27 = vld [vmem:[#allocation14_spill] sm:$0xff] }
 0x6da   : > { %v4802_v41 = vsel %vm1215_vm3, %v15818_v63, %v13420_v57  ;;  %v4801_v5 = vsel %vm1215_vm3, %v15820_v44, %v13419_v51 }
 0x6db   : > { %v4816_v13 = vpack.c.bf16 %v4802_v41, %v4801_v5 }
 0x6dd   : > { %12687 = vmatmul.mubr.msk.bf16.vlgmr.msra.gmra.mrb[136].mxu0 %vm395_vm1, %v4816_v13 }
 0x6df   : > { %v13423_v46 = vpop.permute.xlu0 %13422 }
 0x6e0   : > { %v13425_v54 = vunpack.i.h.bf16 %v13423_v46  ;;  %v13424_v38 = vunpack.i.l.bf16 %v13423_v46 }
 0x6e2   : > { %v4804_v47 = vsel %vm1215_vm3, %v15822_v18, %v13425_v54  ;;  %v4803_v37 = vsel %vm1215_vm3, %v15824_v50, %v13424_v38 }
 0x6e3   : > { %v4817_v59 = vpack.c.bf16 %v4804_v47, %v4803_v37 }
 0x6e5   : > { %12690 = vmatprep.mubr.msk.bf16.mxu0 %vm395_vm1, %v4817_v59 }
 0x6e7   : > { %v13428_v26 = vpop.permute.xlu1 %13427 }
 0x6e8   : > { %v13430_v63 = vunpack.i.h.bf16 %v13428_v26  ;;  %v13429_v58 = vunpack.i.l.bf16 %v13428_v26 }
 0x6ea   : > { %v4806_v44 = vsel %vm1215_vm3, %v15826_v16, %v13430_v63  ;;  %v4805_v30 = vsel %vm1215_vm3, %v15828_v10, %v13429_v58 }
 0x6eb   : > { %v4818_v36 = vpack.c.bf16 %v4806_v44, %v4805_v30  ;;  %v18659_v44 = vld [vmem:[#allocation17_spill] sm:$0xff] }
 0x6ed   : > { %12691 = vmatmul.mubr.msk.bf16.gmra.mrb[140].mxu0 %vm395_vm1, %v4818_v36 }
 0x6ef   : > { %v13433_v1 = vpop.permute.xlu0 %13432 }
 0x6f0   : > { %v13435_v18 = vunpack.i.h.bf16 %v13433_v1  ;;  %v13434_v34 = vunpack.i.l.bf16 %v13433_v1 }
 0x6f2   : > { %v4808_v50 = vsel %vm1215_vm3, %v15836_v3, %v13435_v18  ;;  %v4807_v12 = vsel %vm1215_vm3, %v15830_v17, %v13434_v34  ;;  %v18660_v34 = vld [vmem:[#allocation16_spill] sm:$0xff] }
 0x6f3   : > { %v4819_v39 = vpack.c.bf16 %v4808_v50, %v4807_v12  ;;  %v18661_v12 = vld [vmem:[#allocation18_spill] sm:$0xff] }
 0x6f5   : > { %12694 = vmatprep.mubr.msk.bf16.mxu0 %vm395_vm1, %v4819_v39 }
 0x700   : > { %v13438_v24 = vpop.permute.xlu1 %13437 }
 0x701   : > { %v13440_v16 = vunpack.i.h.bf16 %v13438_v24  ;;  %v13439_v19 = vunpack.i.l.bf16 %v13438_v24 }
 0x703   : > { %v4810_v10 = vsel %vm1215_vm3, %v15840_v22, %v13440_v16  ;;  %v4809_v6 = vsel %vm1215_vm3, %v15832_v25, %v13439_v19  ;;  %v18662_v19 = vld [vmem:[#allocation15_spill] sm:$0xff] }
 0x704   : > { %v4820_v21 = vpack.c.bf16 %v4810_v10, %v4809_v6 }
 0x706   : > { %12695 = vmatmul.mubr.msk.bf16.gmra.mrb[144].mxu0 %vm395_vm1, %v4820_v21 }
 0x708   : > { %v13443_v35 = vpop.permute.xlu0 %13442 }
 0x709   : > { %v13445_v3 = vunpack.i.h.bf16 %v13443_v35  ;;  %v13444_v2 = vunpack.i.l.bf16 %v13443_v35 }
 0x70b   : > { %v4812_v17 = vsel %vm1215_vm3, %v15842_v32, %v13445_v3  ;;  %v4811_v9 = vsel %vm1215_vm3, %v15834_v14, %v13444_v2  ;;  %v18568_v32 = vsub.s32 3, %v18654_v56  ;;  %v15904_v14 = vld [vmem:[%s18529_s6] sm:$0xff] }
 0x70c   : > { %v4821_v8 = vpack.c.bf16 %v4812_v17, %v4811_v9 }
 0x70d   : > { %v15909_v60 = vrot.slane %v15904_v14, %v18568_v32 }
 0x70e   : > { %12698 = vmatprep.mubr.msk.bf16.mxu0 %vm395_vm1, %v4821_v8 }
 0x710   : > { %v13448_v28 = vpop.permute.xlu1 %13447 }
 0x711   : > { %v13450_v22 = vunpack.i.h.bf16 %v13448_v28  ;;  %v13449_v29 = vunpack.i.l.bf16 %v13448_v28 }
 0x713   : > { %v4814_v25 = vsel %vm1215_vm3, %v15844_v42, %v13450_v22  ;;  %v4813_v0 = vsel %vm1215_vm3, %v15838_v11, %v13449_v29 }
 0x714   : > { %v4822_v48 = vpack.c.bf16 %v4814_v25, %v4813_v0 }
 0x716   : > { %12699 = vmatmul.mubr.msk.bf16.gmra.mrb[148].mxu0 %vm395_vm1, %v4822_v48 }
 0x7b0   : > { %v12688_v43 = vpop.f32.mrb[136].mxu0 }
 0x7b1   : > { %v4910_v42 = vadd.f32 %v12688_v43, %v15909_v60  ;;  %v4901_v23 = vpop.f32.mrb[137].mxu0 }
 0x7b2   : > { %v4902_v11 = vadd.f32 %v4901_v23, %v15909_v60  ;;  %v12689_v15 = vpop.f32.mrb[138].mxu0  ;;  %v18663_v23 = vld [vmem:[#allocation22_spill] sm:$0xff] }
 0x7b3   : > { %v15914_v33 = vadd.f32 %v4910_v42, %v18655_v40  ;;  %v4904_v45 = vpop.f32.mrb[139].mxu0  ;;  %v4913_v49 = vadd.f32 %v12689_v15, %v15909_v60 }
 0x7b4   : > { %v15917_v62 = vadd.f32 %v4902_v11, %v18656_v20  ;;  %v4905_v31 = vadd.f32 %v4904_v45, %v15909_v60  ;;  %v18664_v20 = vld [vmem:[#allocation20_spill] sm:$0xff] }
 0x7b5   : > { %v4986_v7 = vsel %vm395_vm1, %v15914_v33, 0.0  ;;  %v15931_v57 = vadd.f32 %v4913_v49, %v18658_v27  ;;  %v5046_v5 = vmul.f32 %v15914_v33, %v15914_v33  ;;  %v18665_v49 = vld [vmem:[#allocation21_spill] sm:$0xff] }
 0x7b6   : > { %v15924_v53 = vadd.f32 %v4905_v31, %v18657_v4  ;;  %4987 = vadd.xlane.f32.xlu0 %v4986_v7  ;;  %v5044_v55 = vmul.f32 %v15917_v62, %v15917_v62  ;;  %v4980_v51 = vsel %vm395_vm1, %v15917_v62, 0.0 }
 0x7b7   : > { %v4989_v13 = vsel %vm395_vm1, %v15931_v57, 0.0  ;;  %v5066_v38 = vsel %vm395_vm1, %v5046_v5, 0.0  ;;  %v5047_v47 = vmul.f32 %v15931_v57, %v15931_v57 }
 0x7b8   : > { %v4983_v61 = vsel %vm395_vm1, %v15924_v53, 0.0  ;;  %v5060_v41 = vsel %vm395_vm1, %v5044_v55, 0.0  ;;  %v5045_v46 = vmul.f32 %v15924_v53, %v15924_v53 }
 0x7b9   : > { %4984 = vadd.xlane.f32.xlu1 %v4983_v61  ;;  %v5069_v18 = vsel %vm395_vm1, %v5047_v47, 0.0  ;;  %v18666_v61 = vld [vmem:[#allocation19_spill] sm:$0xff] }
 0x7ba   : > { %4981 = vadd.xlane.f32.xlu0 %v4980_v51  ;;  %v5063_v26 = vsel %vm395_vm1, %v5045_v46, 0.0 }
 0x7bd   : > { %5061 = vadd.xlane.f32.xlu1 %v5060_v41 }
 0x7be   : > { %4990 = vadd.xlane.f32.xlu0 %v4989_v13 }
 0x7c0   : > { %v12692_v54 = vpop.f32.mrb[140].mxu0 }
 0x7c1   : > { %v4926_v37 = vadd.f32 %v12692_v54, %v15909_v60  ;;  %v4917_v59 = vpop.f32.mrb[141].mxu0  ;;  %5067 = vadd.xlane.f32.xlu1 %v5066_v38 }
 0x7c2   : > { %v4918_v63 = vadd.f32 %v4917_v59, %v15909_v60  ;;  %v12693_v58 = vpop.f32.mrb[142].mxu0  ;;  %5064 = vadd.xlane.f32.xlu0 %v5063_v26 }
 0x7c3   : > { %v15949_v30 = vadd.f32 %v4926_v37, %v18659_v44  ;;  %v4929_v36 = vadd.f32 %v12693_v58, %v15909_v60  ;;  %v4920_v1 = vpop.f32.mrb[143].mxu0 }
 0x7c4   : > { %v15954_v50 = vadd.f32 %v4918_v63, %v18660_v34  ;;  %v4921_v24 = vadd.f32 %v4920_v1, %v15909_v60 }
 0x7c5   : > { %v15957_v39 = vadd.f32 %v4929_v36, %v18661_v12  ;;  %v4998_v16 = vsel %vm395_vm1, %v15949_v30, 0.0  ;;  %v5050_v17 = vmul.f32 %v15949_v30, %v15949_v30  ;;  %v18667_v36 = vld [vmem:[#allocation26_spill] sm:$0xff] }
 0x7c6   : > { %4999 = vadd.xlane.f32.xlu1 %v4998_v16  ;;  %5070 = vadd.xlane.f32.xlu0 %v5069_v18  ;;  %v15963_v10 = vadd.f32 %v4921_v24, %v18662_v19  ;;  %v4992_v6 = vsel %vm395_vm1, %v15954_v50, 0.0  ;;  %v5048_v35 = vmul.f32 %v15954_v50, %v15954_v50  ;;  %v13615_v24 = vld [vmem:[%s18527_s4] sm:$0xff]   ;;  %v13616_v16 = vld [vmem:[%s18527_s4 + $0x8] sm:$0xff]  }
 0x7c7   : > { %v5001_v21 = vsel %vm395_vm1, %v15957_v39, 0.0  ;;  %v5078_v8 = vsel %vm395_vm1, %v5050_v17, 0.0  ;;  %v5051_v22 = vmul.f32 %v15957_v39, %v15957_v39  ;;  %12702 = vmatprep.subr.bf16.mxu1 %v13615_v24  ;;  %v18670_v17 = vld [vmem:[#allocation23_spill] sm:$0xff] }
 0x7c8   : > { %v5072_v3 = vsel %vm395_vm1, %v5048_v35, 0.0  ;;  %v4995_v2 = vsel %vm395_vm1, %v15963_v10, 0.0  ;;  %v5049_v9 = vmul.f32 %v15963_v10, %v15963_v10  ;;  %v18669_v35 = vld [vmem:[#allocation25_spill] sm:$0xff]  ;;  %12703 = vmatpush3.bf16.msra.mxu1 %v13615_v24 }
 0x7c9   : > { %v5081_v29 = vsel %vm395_vm1, %v5051_v22, 0.0  ;;  %12704 = vmatprep.subr.bf16.mxu1 %v13616_v16 }
 0x7ca   : > { %4993 = vadd.xlane.f32.xlu1 %v4992_v6  ;;  %5002 = vadd.xlane.f32.xlu0 %v5001_v21  ;;  %v5075_v28 = vsel %vm395_vm1, %v5049_v9, 0.0  ;;  %v18668_v6 = vld [vmem:[#allocation24_spill] sm:$0xff] }
 0x7cc   : > { %12705 = vmatpush3.bf16.msra.mxu1 %v13616_v16 }
 0x7ce   : > { %5073 = vadd.xlane.f32.xlu1 %v5072_v3  ;;  %4996 = vadd.xlane.f32.xlu0 %v4995_v2 }
 0x7d2   : > { %5079 = vadd.xlane.f32.xlu1 %v5078_v8  ;;  %5076 = vadd.xlane.f32.xlu0 %v5075_v28 }
 0x7d6   : > { %5082 = vadd.xlane.f32.xlu0 %v5081_v29 }
 0x7d9   : > { %v12696_v25 = vpop.f32.mrb[144].mxu0 }
 0x7da   : > { %v4942_v0 = vadd.f32 %v12696_v25, %v15909_v60  ;;  %v4933_v48 = vpop.f32.mrb[145].mxu0 }
 0x7db   : > { %v4934_v43 = vadd.f32 %v4933_v48, %v15909_v60  ;;  %v12697_v42 = vpop.f32.mrb[146].mxu0 }
 0x7dc   : > { %v15986_v11 = vadd.f32 %v4942_v0, %v18663_v23  ;;  %v4945_v15 = vadd.f32 %v12697_v42, %v15909_v60  ;;  %v4936_v40 = vpop.f32.mrb[147].mxu0 }
 0x7dd   : > { %v4937_v45 = vadd.f32 %v4936_v40, %v15909_v60  ;;  %v15991_v31 = vadd.f32 %v4934_v43, %v18664_v20 }
 0x7de   : > { %v15994_v7 = vadd.f32 %v4945_v15, %v18665_v49  ;;  %v5010_v4 = vsel %vm395_vm1, %v15986_v11, 0.0  ;;  %v5054_v54 = vmul.f32 %v15986_v11, %v15986_v11 }
 0x7df   : > { %5011 = vadd.xlane.f32.xlu1 %v5010_v4  ;;  %v15999_v55 = vadd.f32 %v4937_v45, %v18666_v61  ;;  %v5004_v51 = vsel %vm395_vm1, %v15991_v31, 0.0  ;;  %v5052_v41 = vmul.f32 %v15991_v31, %v15991_v31 }
 0x7e0   : > { %v5013_v27 = vsel %vm395_vm1, %v15994_v7, 0.0  ;;  %v5055_v47 = vmul.f32 %v15994_v7, %v15994_v7  ;;  %v5090_v63 = vsel %vm395_vm1, %v5054_v54, 0.0 }
 0x7e1   : > { %5014 = vadd.xlane.f32.xlu0 %v5013_v27  ;;  %v5007_v5 = vsel %vm395_vm1, %v15999_v55, 0.0  ;;  %v5053_v13 = vmul.f32 %v15999_v55, %v15999_v55  ;;  %v5084_v46 = vsel %vm395_vm1, %v5052_v41, 0.0 }
 0x7e2   : > { %v5093_v12 = vsel %vm395_vm1, %v5055_v47, 0.0 }
 0x7e3   : > { %5005 = vadd.xlane.f32.xlu1 %v5004_v51  ;;  %v5087_v38 = vsel %vm395_vm1, %v5053_v13, 0.0 }
 0x7e5   : > { %5008 = vadd.xlane.f32.xlu0 %v5007_v5 }
 0x7e7   : > { %5085 = vadd.xlane.f32.xlu1 %v5084_v46 }
 0x7e9   : > { %v12700_v37 = vpop.f32.mrb[148].mxu0  ;;  %5088 = vadd.xlane.f32.xlu0 %v5087_v38 }
 0x7ea   : > { %v4958_v59 = vadd.f32 %v12700_v37, %v15909_v60  ;;  %v4949_v26 = vpop.f32.mrb[149].mxu0 }
 0x7eb   : > { %v4950_v58 = vadd.f32 %v4949_v26, %v15909_v60  ;;  %v12701_v44 = vpop.f32.mrb[150].mxu0  ;;  %5091 = vadd.xlane.f32.xlu1 %v5090_v63 }
 0x7ec   : > { %v16021_v1 = vadd.f32 %v4958_v59, %v18667_v36  ;;  %v4961_v18 = vadd.f32 %v12701_v44, %v15909_v60  ;;  %v4952_v34 = vpop.f32.mrb[151].mxu0 }
 0x7ed   : > { %v4953_v19 = vadd.f32 %v4952_v34, %v15909_v60  ;;  %5094 = vadd.xlane.f32.xlu0 %v5093_v12  ;;  %v16033_v21 = vadd.f32 %v4950_v58, %v18668_v6 }
 0x7ee   : > { %v16036_v3 = vadd.f32 %v4961_v18, %v18669_v35  ;;  %v5022_v2 = vsel %vm395_vm1, %v16021_v1, 0.0  ;;  %v5058_v0 = vmul.f32 %v16021_v1, %v16021_v1 }
 0x7ef   : > { %5023 = vadd.xlane.f32.xlu1 %v5022_v2  ;;  %v16041_v9 = vadd.f32 %v4953_v19, %v18670_v17  ;;  %v5016_v60 = vsel %vm395_vm1, %v16033_v21, 0.0  ;;  %v5056_v28 = vmul.f32 %v16033_v21, %v16033_v21 }
 0x7f0   : > { %v5025_v8 = vsel %vm395_vm1, %v16036_v3, 0.0  ;;  %v5059_v43 = vmul.f32 %v16036_v3, %v16036_v3  ;;  %v5102_v42 = vsel %vm395_vm1, %v5058_v0, 0.0 }
 0x7f1   : > { %5026 = vadd.xlane.f32.xlu0 %v5025_v8  ;;  %v5019_v22 = vsel %vm395_vm1, %v16041_v9, 0.0  ;;  %v5057_v29 = vmul.f32 %v16041_v9, %v16041_v9  ;;  %v5096_v25 = vsel %vm395_vm1, %v5056_v28, 0.0 }
 0x7f2   : > { %v5105_v23 = vsel %vm395_vm1, %v5059_v43, 0.0 }
 0x7f3   : > { %5017 = vadd.xlane.f32.xlu1 %v5016_v60  ;;  %v5099_v48 = vsel %vm395_vm1, %v5057_v29, 0.0 }
 0x7f5   : > { %5020 = vadd.xlane.f32.xlu0 %v5019_v22  ;;  %v18567_v22 = vsub.s32 4, %v18654_v56 }
 0x7f7   : > { %5097 = vadd.xlane.f32.xlu1 %v5096_v25 }
 0x7f9   : > { %5100 = vadd.xlane.f32.xlu0 %v5099_v48 }
 0x7fb   : > { %5103 = vadd.xlane.f32.xlu1 %v5102_v42 }
 0x7fd   : > { %5106 = vadd.xlane.f32.xlu0 %v5105_v23 }
 0x843   : > { %v4988_v15 = vpop.xlane.xlu0 %4987 }
 0x844   : > { %v16061_v61 = vmul.f32 0.03125, %v4988_v15 }
 0x846   : > { %v4985_v40 = vpop.xlane.xlu1 %4984  ;;  %v5126_v46 = vmul.f32 %v16061_v61, %v16061_v61 }
 0x847   : > { %v4982_v45 = vpop.xlane.xlu0 %4981  ;;  %v16063_v41 = vmul.f32 0.03125, %v4985_v40  ;;  %v18566_v40 = vsub.s32 5, %v18654_v56 }
 0x848   : > { %v5028_v20 = vmul.f32 0.03125, %v4982_v45 }
 0x849   : > { %v5125_v37 = vmul.f32 %v16063_v41, %v16063_v41 }
 0x84a   : > { %v5124_v49 = vmul.f32 %v5028_v20, %v5028_v20  ;;  %v5062_v4 = vpop.xlane.xlu1 %5061  ;;  %v5172_v15 = vsub.f32 %v15917_v62, %v5028_v20 }
 0x84b   : > { %v5108_v27 = vmul.f32 0.03125, %v5062_v4  ;;  %v4991_v51 = vpop.xlane.xlu0 %4990 }
 0x84c   : > { %v16069_v59 = vmul.f32 0.03125, %v4991_v51 }
 0x84d   : > { %v5140_v5 = vsub.f32 %v5108_v27, %v5124_v49  ;;  %v16087_v49 = vrot.slane %v15904_v14, %v18567_v22 }
 0x84e   : > { %v5068_v13 = vpop.xlane.xlu1 %5067  ;;  %v5127_v12 = vmul.f32 %v16069_v59, %v16069_v59 }
 0x84f   : > { %v5156_v54 = vmax.f32 %v5140_v5, 0.0  ;;  %v5110_v38 = vmul.f32 0.03125, %v5068_v13  ;;  %v5065_v47 = vpop.xlane.xlu0 %5064 }
 0x850   : > { %v5109_v26 = vmul.f32 0.03125, %v5065_v47  ;;  %v5174_v47 = vsub.f32 %v15914_v33, %v16061_v61 }
 0x851   : > { %v5188_v63 = vadd.f32 1e-12, %v5156_v54  ;;  %v5142_v58 = vsub.f32 %v5110_v38, %v5126_v46 }
 0x852   : > { %v5141_v44 = vsub.f32 %v5109_v26, %v5125_v37  ;;  %v5173_v37 = vsub.f32 %v15924_v53, %v16063_v41 }
 0x853   : > { %13793 = vrsqrt.f32 %v5188_v63  ;;  %v5158_v36 = vmax.f32 %v5142_v58, 0.0  ;;  %v5000_v18 = vpop.xlane.xlu1 %4999  ;;  %v5071_v34 = vpop.xlane.xlu0 %5070  ;;  %v16102_v63 = vrot.slane %v15904_v14, %v18566_v40 }
 0x854   : > { %v5157_v24 = vmax.f32 %v5141_v44, 0.0  ;;  %v5111_v16 = vmul.f32 0.03125, %v5071_v34  ;;  %v16076_v29 = vmul.f32 0.03125, %v5000_v18 }
 0x855   : > { %v5190_v19 = vadd.f32 1e-12, %v5158_v36 }
 0x856   : > { %v5189_v6 = vadd.f32 1e-12, %v5157_v24  ;;  %v5143_v35 = vsub.f32 %v5111_v16, %v5127_v12  ;;  %v5130_v4 = vmul.f32 %v16076_v29, %v16076_v29  ;;  %v5175_v16 = vsub.f32 %v15931_v57, %v16069_v59 }
 0x857   : > { %13795 = vrsqrt.f32 %v5190_v19  ;;  %v4994_v2 = vpop.xlane.xlu1 %4993  ;;  %v5003_v17 = vpop.xlane.xlu0 %5002 }
 0x858   : > { %13797 = vrsqrt.f32 %v5189_v6  ;;  %v5159_v8 = vmax.f32 %v5143_v35, 0.0  ;;  %v16073_v60 = vmul.f32 0.03125, %v4994_v2  ;;  %v16091_v27 = vmul.f32 0.03125, %v5003_v17 }
 0x85a   : > { %v5191_v28 = vadd.f32 1e-12, %v5159_v8  ;;  %v5128_v48 = vmul.f32 %v16073_v60, %v16073_v60  ;;  %v5131_v34 = vmul.f32 %v16091_v27, %v16091_v27 }
 0x85b   : > { %v5074_v25 = vpop.xlane.xlu1 %5073  ;;  %v4997_v0 = vpop.xlane.xlu0 %4996 }
 0x85c   : > { %13799 = vrsqrt.f32 %v5191_v28  ;;  %v5112_v43 = vmul.f32 0.03125, %v5074_v25  ;;  %v16080_v42 = vmul.f32 0.03125, %v4997_v0 }
 0x85d   : > { %v13794_v23 = vpop.eup %13793 }
 0x85e   : > { %v5144_v45 = vsub.f32 %v5112_v43, %v5128_v48  ;;  %v5220_v13 = vmul.f32 %v13794_v23, %v5172_v15  ;;  %v5129_v62 = vmul.f32 %v16080_v42, %v16080_v42 }
 0x85f   : > { %v5080_v51 = vpop.xlane.xlu1 %5079  ;;  %v5077_v5 = vpop.xlane.xlu0 %5076 }
 0x860   : > { %v5160_v46 = vmax.f32 %v5144_v45, 0.0  ;;  %v5114_v20 = vmul.f32 0.03125, %v5080_v51  ;;  %v5113_v54 = vmul.f32 0.03125, %v5077_v5  ;;  %v5240_v33 = vmul.f32 %v16087_v49, %v5220_v13 }
 0x861   : > { %v13796_v38 = vpop.eup %13795  ;;  %v5176_v51 = vsub.f32 %v15954_v50, %v16073_v60 }
 0x862   : > { %v13798_v26 = vpop.eup %13797  ;;  %v5192_v58 = vadd.f32 1e-12, %v5160_v46  ;;  %v5146_v44 = vsub.f32 %v5114_v20, %v5130_v4  ;;  %v5145_v36 = vsub.f32 %v5113_v54, %v5129_v62  ;;  %v5222_v18 = vmul.f32 %v13796_v38, %v5174_v47 }
 0x863   : > { %v5083_v12 = vpop.xlane.xlu0 %5082  ;;  %v5221_v24 = vmul.f32 %v13798_v26, %v5173_v37  ;;  %v16111_v8 = vadd.f32 %v16102_v63, %v5240_v33  ;;  %v5178_v54 = vsub.f32 %v15949_v30, %v16076_v29  ;;  %v5177_v38 = vsub.f32 %v15963_v10, %v16080_v42 }
 0x864   : > { %13801 = vrsqrt.f32 %v5192_v58  ;;  %v5162_v61 = vmax.f32 %v5146_v44, 0.0  ;;  %v5161_v53 = vmax.f32 %v5145_v36, 0.0  ;;  %v5115_v41 = vmul.f32 0.03125, %v5083_v12 }
 0x865   : > { %v5241_v14 = vmul.f32 %v16087_v49, %v5221_v24  ;;  %v5242_v25 = vmul.f32 %v16087_v49, %v5222_v18  ;;  %v5179_v18 = vsub.f32 %v15957_v39, %v16091_v27 }
 0x866   : > { %v13800_v19 = vpop.eup %13799  ;;  %v5194_v6 = vadd.f32 1e-12, %v5162_v61  ;;  %v5193_v35 = vadd.f32 1e-12, %v5161_v53  ;;  %v5147_v2 = vsub.f32 %v5115_v41, %v5131_v34 }
 0x867   : > { %v5223_v17 = vmul.f32 %v13800_v19, %v5175_v16  ;;  %v16114_v28 = vadd.f32 %v16102_v63, %v5241_v14  ;;  %v16122_v43 = vadd.f32 %v16102_v63, %v5242_v25 }
 0x868   : > { %13803 = vrsqrt.f32 %v5194_v6  ;;  %v5163_v0 = vmax.f32 %v5147_v2, 0.0 }
 0x869   : > { %13805 = vrsqrt.f32 %v5193_v35  ;;  %v5276_v57 = vpack.c.bf16 %v16114_v28, %v16111_v8  ;;  %v5243_v59 = vmul.f32 %v16087_v49, %v5223_v17 }
 0x86a   : > { %v5195_v48 = vadd.f32 1e-12, %v5163_v0 }
 0x86b   : > { %12706 = vmatprep.mubr.msk.bf16.mxu1 %vm395_vm1, %v5276_v57  ;;  %v16125_v23 = vadd.f32 %v16102_v63, %v5243_v59 }
 0x86c   : > { %13807 = vrsqrt.f32 %v5195_v48  ;;  %v5012_v15 = vpop.xlane.xlu1 %5011 }
 0x86d   : > { %v5277_v45 = vpack.c.bf16 %v16125_v23, %v16122_v43  ;;  %v16140_v58 = vmul.f32 0.03125, %v5012_v15 }
 0x86e   : > { %v13802_v4 = vpop.eup %13801  ;;  %v5015_v5 = vpop.xlane.xlu0 %5014 }
 0x86f   : > { %12707 = vmatmul.mubr.msk.bf16.vlgmr.msra.gmra.mrb[136].mxu1 %vm395_vm1, %v5277_v45  ;;  %v5224_v46 = vmul.f32 %v13802_v4, %v5176_v51  ;;  %v16147_v10 = vmul.f32 0.03125, %v5015_v5  ;;  %v5134_v41 = vmul.f32 %v16140_v58, %v16140_v58 }
 0x870   : > { %v5006_v13 = vpop.xlane.xlu1 %5005 }
 0x871   : > { %v16132_v62 = vmul.f32 0.03125, %v5006_v13  ;;  %v5244_v44 = vmul.f32 %v16087_v49, %v5224_v46  ;;  %v5135_v17 = vmul.f32 %v16147_v10, %v16147_v10 }
 0x872   : > { %v13804_v20 = vpop.eup %13803  ;;  %v5009_v47 = vpop.xlane.xlu0 %5008 }
 0x873   : > { %v13806_v37 = vpop.eup %13805  ;;  %v16138_v26 = vmul.f32 0.03125, %v5009_v47  ;;  %v5226_v36 = vmul.f32 %v13804_v20, %v5178_v54  ;;  %v5132_v30 = vmul.f32 %v16132_v62, %v16132_v62  ;;  %v16155_v27 = vadd.f32 %v16102_v63, %v5244_v44 }
 0x874   : > { %v5086_v50 = vpop.xlane.xlu1 %5085  ;;  %v5225_v60 = vmul.f32 %v13806_v37, %v5177_v38 }
 0x875   : > { %v5116_v29 = vmul.f32 0.03125, %v5086_v50  ;;  %v5133_v24 = vmul.f32 %v16138_v26, %v16138_v26  ;;  %v5246_v14 = vmul.f32 %v16087_v49, %v5226_v36 }
 0x876   : > { %v13808_v34 = vpop.eup %13807  ;;  %v5089_v42 = vpop.xlane.xlu0 %5088  ;;  %v5245_v12 = vmul.f32 %v16087_v49, %v5225_v60 }
 0x877   : > { %v5148_v33 = vsub.f32 %v5116_v29, %v5132_v30  ;;  %v5117_v61 = vmul.f32 0.03125, %v5089_v42  ;;  %v5227_v53 = vmul.f32 %v13808_v34, %v5179_v18  ;;  %v16168_v4 = vadd.f32 %v16102_v63, %v5246_v14 }
 0x878   : > { %v5092_v39 = vpop.xlane.xlu1 %5091  ;;  %v16158_v16 = vadd.f32 %v16102_v63, %v5245_v12  ;;  %v5180_v42 = vsub.f32 %v15991_v31, %v16132_v62  ;;  %v5182_v31 = vsub.f32 %v15986_v11, %v16140_v58 }
 0x879   : > { %v5164_v19 = vmax.f32 %v5148_v33, 0.0  ;;  %v5149_v6 = vsub.f32 %v5117_v61, %v5133_v24  ;;  %v5118_v35 = vmul.f32 0.03125, %v5092_v39  ;;  %v5247_v2 = vmul.f32 %v16087_v49, %v5227_v53 }
 0x87a   : > { %v5095_v25 = vpop.xlane.xlu0 %5094  ;;  %v5278_v0 = vpack.c.bf16 %v16158_v16, %v16155_v27  ;;  %v5181_v39 = vsub.f32 %v15999_v55, %v16138_v26 }
 0x87b   : > { %v5196_v57 = vadd.f32 1e-12, %v5164_v19  ;;  %v5165_v59 = vmax.f32 %v5149_v6, 0.0  ;;  %v5150_v48 = vsub.f32 %v5118_v35, %v5134_v41  ;;  %v5119_v15 = vmul.f32 0.03125, %v5095_v25 }
 0x87c   : > { %12710 = vmatprep.mubr.msk.bf16.mxu1 %vm395_vm1, %v5278_v0  ;;  %v5024_v45 = vpop.xlane.xlu1 %5023  ;;  %v16171_v51 = vadd.f32 %v16102_v63, %v5247_v2 }
 0x87d   : > { %13809 = vrsqrt.f32 %v5196_v57  ;;  %v5197_v5 = vadd.f32 1e-12, %v5165_v59  ;;  %v5166_v13 = vmax.f32 %v5150_v48, 0.0  ;;  %v5151_v46 = vsub.f32 %v5119_v15, %v5135_v17 }
 0x87e   : > { %v5027_v20 = vpop.xlane.xlu0 %5026  ;;  %v5279_v54 = vpack.c.bf16 %v16171_v51, %v16168_v4  ;;  %v16176_v30 = vmul.f32 0.03125, %v5024_v45 }
 0x87f   : > { %13811 = vrsqrt.f32 %v5197_v5  ;;  %v5198_v38 = vadd.f32 1e-12, %v5166_v13  ;;  %v5167_v47 = vmax.f32 %v5151_v46, 0.0  ;;  %v16180_v12 = vmul.f32 0.03125, %v5027_v20 }
 0x880   : > { %12711 = vmatmul.mubr.msk.bf16.gmra.mrb[140].mxu1 %vm395_vm1, %v5279_v54  ;;  %v5018_v37 = vpop.xlane.xlu1 %5017  ;;  %v5138_v35 = vmul.f32 %v16176_v30, %v16176_v30  ;;  %v5183_v5 = vsub.f32 %v15994_v7, %v16147_v10 }
 0x881   : > { %13813 = vrsqrt.f32 %v5198_v38  ;;  %v5199_v50 = vadd.f32 1e-12, %v5167_v47  ;;  %v5040_v60 = vmul.f32 0.03125, %v5018_v37  ;;  %v5139_v62 = vmul.f32 %v16180_v12, %v16180_v12 }
 0x882   : > { %v5021_v44 = vpop.xlane.xlu0 %5020 }
 0x883   : > { %13815 = vrsqrt.f32 %v5199_v50  ;;  %v5041_v36 = vmul.f32 0.03125, %v5021_v44  ;;  %v5136_v29 = vmul.f32 %v5040_v60, %v5040_v60 }
 0x884   : > { %v5098_v18 = vpop.xlane.xlu1 %5097 }
 0x885   : > { %v5120_v34 = vmul.f32 0.03125, %v5098_v18  ;;  %v5137_v61 = vmul.f32 %v5041_v36, %v5041_v36 }
 0x886   : > { %v5101_v24 = vpop.xlane.xlu0 %5100 }
 0x887   : > { %v13810_v33 = vpop.eup %13809  ;;  %v5152_v53 = vsub.f32 %v5120_v34, %v5136_v29  ;;  %v5121_v41 = vmul.f32 0.03125, %v5101_v24 }
 0x888   : > { %v5104_v14 = vpop.xlane.xlu1 %5103  ;;  %v5228_v19 = vmul.f32 %v13810_v33, %v5180_v42  ;;  %v5184_v33 = vsub.f32 %v16033_v21, %v5040_v60 }
 0x889   : > { %v13812_v6 = vpop.eup %13811  ;;  %v5168_v2 = vmax.f32 %v5152_v53, 0.0  ;;  %v5153_v17 = vsub.f32 %v5121_v41, %v5137_v61  ;;  %v5122_v25 = vmul.f32 0.03125, %v5104_v14  ;;  %v5185_v53 = vsub.f32 %v16041_v9, %v5041_v36 }
 0x88a   : > { %v5107_v0 = vpop.xlane.xlu0 %5106  ;;  %v5229_v57 = vmul.f32 %v13812_v6, %v5181_v39  ;;  %v5248_v59 = vmul.f32 %v16087_v49, %v5228_v19  ;;  %v5186_v14 = vsub.f32 %v16021_v1, %v16176_v30 }
 0x88b   : > { %v13814_v55 = vpop.eup %13813  ;;  %v5200_v26 = vadd.f32 1e-12, %v5168_v2  ;;  %v5169_v48 = vmax.f32 %v5153_v17, 0.0  ;;  %v5154_v15 = vsub.f32 %v5122_v25, %v5138_v35  ;;  %v5123_v45 = vmul.f32 0.03125, %v5107_v0  ;;  %v13617_v0 = vld [vmem:[%s18528_s5] sm:$0xff]  }
 0x88c   : > { %v5249_v13 = vmul.f32 %v16087_v49, %v5229_v57  ;;  %v5230_v46 = vmul.f32 %v13814_v55, %v5182_v31  ;;  %v16195_v38 = vadd.f32 %v16102_v63, %v5248_v59  ;;  %v5187_v2 = vsub.f32 %v16036_v3, %v16180_v12  ;;  %12722 = vmatprep.subr.bf16.mxu0 %v13617_v0  ;;  %v13620_v57 = vld [vmem:[%s18528_s5 + $0x18] sm:$0xff]   ;;  %v16258_v59 = vld [vmem:[%s18530_s7] ss:$0 sm:$0xff] }
 0x88d   : > { %v13816_v20 = vpop.eup %13815  ;;  %13817 = vrsqrt.f32 %v5200_v26  ;;  %v5201_v11 = vadd.f32 1e-12, %v5169_v48  ;;  %v5170_v58 = vmax.f32 %v5154_v15, 0.0  ;;  %v5155_v54 = vsub.f32 %v5123_v45, %v5139_v62  ;;  %12723 = vmatpush3.bf16.msra.mxu0 %v13617_v0 }
 0x88e   : > { %v16198_v47 = vadd.f32 %v16102_v63, %v5249_v13  ;;  %v5231_v37 = vmul.f32 %v13816_v20, %v5183_v5  ;;  %v5250_v50 = vmul.f32 %v16087_v49, %v5230_v46 }
 0x88f   : > { %13819 = vrsqrt.f32 %v5201_v11  ;;  %v5202_v44 = vadd.f32 1e-12, %v5170_v58  ;;  %v5171_v7 = vmax.f32 %v5155_v54, 0.0 }
 0x890   : > { %v5280_v10 = vpack.c.bf16 %v16198_v47, %v16195_v38  ;;  %v5251_v18 = vmul.f32 %v16087_v49, %v5231_v37  ;;  %v16206_v34 = vadd.f32 %v16102_v63, %v5250_v50 }
 0x891   : > { %13821 = vrsqrt.f32 %v5202_v44  ;;  %v5203_v29 = vadd.f32 1e-12, %v5171_v7 }
 0x892   : > { %12714 = vmatprep.mubr.msk.bf16.mxu1 %vm395_vm1, %v5280_v10  ;;  %v16209_v42 = vadd.f32 %v16102_v63, %v5251_v18 }
 0x893   : > { %13823 = vrsqrt.f32 %v5203_v29 }
 0x894   : > { %v5281_v24 = vpack.c.bf16 %v16209_v42, %v16206_v34 }
 0x896   : > { %12715 = vmatmul.mubr.msk.bf16.gmra.mrb[144].mxu1 %vm395_vm1, %v5281_v24 }
 0x897   : > { %v13818_v61 = vpop.eup %13817 }
 0x898   : > { %v5232_v41 = vmul.f32 %v13818_v61, %v5184_v33 }
 0x899   : > { %v13820_v39 = vpop.eup %13819 }
 0x89a   : > { %v5233_v19 = vmul.f32 %v13820_v39, %v5185_v53  ;;  %v5252_v6 = vmul.f32 %v16087_v49, %v5232_v41 }
 0x89b   : > { %v13822_v35 = vpop.eup %13821 }
 0x89c   : > { %v5253_v17 = vmul.f32 %v16087_v49, %v5233_v19  ;;  %v5234_v21 = vmul.f32 %v13822_v35, %v5186_v14  ;;  %v16223_v25 = vadd.f32 %v16102_v63, %v5252_v6 }
 0x89d   : > { %v13824_v60 = vpop.eup %13823 }
 0x89e   : > { %v16226_v9 = vadd.f32 %v16102_v63, %v5253_v17  ;;  %v5235_v36 = vmul.f32 %v13824_v60, %v5187_v2  ;;  %v5254_v1 = vmul.f32 %v16087_v49, %v5234_v21 }
 0x8a0   : > { %v5282_v30 = vpack.c.bf16 %v16226_v9, %v16223_v25  ;;  %v5255_v31 = vmul.f32 %v16087_v49, %v5235_v36  ;;  %v16234_v3 = vadd.f32 %v16102_v63, %v5254_v1  ;;  %v13618_v49 = vld [vmem:[%s18528_s5 + $0x8] sm:$0xff]  }
 0x8a1   : > { %12724 = vmatprep.subr.bf16.mxu0 %v13618_v49 }
 0x8a2   : > { %12718 = vmatprep.mubr.msk.bf16.mxu1 %vm395_vm1, %v5282_v30  ;;  %v16237_v12 = vadd.f32 %v16102_v63, %v5255_v31  ;;  %12725 = vmatpush3.bf16.msra.mxu0 %v13618_v49  ;;  %v13619_v63 = vld [vmem:[%s18528_s5 + $0x10] sm:$0xff]  }
 0x8a3   : > { %12726 = vmatprep.subr.bf16.mxu0 %v13619_v63 }
 0x8a4   : > { %v5283_v62 = vpack.c.bf16 %v16237_v12, %v16234_v3 }
 0x8a6   : > { %12719 = vmatmul.mubr.msk.bf16.gmra.mrb[148].mxu1 %vm395_vm1, %v5283_v62  ;;  %12727 = vmatpush3.bf16.msra.mxu0 %v13619_v63 }
 0x8a7   : > { %12728 = vmatprep.subr.bf16.mxu0 %v13620_v57 }
 0x8aa   : > { %12729 = vmatpush3.bf16.msra.mxu0 %v13620_v57 }
 0x8ab   : > { %12766 = vmatprep.subr.bf16.mxu0 %v18612_v52 }
 0x942   : > { %v12708_v55 = vpop.f32.mrb[136].mxu1 }
 0x943   : > { %v5374_v26 = vadd.f32 %v12708_v55, %v16258_v59  ;;  %v5365_v48 = vpop.f32.mrb[137].mxu1 }
 0x944   : > { %v5366_v15 = vadd.f32 %v16258_v59, %v5365_v48  ;;  %v12709_v45 = vpop.f32.mrb[138].mxu1 }
 0x945   : > { %v5446_v5 = vmul.f32 0.044715, %v5374_v26  ;;  %v5377_v13 = vadd.f32 %v12709_v45, %v16258_v59  ;;  %v5368_v46 = vpop.f32.mrb[139].mxu1  ;;  %v5430_v45 = vmul.f32 0.5, %v5374_v26 }
 0x946   : > { %v5444_v20 = vmul.f32 0.044715, %v5366_v15  ;;  %v5369_v11 = vadd.f32 %v16258_v59, %v5368_v46 }
 0x947   : > { %v5462_v58 = vmul.f32 %v5446_v5, %v5374_v26  ;;  %v5447_v54 = vmul.f32 0.044715, %v5377_v13 }
 0x948   : > { %v5460_v37 = vmul.f32 %v5444_v20, %v5366_v15  ;;  %v5445_v50 = vmul.f32 0.044715, %v5369_v11 }
 0x949   : > { %v5478_v44 = vmul.f32 %v5462_v58, %v5374_v26  ;;  %v5463_v7 = vmul.f32 %v5447_v54, %v5377_v13 }
 0x94a   : > { %v5476_v10 = vmul.f32 %v5460_v37, %v5366_v15  ;;  %v5461_v18 = vmul.f32 %v5445_v50, %v5369_v11  ;;  %v5428_v50 = vmul.f32 0.5, %v5366_v15 }
 0x94b   : > { %v5494_v29 = vadd.f32 %v5478_v44, %v5374_v26  ;;  %v5479_v24 = vmul.f32 %v5463_v7, %v5377_v13  ;;  %v5429_v26 = vmul.f32 0.5, %v5369_v11 }
 0x94c   : > { %v5492_v33 = vadd.f32 %v5476_v10, %v5366_v15  ;;  %v5477_v61 = vmul.f32 %v5461_v18, %v5369_v11  ;;  %v5431_v10 = vmul.f32 0.5, %v5377_v13 }
 0x94d   : > { %v5510_v53 = vmul.f32 0.7978846, %v5494_v29  ;;  %v5495_v41 = vadd.f32 %v5479_v24, %v5377_v13 }
 0x94e   : > { %v5508_v39 = vmul.f32 0.7978846, %v5492_v33  ;;  %v5493_v14 = vadd.f32 %v5477_v61, %v5369_v11 }
 0x94f   : > { %13825 = vtanh.f32 %v5510_v53  ;;  %v5511_v19 = vmul.f32 0.7978846, %v5495_v41 }
 0x950   : > { %13827 = vtanh.f32 %v5508_v39  ;;  %v5509_v6 = vmul.f32 0.7978846, %v5493_v14 }
 0x951   : > { %13829 = vtanh.f32 %v5511_v19 }
 0x952   : > { %13831 = vtanh.f32 %v5509_v6 }
 0x953   : > { %v12712_v35 = vpop.f32.mrb[140].mxu1 }
 0x954   : > { %v5390_v2 = vadd.f32 %v12712_v35, %v16258_v59  ;;  %v5381_v17 = vpop.f32.mrb[141].mxu1 }
 0x955   : > { %v5382_v21 = vadd.f32 %v16258_v59, %v5381_v17  ;;  %v12713_v60 = vpop.f32.mrb[142].mxu1 }
 0x956   : > { %v5450_v36 = vmul.f32 0.044715, %v5390_v2  ;;  %v16267_v1 = vadd.f32 %v12713_v60, %v16258_v59  ;;  %v5384_v30 = vpop.f32.mrb[143].mxu1 }
 0x957   : > { %v5448_v31 = vmul.f32 0.044715, %v5382_v21  ;;  %v16270_v62 = vadd.f32 %v16258_v59, %v5384_v30 }
 0x958   : > { %v5466_v0 = vmul.f32 %v5450_v36, %v5390_v2  ;;  %v5451_v49 = vmul.f32 0.044715, %v16267_v1 }
 0x959   : > { %v13826_v63 = vpop.eup %13825  ;;  %v5464_v57 = vmul.f32 %v5448_v31, %v5382_v21  ;;  %v5449_v55 = vmul.f32 0.044715, %v16270_v62 }
 0x95a   : > { %v13828_v48 = vpop.eup %13827  ;;  %v5542_v5 = vadd.f32 1.0, %v13826_v63  ;;  %v5482_v46 = vmul.f32 %v5466_v0, %v5390_v2  ;;  %v5467_v20 = vmul.f32 %v5451_v49, %v16267_v1 }
 0x95b   : > { %v13830_v58 = vpop.eup %13829  ;;  %v5480_v54 = vmul.f32 %v5464_v57, %v5382_v21  ;;  %v5465_v37 = vmul.f32 %v5449_v55, %v16270_v62  ;;  %v5540_v44 = vadd.f32 1.0, %v13828_v48  ;;  %v5434_v48 = vmul.f32 0.5, %v5390_v2 }
 0x95c   : > { %v13832_v7 = vpop.eup %13831  ;;  %v5543_v18 = vadd.f32 1.0, %v13830_v58  ;;  %v5498_v29 = vadd.f32 %v5482_v46, %v5390_v2  ;;  %v5483_v24 = vmul.f32 %v5467_v20, %v16267_v1  ;;  %v5558_v41 = vmul.f32 %v5542_v5, %v5430_v45 }
 0x95d   : > { %v5496_v33 = vadd.f32 %v5480_v54, %v5382_v21  ;;  %v5481_v61 = vmul.f32 %v5465_v37, %v16270_v62  ;;  %v5541_v53 = vadd.f32 1.0, %v13832_v7  ;;  %v5556_v35 = vmul.f32 %v5540_v44, %v5428_v50 }
 0x95e   : > { %v5559_v39 = vmul.f32 %v5543_v18, %v5431_v10  ;;  %v5514_v14 = vmul.f32 0.7978846, %v5498_v29  ;;  %v5499_v19 = vadd.f32 %v5483_v24, %v16267_v1  ;;  %v5432_v54 = vmul.f32 0.5, %v5382_v21 }
 0x95f   : > { %v5512_v6 = vmul.f32 0.7978846, %v5496_v33  ;;  %v5497_v15 = vadd.f32 %v5481_v61, %v16270_v62  ;;  %v5557_v17 = vmul.f32 %v5541_v53, %v5429_v26  ;;  %v5435_v10 = vmul.f32 0.5, %v16267_v1 }
 0x960   : > { %v5573_v13 = vpack.c.bf16 %v5559_v39, %v5558_v41  ;;  %13833 = vtanh.f32 %v5514_v14  ;;  %v5515_v60 = vmul.f32 0.7978846, %v5499_v19  ;;  %v5433_v24 = vmul.f32 0.5, %v16270_v62 }
 0x961   : > { %13835 = vtanh.f32 %v5512_v6  ;;  %v5513_v36 = vmul.f32 0.7978846, %v5497_v15  ;;  %v5572_v30 = vpack.c.bf16 %v5557_v17, %v5556_v35 }
 0x962   : > { %13837 = vtanh.f32 %v5515_v60 }
 0x963   : > { %13839 = vtanh.f32 %v5513_v36  ;;  %12730 = vmatprep.mubr.msk.bf16.mxu0 %vm5616_vm6, %v5572_v30 }
 0x964   : > { %12731 = vmatmul.mubr.msk.bf16.vlgmr.msra.gmra.mrb[152].mxu0 %vm5616_vm6, %v5573_v13 }
 0x969   : > { %v12716_v11 = vpop.f32.mrb[144].mxu1 }
 0x96a   : > { %v13834_v31 = vpop.eup %13833  ;;  %v16283_v0 = vadd.f32 %v12716_v11, %v16258_v59  ;;  %v5397_v49 = vpop.f32.mrb[145].mxu1 }
 0x96b   : > { %v13836_v63 = vpop.eup %13835  ;;  %v16286_v57 = vadd.f32 %v16258_v59, %v5397_v49  ;;  %v12717_v55 = vpop.f32.mrb[146].mxu1  ;;  %v5546_v45 = vadd.f32 1.0, %v13834_v31 }
 0x96c   : > { %v13838_v5 = vpop.eup %13837  ;;  %v5454_v46 = vmul.f32 0.044715, %v16283_v0  ;;  %v16290_v20 = vadd.f32 %v12717_v55, %v16258_v59  ;;  %v5400_v58 = vpop.f32.mrb[147].mxu1  ;;  %v5544_v37 = vadd.f32 1.0, %v13836_v63 }
 0x96d   : > { %v13840_v50 = vpop.eup %13839  ;;  %v5452_v44 = vmul.f32 0.044715, %v16286_v57  ;;  %v16294_v7 = vadd.f32 %v16258_v59, %v5400_v58  ;;  %v5547_v18 = vadd.f32 1.0, %v13838_v5  ;;  %v5562_v26 = vmul.f32 %v5546_v45, %v5434_v48 }
 0x96e   : > { %v5470_v2 = vmul.f32 %v5454_v46, %v16283_v0  ;;  %v5455_v29 = vmul.f32 0.044715, %v16290_v20  ;;  %v5545_v33 = vadd.f32 1.0, %v13840_v50  ;;  %v5560_v14 = vmul.f32 %v5544_v37, %v5432_v54 }
 0x96f   : > { %v5468_v61 = vmul.f32 %v5452_v44, %v16286_v57  ;;  %v5453_v21 = vmul.f32 0.044715, %v16294_v7  ;;  %v5563_v53 = vmul.f32 %v5547_v18, %v5435_v10 }
 0x970   : > { %v5486_v41 = vmul.f32 %v5470_v2, %v16283_v0  ;;  %v5471_v39 = vmul.f32 %v5455_v29, %v16290_v20  ;;  %v5561_v1 = vmul.f32 %v5545_v33, %v5433_v24 }
 0x971   : > { %v5484_v19 = vmul.f32 %v5468_v61, %v16286_v57  ;;  %v5469_v6 = vmul.f32 %v5453_v21, %v16294_v7  ;;  %v5575_v15 = vpack.c.bf16 %v5563_v53, %v5562_v26 }
 0x972   : > { %v5502_v62 = vadd.f32 %v5486_v41, %v16283_v0  ;;  %v5487_v35 = vmul.f32 %v5471_v39, %v16290_v20  ;;  %v5574_v17 = vpack.c.bf16 %v5561_v1, %v5560_v14  ;;  %v5438_v41 = vmul.f32 0.5, %v16283_v0 }
 0x973   : > { %v5500_v13 = vadd.f32 %v5484_v19, %v16286_v57  ;;  %v5485_v60 = vmul.f32 %v5469_v6, %v16294_v7  ;;  %v5436_v6 = vmul.f32 0.5, %v16286_v57 }
 0x974   : > { %v5518_v36 = vmul.f32 0.7978846, %v5502_v62  ;;  %v5503_v30 = vadd.f32 %v5487_v35, %v16290_v20  ;;  %12734 = vmatprep.mubr.msk.bf16.mxu0 %vm5616_vm6, %v5574_v17  ;;  %v5439_v17 = vmul.f32 0.5, %v16290_v20 }
 0x975   : > { %v5516_v11 = vmul.f32 0.7978846, %v5500_v13  ;;  %v5501_v31 = vadd.f32 %v5485_v60, %v16294_v7  ;;  %12735 = vmatmul.mubr.msk.bf16.gmra.mrb[156].mxu0 %vm5616_vm6, %v5575_v15 }
 0x976   : > { %13841 = vtanh.f32 %v5518_v36  ;;  %v5519_v49 = vmul.f32 0.7978846, %v5503_v30  ;;  %v5437_v30 = vmul.f32 0.5, %v16294_v7 }
 0x977   : > { %13843 = vtanh.f32 %v5516_v11  ;;  %v5517_v63 = vmul.f32 0.7978846, %v5501_v31 }
 0x978   : > { %13845 = vtanh.f32 %v5519_v49 }
 0x979   : > { %13847 = vtanh.f32 %v5517_v63  ;;  %v12720_v55 = vpop.f32.mrb[148].mxu1 }
 0x97a   : > { %v5422_v48 = vadd.f32 %v12720_v55, %v16258_v59  ;;  %v5413_v45 = vpop.f32.mrb[149].mxu1 }
 0x97b   : > { %v5414_v5 = vadd.f32 %v16258_v59, %v5413_v45  ;;  %v12721_v46 = vpop.f32.mrb[150].mxu1 }
 0x97c   : > { %v5458_v58 = vmul.f32 0.044715, %v5422_v48  ;;  %v5425_v54 = vadd.f32 %v12721_v46, %v16258_v59  ;;  %v5416_v37 = vpop.f32.mrb[151].mxu1 }
 0x97d   : > { %v5456_v50 = vmul.f32 0.044715, %v5414_v5  ;;  %v5417_v44 = vadd.f32 %v16258_v59, %v5416_v37 }
 0x97e   : > { %v5474_v10 = vmul.f32 %v5458_v58, %v5422_v48  ;;  %v5459_v18 = vmul.f32 0.044715, %v5425_v54 }
 0x97f   : > { %v5472_v2 = vmul.f32 %v5456_v50, %v5414_v5  ;;  %v5457_v29 = vmul.f32 0.044715, %v5417_v44 }
 0x980   : > { %v13842_v24 = vpop.eup %13841  ;;  %v5490_v33 = vmul.f32 %v5474_v10, %v5422_v48  ;;  %v5475_v61 = vmul.f32 %v5459_v18, %v5425_v54 }
 0x981   : > { %v13844_v21 = vpop.eup %13843  ;;  %v5488_v26 = vmul.f32 %v5472_v2, %v5414_v5  ;;  %v5473_v53 = vmul.f32 %v5457_v29, %v5417_v44  ;;  %v5550_v39 = vadd.f32 1.0, %v13842_v24  ;;  %v5442_v29 = vmul.f32 0.5, %v5422_v48 }
 0x982   : > { %v13846_v14 = vpop.eup %13845  ;;  %v5506_v1 = vadd.f32 %v5490_v33, %v5422_v48  ;;  %v5491_v19 = vmul.f32 %v5475_v61, %v5425_v54  ;;  %v5548_v15 = vadd.f32 1.0, %v13844_v21  ;;  %v5443_v24 = vmul.f32 0.5, %v5425_v54 }
 0x983   : > { %v13848_v59 = vpop.eup %13847  ;;  %v5504_v62 = vadd.f32 %v5488_v26, %v5414_v5  ;;  %v5489_v35 = vmul.f32 %v5473_v53, %v5417_v44  ;;  %v5551_v13 = vadd.f32 1.0, %v13846_v14  ;;  %v5566_v49 = vmul.f32 %v5550_v39, %v5438_v41 }
 0x984   : > { %v5522_v60 = vmul.f32 0.7978846, %v5506_v1  ;;  %v5507_v36 = vadd.f32 %v5491_v19, %v5425_v54  ;;  %v5549_v11 = vadd.f32 1.0, %v13848_v59  ;;  %v5564_v45 = vmul.f32 %v5548_v15, %v5436_v6 }
 0x985   : > { %v5520_v31 = vmul.f32 0.7978846, %v5504_v62  ;;  %v5505_v0 = vadd.f32 %v5489_v35, %v5417_v44  ;;  %v5567_v63 = vmul.f32 %v5551_v13, %v5439_v17  ;;  %v5440_v61 = vmul.f32 0.5, %v5414_v5  ;;  %v16332_v5 = vld [vmem:[%s18529_s6] sm:$0xff] }
 0x986   : > { %13849 = vtanh.f32 %v5522_v60  ;;  %v5523_v55 = vmul.f32 0.7978846, %v5507_v36  ;;  %v5565_v57 = vmul.f32 %v5549_v11, %v5437_v30  ;;  %v5441_v21 = vmul.f32 0.5, %v5417_v44 }
 0x987   : > { %13851 = vtanh.f32 %v5520_v31  ;;  %v5521_v46 = vmul.f32 0.7978846, %v5505_v0  ;;  %v5577_v58 = vpack.c.bf16 %v5567_v63, %v5566_v49  ;;  %v18565_v48 = vsub.s32 6, %v18654_v56 }
 0x988   : > { %13853 = vtanh.f32 %v5523_v55  ;;  %v5576_v37 = vpack.c.bf16 %v5565_v57, %v5564_v45 }
 0x989   : > { %13855 = vtanh.f32 %v5521_v46  ;;  %v16337_v54 = vrot.slane %v16332_v5, %v18565_v48 }
 0x98a   : > { %12738 = vmatprep.mubr.msk.bf16.mxu0 %vm5616_vm6, %v5576_v37 }
 0x98b   : > { %12739 = vmatmul.mubr.msk.bf16.gmra.mrb[160].mxu0 %vm5616_vm6, %v5577_v58 }
 0x990   : > { %v13850_v20 = vpop.eup %13849 }
 0x991   : > { %v13852_v7 = vpop.eup %13851  ;;  %v5554_v50 = vadd.f32 1.0, %v13850_v20 }
 0x992   : > { %v13854_v10 = vpop.eup %13853  ;;  %v5552_v18 = vadd.f32 1.0, %v13852_v7 }
 0x993   : > { %v13856_v2 = vpop.eup %13855  ;;  %v5555_v33 = vadd.f32 1.0, %v13854_v10  ;;  %v5570_v53 = vmul.f32 %v5554_v50, %v5442_v29 }
 0x994   : > { %v5553_v26 = vadd.f32 1.0, %v13856_v2  ;;  %v5568_v39 = vmul.f32 %v5552_v18, %v5440_v61 }
 0x995   : > { %v5571_v41 = vmul.f32 %v5555_v33, %v5443_v24 }
 0x996   : > { %v5569_v14 = vmul.f32 %v5553_v26, %v5441_v21 }
 0x997   : > { %v5579_v1 = vpack.c.bf16 %v5571_v41, %v5570_v53 }
 0x998   : > { %v5578_v19 = vpack.c.bf16 %v5569_v14, %v5568_v39 }
 0x99a   : > { %12742 = vmatprep.mubr.msk.bf16.mxu0 %vm5616_vm6, %v5578_v19 }
 0x99b   : > { %12743 = vmatmul.mubr.msk.bf16.gmra.mrb[164].mxu0 %vm5616_vm6, %v5579_v1 }
 0x99c   : > { %12768 = vmatprep.mubr.msk.bf16.mxu0 %vm14222_vm2, %v18612_v52 }
 0xa37   : > { %v12732_v44 = vpop.f32.mrb[152].mxu0 }
 0xa38   : > { %v5684_v6 = vadd.f32 %v12732_v44, %v16337_v54  ;;  %v5675_v15 = vpop.f32.mrb[153].mxu0 }
 0xa39   : > { %v5676_v59 = vadd.f32 %v5675_v15, %v16337_v54  ;;  %v12733_v62 = vpop.f32.mrb[154].mxu0 }
 0xa3a   : > { %v16342_v35 = vadd.f32 %v5684_v6, %v16122_v43  ;;  %v5687_v17 = vadd.f32 %v12733_v62, %v16337_v54  ;;  %v5678_v13 = vpop.f32.mrb[155].mxu0 }
 0xa3b   : > { %v5679_v60 = vadd.f32 %v5678_v13, %v16337_v54  ;;  %v16347_v36 = vadd.f32 %v5676_v59, %v16111_v8 }
 0xa3c   : > { %v16350_v30 = vadd.f32 %v5687_v17, %v16125_v23  ;;  %v5760_v11 = vsel %vm395_vm1, %v16342_v35, 0.0  ;;  %v5820_v63 = vmul.f32 %v16342_v35, %v16342_v35 }
 0xa3d   : > { %5761 = vadd.xlane.f32.xlu1 %v5760_v11  ;;  %v16355_v31 = vadd.f32 %v5679_v60, %v16114_v28  ;;  %v5754_v0 = vsel %vm395_vm1, %v16347_v36, 0.0  ;;  %v5818_v8 = vmul.f32 %v16347_v36, %v16347_v36 }
 0xa3e   : > { %v5763_v43 = vsel %vm395_vm1, %v16350_v30, 0.0  ;;  %v5821_v45 = vmul.f32 %v16350_v30, %v16350_v30  ;;  %v5840_v46 = vsel %vm395_vm1, %v5820_v63, 0.0 }
 0xa3f   : > { %5764 = vadd.xlane.f32.xlu0 %v5763_v43  ;;  %v5757_v23 = vsel %vm395_vm1, %v16355_v31, 0.0  ;;  %v5819_v49 = vmul.f32 %v16355_v31, %v16355_v31  ;;  %v5834_v28 = vsel %vm395_vm1, %v5818_v8, 0.0 }
 0xa40   : > { %v5843_v50 = vsel %vm395_vm1, %v5821_v45, 0.0 }
 0xa41   : > { %5755 = vadd.xlane.f32.xlu1 %v5754_v0  ;;  %v5837_v55 = vsel %vm395_vm1, %v5819_v49, 0.0 }
 0xa43   : > { %5758 = vadd.xlane.f32.xlu0 %v5757_v23 }
 0xa45   : > { %5835 = vadd.xlane.f32.xlu1 %v5834_v28 }
 0xa47   : > { %5838 = vadd.xlane.f32.xlu0 %v5837_v55 }
 0xa48   : > { %v12736_v57 = vpop.f32.mrb[156].mxu0 }
 0xa49   : > { %v5700_v58 = vadd.f32 %v12736_v57, %v16337_v54  ;;  %v5691_v37 = vpop.f32.mrb[157].mxu0  ;;  %5841 = vadd.xlane.f32.xlu1 %v5840_v46  ;;  %v13621_v46 = vld [vmem:[%s18525_s2 + $0x10] sm:$0xff]  }
 0xa4a   : > { %v5692_v20 = vadd.f32 %v5691_v37, %v16337_v54  ;;  %v12737_v7 = vpop.f32.mrb[158].mxu0  ;;  %12746 = vmatprep.subr.bf16.mxu1 %v13621_v46 }
 0xa4b   : > { %v16378_v10 = vadd.f32 %v5700_v58, %v16168_v4  ;;  %v5703_v18 = vadd.f32 %v12737_v7, %v16337_v54  ;;  %v5694_v2 = vpop.f32.mrb[159].mxu0  ;;  %5844 = vadd.xlane.f32.xlu0 %v5843_v50  ;;  %12747 = vmatpush3.bf16.msra.mxu1 %v13621_v46 }
 0xa4c   : > { %v5695_v29 = vadd.f32 %v5694_v2, %v16337_v54  ;;  %v16383_v24 = vadd.f32 %v5692_v20, %v16155_v27 }
 0xa4d   : > { %v16386_v33 = vadd.f32 %v5703_v18, %v16171_v51  ;;  %v5772_v61 = vsel %vm395_vm1, %v16378_v10, 0.0  ;;  %v5824_v41 = vmul.f32 %v16378_v10, %v16378_v10 }
 0xa4e   : > { %5773 = vadd.xlane.f32.xlu1 %v5772_v61  ;;  %v16391_v21 = vadd.f32 %v5695_v29, %v16158_v16  ;;  %v5766_v26 = vsel %vm395_vm1, %v16383_v24, 0.0  ;;  %v5822_v27 = vmul.f32 %v16383_v24, %v16383_v24 }
 0xa4f   : > { %v5775_v4 = vsel %vm395_vm1, %v16386_v33, 0.0  ;;  %v5825_v14 = vmul.f32 %v16386_v33, %v16386_v33  ;;  %v5852_v1 = vsel %vm395_vm1, %v5824_v41, 0.0 }
 0xa50   : > { %5776 = vadd.xlane.f32.xlu0 %v5775_v4  ;;  %v5769_v51 = vsel %vm395_vm1, %v16391_v21, 0.0  ;;  %v5823_v53 = vmul.f32 %v16391_v21, %v16391_v21  ;;  %v5846_v16 = vsel %vm395_vm1, %v5822_v27, 0.0 }
 0xa51   : > { %v5855_v19 = vsel %vm395_vm1, %v5825_v14, 0.0 }
 0xa52   : > { %5767 = vadd.xlane.f32.xlu1 %v5766_v26  ;;  %v5849_v39 = vsel %vm395_vm1, %v5823_v53, 0.0 }
 0xa54   : > { %5770 = vadd.xlane.f32.xlu0 %v5769_v51 }
 0xa56   : > { %5847 = vadd.xlane.f32.xlu1 %v5846_v16 }
 0xa58   : > { %5850 = vadd.xlane.f32.xlu0 %v5849_v39 }
 0xa5a   : > { %5853 = vadd.xlane.f32.xlu1 %v5852_v1 }
 0xa5c   : > { %5856 = vadd.xlane.f32.xlu0 %v5855_v19 }
 0xa5e   : > { %v12740_v44 = vpop.f32.mrb[160].mxu0 }
 0xa5f   : > { %v5716_v6 = vadd.f32 %v12740_v44, %v16337_v54  ;;  %v5707_v15 = vpop.f32.mrb[161].mxu0 }
 0xa60   : > { %v5708_v59 = vadd.f32 %v5707_v15, %v16337_v54  ;;  %v12741_v62 = vpop.f32.mrb[162].mxu0  ;;  %v18671_v15 = vld [vmem:[#allocation9_spill] sm:$0xff] }
 0xa61   : > { %v16414_v17 = vadd.f32 %v5716_v6, %v16206_v34  ;;  %v5719_v13 = vadd.f32 %v12741_v62, %v16337_v54  ;;  %v5710_v60 = vpop.f32.mrb[163].mxu0  ;;  %v16493_v6 = vld [vmem:[%s18529_s6 + $0x10] sm:$0xff] }
 0xa62   : > { %v5711_v11 = vadd.f32 %v5710_v60, %v16337_v54  ;;  %v16419_v43 = vadd.f32 %v5708_v59, %v16195_v38  ;;  %v6238_v59 = vrot.slane %v16493_v6, %v18671_v15 }
 0xa63   : > { %v16422_v0 = vadd.f32 %v5719_v13, %v16209_v42  ;;  %v5784_v8 = vsel %vm395_vm1, %v16414_v17, 0.0  ;;  %v5828_v63 = vmul.f32 %v16414_v17, %v16414_v17 }
 0xa64   : > { %5785 = vadd.xlane.f32.xlu1 %v5784_v8  ;;  %v16427_v23 = vadd.f32 %v5711_v11, %v16198_v47  ;;  %v5778_v49 = vsel %vm395_vm1, %v16419_v43, 0.0  ;;  %v5826_v38 = vmul.f32 %v16419_v43, %v16419_v43 }
 0xa65   : > { %v5787_v34 = vsel %vm395_vm1, %v16422_v0, 0.0  ;;  %v5829_v45 = vmul.f32 %v16422_v0, %v16422_v0  ;;  %v5864_v20 = vsel %vm395_vm1, %v5828_v63, 0.0 }
 0xa66   : > { %5788 = vadd.xlane.f32.xlu0 %v5787_v34  ;;  %v5781_v42 = vsel %vm395_vm1, %v16427_v23, 0.0  ;;  %v5827_v28 = vmul.f32 %v16427_v23, %v16427_v23  ;;  %v5858_v47 = vsel %vm395_vm1, %v5826_v38, 0.0 }
 0xa67   : > { %v5867_v61 = vsel %vm395_vm1, %v5829_v45, 0.0 }
 0xa68   : > { %5779 = vadd.xlane.f32.xlu1 %v5778_v49  ;;  %v5861_v55 = vsel %vm395_vm1, %v5827_v28, 0.0 }
 0xa6a   : > { %5782 = vadd.xlane.f32.xlu0 %v5781_v42 }
 0xa6c   : > { %5859 = vadd.xlane.f32.xlu1 %v5858_v47 }
 0xa6e   : > { %5862 = vadd.xlane.f32.xlu0 %v5861_v55  ;;  %v12744_v57 = vpop.f32.mrb[164].mxu0 }
 0xa6f   : > { %v5732_v58 = vadd.f32 %v12744_v57, %v16337_v54  ;;  %v5723_v37 = vpop.f32.mrb[165].mxu0 }
 0xa70   : > { %v5724_v7 = vadd.f32 %v5723_v37, %v16337_v54  ;;  %5865 = vadd.xlane.f32.xlu1 %v5864_v20  ;;  %v12745_v50 = vpop.f32.mrb[166].mxu0 }
 0xa71   : > { %v16452_v18 = vadd.f32 %v5732_v58, %v16234_v3  ;;  %v5735_v2 = vadd.f32 %v12745_v50, %v16337_v54  ;;  %v5726_v29 = vpop.f32.mrb[167].mxu0  ;;  %v13622_v3 = vld [vmem:[%s18525_s2 + $0x18] sm:$0xff]  }
 0xa72   : > { %v5727_v4 = vadd.f32 %v5726_v29, %v16337_v54  ;;  %5868 = vadd.xlane.f32.xlu0 %v5867_v61  ;;  %v16458_v26 = vadd.f32 %v5724_v7, %v16223_v25  ;;  %12748 = vmatprep.subr.bf16.mxu1 %v13622_v3 }
 0xa73   : > { %v16461_v27 = vadd.f32 %v5735_v2, %v16237_v12  ;;  %v5796_v51 = vsel %vm395_vm1, %v16452_v18, 0.0  ;;  %12749 = vmatpush3.bf16.msra.mxu1 %v13622_v3  ;;  %v5832_v39 = vmul.f32 %v16452_v18, %v16452_v18 }
 0xa74   : > { %5797 = vadd.xlane.f32.xlu1 %v5796_v51  ;;  %v16469_v53 = vadd.f32 %v5727_v4, %v16226_v9  ;;  %v5790_v25 = vsel %vm395_vm1, %v16458_v26, 0.0  ;;  %v5830_v12 = vmul.f32 %v16458_v26, %v16458_v26  ;;  %12772 = vmatprep.subr.bf16.mxu1 %v18612_v52 }
 0xa75   : > { %v5799_v54 = vsel %vm395_vm1, %v16461_v27, 0.0  ;;  %v5833_v1 = vmul.f32 %v16461_v27, %v16461_v27  ;;  %v5876_v19 = vsel %vm395_vm1, %v5832_v39, 0.0 }
 0xa76   : > { %5800 = vadd.xlane.f32.xlu0 %v5799_v54  ;;  %v5793_v16 = vsel %vm395_vm1, %v16469_v53, 0.0  ;;  %v5831_v9 = vmul.f32 %v16469_v53, %v16469_v53  ;;  %v5870_v41 = vsel %vm395_vm1, %v5830_v12, 0.0 }
 0xa77   : > { %v5879_v44 = vsel %vm395_vm1, %v5833_v1, 0.0 }
 0xa78   : > { %5791 = vadd.xlane.f32.xlu1 %v5790_v25  ;;  %v5873_v14 = vsel %vm395_vm1, %v5831_v9, 0.0 }
 0xa7a   : > { %5794 = vadd.xlane.f32.xlu0 %v5793_v16 }
 0xa7c   : > { %5871 = vadd.xlane.f32.xlu1 %v5870_v41 }
 0xa7e   : > { %5874 = vadd.xlane.f32.xlu0 %v5873_v14 }
 0xa80   : > { %5877 = vadd.xlane.f32.xlu1 %v5876_v19  ;;  %v18564_v19 = vsub.s32 7, %v18654_v56 }
 0xa82   : > { %5880 = vadd.xlane.f32.xlu0 %v5879_v44 }
 0xa91   : > { %6240 = vrot.lane.b32.xlu1 %v6238_v59, %s14220_s28  ;;  %s14227_s28 = smov [#allocation5]  }
 0xa92   : > { %s14153_s23 = sshll.u32 %s14227_s28, 4  ;;  %s14154_s23 = int_to_ptr.vmem [resolvable:$false] %s14153_s23 }
 0xa93   : > { %s14155_s27 = scalar_lea.vmem %s14154_s23, 4096 }
 0xaca   : > { %v5762_v62 = vpop.xlane.xlu1 %5761 }
 0xacb   : > { %v16498_v38 = vmul.f32 0.03125, %v5762_v62 }
 0xacc   : > { %v5765_v13 = vpop.xlane.xlu0 %5764 }
 0xacd   : > { %v16500_v47 = vmul.f32 0.03125, %v5765_v13  ;;  %v5900_v58 = vmul.f32 %v16498_v38, %v16498_v38 }
 0xace   : > { %v5756_v60 = vpop.xlane.xlu1 %5755 }
 0xacf   : > { %v5802_v11 = vmul.f32 0.03125, %v5756_v60  ;;  %v5901_v50 = vmul.f32 %v16500_v47, %v16500_v47 }
 0xad0   : > { %v5759_v8 = vpop.xlane.xlu0 %5758 }
 0xad1   : > { %v5803_v34 = vmul.f32 0.03125, %v5759_v8  ;;  %v5898_v42 = vmul.f32 %v5802_v11, %v5802_v11  ;;  %v5946_v13 = vsub.f32 %v16347_v36, %v5802_v11  ;;  %v5948_v11 = vsub.f32 %v16342_v35, %v16498_v38 }
 0xad2   : > { %v5836_v49 = vpop.xlane.xlu1 %5835 }
 0xad3   : > { %v5882_v28 = vmul.f32 0.03125, %v5836_v49  ;;  %v5899_v55 = vmul.f32 %v5803_v34, %v5803_v34 }
 0xad4   : > { %v5839_v63 = vpop.xlane.xlu0 %5838 }
 0xad5   : > { %v5914_v45 = vsub.f32 %v5882_v28, %v5898_v42  ;;  %v5883_v57 = vmul.f32 0.03125, %v5839_v63  ;;  %v16519_v42 = vrot.slane %v16332_v5, %v18564_v19  ;;  %v5947_v28 = vsub.f32 %v16355_v31, %v5803_v34 }
 0xad6   : > { %v5842_v46 = vpop.xlane.xlu1 %5841 }
 0xad7   : > { %v5930_v37 = vmax.f32 %v5914_v45, 0.0  ;;  %v5915_v20 = vsub.f32 %v5883_v57, %v5899_v55  ;;  %v5884_v7 = vmul.f32 0.03125, %v5842_v46 }
 0xad8   : > { %v5845_v2 = vpop.xlane.xlu0 %5844 }
 0xad9   : > { %v5962_v29 = vadd.f32 1e-12, %v5930_v37  ;;  %v5931_v61 = vmax.f32 %v5915_v20, 0.0  ;;  %v5916_v4 = vsub.f32 %v5884_v7, %v5900_v58  ;;  %v5885_v51 = vmul.f32 0.03125, %v5845_v2 }
 0xada   : > { %v5949_v2 = vsub.f32 %v16350_v30, %v16500_v47 }
 0xadb   : > { %13857 = vrsqrt.f32 %v5962_v29  ;;  %v5963_v3 = vadd.f32 1e-12, %v5931_v61  ;;  %v5932_v54 = vmax.f32 %v5916_v4, 0.0  ;;  %v5917_v25 = vsub.f32 %v5885_v51, %v5901_v50  ;;  %v5774_v12 = vpop.xlane.xlu1 %5773 }
 0xadc   : > { %v16511_v59 = vmul.f32 0.03125, %v5774_v12 }
 0xadd   : > { %13859 = vrsqrt.f32 %v5963_v3  ;;  %v5964_v16 = vadd.f32 1e-12, %v5932_v54  ;;  %v5933_v9 = vmax.f32 %v5917_v25, 0.0  ;;  %v5777_v41 = vpop.xlane.xlu0 %5776  ;;  %v16536_v3 = vld [vmem:[%s18529_s6 + $0x8] ss:$0 sm:$0xff] }
 0xade   : > { %v5904_v58 = vmul.f32 %v16511_v59, %v16511_v59  ;;  %v16528_v37 = vmul.f32 0.03125, %v5777_v41 }
 0xadf   : > { %13861 = vrsqrt.f32 %v5964_v16  ;;  %v5965_v39 = vadd.f32 1e-12, %v5933_v9  ;;  %v5768_v14 = vpop.xlane.xlu1 %5767 }
 0xae0   : > { %v16506_v1 = vmul.f32 0.03125, %v5768_v14  ;;  %v5905_v25 = vmul.f32 %v16528_v37, %v16528_v37 }
 0xae1   : > { %13863 = vrsqrt.f32 %v5965_v39  ;;  %v5771_v44 = vpop.xlane.xlu0 %5770 }
 0xae2   : > { %v16509_v15 = vmul.f32 0.03125, %v5771_v44  ;;  %v5902_v60 = vmul.f32 %v16506_v1, %v16506_v1 }
 0xae3   : > { %v5848_v62 = vpop.xlane.xlu1 %5847 }
 0xae4   : > { %v5886_v8 = vmul.f32 0.03125, %v5848_v62  ;;  %v5903_v55 = vmul.f32 %v16509_v15, %v16509_v15 }
 0xae5   : > { %v13858_v49 = vpop.eup %13857  ;;  %v5851_v63 = vpop.xlane.xlu0 %5850 }
 0xae6   : > { %v5918_v45 = vsub.f32 %v5886_v8, %v5902_v60  ;;  %v5887_v57 = vmul.f32 0.03125, %v5851_v63  ;;  %v5994_v46 = vmul.f32 %v13858_v49, %v5946_v13 }
 0xae7   : > { %v13860_v36 = vpop.eup %13859  ;;  %v5854_v5 = vpop.xlane.xlu1 %5853 }
 0xae8   : > { %v5934_v20 = vmax.f32 %v5918_v45, 0.0  ;;  %v5919_v7 = vsub.f32 %v5887_v57, %v5903_v55  ;;  %v5888_v31 = vmul.f32 0.03125, %v5854_v5  ;;  %v5995_v34 = vmul.f32 %v13860_v36, %v5947_v28 }
 0xae9   : > { %v13862_v50 = vpop.eup %13861  ;;  %v5857_v29 = vpop.xlane.xlu0 %5856  ;;  %v6014_v61 = vmul.f32 %v16519_v42, %v5994_v46  ;;  %v5950_v46 = vsub.f32 %v16383_v24, %v16506_v1  ;;  %v5951_v5 = vsub.f32 %v16391_v21, %v16509_v15  ;;  %v5952_v24 = vsub.f32 %v16378_v10, %v16511_v59 }
 0xaea   : > { %v5996_v4 = vmul.f32 %v13862_v50, %v5948_v11  ;;  %v5966_v51 = vadd.f32 1e-12, %v5934_v20  ;;  %v5935_v35 = vmax.f32 %v5919_v7, 0.0  ;;  %v5920_v38 = vsub.f32 %v5888_v31, %v5904_v58 }
 0xaeb   : > { %v13864_v54 = vpop.eup %13863  ;;  %v5889_v12 = vmul.f32 0.03125, %v5857_v29  ;;  %v6015_v16 = vmul.f32 %v16519_v42, %v5995_v34  ;;  %v16543_v14 = vadd.f32 %v16536_v3, %v6014_v61  ;;  %v5953_v21 = vsub.f32 %v16386_v33, %v16528_v37 }
 0xaec   : > { %v6016_v30 = vmul.f32 %v16519_v42, %v5996_v4  ;;  %v5997_v47 = vmul.f32 %v13864_v54, %v5949_v2  ;;  %13865 = vrsqrt.f32 %v5966_v51  ;;  %v5967_v9 = vadd.f32 1e-12, %v5935_v35 }
 0xaed   : > { %v5936_v41 = vmax.f32 %v5920_v38, 0.0  ;;  %v5921_v39 = vsub.f32 %v5889_v12, %v5905_v25  ;;  %18672 = vst [vmem:[#allocation27_spill] sm:$0xff] %v16543_v14  ;;  %v16546_v44 = vadd.f32 %v16536_v3, %v6015_v16 }
 0xaee   : > { %v6017_v62 = vmul.f32 %v16519_v42, %v5997_v47  ;;  %13867 = vrsqrt.f32 %v5967_v9  ;;  %v16552_v49 = vadd.f32 %v16536_v3, %v6016_v30 }
 0xaef   : > { %18673 = vst [vmem:[#allocation43_spill] sm:$0xff] %v16546_v44  ;;  %v5968_v13 = vadd.f32 1e-12, %v5936_v41  ;;  %v5937_v60 = vmax.f32 %v5921_v39, 0.0  ;;  %v6053_v8 = vpack.c.bf16 %v16546_v44, %v16543_v14 }
 0xaf0   : > { %18674 = vst [vmem:[#allocation29_spill] sm:$0xff] %v16552_v49  ;;  %v16555_v28 = vadd.f32 %v16536_v3, %v6017_v62 }
 0xaf1   : > { %13869 = vrsqrt.f32 %v5968_v13  ;;  %v5969_v63 = vadd.f32 1e-12, %v5937_v60  ;;  %12750 = vmatprep.mubr.msk.bf16.mxu1 %vm395_vm1, %v6053_v8  ;;  %v5786_v55 = vpop.xlane.xlu1 %5785 }
 0xaf2   : > { %18675 = vst [vmem:[#allocation31_spill] sm:$0xff] %v16555_v28  ;;  %v6054_v45 = vpack.c.bf16 %v16555_v28, %v16552_v49  ;;  %v16569_v50 = vmul.f32 0.03125, %v5786_v55 }
 0xaf3   : > { %13871 = vrsqrt.f32 %v5969_v63  ;;  %v5789_v57 = vpop.xlane.xlu0 %5788 }
 0xaf4   : > { %12751 = vmatmul.mubr.msk.bf16.vlgmr.msra.gmra.mrb[152].mxu1 %vm395_vm1, %v6054_v45  ;;  %v16578_v15 = vmul.f32 0.03125, %v5789_v57  ;;  %v5908_v59 = vmul.f32 %v16569_v50, %v16569_v50 }
 0xaf5   : > { %v5780_v36 = vpop.xlane.xlu1 %5779 }
 0xaf6   : > { %v13866_v11 = vpop.eup %13865  ;;  %v16563_v58 = vmul.f32 0.03125, %v5780_v36  ;;  %v5909_v62 = vmul.f32 %v16578_v15, %v16578_v15 }
 0xaf7   : > { %v5783_v20 = vpop.xlane.xlu0 %5782  ;;  %v5998_v7 = vmul.f32 %v13866_v11, %v5950_v46 }
 0xaf8   : > { %v13868_v31 = vpop.eup %13867  ;;  %v16567_v34 = vmul.f32 0.03125, %v5783_v20  ;;  %v5906_v1 = vmul.f32 %v16563_v58, %v16563_v58 }
 0xaf9   : > { %v5860_v2 = vpop.xlane.xlu1 %5859  ;;  %v5999_v29 = vmul.f32 %v13868_v31, %v5951_v5  ;;  %v6018_v61 = vmul.f32 %v16519_v42, %v5998_v7 }
 0xafa   : > { %v5890_v4 = vmul.f32 0.03125, %v5860_v2  ;;  %v5907_v54 = vmul.f32 %v16567_v34, %v16567_v34 }
 0xafb   : > { %v13870_v51 = vpop.eup %13869  ;;  %v5863_v35 = vpop.xlane.xlu0 %5862  ;;  %v6019_v38 = vmul.f32 %v16519_v42, %v5999_v29  ;;  %v16586_v47 = vadd.f32 %v16536_v3, %v6018_v61 }
 0xafc   : > { %v5922_v25 = vsub.f32 %v5890_v4, %v5906_v1  ;;  %v5891_v12 = vmul.f32 0.03125, %v5863_v35  ;;  %v6000_v16 = vmul.f32 %v13870_v51, %v5952_v24 }
 0xafd   : > { %v13872_v10 = vpop.eup %13871  ;;  %v5866_v30 = vpop.xlane.xlu1 %5865  ;;  %18676 = vst [vmem:[#allocation28_spill] sm:$0xff] %v16586_v47  ;;  %v16589_v33 = vadd.f32 %v16536_v3, %v6019_v38 }
 0xafe   : > { %v5938_v37 = vmax.f32 %v5922_v25, 0.0  ;;  %v5923_v9 = vsub.f32 %v5891_v12, %v5907_v54  ;;  %v5892_v41 = vmul.f32 0.03125, %v5866_v30  ;;  %v6001_v39 = vmul.f32 %v13872_v10, %v5953_v21 }
 0xaff   : > { %18677 = vst [vmem:[#allocation33_spill] sm:$0xff] %v16589_v33  ;;  %v5869_v13 = vpop.xlane.xlu0 %5868  ;;  %v6055_v60 = vpack.c.bf16 %v16589_v33, %v16586_v47  ;;  %v6020_v8 = vmul.f32 %v16519_v42, %v6000_v16  ;;  %v5954_v16 = vsub.f32 %v16419_v43, %v16563_v58  ;;  %v5956_v43 = vsub.f32 %v16414_v17, %v16569_v50 }
 0xb00   : > { %v5970_v63 = vadd.f32 1e-12, %v5938_v37  ;;  %v5939_v55 = vmax.f32 %v5923_v9, 0.0  ;;  %v5924_v45 = vsub.f32 %v5892_v41, %v5908_v59  ;;  %v5893_v57 = vmul.f32 0.03125, %v5869_v13 }
 0xb01   : > { %12754 = vmatprep.mubr.msk.bf16.mxu1 %vm395_vm1, %v6055_v60  ;;  %v5798_v46 = vpop.xlane.xlu1 %5797  ;;  %v6021_v36 = vmul.f32 %v16519_v42, %v6001_v39  ;;  %v16599_v31 = vadd.f32 %v16536_v3, %v6020_v8  ;;  %v5955_v39 = vsub.f32 %v16427_v23, %v16567_v34 }
 0xb02   : > { %13873 = vrsqrt.f32 %v5970_v63  ;;  %v5971_v11 = vadd.f32 1e-12, %v5939_v55  ;;  %v5940_v5 = vmax.f32 %v5924_v45, 0.0  ;;  %v5925_v20 = vsub.f32 %v5893_v57, %v5909_v62 }
 0xb03   : > { %v5801_v7 = vpop.xlane.xlu0 %5800  ;;  %18678 = vst [vmem:[#allocation30_spill] sm:$0xff] %v16599_v31  ;;  %v16602_v2 = vadd.f32 %v16536_v3, %v6021_v36  ;;  %v16607_v54 = vmul.f32 0.03125, %v5798_v46 }
 0xb04   : > { %13875 = vrsqrt.f32 %v5971_v11  ;;  %v5972_v29 = vadd.f32 1e-12, %v5940_v5  ;;  %v5941_v61 = vmax.f32 %v5925_v20, 0.0  ;;  %v16611_v10 = vmul.f32 0.03125, %v5801_v7 }
 0xb05   : > { %18679 = vst [vmem:[#allocation34_spill] sm:$0xff] %v16602_v2  ;;  %v6056_v24 = vpack.c.bf16 %v16602_v2, %v16599_v31  ;;  %v5792_v1 = vpop.xlane.xlu1 %5791  ;;  %v5912_v8 = vmul.f32 %v16607_v54, %v16607_v54  ;;  %v5957_v7 = vsub.f32 %v16422_v0, %v16578_v15 }
 0xb06   : > { %13877 = vrsqrt.f32 %v5972_v29  ;;  %v5973_v4 = vadd.f32 1e-12, %v5941_v61  ;;  %v5814_v51 = vmul.f32 0.03125, %v5792_v1  ;;  %v5913_v58 = vmul.f32 %v16611_v10, %v16611_v10 }
 0xb07   : > { %12755 = vmatmul.mubr.msk.bf16.gmra.mrb[156].mxu1 %vm395_vm1, %v6056_v24  ;;  %v5795_v21 = vpop.xlane.xlu0 %5794 }
 0xb08   : > { %13879 = vrsqrt.f32 %v5973_v4  ;;  %v5815_v35 = vmul.f32 0.03125, %v5795_v21  ;;  %v5910_v25 = vmul.f32 %v5814_v51, %v5814_v51 }
 0xb09   : > { %v5872_v38 = vpop.xlane.xlu1 %5871 }
 0xb0a   : > { %v5894_v12 = vmul.f32 0.03125, %v5872_v38  ;;  %v5911_v37 = vmul.f32 %v5815_v35, %v5815_v35 }
 0xb0b   : > { %v5875_v59 = vpop.xlane.xlu0 %5874 }
 0xb0c   : > { %v13874_v30 = vpop.eup %13873  ;;  %v5926_v9 = vsub.f32 %v5894_v12, %v5910_v25  ;;  %v5895_v41 = vmul.f32 0.03125, %v5875_v59 }
 0xb0d   : > { %v5878_v62 = vpop.xlane.xlu1 %5877  ;;  %v6002_v13 = vmul.f32 %v13874_v30, %v5954_v16 }
 0xb0e   : > { %v13876_v60 = vpop.eup %13875  ;;  %v5942_v63 = vmax.f32 %v5926_v9, 0.0  ;;  %v5927_v55 = vsub.f32 %v5895_v41, %v5911_v37  ;;  %v5896_v45 = vmul.f32 0.03125, %v5878_v62  ;;  %v5958_v41 = vsub.f32 %v16458_v26, %v5814_v51 }
 0xb0f   : > { %v5881_v57 = vpop.xlane.xlu0 %5880  ;;  %v6003_v46 = vmul.f32 %v13876_v60, %v5955_v39  ;;  %v6022_v36 = vmul.f32 %v16519_v42, %v6002_v13  ;;  %v5959_v62 = vsub.f32 %v16469_v53, %v5815_v35 }
 0xb10   : > { %v13878_v23 = vpop.eup %13877  ;;  %v5974_v34 = vadd.f32 1e-12, %v5942_v63  ;;  %v5943_v11 = vmax.f32 %v5927_v55, 0.0  ;;  %v5928_v5 = vsub.f32 %v5896_v45, %v5912_v8  ;;  %v5897_v20 = vmul.f32 0.03125, %v5881_v57 }
 0xb11   : > { %v6023_v29 = vmul.f32 %v16519_v42, %v6003_v46  ;;  %v6004_v61 = vmul.f32 %v13878_v23, %v5956_v43  ;;  %v16626_v4 = vadd.f32 %v16536_v3, %v6022_v36  ;;  %v5960_v8 = vsub.f32 %v16452_v18, %v16607_v54  ;;  %v18688_v23 = vld [vmem:[#allocation10_spill] sm:$0xff] }
 0xb12   : > { %v13880_v24 = vpop.eup %13879  ;;  %13881 = vrsqrt.f32 %v5974_v34  ;;  %v5975_v17 = vadd.f32 1e-12, %v5943_v11  ;;  %v5944_v50 = vmax.f32 %v5928_v5, 0.0  ;;  %v5929_v1 = vsub.f32 %v5897_v20, %v5913_v58 }
 0xb13   : > { %18680 = vst [vmem:[#allocation32_spill] sm:$0xff] %v16626_v4  ;;  %v16629_v21 = vadd.f32 %v16536_v3, %v6023_v29  ;;  %v6005_v38 = vmul.f32 %v13880_v24, %v5957_v7  ;;  %v6024_v25 = vmul.f32 %v16519_v42, %v6004_v61  ;;  %v5961_v43 = vsub.f32 %v16461_v27, %v16611_v10 }
 0xb14   : > { %13883 = vrsqrt.f32 %v5975_v17  ;;  %v5976_v12 = vadd.f32 1e-12, %v5944_v50  ;;  %v5945_v0 = vmax.f32 %v5929_v1, 0.0  ;;  %v16677_v34 = vrot.slane %v16493_v6, %v18688_v23 }
 0xb15   : > { %18681 = vst [vmem:[#allocation36_spill] sm:$0xff] %v16629_v21  ;;  %v6057_v15 = vpack.c.bf16 %v16629_v21, %v16626_v4  ;;  %v6025_v16 = vmul.f32 %v16519_v42, %v6005_v38  ;;  %v16637_v30 = vadd.f32 %v16536_v3, %v6024_v25 }
 0xb16   : > { %13885 = vrsqrt.f32 %v5976_v12  ;;  %v5977_v59 = vadd.f32 1e-12, %v5945_v0 }
 0xb17   : > { %12758 = vmatprep.mubr.msk.bf16.mxu1 %vm395_vm1, %v6057_v15  ;;  %18682 = vst [vmem:[#allocation35_spill] sm:$0xff] %v16637_v30  ;;  %v16640_v37 = vadd.f32 %v16536_v3, %v6025_v16 }
 0xb18   : > { %13887 = vrsqrt.f32 %v5977_v59 }
 0xb19   : > { %18683 = vst [vmem:[#allocation38_spill] sm:$0xff] %v16640_v37  ;;  %v6058_v9 = vpack.c.bf16 %v16640_v37, %v16637_v30 }
 0xb1b   : > { %12759 = vmatmul.mubr.msk.bf16.gmra.mrb[160].mxu1 %vm395_vm1, %v6058_v9 }
 0xb1c   : > { %v13882_v39 = vpop.eup %13881 }
 0xb1d   : > { %v6006_v13 = vmul.f32 %v13882_v39, %v5958_v41 }
 0xb1e   : > { %v13884_v60 = vpop.eup %13883 }
 0xb1f   : > { %v6007_v63 = vmul.f32 %v13884_v60, %v5959_v62  ;;  %v6026_v55 = vmul.f32 %v16519_v42, %v6006_v13 }
 0xb20   : > { %v13886_v45 = vpop.eup %13885 }
 0xb21   : > { %v6027_v58 = vmul.f32 %v16519_v42, %v6007_v63  ;;  %v6008_v26 = vmul.f32 %v13886_v45, %v5960_v8  ;;  %v16654_v57 = vadd.f32 %v16536_v3, %v6026_v55 }
 0xb22   : > { %v13888_v51 = vpop.eup %13887 }
 0xb23   : > { %18684 = vst [vmem:[#allocation37_spill] sm:$0xff] %v16654_v57  ;;  %v16657_v53 = vadd.f32 %v16536_v3, %v6027_v58  ;;  %v6009_v35 = vmul.f32 %v13888_v51, %v5961_v43  ;;  %v6028_v18 = vmul.f32 %v16519_v42, %v6008_v26 }
 0xb25   : > { %18685 = vst [vmem:[#allocation40_spill] sm:$0xff] %v16657_v53  ;;  %v6059_v54 = vpack.c.bf16 %v16657_v53, %v16654_v57  ;;  %v6029_v46 = vmul.f32 %v16519_v42, %v6009_v35  ;;  %v16665_v27 = vadd.f32 %v16536_v3, %v6028_v18  ;;  %v16679_v42 = vpop.permute.xlu1 %6240 }
 0xb27   : > { %12762 = vmatprep.mubr.msk.bf16.mxu1 %vm395_vm1, %v6059_v54  ;;  %18686 = vst [vmem:[#allocation39_spill] sm:$0xff] %v16665_v27  ;;  %v16668_v10 = vadd.f32 %v16536_v3, %v6029_v46 }
 0xb29   : > { %18687 = vst [vmem:[#allocation41_spill] sm:$0xff] %v16668_v10  ;;  %v6060_v36 = vpack.c.bf16 %v16668_v10, %v16665_v27 }
 0xb2b   : > { %12763 = vmatmul.mubr.msk.bf16.gmra.mrb[164].mxu1 %vm395_vm1, %v6060_v36 }
 0xb2c   : > { %12774 = vmatprep.mubr.msk.bf16.mxu1 %vm14222_vm2, %v18612_v52 }
 0xbc7   : > { %v16681_v11 = vpop.f32.mrb[152].mxu1 }
 0xbc8   : > { %v6205_v3 = vadd.f32 %v16681_v11, %v16677_v34  ;;  %v16685_v5 = vpop.f32.mrb[153].mxu1  ;;  %v6245_v6 = vadd.f32 %v16681_v11, %v16679_v42 }
 0xbc9   : > { %v6203_v20 = vadd.f32 %v16677_v34, %v16685_v5  ;;  %v6243_v7 = vadd.f32 %v16679_v42, %v16685_v5  ;;  %v16691_v29 = vpop.f32.mrb[154].mxu1 }
 0xbca   : > { %v6246_v61 = vadd.f32 %v16691_v29, %v16679_v42  ;;  %v6206_v24 = vadd.f32 %v16691_v29, %v16677_v34  ;;  %v16699_v17 = vpop.f32.mrb[155].mxu1  ;;  %v16705_v25 = vmul.f32 0.25, %v6205_v3  ;;  %v6445_v39 = vpack.c.bf16 %v6245_v6, %v6245_v6 }
 0xbcb   : > { %v6443_v50 = vpack.c.bf16 %v6243_v7, %v6243_v7  ;;  %v6244_v1 = vadd.f32 %v16679_v42, %v16699_v17  ;;  %v6204_v38 = vadd.f32 %v16677_v34, %v16699_v17  ;;  %v16709_v15 = vmul.f32 0.25, %v6203_v20 }
 0xbcc   : > { %v13456_v12 = vpack.i.bf16 %v6246_v61, %v6245_v6  ;;  %v16707_v0 = vmul.f32 0.25, %v6206_v24  ;;  %v6446_v13 = vpack.c.bf16 %v6246_v61, %v6246_v61 }
 0xbcd   : > { %v13451_v16 = vpack.i.bf16 %v6244_v1, %v6243_v7  ;;  %v16711_v59 = vmul.f32 0.25, %v6204_v38  ;;  %v6444_v9 = vpack.c.bf16 %v6244_v1, %v6244_v1  ;;  %6572 = vrot.lane.b32.xlu0 %v6443_v50, %s14223_s14 }
 0xbcf   : > { %6621 = vrot.lane.b32.xlu1 %v6444_v9, %s14223_s14 }
 0xbd1   : > { %6670 = vrot.lane.b32.xlu0 %v6445_v39, %s14223_s14 }
 0xbd3   : > { %13452 = vrot.lane.b32.xlu1 %v13451_v16, %s14224_s16 }
 0xbd5   : > { %13457 = vrot.lane.b32.xlu0 %v13456_v12, %s14224_s16 }
 0xbd7   : > { %6719 = vrot.lane.b32.xlu1 %v6446_v13, %s14223_s14 }
 0xbda   : > { %v16723_v60 = vpop.f32.mrb[156].mxu1 }
 0xbdb   : > { %v6209_v8 = vadd.f32 %v16723_v60, %v16677_v34  ;;  %v16727_v63 = vpop.f32.mrb[157].mxu1  ;;  %v6249_v58 = vadd.f32 %v16723_v60, %v16679_v42 }
 0xbdc   : > { %v6207_v55 = vadd.f32 %v16677_v34, %v16727_v63  ;;  %v6247_v45 = vadd.f32 %v16679_v42, %v16727_v63  ;;  %v16733_v43 = vpop.f32.mrb[158].mxu1 }
 0xbdd   : > { %v6250_v26 = vadd.f32 %v16733_v43, %v16679_v42  ;;  %v6210_v51 = vadd.f32 %v16733_v43, %v16677_v34  ;;  %v16741_v35 = vpop.f32.mrb[159].mxu1  ;;  %v16747_v36 = vmul.f32 0.25, %v6209_v8  ;;  %v6449_v38 = vpack.c.bf16 %v6249_v58, %v6249_v58 }
 0xbde   : > { %v6447_v18 = vpack.c.bf16 %v6247_v45, %v6247_v45  ;;  %v6248_v54 = vadd.f32 %v16679_v42, %v16741_v35  ;;  %v6208_v46 = vadd.f32 %v16677_v34, %v16741_v35  ;;  %v16751_v7 = vmul.f32 0.25, %v6207_v55 }
 0xbdf   : > { %v13466_v3 = vpack.i.bf16 %v6250_v26, %v6249_v58  ;;  %v16749_v20 = vmul.f32 0.25, %v6210_v51  ;;  %v6450_v12 = vpack.c.bf16 %v6250_v26, %v6250_v26 }
 0xbe0   : > { %v13461_v6 = vpack.i.bf16 %v6248_v54, %v6247_v45  ;;  %v16753_v61 = vmul.f32 0.25, %v6208_v46  ;;  %v6448_v24 = vpack.c.bf16 %v6248_v54, %v6248_v54  ;;  %6768 = vrot.lane.b32.xlu1 %v6447_v18, %s14223_s14 }
 0xbe2   : > { %6817 = vrot.lane.b32.xlu0 %v6448_v24, %s14223_s14 }
 0xbe4   : > { %13462 = vrot.lane.b32.xlu1 %v13461_v6, %s14224_s16 }
 0xbe6   : > { %6866 = vrot.lane.b32.xlu0 %v6449_v38, %s14223_s14 }
 0xbe8   : > { %6915 = vrot.lane.b32.xlu1 %v6450_v12, %s14223_s14 }
 0xbea   : > { %13467 = vrot.lane.b32.xlu0 %v13466_v3, %s14224_s16 }
 0xbee   : > { %v16765_v16 = vpop.f32.mrb[160].mxu1 }
 0xbef   : > { %v6213_v9 = vadd.f32 %v16765_v16, %v16677_v34  ;;  %v16769_v39 = vpop.f32.mrb[161].mxu1  ;;  %v6253_v45 = vadd.f32 %v16765_v16, %v16679_v42 }
 0xbf0   : > { %v6211_v13 = vadd.f32 %v16677_v34, %v16769_v39  ;;  %v6251_v8 = vadd.f32 %v16679_v42, %v16769_v39  ;;  %v16775_v55 = vpop.f32.mrb[162].mxu1 }
 0xbf1   : > { %v6254_v58 = vadd.f32 %v16775_v55, %v16679_v42  ;;  %v6214_v26 = vadd.f32 %v16775_v55, %v16677_v34  ;;  %v16783_v51 = vpop.f32.mrb[163].mxu1  ;;  %v16789_v3 = vmul.f32 0.25, %v6213_v9  ;;  %v6453_v9 = vpack.c.bf16 %v6253_v45, %v6253_v45 }
 0xbf2   : > { %v6451_v18 = vpack.c.bf16 %v6251_v8, %v6251_v8  ;;  %v6252_v54 = vadd.f32 %v16679_v42, %v16783_v51  ;;  %v6212_v46 = vadd.f32 %v16677_v34, %v16783_v51  ;;  %v16793_v38 = vmul.f32 0.25, %v6211_v13 }
 0xbf3   : > { %v13476_v6 = vpack.i.bf16 %v6254_v58, %v6253_v45  ;;  %v16791_v24 = vmul.f32 0.25, %v6214_v26  ;;  %v6454_v26 = vpack.c.bf16 %v6254_v58, %v6254_v58 }
 0xbf4   : > { %v13471_v12 = vpack.i.bf16 %v6252_v54, %v6251_v8  ;;  %v16795_v19 = vmul.f32 0.25, %v6212_v46  ;;  %v6452_v48 = vpack.c.bf16 %v6252_v54, %v6252_v54  ;;  %6964 = vrot.lane.b32.xlu1 %v6451_v18, %s14223_s14 }
 0xbf6   : > { %7013 = vrot.lane.b32.xlu0 %v6452_v48, %s14223_s14 }
 0xbf8   : > { %13472 = vrot.lane.b32.xlu1 %v13471_v12, %s14224_s16 }
 0xbfa   : > { %7062 = vrot.lane.b32.xlu0 %v6453_v9, %s14223_s14 }
 0xbfc   : > { %7111 = vrot.lane.b32.xlu1 %v6454_v26, %s14223_s14 }
 0xbfe   : > { %13477 = vrot.lane.b32.xlu0 %v13476_v6, %s14224_s16  ;;  %v16807_v13 = vpop.f32.mrb[164].mxu1 }
 0xbff   : > { %v6217_v8 = vadd.f32 %v16807_v13, %v16677_v34  ;;  %v16811_v18 = vpop.f32.mrb[165].mxu1  ;;  %v6257_v54 = vadd.f32 %v16807_v13, %v16679_v42 }
 0xc00   : > { %v6215_v48 = vadd.f32 %v16677_v34, %v16811_v18  ;;  %v6255_v45 = vadd.f32 %v16679_v42, %v16811_v18  ;;  %v16817_v58 = vpop.f32.mrb[166].mxu1 }
 0xc01   : > { %v6258_v46 = vadd.f32 %v16817_v58, %v16679_v42  ;;  %v6218_v6 = vadd.f32 %v16817_v58, %v16677_v34  ;;  %v16825_v12 = vpop.f32.mrb[167].mxu1  ;;  %v16831_v40 = vmul.f32 0.25, %v6217_v8 }
 0xc02   : > { %v6455_v9 = vpack.c.bf16 %v6255_v45, %v6255_v45  ;;  %v6256_v26 = vadd.f32 %v16679_v42, %v16825_v12  ;;  %v6216_v32 = vadd.f32 %v16677_v34, %v16825_v12  ;;  %v16835_v1 = vmul.f32 0.25, %v6215_v48 }
 0xc03   : > { %v13486_v22 = vpack.i.bf16 %v6258_v46, %v6257_v54  ;;  %v16833_v50 = vmul.f32 0.25, %v6218_v6  ;;  %v6457_v34 = vpack.c.bf16 %v6257_v54, %v6257_v54  ;;  %v6458_v8 = vpack.c.bf16 %v6258_v46, %v6258_v46 }
 0xc04   : > { %v13481_v41 = vpack.i.bf16 %v6256_v26, %v6255_v45  ;;  %v16837_v62 = vmul.f32 0.25, %v6216_v32  ;;  %v6456_v23 = vpack.c.bf16 %v6256_v26, %v6256_v26  ;;  %7160 = vrot.lane.b32.xlu1 %v6455_v9, %s14223_s14  ;;  %v6347_v54 = vpack.c.bf16 %v16709_v15, %v16709_v15 }
 0xc05   : > { %v13526_v53 = vpack.i.bf16 %v16833_v50, %v16831_v40  ;;  %v6348_v26 = vpack.c.bf16 %v16711_v59, %v16711_v59 }
 0xc06   : > { %v13521_v42 = vpack.i.bf16 %v16837_v62, %v16835_v1  ;;  %7209 = vrot.lane.b32.xlu0 %v6456_v23, %s14223_s14 }
 0xc08   : > { %13482 = vrot.lane.b32.xlu1 %v13481_v41, %s14224_s16 }
 0xc0a   : > { %7258 = vrot.lane.b32.xlu0 %v6457_v34, %s14223_s14 }
 0xc0c   : > { %7307 = vrot.lane.b32.xlu1 %v6458_v8, %s14223_s14 }
 0xc0e   : > { %13487 = vrot.lane.b32.xlu0 %v13486_v22, %s14224_s16 }
 0xc3f   : > { %v6573_v32 = vpop.permute.xlu0 %6572 }
 0xc40   : > { %v6578_v48 = vsel %vm1215_vm3, %v6573_v32, 0 }
 0xc41   : > { %v6622_v45 = vpop.permute.xlu1 %6621  ;;  %12767 = vmatpush3.bf16.xpose.msra.mxu0 %v6578_v48 }
 0xc42   : > { %v6627_v6 = vsel %vm1215_vm3, %v6622_v45, 0  ;;  %12778 = vmatprep.subr.bf16.mxu0 %v18612_v52 }
 0xc43   : > { %12773 = vmatpush3.bf16.xpose.msra.mxu1 %v6627_v6  ;;  %v6671_v23 = vpop.permute.xlu0 %6670 }
 0xc44   : > { %12784 = vmatprep.subr.bf16.mxu1 %v18612_v52  ;;  %v6676_v34 = vsel %vm1215_vm3, %v6671_v23, 0 }
 0xc45   : > { %v13453_v41 = vpop.permute.xlu1 %13452 }
 0xc46   : > { %v13455_v46 = vunpack.i.h.bf16 %v13453_v41  ;;  %v13454_v9 = vunpack.i.l.bf16 %v13453_v41 }
 0xc47   : > { %v13458_v22 = vpop.permute.xlu0 %13457 }
 0xc48   : > { %v6460_v8 = vpack.c.bf16 %v13455_v46, %v13455_v46  ;;  %v6459_v32 = vpack.c.bf16 %v13454_v9, %v13454_v9  ;;  %12769 = vmatmul.mubr.msk.bf16.vlgmr.msra.gmra.mrb[168].mxu0 %vm1215_vm3, %v6347_v54  ;;  %v13459_v48 = vunpack.i.l.bf16 %v13458_v22  ;;  %v13460_v23 = vunpack.i.h.bf16 %v13458_v22 }
 0xc49   : > { %v6720_v45 = vpop.permute.xlu1 %6719  ;;  %12779 = vmatpush3.bf16.xpose.msra.mxu0 %v6676_v34  ;;  %12780 = vmatprep.mubr.msk.bf16.mxu0 %vm14222_vm2, %v18612_v52  ;;  %v6349_v54 = vpack.c.bf16 %v16705_v25, %v16705_v25  ;;  %v18689_v46 = vpack.i.bf16 %v16711_v59, %v16709_v15  ;;  %v6350_v9 = vpack.c.bf16 %v16707_v0, %v16707_v0 }
 0xc4a   : > { %v6725_v6 = vsel %vm1215_vm3, %v6720_v45, 0  ;;  %12775 = vmatmul.mubr.msk.bf16.vlgmr.msra.gmra.mrb[168].mxu1 %vm1215_vm3, %v6348_v26  ;;  %7356 = vrot.lane.b32.xlu1 %v6459_v32, %s14223_s14  ;;  %v6461_v41 = vpack.c.bf16 %v13459_v48, %v13459_v48  ;;  %v6462_v22 = vpack.c.bf16 %v13460_v23, %v13460_v23  ;;  %v18690_v15 = vpack.i.bf16 %v16707_v0, %v16705_v25 }
 0xc4b   : > { %7405 = vrot.lane.b32.xlu0 %v6460_v8, %s14223_s14  ;;  %12785 = vmatpush3.bf16.xpose.msra.mxu1 %v6725_v6  ;;  %v6351_v25 = vpack.c.bf16 %v16751_v7, %v16751_v7 }
 0xc4c   : > { %12790 = vmatprep.subr.bf16.mxu0 %v18612_v52  ;;  %12786 = vmatprep.mubr.msk.bf16.mxu1 %vm14222_vm2, %v18612_v52 }
 0xc4d   : > { %12796 = vmatprep.subr.bf16.mxu1 %v18612_v52 }
 0xc4e   : > { %13492 = vrot.lane.b32.xlu1 %v18689_v46, %s14224_s16 }
 0xc4f   : > { %7454 = vrot.lane.b32.xlu0 %v6461_v41, %s14223_s14 }
 0xc50   : > { %12781 = vmatmul.mubr.msk.bf16.vlgmr.msra.gmra.mrb[172].mxu0 %vm1215_vm3, %v6349_v54  ;;  %v6352_v54 = vpack.c.bf16 %v16753_v61, %v16753_v61 }
 0xc51   : > { %12792 = vmatprep.mubr.msk.bf16.mxu0 %vm14222_vm2, %v18612_v52 }
 0xc52   : > { %v6769_v26 = vpop.permute.xlu1 %6768  ;;  %12787 = vmatmul.mubr.msk.bf16.vlgmr.msra.gmra.mrb[172].mxu1 %vm1215_vm3, %v6350_v9  ;;  %7503 = vrot.lane.b32.xlu1 %v6462_v22, %s14223_s14 }
 0xc53   : > { %v6774_v34 = vsel %vm1215_vm3, %v6769_v26, 0  ;;  %13497 = vrot.lane.b32.xlu0 %v18690_v15, %s14224_s16  ;;  %12798 = vmatprep.mubr.msk.bf16.mxu1 %vm14222_vm2, %v18612_v52 }
 0xc54   : > { %12791 = vmatpush3.bf16.xpose.msra.mxu0 %v6774_v34  ;;  %v6818_v59 = vpop.permute.xlu0 %6817 }
 0xc55   : > { %v6823_v8 = vsel %vm1215_vm3, %v6818_v59, 0  ;;  %12802 = vmatprep.subr.bf16.mxu0 %v18612_v52  ;;  %v18691_v59 = vpack.i.bf16 %v16753_v61, %v16751_v7  ;;  %v18692_v7 = vpack.i.bf16 %v16749_v20, %v16747_v36 }
 0xc56   : > { %v13463_v32 = vpop.permute.xlu1 %13462  ;;  %12797 = vmatpush3.bf16.xpose.msra.mxu1 %v6823_v8  ;;  %v6353_v8 = vpack.c.bf16 %v16747_v36, %v16747_v36 }
 0xc57   : > { %v13465_v48 = vunpack.i.h.bf16 %v13463_v32  ;;  %v13464_v45 = vunpack.i.l.bf16 %v13463_v32  ;;  %12808 = vmatprep.subr.bf16.mxu1 %v18612_v52 }
 0xc58   : > { %v6867_v6 = vpop.permute.xlu0 %6866 }
 0xc59   : > { %v6464_v0 = vpack.c.bf16 %v13465_v48, %v13465_v48  ;;  %v6463_v23 = vpack.c.bf16 %v13464_v45, %v13464_v45  ;;  %v6872_v46 = vsel %vm1215_vm3, %v6867_v6, 0  ;;  %v6354_v48 = vpack.c.bf16 %v16749_v20, %v16749_v20 }
 0xc5a   : > { %v6916_v41 = vpop.permute.xlu1 %6915  ;;  %v6355_v20 = vpack.c.bf16 %v16793_v38, %v16793_v38 }
 0xc5b   : > { %12793 = vmatmul.mubr.msk.bf16.vlgmr.msra.gmra.mrb[176].mxu0 %vm1215_vm3, %v6351_v25  ;;  %7552 = vrot.lane.b32.xlu1 %v6463_v23, %s14223_s14  ;;  %v6921_v22 = vsel %vm1215_vm3, %v6916_v41, 0 }
 0xc5c   : > { %7601 = vrot.lane.b32.xlu0 %v6464_v0, %s14223_s14  ;;  %12803 = vmatpush3.bf16.xpose.msra.mxu0 %v6872_v46  ;;  %v13468_v9 = vpop.permute.xlu0 %13467 }
 0xc5d   : > { %v13470_v26 = vunpack.i.h.bf16 %v13468_v9  ;;  %v13469_v34 = vunpack.i.l.bf16 %v13468_v9  ;;  %12799 = vmatmul.mubr.msk.bf16.vlgmr.msra.gmra.mrb[176].mxu1 %vm1215_vm3, %v6352_v54  ;;  %12804 = vmatprep.mubr.msk.bf16.mxu0 %vm14222_vm2, %v18612_v52 }
 0xc5e   : > { %12809 = vmatpush3.bf16.xpose.msra.mxu1 %v6921_v22  ;;  %12810 = vmatprep.mubr.msk.bf16.mxu1 %vm14222_vm2, %v18612_v52  ;;  %v6356_v22 = vpack.c.bf16 %v16795_v19, %v16795_v19 }
 0xc5f   : > { %v6465_v15 = vpack.c.bf16 %v13469_v34, %v13469_v34  ;;  %13502 = vrot.lane.b32.xlu1 %v18691_v59, %s14224_s16  ;;  %12814 = vmatprep.subr.bf16.mxu0 %v18612_v52  ;;  %v6466_v32 = vpack.c.bf16 %v13470_v26, %v13470_v26 }
 0xc60   : > { %12820 = vmatprep.subr.bf16.mxu1 %v18612_v52 }
 0xc61   : > { %7650 = vrot.lane.b32.xlu0 %v6465_v15, %s14223_s14 }
 0xc63   : > { %12805 = vmatmul.mubr.msk.bf16.vlgmr.msra.gmra.mrb[180].mxu0 %vm1215_vm3, %v6353_v8  ;;  %7699 = vrot.lane.b32.xlu1 %v6466_v32, %s14223_s14 }
 0xc64   : > { %12816 = vmatprep.mubr.msk.bf16.mxu0 %vm14222_vm2, %v18612_v52 }
 0xc65   : > { %12811 = vmatmul.mubr.msk.bf16.vlgmr.msra.gmra.mrb[180].mxu1 %vm1215_vm3, %v6354_v48  ;;  %13507 = vrot.lane.b32.xlu0 %v18692_v7, %s14224_s16  ;;  %v18693_v48 = vpack.i.bf16 %v16795_v19, %v16793_v38  ;;  %v6357_v7 = vpack.c.bf16 %v16789_v3, %v16789_v3 }
 0xc66   : > { %v6965_v61 = vpop.permute.xlu1 %6964  ;;  %12822 = vmatprep.mubr.msk.bf16.mxu1 %vm14222_vm2, %v18612_v52 }
 0xc67   : > { %v6970_v45 = vsel %vm1215_vm3, %v6965_v61, 0 }
 0xc68   : > { %12815 = vmatpush3.bf16.xpose.msra.mxu0 %v6970_v45  ;;  %v7014_v6 = vpop.permute.xlu0 %7013 }
 0xc69   : > { %v7019_v25 = vsel %vm1215_vm3, %v7014_v6, 0  ;;  %12826 = vmatprep.subr.bf16.mxu0 %v18612_v52  ;;  %v6358_v6 = vpack.c.bf16 %v16791_v24, %v16791_v24 }
 0xc6a   : > { %v13473_v0 = vpop.permute.xlu1 %13472  ;;  %12821 = vmatpush3.bf16.xpose.msra.mxu1 %v7019_v25 }
 0xc6b   : > { %v13475_v23 = vunpack.i.h.bf16 %v13473_v0  ;;  %v13474_v41 = vunpack.i.l.bf16 %v13473_v0  ;;  %12832 = vmatprep.subr.bf16.mxu1 %v18612_v52  ;;  %v18694_v0 = vpack.i.bf16 %v16791_v24, %v16789_v3  ;;  %v6360_v3 = vpack.c.bf16 %v16837_v62, %v16837_v62  ;;  %v14116_v62 = vld [vmem:[%s18529_s6 + $0x10] sm:$0xff] }
 0xc6c   : > { %v7063_v36 = vpop.permute.xlu0 %7062 }
 0xc6d   : > { %v6468_v54 = vpack.c.bf16 %v13475_v23, %v13475_v23  ;;  %v6467_v46 = vpack.c.bf16 %v13474_v41, %v13474_v41  ;;  %v7068_v26 = vsel %vm1215_vm3, %v7063_v36, 0 }
 0xc6e   : > { %v7112_v9 = vpop.permute.xlu1 %7111 }
 0xc6f   : > { %12817 = vmatmul.mubr.msk.bf16.vlgmr.msra.gmra.mrb[184].mxu0 %vm1215_vm3, %v6355_v20  ;;  %7748 = vrot.lane.b32.xlu1 %v6467_v46, %s14223_s14  ;;  %v7117_v15 = vsel %vm1215_vm3, %v7112_v9, 0 }
 0xc70   : > { %7797 = vrot.lane.b32.xlu0 %v6468_v54, %s14223_s14  ;;  %12827 = vmatpush3.bf16.xpose.msra.mxu0 %v7068_v26  ;;  %v13478_v34 = vpop.permute.xlu0 %13477  ;;  %v6359_v54 = vpack.c.bf16 %v16835_v1, %v16835_v1  ;;  %v18695_v1 = vsub.s32 2, %v18654_v56 }
 0xc71   : > { %v13480_v59 = vunpack.i.h.bf16 %v13478_v34  ;;  %v13479_v8 = vunpack.i.l.bf16 %v13478_v34  ;;  %12823 = vmatmul.mubr.msk.bf16.vlgmr.msra.gmra.mrb[184].mxu1 %vm1215_vm3, %v6356_v22  ;;  %12828 = vmatprep.mubr.msk.bf16.mxu0 %vm14222_vm2, %v18612_v52 }
 0xc72   : > { %12833 = vmatpush3.bf16.xpose.msra.mxu1 %v7117_v15  ;;  %12838 = vmatprep.subr.bf16.mxu0 %v18612_v52 }
 0xc73   : > { %v6469_v32 = vpack.c.bf16 %v13479_v8, %v13479_v8  ;;  %13512 = vrot.lane.b32.xlu1 %v18693_v48, %s14224_s16  ;;  %12834 = vmatprep.mubr.msk.bf16.mxu1 %vm14222_vm2, %v18612_v52  ;;  %v6470_v61 = vpack.c.bf16 %v13480_v59, %v13480_v59 }
 0xc74   : > { %12844 = vmatprep.subr.bf16.mxu1 %v18612_v52 }
 0xc75   : > { %7846 = vrot.lane.b32.xlu0 %v6469_v32, %s14223_s14  ;;  %v6361_v32 = vpack.c.bf16 %v16831_v40, %v16831_v40 }
 0xc76   : > { %v7161_v45 = vpop.permute.xlu1 %7160 }
 0xc77   : > { %v7166_v25 = vsel %vm1215_vm3, %v7161_v45, 0  ;;  %12829 = vmatmul.mubr.msk.bf16.vlgmr.msra.gmra.mrb[188].mxu0 %vm1215_vm3, %v6357_v7  ;;  %7895 = vrot.lane.b32.xlu1 %v6470_v61, %s14223_s14  ;;  %v6362_v7 = vpack.c.bf16 %v16833_v50, %v16833_v50 }
 0xc78   : > { %12839 = vmatpush3.bf16.xpose.msra.mxu0 %v7166_v25  ;;  %v7210_v19 = vpop.permute.xlu0 %7209  ;;  %12840 = vmatprep.mubr.msk.bf16.mxu0 %vm14222_vm2, %v18612_v52 }
 0xc79   : > { %v7215_v38 = vsel %vm1215_vm3, %v7210_v19, 0  ;;  %12835 = vmatmul.mubr.msk.bf16.vlgmr.msra.gmra.mrb[188].mxu1 %vm1215_vm3, %v6358_v6  ;;  %13517 = vrot.lane.b32.xlu0 %v18694_v0, %s14224_s16 }
 0xc7a   : > { %v13483_v23 = vpop.permute.xlu1 %13482  ;;  %12845 = vmatpush3.bf16.xpose.msra.mxu1 %v7215_v38  ;;  %12850 = vmatprep.subr.bf16.mxu0 %v18612_v52 }
 0xc7b   : > { %v13485_v41 = vunpack.i.h.bf16 %v13483_v23  ;;  %v13484_v36 = vunpack.i.l.bf16 %v13483_v23  ;;  %12846 = vmatprep.mubr.msk.bf16.mxu1 %vm14222_vm2, %v18612_v52  ;;  %12856 = vmatprep.subr.bf16.mxu1 %v18612_v52 }
 0xc7c   : > { %v7259_v20 = vpop.permute.xlu0 %7258 }
 0xc7d   : > { %v6472_v46 = vpack.c.bf16 %v13485_v41, %v13485_v41  ;;  %v6471_v9 = vpack.c.bf16 %v13484_v36, %v13484_v36  ;;  %v7264_v24 = vsel %vm1215_vm3, %v7259_v20, 0 }
 0xc7e   : > { %v7308_v22 = vpop.permute.xlu1 %7307 }
 0xc7f   : > { %12841 = vmatmul.mubr.msk.bf16.vlgmr.msra.gmra.mrb[192].mxu0 %vm1215_vm3, %v6359_v54  ;;  %7944 = vrot.lane.b32.xlu1 %v6471_v9, %s14223_s14  ;;  %v7313_v34 = vsel %vm1215_vm3, %v7308_v22, 0 }
 0xc80   : > { %7993 = vrot.lane.b32.xlu0 %v6472_v46, %s14223_s14  ;;  %12851 = vmatpush3.bf16.xpose.msra.mxu0 %v7264_v24  ;;  %v13488_v26 = vpop.permute.xlu0 %13487 }
 0xc81   : > { %v13490_v15 = vunpack.i.h.bf16 %v13488_v26  ;;  %v13489_v59 = vunpack.i.l.bf16 %v13488_v26  ;;  %12847 = vmatmul.mubr.msk.bf16.vlgmr.msra.gmra.mrb[192].mxu1 %vm1215_vm3, %v6360_v3  ;;  %12852 = vmatprep.mubr.msk.bf16.mxu0 %vm14222_vm2, %v18612_v52 }
 0xc82   : > { %12857 = vmatpush3.bf16.xpose.msra.mxu1 %v7313_v34  ;;  %12858 = vmatprep.mubr.msk.bf16.mxu1 %vm14222_vm2, %v18612_v52 }
 0xc83   : > { %v6473_v8 = vpack.c.bf16 %v13489_v59, %v13489_v59  ;;  %13522 = vrot.lane.b32.xlu1 %v13521_v42, %s14224_s16  ;;  %12862 = vmatprep.subr.bf16.mxu0 %v18612_v52  ;;  %v6474_v48 = vpack.c.bf16 %v13490_v15, %v13490_v15  ;;  %v6262_v42 = vrot.slane %v14116_v62, %v18695_v1 }
 0xc84   : > { %12868 = vmatprep.subr.bf16.mxu1 %v18612_v52 }
 0xc85   : > { %8042 = vrot.lane.b32.xlu0 %v6473_v8, %s14223_s14 }
 0xc87   : > { %12853 = vmatmul.mubr.msk.bf16.vlgmr.msra.gmra.mrb[196].mxu0 %vm1215_vm3, %v6361_v32  ;;  %8091 = vrot.lane.b32.xlu1 %v6474_v48, %s14223_s14  ;;  %s18696_s14 = smov 64  }
 0xc88   : > { %12864 = vmatprep.mubr.msk.bf16.mxu0 %vm14222_vm2, %v18612_v52 }
 0xc89   : > { %12859 = vmatmul.mubr.msk.bf16.vlgmr.msra.gmra.mrb[196].mxu1 %vm1215_vm3, %v6362_v7  ;;  %13527 = vrot.lane.b32.xlu0 %v13526_v53, %s14224_s16 }
 0xc8a   : > { %12870 = vmatprep.mubr.msk.bf16.mxu1 %vm14222_vm2, %v18612_v52 }
 0xc8d   : > { %6264 = vrot.lane.b32.xlu0 %v6262_v42, %s18696_s14 }
 0xcbc   : > { %v7357_v61 = vpop.permute.xlu1 %7356 }
 0xcbd   : > { %v7362_v45 = vsel %vm1215_vm3, %v7357_v61, 0  ;;  %v7406_v6 = vpop.permute.xlu0 %7405 }
 0xcbe   : > { %v7411_v25 = vsel %vm1215_vm3, %v7406_v6, 0  ;;  %12863 = vmatpush3.bf16.xpose.msra.mxu0 %v7362_v45 }
 0xcbf   : > { %12869 = vmatpush3.bf16.xpose.msra.mxu1 %v7411_v25  ;;  %12874 = vmatprep.subr.bf16.mxu0 %v18612_v52 }
 0xcc0   : > { %v13493_v40 = vpop.permute.xlu1 %13492  ;;  %12880 = vmatprep.subr.bf16.mxu1 %v18612_v52 }
 0xcc1   : > { %v13495_v53 = vunpack.i.h.bf16 %v13493_v40  ;;  %v13494_v50 = vunpack.i.l.bf16 %v13493_v40  ;;  %v7455_v19 = vpop.permute.xlu0 %7454 }
 0xcc2   : > { %v7460_v41 = vsel %vm1215_vm3, %v7455_v19, 0 }
 0xcc3   : > { %v6364_v38 = vpack.c.bf16 %v13495_v53, %v13495_v53  ;;  %v6363_v0 = vpack.c.bf16 %v13494_v50, %v13494_v50 }
 0xcc4   : > { %v7504_v23 = vpop.permute.xlu1 %7503 }
 0xcc5   : > { %v7509_v36 = vsel %vm1215_vm3, %v7504_v23, 0  ;;  %v13498_v20 = vpop.permute.xlu0 %13497  ;;  %12865 = vmatmul.mubr.msk.bf16.vlgmr.msra.gmra.mrb[200].mxu0 %vm1215_vm3, %v6363_v0 }
 0xcc6   : > { %12871 = vmatmul.mubr.msk.bf16.vlgmr.msra.gmra.mrb[200].mxu1 %vm1215_vm3, %v6364_v38  ;;  %12875 = vmatpush3.bf16.xpose.msra.mxu0 %v7460_v41  ;;  %v13499_v54 = vunpack.i.l.bf16 %v13498_v20  ;;  %v13500_v46 = vunpack.i.h.bf16 %v13498_v20 }
 0xcc7   : > { %12881 = vmatpush3.bf16.xpose.msra.mxu1 %v7509_v36  ;;  %12876 = vmatprep.mubr.msk.bf16.mxu0 %vm14222_vm2, %v18612_v52 }
 0xcc8   : > { %12882 = vmatprep.mubr.msk.bf16.mxu1 %vm14222_vm2, %v18612_v52  ;;  %12886 = vmatprep.subr.bf16.mxu0 %v18612_v52  ;;  %v6365_v9 = vpack.c.bf16 %v13499_v54, %v13499_v54  ;;  %v6366_v22 = vpack.c.bf16 %v13500_v46, %v13500_v46 }
 0xcc9   : > { %12892 = vmatprep.subr.bf16.mxu1 %v18612_v52 }
 0xccd   : > { %v7553_v3 = vpop.permute.xlu1 %7552  ;;  %12877 = vmatmul.mubr.msk.bf16.vlgmr.msra.gmra.mrb[204].mxu0 %vm1215_vm3, %v6365_v9 }
 0xcce   : > { %v7558_v24 = vsel %vm1215_vm3, %v7553_v3, 0  ;;  %v7602_v26 = vpop.permute.xlu0 %7601  ;;  %12883 = vmatmul.mubr.msk.bf16.vlgmr.msra.gmra.mrb[204].mxu1 %vm1215_vm3, %v6366_v22  ;;  %12888 = vmatprep.mubr.msk.bf16.mxu0 %vm14222_vm2, %v18612_v52 }
 0xccf   : > { %v7607_v34 = vsel %vm1215_vm3, %v7602_v26, 0  ;;  %12887 = vmatpush3.bf16.xpose.msra.mxu0 %v7558_v24  ;;  %12894 = vmatprep.mubr.msk.bf16.mxu1 %vm14222_vm2, %v18612_v52 }
 0xcd0   : > { %12893 = vmatpush3.bf16.xpose.msra.mxu1 %v7607_v34  ;;  %12898 = vmatprep.subr.bf16.mxu0 %v18612_v52 }
 0xcd1   : > { %v13503_v15 = vpop.permute.xlu1 %13502  ;;  %12904 = vmatprep.subr.bf16.mxu1 %v18612_v52 }
 0xcd2   : > { %v13505_v59 = vunpack.i.h.bf16 %v13503_v15  ;;  %v13504_v8 = vunpack.i.l.bf16 %v13503_v15 }
 0xcd3   : > { %v7651_v32 = vpop.permute.xlu0 %7650 }
 0xcd4   : > { %v6367_v48 = vpack.c.bf16 %v13504_v8, %v13504_v8  ;;  %v6368_v7 = vpack.c.bf16 %v13505_v59, %v13505_v59  ;;  %v7656_v1 = vsel %vm1215_vm3, %v7651_v32, 0 }
 0xcd5   : > { %v7700_v62 = vpop.permute.xlu1 %7699 }
 0xcd6   : > { %12889 = vmatmul.mubr.msk.bf16.vlgmr.msra.gmra.mrb[208].mxu0 %vm1215_vm3, %v6367_v48  ;;  %v7705_v42 = vsel %vm1215_vm3, %v7700_v62, 0 }
 0xcd7   : > { %v13508_v61 = vpop.permute.xlu0 %13507  ;;  %12895 = vmatmul.mubr.msk.bf16.vlgmr.msra.gmra.mrb[208].mxu1 %vm1215_vm3, %v6368_v7  ;;  %12899 = vmatpush3.bf16.xpose.msra.mxu0 %v7656_v1 }
 0xcd8   : > { %v13509_v45 = vunpack.i.l.bf16 %v13508_v61  ;;  %12905 = vmatpush3.bf16.xpose.msra.mxu1 %v7705_v42  ;;  %12900 = vmatprep.mubr.msk.bf16.mxu0 %vm14222_vm2, %v18612_v52  ;;  %v13510_v6 = vunpack.i.h.bf16 %v13508_v61 }
 0xcd9   : > { %12906 = vmatprep.mubr.msk.bf16.mxu1 %vm14222_vm2, %v18612_v52  ;;  %12910 = vmatprep.subr.bf16.mxu0 %v18612_v52 }
 0xcda   : > { %12916 = vmatprep.subr.bf16.mxu1 %v18612_v52  ;;  %v6369_v25 = vpack.c.bf16 %v13509_v45, %v13509_v45  ;;  %v6370_v40 = vpack.c.bf16 %v13510_v6, %v13510_v6 }
 0xcde   : > { %12901 = vmatmul.mubr.msk.bf16.vlgmr.msra.gmra.mrb[212].mxu0 %vm1215_vm3, %v6369_v25 }
 0xcdf   : > { %12907 = vmatmul.mubr.msk.bf16.vlgmr.msra.gmra.mrb[212].mxu1 %vm1215_vm3, %v6370_v40  ;;  %12912 = vmatprep.mubr.msk.bf16.mxu0 %vm14222_vm2, %v18612_v52 }
 0xce0   : > { %12918 = vmatprep.mubr.msk.bf16.mxu1 %vm14222_vm2, %v18612_v52 }
 0xce1   : > { %v7749_v53 = vpop.permute.xlu1 %7748 }
 0xce2   : > { %v7754_v50 = vsel %vm1215_vm3, %v7749_v53, 0  ;;  %v7798_v19 = vpop.permute.xlu0 %7797 }
 0xce3   : > { %v7803_v38 = vsel %vm1215_vm3, %v7798_v19, 0  ;;  %12911 = vmatpush3.bf16.xpose.msra.mxu0 %v7754_v50 }
 0xce4   : > { %12917 = vmatpush3.bf16.xpose.msra.mxu1 %v7803_v38  ;;  %12922 = vmatprep.subr.bf16.mxu0 %v18612_v52 }
 0xce5   : > { %v13513_v0 = vpop.permute.xlu1 %13512  ;;  %12928 = vmatprep.subr.bf16.mxu1 %v18612_v52 }
 0xce6   : > { %v13515_v23 = vunpack.i.h.bf16 %v13513_v0  ;;  %v13514_v41 = vunpack.i.l.bf16 %v13513_v0 }
 0xce7   : > { %v7847_v36 = vpop.permute.xlu0 %7846 }
 0xce8   : > { %v6372_v20 = vpack.c.bf16 %v13515_v23, %v13515_v23  ;;  %v6371_v54 = vpack.c.bf16 %v13514_v41, %v13514_v41  ;;  %v7852_v9 = vsel %vm1215_vm3, %v7847_v36, 0 }
 0xce9   : > { %v7896_v46 = vpop.permute.xlu1 %7895 }
 0xcea   : > { %v7901_v22 = vsel %vm1215_vm3, %v7896_v46, 0  ;;  %12913 = vmatmul.mubr.msk.bf16.vlgmr.msra.gmra.mrb[216].mxu0 %vm1215_vm3, %v6371_v54 }
 0xceb   : > { %12919 = vmatmul.mubr.msk.bf16.vlgmr.msra.gmra.mrb[216].mxu1 %vm1215_vm3, %v6372_v20  ;;  %v13518_v3 = vpop.permute.xlu0 %13517  ;;  %12923 = vmatpush3.bf16.xpose.msra.mxu0 %v7852_v9 }
 0xcec   : > { %v13519_v24 = vunpack.i.l.bf16 %v13518_v3  ;;  %12929 = vmatpush3.bf16.xpose.msra.mxu1 %v7901_v22  ;;  %12924 = vmatprep.mubr.msk.bf16.mxu0 %vm14222_vm2, %v18612_v52  ;;  %v13520_v26 = vunpack.i.h.bf16 %v13518_v3 }
 0xced   : > { %12930 = vmatprep.mubr.msk.bf16.mxu1 %vm14222_vm2, %v18612_v52  ;;  %12934 = vmatprep.subr.bf16.mxu0 %v18612_v52 }
 0xcee   : > { %12940 = vmatprep.subr.bf16.mxu1 %v18612_v52  ;;  %v6373_v34 = vpack.c.bf16 %v13519_v24, %v13519_v24  ;;  %v6374_v15 = vpack.c.bf16 %v13520_v26, %v13520_v26 }
 0xcf1   : > { %v7945_v59 = vpop.permute.xlu1 %7944 }
 0xcf2   : > { %v7950_v8 = vsel %vm1215_vm3, %v7945_v59, 0  ;;  %v7994_v32 = vpop.permute.xlu0 %7993  ;;  %12925 = vmatmul.mubr.msk.bf16.vlgmr.msra.gmra.mrb[220].mxu0 %vm1215_vm3, %v6373_v34 }
 0xcf3   : > { %v7999_v48 = vsel %vm1215_vm3, %v7994_v32, 0  ;;  %12931 = vmatmul.mubr.msk.bf16.vlgmr.msra.gmra.mrb[220].mxu1 %vm1215_vm3, %v6374_v15  ;;  %12935 = vmatpush3.bf16.xpose.msra.mxu0 %v7950_v8 }
 0xcf4   : > { %12941 = vmatpush3.bf16.xpose.msra.mxu1 %v7999_v48  ;;  %12936 = vmatprep.mubr.msk.bf16.mxu0 %vm14222_vm2, %v18612_v52 }
 0xcf5   : > { %v13523_v7 = vpop.permute.xlu1 %13522  ;;  %12942 = vmatprep.mubr.msk.bf16.mxu1 %vm14222_vm2, %v18612_v52  ;;  %12946 = vmatprep.subr.bf16.mxu0 %v18612_v52 }
 0xcf6   : > { %v13525_v62 = vunpack.i.h.bf16 %v13523_v7  ;;  %v13524_v1 = vunpack.i.l.bf16 %v13523_v7  ;;  %12952 = vmatprep.subr.bf16.mxu1 %v18612_v52 }
 0xcf7   : > { %v8043_v42 = vpop.permute.xlu0 %8042 }
 0xcf8   : > { %v6376_v61 = vpack.c.bf16 %v13525_v62, %v13525_v62  ;;  %v6375_v45 = vpack.c.bf16 %v13524_v1, %v13524_v1  ;;  %v8048_v25 = vsel %vm1215_vm3, %v8043_v42, 0 }
 0xcf9   : > { %v8092_v6 = vpop.permute.xlu1 %8091 }
 0xcfa   : > { %v8097_v40 = vsel %vm1215_vm3, %v8092_v6, 0  ;;  %12937 = vmatmul.mubr.msk.bf16.vlgmr.msra.gmra.mrb[224].mxu0 %vm1215_vm3, %v6375_v45 }
 0xcfb   : > { %12943 = vmatmul.mubr.msk.bf16.vlgmr.msra.gmra.mrb[224].mxu1 %vm1215_vm3, %v6376_v61  ;;  %v13528_v53 = vpop.permute.xlu0 %13527  ;;  %12947 = vmatpush3.bf16.xpose.msra.mxu0 %v8048_v25 }
 0xcfc   : > { %v13529_v50 = vunpack.i.l.bf16 %v13528_v53  ;;  %12953 = vmatpush3.bf16.xpose.msra.mxu1 %v8097_v40  ;;  %12948 = vmatprep.mubr.msk.bf16.mxu0 %vm14222_vm2, %v18612_v52  ;;  %v13530_v19 = vunpack.i.h.bf16 %v13528_v53 }
 0xcfd   : > { %12954 = vmatprep.mubr.msk.bf16.mxu1 %vm14222_vm2, %v18612_v52  ;;  %12958 = vmatprep.subr.bf16.mxu0 %v18612_v52 }
 0xcfe   : > { %12964 = vmatprep.subr.bf16.mxu1 %v18612_v52  ;;  %v6377_v38 = vpack.c.bf16 %v13529_v50, %v13529_v50  ;;  %v6378_v54 = vpack.c.bf16 %v13530_v19, %v13530_v19 }
 0xcff   : > { %v6265_v0 = vpop.permute.xlu0 %6264 }
 0xd00   : > { %v6268_v23 = vadd.f32 %v6265_v0, %v16699_v17  ;;  %v6267_v41 = vadd.f32 %v6265_v0, %v16685_v5  ;;  %v6270_v36 = vadd.f32 %v16691_v29, %v6265_v0  ;;  %v6269_v20 = vadd.f32 %v16681_v11, %v6265_v0 }
 0xd01   : > { %v6271_v46 = vadd.f32 %v6265_v0, %v16727_v63  ;;  %v6272_v9 = vadd.f32 %v6265_v0, %v16741_v35  ;;  %v6273_v17 = vadd.f32 %v16723_v60, %v6265_v0  ;;  %v6275_v5 = vadd.f32 %v6265_v0, %v16769_v39 }
 0xd02   : > { %12949 = vmatmul.mubr.msk.bf16.vlgmr.msra.gmra.mrb[228].mxu0 %vm1215_vm3, %v6377_v38  ;;  %v6540_v22 = vpack.c.bf16 %v6268_v23, %v6268_v23  ;;  %v6539_v3 = vpack.c.bf16 %v6267_v41, %v6267_v41  ;;  %v13531_v24 = vpack.i.bf16 %v6268_v23, %v6267_v41  ;;  %v13536_v26 = vpack.i.bf16 %v6270_v36, %v6269_v20 }
 0xd03   : > { %12955 = vmatmul.mubr.msk.bf16.vlgmr.msra.gmra.mrb[228].mxu1 %vm1215_vm3, %v6378_v54  ;;  %v6542_v11 = vpack.c.bf16 %v6270_v36, %v6270_v36  ;;  %v13541_v29 = vpack.i.bf16 %v6272_v9, %v6271_v46  ;;  %v6276_v63 = vadd.f32 %v6265_v0, %v16783_v51  ;;  %v6274_v35 = vadd.f32 %v16733_v43, %v6265_v0 }
 0xd04   : > { %8573 = vrot.lane.b32.xlu1 %v6540_v22, %s18696_s14  ;;  %8524 = vrot.lane.b32.xlu0 %v6539_v3, %s18696_s14  ;;  %v6277_v34 = vadd.f32 %v16765_v16, %v6265_v0  ;;  %v6279_v15 = vadd.f32 %v6265_v0, %v16811_v18  ;;  %v6280_v60 = vadd.f32 %v6265_v0, %v16825_v12 }
 0xd05   : > { %12960 = vmatprep.mubr.msk.bf16.mxu0 %vm14222_vm2, %v18612_v52  ;;  %v6278_v39 = vadd.f32 %v16775_v55, %v6265_v0  ;;  %v17110_v59 = vadd.f32 %v16807_v13, %v6265_v0  ;;  %v17113_v8 = vadd.f32 %v16817_v58, %v6265_v0  ;;  %12966 = vmatprep.mubr.msk.bf16.mxu1 %vm14222_vm2, %v18612_v52 }
 0xd06   : > { %v13551_v43 = vpack.i.bf16 %v6276_v63, %v6275_v5  ;;  %v13546_v16 = vpack.i.bf16 %v6274_v35, %v6273_v17  ;;  %v13561_v51 = vpack.i.bf16 %v6280_v60, %v6279_v15  ;;  %v6541_v12 = vpack.c.bf16 %v6269_v20, %v6269_v20 }
 0xd07   : > { %v13556_v18 = vpack.i.bf16 %v6278_v39, %v6277_v34  ;;  %v6543_v32 = vpack.c.bf16 %v6271_v46, %v6271_v46  ;;  %v13566_v55 = vpack.i.bf16 %v17113_v8, %v17110_v59  ;;  %v6545_v13 = vpack.c.bf16 %v6273_v17, %v6273_v17 }
 0xd08   : > { %13532 = vrot.lane.b32.xlu1 %v13531_v24, %s14224_s16  ;;  %8671 = vrot.lane.b32.xlu0 %v6542_v11, %s18696_s14  ;;  %v6544_v58 = vpack.c.bf16 %v6272_v9, %v6272_v9  ;;  %v6547_v48 = vpack.c.bf16 %v6275_v5, %v6275_v5  ;;  %v6546_v7 = vpack.c.bf16 %v6274_v35, %v6274_v35 }
 0xd09   : > { %v6549_v62 = vpack.c.bf16 %v6277_v34, %v6277_v34  ;;  %v6551_v40 = vpack.c.bf16 %v6279_v15, %v6279_v15  ;;  %v6548_v19 = vpack.c.bf16 %v6276_v63, %v6276_v63  ;;  %v6550_v54 = vpack.c.bf16 %v6278_v39, %v6278_v39 }
 0xd0a   : > { %v6553_v46 = vpack.c.bf16 %v17110_v59, %v17110_v59  ;;  %v6552_v24 = vpack.c.bf16 %v6280_v60, %v6280_v60  ;;  %v6554_v35 = vpack.c.bf16 %v17113_v8, %v17113_v8 }
 0xd0c   : > { %8622 = vrot.lane.b32.xlu1 %v6541_v12, %s18696_s14  ;;  %8720 = vrot.lane.b32.xlu0 %v6543_v32, %s18696_s14 }
 0xd10   : > { %13537 = vrot.lane.b32.xlu1 %v13536_v26, %s14224_s16  ;;  %8818 = vrot.lane.b32.xlu0 %v6545_v13, %s18696_s14 }
 0xd14   : > { %8769 = vrot.lane.b32.xlu1 %v6544_v58, %s18696_s14  ;;  %8916 = vrot.lane.b32.xlu0 %v6547_v48, %s18696_s14 }
 0xd18   : > { %13542 = vrot.lane.b32.xlu1 %v13541_v29, %s14224_s16  ;;  %13552 = vrot.lane.b32.xlu0 %v13551_v43, %s14224_s16 }
 0xd1b   : > { %v17129_v1 = vpop.f32.mrb[168].mxu0 }
 0xd1c   : > { %v12770_v42 = vpop.f32.mrb[169].mxu0  ;;  %8867 = vrot.lane.b32.xlu1 %v6546_v7, %s18696_s14  ;;  %9014 = vrot.lane.b32.xlu0 %v6549_v62, %s18696_s14 }
 0xd1d   : > { %v6617_v61 = vpop.f32.mrb[170].mxu0  ;;  %v17133_v45 = vpop.f32.mrb[168].mxu1 }
 0xd1e   : > { %v12771_v6 = vpop.f32.mrb[171].mxu0  ;;  %v12776_v25 = vpop.f32.mrb[169].mxu1 }
 0xd1f   : > { %v6666_v53 = vpop.f32.mrb[170].mxu1 }
 0xd20   : > { %v12777_v50 = vpop.f32.mrb[171].mxu1  ;;  %13547 = vrot.lane.b32.xlu1 %v13546_v16, %s14224_s16  ;;  %9112 = vrot.lane.b32.xlu0 %v6551_v40, %s18696_s14 }
 0xd23   : > { %v17137_v38 = vpop.f32.mrb[172].mxu0 }
 0xd24   : > { %v12782_v0 = vpop.f32.mrb[173].mxu0  ;;  %8965 = vrot.lane.b32.xlu1 %v6548_v19, %s18696_s14  ;;  %13562 = vrot.lane.b32.xlu0 %v13561_v51, %s14224_s16 }
 0xd25   : > { %v6715_v23 = vpop.f32.mrb[174].mxu0  ;;  %v17141_v41 = vpop.f32.mrb[172].mxu1 }
 0xd26   : > { %v12783_v36 = vpop.f32.mrb[175].mxu0  ;;  %v12788_v20 = vpop.f32.mrb[173].mxu1 }
 0xd27   : > { %v6764_v9 = vpop.f32.mrb[174].mxu1 }
 0xd28   : > { %v12789_v22 = vpop.f32.mrb[175].mxu1  ;;  %9063 = vrot.lane.b32.xlu1 %v6550_v54, %s18696_s14  ;;  %9210 = vrot.lane.b32.xlu0 %v6553_v46, %s18696_s14 }
 0xd2c   : > { %13557 = vrot.lane.b32.xlu1 %v13556_v18, %s14224_s16 }
 0xd2e   : > { %v17148_v3 = vpop.f32.mrb[176].mxu0 }
 0xd2f   : > { %v12794_v26 = vpop.f32.mrb[177].mxu0 }
 0xd30   : > { %v6813_v17 = vpop.f32.mrb[178].mxu0  ;;  %v17150_v5 = vpop.f32.mrb[176].mxu1  ;;  %9161 = vrot.lane.b32.xlu1 %v6552_v24, %s18696_s14 }
 0xd31   : > { %v12795_v11 = vpop.f32.mrb[179].mxu0  ;;  %v12800_v29 = vpop.f32.mrb[177].mxu1 }
 0xd32   : > { %v6862_v63 = vpop.f32.mrb[178].mxu1 }
 0xd33   : > { %v12801_v34 = vpop.f32.mrb[179].mxu1 }
 0xd34   : > { %9259 = vrot.lane.b32.xlu1 %v6554_v35, %s18696_s14 }
 0xd36   : > { %v17156_v15 = vpop.f32.mrb[180].mxu0 }
 0xd37   : > { %v12806_v39 = vpop.f32.mrb[181].mxu0 }
 0xd38   : > { %v6911_v59 = vpop.f32.mrb[182].mxu0  ;;  %v17158_v60 = vpop.f32.mrb[180].mxu1  ;;  %13567 = vrot.lane.b32.xlu1 %v13566_v55, %s14224_s16  ;;  %s11927_s16 = sshll.u32 %s14301_s13, 11  ;;  %s11577_s13 = scalar_lea.sflag [#allocation4], %s14384_s29 }
 0xd39   : > { %v12807_v43 = vpop.f32.mrb[183].mxu0  ;;  %v12812_v16 = vpop.f32.mrb[181].mxu1 }
 0xd3a   : > { %v6960_v51 = vpop.f32.mrb[182].mxu1 }
 0xd3b   : > { %v12813_v18 = vpop.f32.mrb[183].mxu1 }
 0xd42   : > { %v17161_v12 = vpop.f32.mrb[184].mxu0 }
 0xd43   : > { %v12818_v32 = vpop.f32.mrb[185].mxu0 }
 0xd44   : > { %v7009_v13 = vpop.f32.mrb[186].mxu0  ;;  %v17163_v8 = vpop.f32.mrb[184].mxu1 }
 0xd45   : > { %v12819_v58 = vpop.f32.mrb[187].mxu0  ;;  %v12824_v48 = vpop.f32.mrb[185].mxu1 }
 0xd46   : > { %v7058_v7 = vpop.f32.mrb[186].mxu1 }
 0xd47   : > { %v12825_v62 = vpop.f32.mrb[187].mxu1 }
 0xd4a   : > { %v17165_v42 = vpop.f32.mrb[188].mxu0 }
 0xd4b   : > { %v12830_v61 = vpop.f32.mrb[189].mxu0 }
 0xd4c   : > { %v7107_v6 = vpop.f32.mrb[190].mxu0  ;;  %v17167_v25 = vpop.f32.mrb[188].mxu1 }
 0xd4d   : > { %v12831_v55 = vpop.f32.mrb[191].mxu0  ;;  %v12836_v40 = vpop.f32.mrb[189].mxu1  ;;  %v8172_v10 = vsel %vm2781_vm5, %v17167_v25, -inf }
 0xd4e   : > { %v7156_v53 = vpop.f32.mrb[190].mxu1 }
 0xd4f   : > { %v12837_v50 = vpop.f32.mrb[191].mxu1 }
 0xd52   : > { %v17169_v19 = vpop.f32.mrb[192].mxu0 }
 0xd53   : > { %v12842_v0 = vpop.f32.mrb[193].mxu0 }
 0xd54   : > { %v7205_v23 = vpop.f32.mrb[194].mxu0  ;;  %v17171_v36 = vpop.f32.mrb[192].mxu1 }
 0xd55   : > { %v12843_v20 = vpop.f32.mrb[195].mxu0  ;;  %v12848_v54 = vpop.f32.mrb[193].mxu1 }
 0xd56   : > { %v7254_v46 = vpop.f32.mrb[194].mxu1 }
 0xd57   : > { %v12849_v9 = vpop.f32.mrb[195].mxu1 }
 0xd5a   : > { %v17173_v22 = vpop.f32.mrb[196].mxu0 }
 0xd5b   : > { %v12854_v24 = vpop.f32.mrb[197].mxu0 }
 0xd5c   : > { %v7303_v26 = vpop.f32.mrb[198].mxu0  ;;  %v17175_v17 = vpop.f32.mrb[196].mxu1 }
 0xd5d   : > { %v12855_v11 = vpop.f32.mrb[199].mxu0  ;;  %v12860_v29 = vpop.f32.mrb[197].mxu1 }
 0xd5e   : > { %v7352_v63 = vpop.f32.mrb[198].mxu1 }
 0xd5f   : > { %v12861_v35 = vpop.f32.mrb[199].mxu1 }
 0xd76   : > { %v8574_v34 = vpop.permute.xlu1 %8573  ;;  %v8525_v39 = vpop.permute.xlu0 %8524 }
 0xd77   : > { %v8579_v59 = vsel %vm3172_vm4, %v8574_v34, 0  ;;  %v8530_v43 = vsel %vm3172_vm4, %v8525_v39, 0 }
 0xd78   : > { %12959 = vmatpush3.bf16.msra.mxu0 %v8530_v43  ;;  %12965 = vmatpush3.bf16.msra.mxu1 %v8579_v59 }
 0xd79   : > { %12970 = vmatprep.subr.bf16.mxu0 %v18612_v52  ;;  %12976 = vmatprep.subr.bf16.mxu1 %v18612_v52 }
 0xd7a   : > { %v13533_v16 = vpop.permute.xlu1 %13532  ;;  %v17181_v51 = vpop.permute.xlu0 %8671 }
 0xd7b   : > { %v13535_v18 = vunpack.i.h.bf16 %v13533_v16  ;;  %v13534_v32 = vunpack.i.l.bf16 %v13533_v16 }
 0xd7d   : > { %v6556_v13 = vpack.c.bf16 %v13535_v18, %v13535_v18  ;;  %v6555_v58 = vpack.c.bf16 %v13534_v32, %v13534_v32 }
 0xd7e   : > { %v17183_v48 = vpop.permute.xlu1 %8622  ;;  %v17187_v7 = vpop.permute.xlu0 %8720 }
 0xd7f   : > { %9357 = vrot.lane.b32.xlu1 %v6556_v13, %s18696_s14  ;;  %9308 = vrot.lane.b32.xlu0 %v6555_v58, %s18696_s14 }
 0xd82   : > { %v13538_v62 = vpop.permute.xlu1 %13537  ;;  %v17189_v53 = vpop.permute.xlu0 %8818 }
 0xd83   : > { %v13540_v61 = vunpack.i.h.bf16 %v13538_v62  ;;  %v13539_v6 = vunpack.i.l.bf16 %v13538_v62 }
 0xd85   : > { %v6558_v55 = vpack.c.bf16 %v13540_v61, %v13540_v61  ;;  %v6557_v40 = vpack.c.bf16 %v13539_v6, %v13539_v6 }
 0xd86   : > { %v17191_v50 = vpop.permute.xlu1 %8769  ;;  %v17195_v54 = vpop.permute.xlu0 %8916 }
 0xd87   : > { %9455 = vrot.lane.b32.xlu1 %v6558_v55, %s18696_s14  ;;  %9406 = vrot.lane.b32.xlu0 %v6557_v40, %s18696_s14 }
 0xd8a   : > { %v13543_v0 = vpop.permute.xlu1 %13542  ;;  %v13553_v26 = vpop.permute.xlu0 %13552 }
 0xd8b   : > { %v13545_v23 = vunpack.i.h.bf16 %v13543_v0  ;;  %v13544_v20 = vunpack.i.l.bf16 %v13543_v0  ;;  %v13555_v35 = vunpack.i.h.bf16 %v13553_v26  ;;  %v13554_v34 = vunpack.i.l.bf16 %v13553_v26 }
 0xd8d   : > { %v6560_v46 = vpack.c.bf16 %v13545_v23, %v13545_v23  ;;  %v6559_v9 = vpack.c.bf16 %v13544_v20, %v13544_v20  ;;  %v6564_v16 = vpack.c.bf16 %v13555_v35, %v13555_v35  ;;  %v6563_v18 = vpack.c.bf16 %v13554_v34, %v13554_v34 }
 0xd8e   : > { %v17197_v24 = vpop.permute.xlu1 %8867 }
 0xd8f   : > { %9553 = vrot.lane.b32.xlu1 %v6560_v46, %s18696_s14  ;;  %9504 = vrot.lane.b32.xlu0 %v6559_v9, %s18696_s14 }
 0xd92   : > { %v13548_v11 = vpop.permute.xlu1 %13547 }
 0xd93   : > { %v13550_v29 = vunpack.i.h.bf16 %v13548_v11  ;;  %v13549_v63 = vunpack.i.l.bf16 %v13548_v11 }
 0xd95   : > { %v6562_v39 = vpack.c.bf16 %v13550_v29, %v13550_v29  ;;  %v6561_v59 = vpack.c.bf16 %v13549_v63, %v13549_v63 }
 0xd97   : > { %9651 = vrot.lane.b32.xlu1 %v6562_v39, %s18696_s14  ;;  %9602 = vrot.lane.b32.xlu0 %v6561_v59, %s18696_s14 }
 0xd98   : > { %v17203_v43 = vpop.f32.mrb[200].mxu0 }
 0xd99   : > { %v17205_v32 = vpop.f32.mrb[200].mxu1  ;;  %v12866_v13 = vpop.f32.mrb[201].mxu0 }
 0xd9a   : > { %v12872_v58 = vpop.f32.mrb[201].mxu1  ;;  %v7401_v62 = vpop.f32.mrb[202].mxu0 }
 0xd9b   : > { %v7450_v61 = vpop.f32.mrb[202].mxu1  ;;  %9749 = vrot.lane.b32.xlu1 %v6564_v16, %s18696_s14  ;;  %9700 = vrot.lane.b32.xlu0 %v6563_v18, %s18696_s14  ;;  %v12867_v6 = vpop.f32.mrb[203].mxu0 }
 0xd9c   : > { %v12873_v55 = vpop.f32.mrb[203].mxu1 }
 0xda0   : > { %v17209_v40 = vpop.f32.mrb[204].mxu0 }
 0xda1   : > { %v17211_v0 = vpop.f32.mrb[204].mxu1  ;;  %v12878_v23 = vpop.f32.mrb[205].mxu0 }
 0xda2   : > { %v12884_v20 = vpop.f32.mrb[205].mxu1  ;;  %v7499_v46 = vpop.f32.mrb[206].mxu0 }
 0xda3   : > { %v7548_v9 = vpop.f32.mrb[206].mxu1  ;;  %v12879_v26 = vpop.f32.mrb[207].mxu0  ;;  %v8142_v46 = vsel %vm2781_vm5, %v17133_v45, -inf }
 0xda4   : > { %v12885_v11 = vpop.f32.mrb[207].mxu1  ;;  %v8145_v26 = vsel %vm2781_vm5, %v17137_v38, -inf }
 0xda9   : > { %v17213_v29 = vpop.f32.mrb[208].mxu0 }
 0xdaa   : > { %v17215_v63 = vpop.f32.mrb[208].mxu1  ;;  %v12890_v35 = vpop.f32.mrb[209].mxu0 }
 0xdab   : > { %v12896_v34 = vpop.f32.mrb[209].mxu1  ;;  %v7597_v39 = vpop.f32.mrb[210].mxu0 }
 0xdac   : > { %v7646_v59 = vpop.f32.mrb[210].mxu1  ;;  %v12891_v16 = vpop.f32.mrb[211].mxu0  ;;  %v8139_v34 = vsel %vm2781_vm5, %v17129_v1, -inf }
 0xdad   : > { %v12897_v18 = vpop.f32.mrb[211].mxu1 }
 0xdb1   : > { %v17217_v13 = vpop.f32.mrb[212].mxu0 }
 0xdb2   : > { %v17219_v58 = vpop.f32.mrb[212].mxu1  ;;  %v12902_v62 = vpop.f32.mrb[213].mxu0 }
 0xdb3   : > { %v12908_v61 = vpop.f32.mrb[213].mxu1  ;;  %v7695_v6 = vpop.f32.mrb[214].mxu0 }
 0xdb4   : > { %v7744_v55 = vpop.f32.mrb[214].mxu1  ;;  %v12903_v23 = vpop.f32.mrb[215].mxu0  ;;  %v8151_v61 = vsel %vm2781_vm5, %v17148_v3, -inf  ;;  %v8148_v6 = vsel %vm2781_vm5, %v17141_v41, -inf }
 0xdb5   : > { %v12909_v20 = vpop.f32.mrb[215].mxu1  ;;  %v8157_v23 = vsel %vm2781_vm5, %v17156_v15, -inf }
 0xdba   : > { %8143 = vmax.xlane.f32.xlu0 %v8142_v46 }
 0xdbd   : > { %v17223_v9 = vpop.f32.mrb[216].mxu0 }
 0xdbe   : > { %v17227_v11 = vpop.f32.mrb[216].mxu1  ;;  %8146 = vmax.xlane.f32.xlu0 %v8145_v26  ;;  %v12914_v35 = vpop.f32.mrb[217].mxu0  ;;  %v8154_v26 = vsel %vm2781_vm5, %v17150_v5, -inf }
 0xdbf   : > { %v12920_v39 = vpop.f32.mrb[217].mxu1  ;;  %8140 = vmax.xlane.f32.xlu1 %v8139_v34  ;;  %v7793_v59 = vpop.f32.mrb[218].mxu0 }
 0xdc0   : > { %v7842_v16 = vpop.f32.mrb[218].mxu1  ;;  %v12915_v18 = vpop.f32.mrb[219].mxu0 }
 0xdc1   : > { %v12921_v62 = vpop.f32.mrb[219].mxu1  ;;  %v8163_v18 = vsel %vm2781_vm5, %v17161_v12, -inf }
 0xdc2   : > { %8152 = vmax.xlane.f32.xlu0 %v8151_v61  ;;  %v8160_v62 = vsel %vm2781_vm5, %v17158_v60, -inf  ;;  %v17247_v61 = vpop.permute.xlu1 %8965 }
 0xdc3   : > { %8149 = vmax.xlane.f32.xlu1 %v8148_v6 }
 0xdc5   : > { %v17235_v55 = vpop.f32.mrb[220].mxu0 }
 0xdc6   : > { %v17239_v20 = vpop.f32.mrb[220].mxu1  ;;  %8158 = vmax.xlane.f32.xlu0 %v8157_v23  ;;  %v12926_v46 = vpop.f32.mrb[221].mxu0  ;;  %v8169_v23 = vsel %vm2781_vm5, %v17165_v42, -inf }
 0xdc7   : > { %v12932_v35 = vpop.f32.mrb[221].mxu1  ;;  %8155 = vmax.xlane.f32.xlu1 %v8154_v26  ;;  %v7891_v34 = vpop.f32.mrb[222].mxu0 }
 0xdc8   : > { %v7940_v39 = vpop.f32.mrb[222].mxu1  ;;  %v12927_v59 = vpop.f32.mrb[223].mxu0  ;;  %v8166_v35 = vsel %vm2781_vm5, %v17163_v8, -inf }
 0xdc9   : > { %v12933_v16 = vpop.f32.mrb[223].mxu1  ;;  %v17261_v57 = vpop.permute.xlu1 %9063 }
 0xdca   : > { %8164 = vmax.xlane.f32.xlu0 %v8163_v18 }
 0xdcb   : > { %8161 = vmax.xlane.f32.xlu1 %v8160_v62  ;;  %v8175_v62 = vsel %vm2781_vm5, %v17169_v19, -inf }
 0xdcd   : > { %v17249_v6 = vpop.f32.mrb[224].mxu0  ;;  %v13558_v27 = vpop.permute.xlu1 %13557 }
 0xdce   : > { %v17253_v46 = vpop.f32.mrb[224].mxu1  ;;  %8170 = vmax.xlane.f32.xlu0 %v8169_v23  ;;  %v12938_v26 = vpop.f32.mrb[225].mxu0  ;;  %v13560_v21 = vunpack.i.h.bf16 %v13558_v27 }
 0xdcf   : > { %v12944_v34 = vpop.f32.mrb[225].mxu1  ;;  %8167 = vmax.xlane.f32.xlu1 %v8166_v35  ;;  %v7989_v39 = vpop.f32.mrb[226].mxu0 }
 0xdd0   : > { %v8038_v59 = vpop.f32.mrb[226].mxu1  ;;  %v12939_v16 = vpop.f32.mrb[227].mxu0  ;;  %v6566_v37 = vpack.c.bf16 %v13560_v21, %v13560_v21  ;;  %v8181_v21 = vsel %vm2781_vm5, %v17173_v22, -inf }
 0xdd1   : > { %v12945_v18 = vpop.f32.mrb[227].mxu1 }
 0xdd2   : > { %8176 = vmax.xlane.f32.xlu0 %v8175_v62  ;;  %v13559_v62 = vunpack.i.l.bf16 %v13558_v27  ;;  %v8187_v27 = vsel %vm2781_vm5, %v17203_v43, -inf }
 0xdd3   : > { %8173 = vmax.xlane.f32.xlu1 %v8172_v10  ;;  %v8199_v10 = vsel %vm2781_vm5, %v17213_v29, -inf }
 0xdd4   : > { %v6565_v4 = vpack.c.bf16 %v13559_v62, %v13559_v62 }
 0xdd5   : > { %v17263_v23 = vpop.f32.mrb[228].mxu0 }
 0xdd6   : > { %v17265_v26 = vpop.f32.mrb[228].mxu1  ;;  %v12950_v34 = vpop.f32.mrb[229].mxu0 }
 0xdd7   : > { %v12956_v35 = vpop.f32.mrb[229].mxu1  ;;  %v8087_v39 = vpop.f32.mrb[230].mxu0  ;;  %v8178_v34 = vsel %vm2781_vm5, %v17171_v36, -inf }
 0xdd8   : > { %v8136_v59 = vpop.f32.mrb[230].mxu1  ;;  %v12951_v16 = vpop.f32.mrb[231].mxu0  ;;  %v8217_v35 = vsel %vm2781_vm5, %v17235_v55, -inf  ;;  %v8190_v39 = vsel %vm2781_vm5, %v17205_v32, -inf }
 0xdd9   : > { %v12957_v18 = vpop.f32.mrb[231].mxu1  ;;  %v17285_v59 = vpop.permute.xlu0 %9014  ;;  %v8193_v16 = vsel %vm2781_vm5, %v17209_v40, -inf }
 0xdda   : > { %v8196_v18 = vsel %vm2781_vm5, %v17211_v0, -inf }
 0xddd   : > { %v17291_v62 = vpop.permute.xlu0 %9112 }
 0xde4   : > { %9847 = vrot.lane.b32.xlu1 %v6566_v37, %s18696_s14  ;;  %v8223_v37 = vsel %vm2781_vm5, %v17249_v6, -inf }
 0xde8   : > { %9798 = vrot.lane.b32.xlu0 %v6565_v4, %s18696_s14  ;;  %v8184_v4 = vsel %vm2781_vm5, %v17175_v17, -inf }
 0xe07   : > { %8200 = vmax.xlane.f32.xlu0 %v8199_v10  ;;  %v8202_v10 = vsel %vm2781_vm5, %v17215_v63, -inf }
 0xe08   : > { %8179 = vmax.xlane.f32.xlu1 %v8178_v34  ;;  %v17295_v34 = vpop.permute.xlu1 %9161 }
 0xe0b   : > { %8218 = vmax.xlane.f32.xlu0 %v8217_v35  ;;  %v17297_v35 = vpop.permute.xlu0 %13562 }
 0xe0c   : > { %8182 = vmax.xlane.f32.xlu1 %v8181_v21  ;;  %v8205_v21 = vsel %vm2781_vm5, %v17217_v13, -inf }
 0xe0f   : > { %8224 = vmax.xlane.f32.xlu0 %v8223_v37  ;;  %v8208_v37 = vsel %vm2781_vm5, %v17219_v58, -inf }
 0xe10   : > { %8185 = vmax.xlane.f32.xlu1 %v8184_v4  ;;  %v17303_v4 = vpop.permute.xlu1 %9259 }
 0xe14   : > { %8188 = vmax.xlane.f32.xlu1 %v8187_v27  ;;  %v17305_v27 = vpop.permute.xlu0 %9210 }
 0xe18   : > { %8191 = vmax.xlane.f32.xlu1 %v8190_v39  ;;  %v8211_v39 = vsel %vm2781_vm5, %v17223_v9, -inf }
 0xe1c   : > { %8194 = vmax.xlane.f32.xlu1 %v8193_v16  ;;  %v17309_v16 = vpop.permute.xlu0 %9308 }
 0xe20   : > { %8197 = vmax.xlane.f32.xlu1 %v8196_v18  ;;  %v17311_v18 = vpop.permute.xlu1 %13567 }
 0xe24   : > { %8203 = vmax.xlane.f32.xlu1 %v8202_v10  ;;  %v8214_v10 = vsel %vm2781_vm5, %v17227_v11, -inf  ;;  %v17317_v30 = vpop.permute.xlu1 %9357 }
 0xe25   : > { %18698 = vst [vmem:[#allocation13_spill] sm:$0xff] %v17317_v30 }
 0xe28   : > { %8206 = vmax.xlane.f32.xlu1 %v8205_v21  ;;  %v17315_v21 = vpop.permute.xlu0 %9406  ;;  %v17323_v33 = vpop.permute.xlu1 %9455 }
 0xe29   : > { %18697 = vst [vmem:[#allocation42_spill] sm:$0xff] %v17315_v21  ;;  %18700 = vst [vmem:[#allocation11_spill] sm:$0xff] %v17323_v33 }
 0xe2c   : > { %8209 = vmax.xlane.f32.xlu1 %v8208_v37  ;;  %v8220_v37 = vsel %vm2781_vm5, %v17239_v20, -inf  ;;  %v17321_v47 = vpop.permute.xlu0 %9504  ;;  %v17327_v2 = vpop.permute.xlu1 %9553 }
 0xe2d   : > { %18699 = vst [vmem:[#allocation12_spill] sm:$0xff] %v17321_v47  ;;  %18702 = vst [vmem:[#allocation17_spill] sm:$0xff] %v17327_v2 }
 0xe30   : > { %8212 = vmax.xlane.f32.xlu1 %v8211_v39  ;;  %v17325_v39 = vpop.permute.xlu0 %9602  ;;  %v17329_v31 = vpop.permute.xlu1 %9651 }
 0xe31   : > { %18701 = vst [vmem:[#allocation14_spill] sm:$0xff] %v17325_v39  ;;  %18703 = vst [vmem:[#allocation16_spill] sm:$0xff] %v17329_v31 }
 0xe34   : > { %8215 = vmax.xlane.f32.xlu1 %v8214_v10  ;;  %v17331_v44 = vpop.permute.xlu0 %9700  ;;  %v17333_v28 = vpop.permute.xlu1 %9749 }
 0xe35   : > { %18704 = vst [vmem:[#allocation18_spill] sm:$0xff] %v17331_v44  ;;  %18705 = vst [vmem:[#allocation15_spill] sm:$0xff] %v17333_v28 }
 0xe38   : > { %8221 = vmax.xlane.f32.xlu1 %v8220_v37 }
 0xe47   : > { %v8144_v10 = vpop.xlane.xlu0 %8143 }
 0xe48   : > { %v8236_v14 = vsub.f32 %v17133_v45, %v8144_v10 }
 0xe4a   : > { %v8269_v21 = vmul.f32 1.442695, %v8236_v14 }
 0xe4b   : > { %v8147_v49 = vpop.xlane.xlu0 %8146 }
 0xe4c   : > { %v8237_v37 = vsub.f32 %v17137_v38, %v8147_v49  ;;  %v8141_v56 = vpop.xlane.xlu1 %8140 }
 0xe4d   : > { %v8235_v47 = vsub.f32 %v17129_v1, %v8141_v56 }
 0xe4e   : > { %v8271_v33 = vmul.f32 1.442695, %v8237_v37  ;;  %v8232_v37 = vsel %vm2781_vm5, %v17265_v26, -inf }
 0xe4f   : > { %v8267_v39 = vmul.f32 1.442695, %v8235_v47  ;;  %v8153_v30 = vpop.xlane.xlu0 %8152 }
 0xe50   : > { %13889 = vpow2.f32 %v8271_v33  ;;  %v8239_v31 = vsub.f32 %v17148_v3, %v8153_v30  ;;  %v8150_v2 = vpop.xlane.xlu1 %8149 }
 0xe51   : > { %13891 = vpow2.f32 %v8267_v39  ;;  %v8238_v28 = vsub.f32 %v17141_v41, %v8150_v2 }
 0xe52   : > { %v8275_v44 = vmul.f32 1.442695, %v8239_v31  ;;  %13893 = vpow2.f32 %v8269_v21 }
 0xe53   : > { %v8159_v45 = vpop.xlane.xlu0 %8158  ;;  %v8273_v56 = vmul.f32 1.442695, %v8238_v28 }
 0xe54   : > { %v8241_v10 = vsub.f32 %v17156_v15, %v8159_v45  ;;  %v8156_v49 = vpop.xlane.xlu1 %8155  ;;  %13895 = vpow2.f32 %v8275_v44 }
 0xe55   : > { %v8240_v33 = vsub.f32 %v17150_v5, %v8156_v49 }
 0xe56   : > { %v8279_v38 = vmul.f32 1.442695, %v8241_v10 }
 0xe57   : > { %v8165_v1 = vpop.xlane.xlu0 %8164  ;;  %v8277_v15 = vmul.f32 1.442695, %v8240_v33  ;;  %v8226_v33 = vsel %vm2781_vm5, %v17253_v46, -inf }
 0xe58   : > { %v8243_v14 = vsub.f32 %v17161_v12, %v8165_v1  ;;  %v8162_v47 = vpop.xlane.xlu1 %8161  ;;  %13897 = vpow2.f32 %v8279_v38 }
 0xe59   : > { %13899 = vpow2.f32 %v8273_v56  ;;  %v8242_v21 = vsub.f32 %v17158_v60, %v8162_v47 }
 0xe5a   : > { %v17343_v30 = vpop.eup %13889  ;;  %v8283_v31 = vmul.f32 1.442695, %v8243_v14 }
 0xe5b   : > { %v17345_v3 = vpop.eup %13891  ;;  %v8337_v2 = vsel %vm2781_vm5, %v17343_v30, 0.0  ;;  %v8171_v12 = vpop.xlane.xlu0 %8170 }
 0xe5c   : > { %v8168_v41 = vpop.xlane.xlu1 %8167  ;;  %8338 = vadd.xlane.f32.xlu0 %v8337_v2  ;;  %v8331_v44 = vsel %vm2781_vm5, %v17345_v3, 0.0  ;;  %v17351_v28 = vpop.eup %13893  ;;  %13901 = vpow2.f32 %v8283_v31  ;;  %v8245_v56 = vsub.f32 %v17165_v42, %v8171_v12 }
 0xe5d   : > { %v8244_v5 = vsub.f32 %v17163_v8, %v8168_v41  ;;  %8332 = vadd.xlane.f32.xlu1 %v8331_v44  ;;  %v8334_v49 = vsel %vm2781_vm5, %v17351_v28, 0.0  ;;  %13903 = vpow2.f32 %v8277_v15  ;;  %v8281_v8 = vmul.f32 1.442695, %v8242_v21 }
 0xe5e   : > { %v17357_v45 = vpop.eup %13895 }
 0xe5f   : > { %v8285_v39 = vmul.f32 1.442695, %v8244_v5  ;;  %v8343_v1 = vsel %vm2781_vm5, %v17357_v45, 0.0  ;;  %v8177_v47 = vpop.xlane.xlu0 %8176 }
 0xe60   : > { %v8174_v10 = vpop.xlane.xlu1 %8173  ;;  %8233 = vmax.xlane.f32.xlu0 %v8232_v37  ;;  %v8247_v2 = vsub.f32 %v17169_v19, %v8177_v47  ;;  %v8229_v19 = vsel %vm2781_vm5, %v17263_v23, -inf }
 0xe61   : > { %v8246_v38 = vsub.f32 %v17167_v25, %v8174_v10  ;;  %8335 = vadd.xlane.f32.xlu1 %v8334_v49  ;;  %13905 = vpow2.f32 %v8285_v39  ;;  %v8287_v25 = vmul.f32 1.442695, %v8245_v56 }
 0xe62   : > { %v17365_v14 = vpop.eup %13897  ;;  %v8291_v5 = vmul.f32 1.442695, %v8247_v2 }
 0xe63   : > { %v8289_v60 = vmul.f32 1.442695, %v8246_v38  ;;  %v17369_v31 = vpop.eup %13899  ;;  %v8349_v42 = vsel %vm2781_vm5, %v17365_v14, 0.0 }
 0xe64   : > { %8344 = vadd.xlane.f32.xlu0 %v8343_v1  ;;  %v8340_v44 = vsel %vm2781_vm5, %v17369_v31, 0.0 }
 0xe65   : > { %8227 = vmax.xlane.f32.xlu1 %v8226_v33  ;;  %13907 = vpow2.f32 %v8289_v60  ;;  %v17406_v33 = vpop.permute.xlu1 %9847 }
 0xe66   : > { %13909 = vpow2.f32 %v8281_v8  ;;  %v17374_v41 = vpop.eup %13901  ;;  %18706 = vst [vmem:[#allocation22_spill] sm:$0xff] %v17406_v33  ;;  %v17414_v33 = vpop.permute.xlu0 %9798 }
 0xe67   : > { %v17378_v15 = vpop.eup %13903  ;;  %13911 = vpow2.f32 %v8287_v25  ;;  %v8355_v12 = vsel %vm2781_vm5, %v17374_v41, 0.0  ;;  %18707 = vst [vmem:[#allocation20_spill] sm:$0xff] %v17414_v33 }
 0xe68   : > { %8350 = vadd.xlane.f32.xlu0 %v8349_v42  ;;  %13913 = vpow2.f32 %v8291_v5  ;;  %v8346_v10 = vsel %vm2781_vm5, %v17378_v15, 0.0 }
 0xe69   : > { %8341 = vadd.xlane.f32.xlu1 %v8340_v44 }
 0xe6b   : > { %v17382_v21 = vpop.eup %13905 }
 0xe6c   : > { %8356 = vadd.xlane.f32.xlu0 %v8355_v12  ;;  %v8358_v39 = vsel %vm2781_vm5, %v17382_v21, 0.0 }
 0xe6d   : > { %8230 = vmax.xlane.f32.xlu1 %v8229_v19 }
 0xe6f   : > { %v17388_v37 = vpop.eup %13907 }
 0xe70   : > { %8359 = vadd.xlane.f32.xlu0 %v8358_v39  ;;  %v17392_v49 = vpop.eup %13909  ;;  %v8364_v38 = vsel %vm2781_vm5, %v17388_v37, 0.0 }
 0xe71   : > { %8347 = vadd.xlane.f32.xlu1 %v8346_v10  ;;  %v8352_v8 = vsel %vm2781_vm5, %v17392_v49, 0.0  ;;  %v17398_v56 = vpop.eup %13911 }
 0xe72   : > { %v8361_v60 = vsel %vm2781_vm5, %v17398_v56, 0.0  ;;  %v17402_v1 = vpop.eup %13913 }
 0xe73   : > { %v8367_v47 = vsel %vm2781_vm5, %v17402_v1, 0.0 }
 0xe74   : > { %8365 = vadd.xlane.f32.xlu0 %v8364_v38 }
 0xe75   : > { %8353 = vadd.xlane.f32.xlu1 %v8352_v8 }
 0xe79   : > { %8362 = vadd.xlane.f32.xlu1 %v8361_v60 }
 0xe7d   : > { %8368 = vadd.xlane.f32.xlu1 %v8367_v47 }
 0xe95   : > { %v8180_v25 = vpop.xlane.xlu1 %8179 }
 0xe96   : > { %v8248_v2 = vsub.f32 %v17171_v36, %v8180_v25 }
 0xe98   : > { %v8293_v42 = vmul.f32 1.442695, %v8248_v2 }
 0xe99   : > { %v8183_v44 = vpop.xlane.xlu1 %8182 }
 0xe9a   : > { %13915 = vpow2.f32 %v8293_v42  ;;  %v8249_v5 = vsub.f32 %v17173_v22, %v8183_v44  ;;  %v8201_v42 = vpop.xlane.xlu0 %8200 }
 0xe9c   : > { %v8295_v12 = vmul.f32 1.442695, %v8249_v5 }
 0xe9d   : > { %v8186_v19 = vpop.xlane.xlu1 %8185 }
 0xe9e   : > { %13917 = vpow2.f32 %v8295_v12  ;;  %v8250_v39 = vsub.f32 %v17175_v17, %v8186_v19  ;;  %v8255_v19 = vsub.f32 %v17213_v29, %v8201_v42 }
 0xea0   : > { %v8297_v10 = vmul.f32 1.442695, %v8250_v39 }
 0xea1   : > { %v8189_v38 = vpop.xlane.xlu1 %8188 }
 0xea2   : > { %13919 = vpow2.f32 %v8297_v10  ;;  %v8251_v8 = vsub.f32 %v17203_v43, %v8189_v38 }
 0xea4   : > { %v17412_v60 = vpop.eup %13915  ;;  %v8299_v47 = vmul.f32 1.442695, %v8251_v8 }
 0xea5   : > { %v8192_v36 = vpop.xlane.xlu1 %8191  ;;  %v8370_v25 = vsel %vm2781_vm5, %v17412_v60, 0.0 }
 0xea6   : > { %13921 = vpow2.f32 %v8299_v47  ;;  %v8252_v22 = vsub.f32 %v17205_v32, %v8192_v36  ;;  %8371 = vadd.xlane.f32.xlu0 %v8370_v25  ;;  %v8307_v47 = vmul.f32 1.442695, %v8255_v19  ;;  %v8219_v19 = vpop.xlane.xlu0 %8218 }
 0xea8   : > { %v17419_v2 = vpop.eup %13917  ;;  %v8301_v17 = vmul.f32 1.442695, %v8252_v22 }
 0xea9   : > { %v8195_v44 = vpop.xlane.xlu1 %8194  ;;  %v8373_v43 = vsel %vm2781_vm5, %v17419_v2, 0.0 }
 0xeaa   : > { %13923 = vpow2.f32 %v8301_v17  ;;  %v8253_v5 = vsub.f32 %v17209_v40, %v8195_v44  ;;  %8374 = vadd.xlane.f32.xlu0 %v8373_v43 }
 0xeac   : > { %v17424_v12 = vpop.eup %13919  ;;  %v8303_v39 = vmul.f32 1.442695, %v8253_v5 }
 0xead   : > { %v8198_v10 = vpop.xlane.xlu1 %8197  ;;  %v8376_v32 = vsel %vm2781_vm5, %v17424_v12, 0.0 }
 0xeae   : > { %13925 = vpow2.f32 %v8303_v39  ;;  %v8254_v38 = vsub.f32 %v17211_v0, %v8198_v10  ;;  %8377 = vadd.xlane.f32.xlu1 %v8376_v32 }
 0xeb0   : > { %v17430_v8 = vpop.eup %13921  ;;  %v8305_v36 = vmul.f32 1.442695, %v8254_v38  ;;  %v8261_v38 = vsub.f32 %v17235_v55, %v8219_v19 }
 0xeb1   : > { %v8204_v25 = vpop.xlane.xlu1 %8203  ;;  %v8379_v40 = vsel %vm2781_vm5, %v17430_v8, 0.0 }
 0xeb2   : > { %13927 = vpow2.f32 %v8305_v36  ;;  %v8256_v29 = vsub.f32 %v17215_v63, %v8204_v25  ;;  %8380 = vadd.xlane.f32.xlu1 %v8379_v40 }
 0xeb3   : > { %13929 = vpow2.f32 %v8307_v47 }
 0xeb4   : > { %v17435_v22 = vpop.eup %13923  ;;  %v8309_v17 = vmul.f32 1.442695, %v8256_v29 }
 0xeb5   : > { %v8207_v42 = vpop.xlane.xlu1 %8206  ;;  %v8382_v0 = vsel %vm2781_vm5, %v17435_v22, 0.0 }
 0xeb6   : > { %13931 = vpow2.f32 %v8309_v17  ;;  %v8257_v44 = vsub.f32 %v17217_v13, %v8207_v42  ;;  %8383 = vadd.xlane.f32.xlu0 %v8382_v0  ;;  %v8319_v17 = vmul.f32 1.442695, %v8261_v38 }
 0xeb8   : > { %v17440_v43 = vpop.eup %13925  ;;  %v8311_v5 = vmul.f32 1.442695, %v8257_v44 }
 0xeb9   : > { %v8210_v39 = vpop.xlane.xlu1 %8209  ;;  %v8385_v63 = vsel %vm2781_vm5, %v17440_v43, 0.0 }
 0xeba   : > { %13933 = vpow2.f32 %v8311_v5  ;;  %v8258_v10 = vsub.f32 %v17219_v58, %v8210_v39  ;;  %8386 = vadd.xlane.f32.xlu0 %v8385_v63 }
 0xebc   : > { %v17445_v32 = vpop.eup %13927  ;;  %v8313_v47 = vmul.f32 1.442695, %v8258_v10 }
 0xebd   : > { %v8213_v36 = vpop.xlane.xlu1 %8212  ;;  %v8388_v13 = vsel %vm2781_vm5, %v17445_v32, 0.0  ;;  %v17450_v25 = vpop.eup %13929 }
 0xebe   : > { %13935 = vpow2.f32 %v8313_v47  ;;  %v8259_v40 = vsub.f32 %v17223_v9, %v8213_v36  ;;  %8389 = vadd.xlane.f32.xlu1 %v8388_v13  ;;  %v8391_v55 = vsel %vm2781_vm5, %v17450_v25, 0.0 }
 0xec0   : > { %v17453_v29 = vpop.eup %13931  ;;  %v8315_v58 = vmul.f32 1.442695, %v8259_v40  ;;  %v13565_v40 = vunpack.i.h.bf16 %v17297_v35 }
 0xec1   : > { %v8216_v42 = vpop.xlane.xlu1 %8215  ;;  %v8394_v0 = vsel %vm2781_vm5, %v17453_v29, 0.0 }
 0xec2   : > { %13937 = vpow2.f32 %v8315_v58  ;;  %v8260_v44 = vsub.f32 %v17227_v11, %v8216_v42  ;;  %8395 = vadd.xlane.f32.xlu0 %v8394_v0  ;;  %8392 = vadd.xlane.f32.xlu1 %v8391_v55  ;;  %v13564_v58 = vunpack.i.l.bf16 %v17297_v35  ;;  %v8225_v42 = vpop.xlane.xlu0 %8224 }
 0xec3   : > { %13939 = vpow2.f32 %v8319_v17  ;;  %v6568_v17 = vpack.c.bf16 %v13565_v40, %v13565_v40 }
 0xec4   : > { %v17460_v5 = vpop.eup %13933  ;;  %v8317_v9 = vmul.f32 1.442695, %v8260_v44  ;;  %v6567_v0 = vpack.c.bf16 %v13564_v58, %v13564_v58 }
 0xec5   : > { %v8397_v19 = vsel %vm2781_vm5, %v17460_v5, 0.0  ;;  %v8222_v55 = vpop.xlane.xlu1 %8221 }
 0xec6   : > { %13941 = vpow2.f32 %v8317_v9  ;;  %8398 = vadd.xlane.f32.xlu0 %v8397_v19 }
 0xec8   : > { %v17464_v39 = vpop.eup %13935 }
 0xec9   : > { %v8400_v63 = vsel %vm2781_vm5, %v17464_v39, 0.0 }
 0xeca   : > { %8401 = vadd.xlane.f32.xlu1 %v8400_v63 }
 0xecc   : > { %v17468_v10 = vpop.eup %13937 }
 0xecd   : > { %v8403_v11 = vsel %vm2781_vm5, %v17468_v10, 0.0  ;;  %v17472_v38 = vpop.eup %13939 }
 0xece   : > { %18708 = vst [vmem:[#allocation21_spill] sm:$0xff] %v17472_v38  ;;  %8404 = vadd.xlane.f32.xlu0 %v8403_v11  ;;  %v8409_v36 = vsel %vm2781_vm5, %v17472_v38, 0.0  ;;  %v8263_v11 = vsub.f32 %v17249_v6, %v8225_v42  ;;  %v8628_v6 = vsel %vm3172_vm4, %v17183_v48, 0 }
 0xed0   : > { %v17474_v47 = vpop.eup %13941 }
 0xed1   : > { %18709 = vst [vmem:[#allocation19_spill] sm:$0xff] %v17474_v47  ;;  %v8406_v13 = vsel %vm2781_vm5, %v17474_v47, 0.0 }
 0xed2   : > { %8410 = vadd.xlane.f32.xlu0 %v8409_v36  ;;  %8407 = vadd.xlane.f32.xlu1 %v8406_v13  ;;  %v8262_v36 = vsub.f32 %v17239_v20, %v8222_v55 }
 0xed4   : > { %v8321_v38 = vmul.f32 1.442695, %v8262_v36 }
 0xee3   : > { %9945 = vrot.lane.b32.xlu1 %v6568_v17, %s18696_s14  ;;  %v8323_v17 = vmul.f32 1.442695, %v8263_v11  ;;  %v8726_v11 = vsel %vm3172_vm4, %v17187_v7, 0 }
 0xee8   : > { %9896 = vrot.lane.b32.xlu0 %v6567_v0, %s18696_s14 }
 0xee9   : > { %v8339_v44 = vpop.xlane.xlu0 %8338 }
 0xeea   : > { %v8333_v9 = vpop.xlane.xlu1 %8332 }
 0xeeb   : > { %13943 = vrcp.f32 %v8333_v9 }
 0xeec   : > { %13945 = vrcp.f32 %v8339_v44 }
 0xeed   : > { %v8234_v19 = vpop.xlane.xlu0 %8233 }
 0xeee   : > { %v8336_v63 = vpop.xlane.xlu1 %8335  ;;  %v8266_v20 = vsub.f32 %v17265_v26, %v8234_v19 }
 0xeef   : > { %13947 = vrcp.f32 %v8336_v63 }
 0xef0   : > { %v8329_v19 = vmul.f32 1.442695, %v8266_v20 }
 0xef1   : > { %v8345_v35 = vpop.xlane.xlu0 %8344 }
 0xef2   : > { %v8228_v13 = vpop.xlane.xlu1 %8227  ;;  %13949 = vrcp.f32 %v8345_v35 }
 0xef3   : > { %v8264_v58 = vsub.f32 %v17253_v46, %v8228_v13 }
 0xef5   : > { %v13944_v40 = vpop.eup %13943  ;;  %v8325_v42 = vmul.f32 1.442695, %v8264_v58  ;;  %v8351_v55 = vpop.xlane.xlu0 %8350 }
 0xef6   : > { %v8342_v33 = vpop.xlane.xlu1 %8341  ;;  %v8459_v0 = vmul.f32 %v13944_v40, %v17345_v3  ;;  %v13946_v9 = vpop.eup %13945 }
 0xef7   : > { %13951 = vrcp.f32 %v8342_v33  ;;  %v8461_v48 = vmul.f32 %v13946_v9, %v17343_v30  ;;  %v8775_v9 = vsel %vm3172_vm4, %v17191_v50, 0 }
 0xef8   : > { %v8491_v44 = vpack.c.bf16 %v8459_v0, %v8459_v0  ;;  %13953 = vpow2.f32 %v8323_v17 }
 0xef9   : > { %v13948_v47 = vpop.eup %13947  ;;  %13955 = vpow2.f32 %v8321_v38  ;;  %v8677_v38 = vsel %vm3172_vm4, %v17181_v51, 0  ;;  %v8357_v13 = vpop.xlane.xlu0 %8356 }
 0xefa   : > { %12961 = vmatmul.mubr.msk.bf16.vlgmr.msra.gmra.mrb[232].mxu0 %vm2781_vm5, %v8491_v44  ;;  %v8231_v46 = vpop.xlane.xlu1 %8230  ;;  %v8460_v63 = vmul.f32 %v13948_v47, %v17351_v28  ;;  %13957 = vrcp.f32 %v8351_v55 }
 0xefb   : > { %12971 = vmatpush3.bf16.msra.mxu0 %v8628_v6  ;;  %v8265_v3 = vsub.f32 %v17263_v23, %v8231_v46  ;;  %12972 = vmatprep.mubr.msk.bf16.mxu0 %vm14222_vm2, %v18612_v52  ;;  %13959 = vpow2.f32 %v8325_v42  ;;  %v8493_v23 = vpack.c.bf16 %v8461_v48, %v8461_v48  ;;  %v8824_v42 = vsel %vm3172_vm4, %v17189_v53, 0 }
 0xefc   : > { %v8492_v33 = vpack.c.bf16 %v8460_v63, %v8460_v63  ;;  %12982 = vmatprep.subr.bf16.mxu0 %v18612_v52  ;;  %v13950_v30 = vpop.eup %13949 }
 0xefd   : > { %v8327_v26 = vmul.f32 1.442695, %v8265_v3  ;;  %v8463_v7 = vmul.f32 %v13950_v30, %v17357_v45  ;;  %v8360_v20 = vpop.xlane.xlu0 %8359 }
 0xefe   : > { %12967 = vmatmul.mubr.msk.bf16.vlgmr.msra.gmra.mrb[232].mxu1 %vm2781_vm5, %v8492_v33  ;;  %v8348_v28 = vpop.xlane.xlu1 %8347 }
 0xeff   : > { %13961 = vpow2.f32 %v8327_v26  ;;  %12977 = vmatpush3.bf16.msra.mxu1 %v8677_v38  ;;  %12978 = vmatprep.mubr.msk.bf16.mxu1 %vm14222_vm2, %v18612_v52  ;;  %v8495_v45 = vpack.c.bf16 %v8463_v7, %v8463_v7  ;;  %v8873_v38 = vsel %vm3172_vm4, %v17197_v24, 0  ;;  %v8922_v24 = vsel %vm3172_vm4, %v17195_v54, 0 }
 0xf00   : > { %13963 = vrcp.f32 %v8348_v28  ;;  %12988 = vmatprep.subr.bf16.mxu1 %v18612_v52  ;;  %v13569_v7 = vunpack.i.l.bf16 %v17311_v18 }
 0xf01   : > { %v13952_v47 = vpop.eup %13951  ;;  %13965 = vpow2.f32 %v8329_v19 }
 0xf02   : > { %12973 = vmatmul.mubr.msk.bf16.vlgmr.msra.gmra.mrb[236].mxu0 %vm2781_vm5, %v8493_v23  ;;  %v8354_v51 = vpop.xlane.xlu1 %8353  ;;  %v17507_v36 = vpop.eup %13953  ;;  %v8462_v35 = vmul.f32 %v13952_v47, %v17369_v31 }
 0xf03   : > { %12983 = vmatpush3.bf16.msra.mxu0 %v8726_v11  ;;  %12984 = vmatprep.mubr.msk.bf16.mxu0 %vm14222_vm2, %v18612_v52  ;;  %v17512_v40 = vpop.eup %13955  ;;  %13967 = vrcp.f32 %v8354_v51  ;;  %v8415_v58 = vsel %vm2781_vm5, %v17507_v36, 0.0  ;;  %v8366_v23 = vpop.xlane.xlu0 %8365  ;;  %v8971_v51 = vsel %vm3172_vm4, %v17247_v61, 0  ;;  %v13570_v61 = vunpack.i.h.bf16 %v17311_v18 }
 0xf04   : > { %12994 = vmatprep.subr.bf16.mxu0 %v18612_v52  ;;  %v8494_v17 = vpack.c.bf16 %v8462_v35, %v8462_v35  ;;  %v13958_v0 = vpop.eup %13957  ;;  %13969 = vrcp.f32 %v8357_v13  ;;  %v8412_v31 = vsel %vm2781_vm5, %v17512_v40, 0.0 }
 0xf05   : > { %v17523_v44 = vpop.eup %13959  ;;  %13971 = vrcp.f32 %v8360_v20  ;;  %v8465_v53 = vmul.f32 %v13958_v0, %v17365_v14 }
 0xf06   : > { %12979 = vmatmul.mubr.msk.bf16.vlgmr.msra.gmra.mrb[236].mxu1 %vm2781_vm5, %v8494_v17  ;;  %v8418_v46 = vsel %vm2781_vm5, %v17523_v44, 0.0  ;;  %v8363_v33 = vpop.xlane.xlu1 %8362 }
 0xf07   : > { %8416 = vadd.xlane.f32.xlu0 %v8415_v58  ;;  %12989 = vmatpush3.bf16.msra.mxu1 %v8775_v9  ;;  %13973 = vrcp.f32 %v8363_v33  ;;  %v8497_v19 = vpack.c.bf16 %v8465_v53, %v8465_v53  ;;  %v6569_v9 = vpack.c.bf16 %v13569_v7, %v13569_v7  ;;  %v9265_v53 = vsel %vm3172_vm4, %v17303_v4, 0 }
 0xf08   : > { %8413 = vadd.xlane.f32.xlu1 %v8412_v31  ;;  %12990 = vmatprep.mubr.msk.bf16.mxu1 %vm14222_vm2, %v18612_v52  ;;  %13975 = vrcp.f32 %v8366_v23  ;;  %v18710_v23 = vld [vmem:[#allocation13_spill] sm:$0xff] }
 0xf09   : > { %v17525_v6 = vpop.eup %13961  ;;  %13000 = vmatprep.subr.bf16.mxu1 %v18612_v52 }
 0xf0a   : > { %v13964_v50 = vpop.eup %13963  ;;  %12985 = vmatmul.mubr.msk.bf16.vlgmr.msra.gmra.mrb[240].mxu0 %vm2781_vm5, %v8495_v45  ;;  %v8421_v55 = vsel %vm2781_vm5, %v17525_v6, 0.0  ;;  %v8369_v30 = vpop.xlane.xlu1 %8368  ;;  %v9118_v45 = vsel %vm3172_vm4, %v17291_v62, 0  ;;  %v9216_v62 = vsel %vm3172_vm4, %v17305_v27, 0 }
 0xf0b   : > { %12995 = vmatpush3.bf16.msra.mxu0 %v8824_v42  ;;  %8422 = vadd.xlane.f32.xlu0 %v8421_v55  ;;  %v8464_v63 = vmul.f32 %v13964_v50, %v17378_v15  ;;  %v17538_v3 = vpop.eup %13965  ;;  %13977 = vrcp.f32 %v8369_v30  ;;  %v9167_v50 = vsel %vm3172_vm4, %v17295_v34, 0 }
 0xf0c   : > { %8419 = vadd.xlane.f32.xlu1 %v8418_v46  ;;  %12996 = vmatprep.mubr.msk.bf16.mxu0 %vm14222_vm2, %v18612_v52  ;;  %v8424_v15 = vsel %vm2781_vm5, %v17538_v3, 0.0 }
 0xf0d   : > { %v8496_v48 = vpack.c.bf16 %v8464_v63, %v8464_v63  ;;  %13006 = vmatprep.subr.bf16.mxu0 %v18612_v52  ;;  %v13968_v26 = vpop.eup %13967 }
 0xf0e   : > { %v13970_v28 = vpop.eup %13969  ;;  %v8466_v14 = vmul.f32 %v13968_v26, %v17392_v49 }
 0xf0f   : > { %12991 = vmatmul.mubr.msk.bf16.vlgmr.msra.gmra.mrb[240].mxu1 %vm2781_vm5, %v8496_v48  ;;  %v8467_v49 = vmul.f32 %v13970_v28, %v17374_v41  ;;  %v13972_v11 = vpop.eup %13971  ;;  %v9020_v41 = vsel %vm3172_vm4, %v17285_v59, 0  ;;  %v6570_v59 = vpack.c.bf16 %v13570_v61, %v13570_v61 }
 0xf10   : > { %13001 = vmatpush3.bf16.msra.mxu1 %v8873_v38  ;;  %8425 = vadd.xlane.f32.xlu1 %v8424_v15  ;;  %v8498_v47 = vpack.c.bf16 %v8466_v14, %v8466_v14  ;;  %v8468_v35 = vmul.f32 %v13972_v11, %v17382_v21  ;;  %v9069_v21 = vsel %vm3172_vm4, %v17261_v57, 0  ;;  %v9314_v15 = vsel %vm3172_vm4, %v17309_v16, 0 }
 0xf11   : > { %13002 = vmatprep.mubr.msk.bf16.mxu1 %vm14222_vm2, %v18612_v52  ;;  %13012 = vmatprep.subr.bf16.mxu1 %v18612_v52  ;;  %v8499_v54 = vpack.c.bf16 %v8467_v49, %v8467_v49  ;;  %v13974_v13 = vpop.eup %13973  ;;  %v9363_v14 = vsel %vm3172_vm4, %v18710_v23, 0  ;;  %v18711_v49 = vld [vmem:[#allocation42_spill] sm:$0xff] }
 0xf12   : > { %12997 = vmatmul.mubr.msk.bf16.vlgmr.msra.gmra.mrb[244].mxu0 %vm2781_vm5, %v8497_v19  ;;  %v8469_v17 = vmul.f32 %v13974_v13, %v17398_v56  ;;  %v8500_v58 = vpack.c.bf16 %v8468_v35, %v8468_v35  ;;  %v13976_v0 = vpop.eup %13975  ;;  %v18712_v35 = vld [vmem:[#allocation11_spill] sm:$0xff] }
 0xf13   : > { %13007 = vmatpush3.bf16.msra.mxu0 %v8922_v24  ;;  %13008 = vmatprep.mubr.msk.bf16.mxu0 %vm14222_vm2, %v18612_v52  ;;  %v8470_v56 = vmul.f32 %v13976_v0, %v17388_v37 }
 0xf14   : > { %13018 = vmatprep.subr.bf16.mxu0 %v18612_v52  ;;  %v8501_v31 = vpack.c.bf16 %v8469_v17, %v8469_v17 }
 0xf15   : > { %v13978_v18 = vpop.eup %13977  ;;  %v8502_v20 = vpack.c.bf16 %v8470_v56, %v8470_v56 }
 0xf16   : > { %v8471_v57 = vmul.f32 %v13978_v18, %v17402_v1  ;;  %v18714_v18 = vld [vmem:[#allocation17_spill] sm:$0xff] }
 0xf17   : > { %13003 = vmatmul.mubr.msk.bf16.vlgmr.msra.gmra.mrb[244].mxu1 %vm2781_vm5, %v8498_v47  ;;  %v9412_v47 = vsel %vm3172_vm4, %v18711_v49, 0  ;;  %v9559_v56 = vsel %vm3172_vm4, %v18714_v18, 0 }
 0xf18   : > { %13013 = vmatpush3.bf16.msra.mxu1 %v8971_v51  ;;  %13014 = vmatprep.mubr.msk.bf16.mxu1 %vm14222_vm2, %v18612_v52  ;;  %v8503_v37 = vpack.c.bf16 %v8471_v57, %v8471_v57 }
 0xf19   : > { %13024 = vmatprep.subr.bf16.mxu1 %v18612_v52 }
 0xf1a   : > { %13009 = vmatmul.mubr.msk.bf16.vlgmr.msra.gmra.mrb[248].mxu0 %vm2781_vm5, %v8499_v54 }
 0xf1b   : > { %13019 = vmatpush3.bf16.msra.mxu0 %v9020_v41  ;;  %13020 = vmatprep.mubr.msk.bf16.mxu0 %vm14222_vm2, %v18612_v52  ;;  %v9461_v41 = vsel %vm3172_vm4, %v18712_v35, 0 }
 0xf1c   : > { %13030 = vmatprep.subr.bf16.mxu0 %v18612_v52 }
 0xf1f   : > { %13015 = vmatmul.mubr.msk.bf16.vlgmr.msra.gmra.mrb[248].mxu1 %vm2781_vm5, %v8500_v58  ;;  %v18713_v58 = vld [vmem:[#allocation12_spill] sm:$0xff] }
 0xf20   : > { %13025 = vmatpush3.bf16.msra.mxu1 %v9069_v21  ;;  %13026 = vmatprep.mubr.msk.bf16.mxu1 %vm14222_vm2, %v18612_v52  ;;  %v9510_v0 = vsel %vm3172_vm4, %v18713_v58, 0 }
 0xf21   : > { %10043 = vrot.lane.b32.xlu1 %v6570_v59, %s18696_s14  ;;  %9994 = vrot.lane.b32.xlu0 %v6569_v9, %s18696_s14  ;;  %s18454_s14 = scalar_lea.vmem [#allocation5], %s18747_s17 }
 0xf22   : > { %13021 = vmatmul.mubr.msk.bf16.vlgmr.msra.gmra.mrb[252].mxu0 %vm2781_vm5, %v8501_v31  ;;  %13036 = vmatprep.subr.bf16.mxu1 %v18612_v52  ;;  %s11590_s24 = sshll.u32 %s18454_s14, 4  ;;  %s18476_s24 = int_to_ptr.vmem [resolvable:$true] %s11590_s24 }
 0xf23   : > { %13031 = vmatpush3.bf16.msra.mxu0 %v9118_v45  ;;  %13032 = vmatprep.mubr.msk.bf16.mxu0 %vm14222_vm2, %v18612_v52  ;;  %s14149_s25 = scalar_lea.vmem %s18476_s24, 2048  ;;  %p14156_p8 = scmp.lt.s32.totalorder %s18476_s24, %s14154_s23 }
 0xf24   : > { %13042 = vmatprep.subr.bf16.mxu0 %v18612_v52  ;;  %p14150_p6 = scmp.ne.s32.totalorder %s18476_s24, %s14149_s25  ;;  %p14157_p10 = scmp.lt.s32.totalorder %s14155_s27, %s14149_s25 }
 0xf26   : > { %p14151_p12 = pnand %p14150_p6, %p18748_p11  ;;  %p14158_p0 = por %p14157_p10, %p14156_p8 }
 0xf27   : > { %13027 = vmatmul.mubr.msk.bf16.vlgmr.msra.gmra.mrb[252].mxu1 %vm2781_vm5, %v8502_v20 }
 0xf28   : > { %13037 = vmatpush3.bf16.msra.mxu1 %v9167_v50  ;;  %13038 = vmatprep.mubr.msk.bf16.mxu1 %vm14222_vm2, %v18612_v52  ;;  %p14152_p13 = pneg %p14151_p12 }
 0xf29   : > { %13048 = vmatprep.subr.bf16.mxu1 %v18612_v52 }
 0xf2a   : > { %13033 = vmatmul.mubr.msk.bf16.vlgmr.msra.gmra.mrb[0].mxu0 %vm2781_vm5, %v8503_v37  ;;  %p14159_p2 = pnand %p14158_p0, %p14152_p13 }
 0xf2b   : > { %13043 = vmatpush3.bf16.msra.mxu0 %v9216_v62  ;;  %13044 = vmatprep.mubr.msk.bf16.mxu0 %vm14222_vm2, %v18612_v52  ;;  %v18715_v62 = vld [vmem:[#allocation14_spill] sm:$0xff] }
 0xf2c   : > { %13054 = vmatprep.subr.bf16.mxu0 %v18612_v52 }
 0xf33   : > { %v8372_v34 = vpop.xlane.xlu0 %8371 }
 0xf34   : > { %13979 = vrcp.f32 %v8372_v34  ;;  %v9608_v34 = vsel %vm3172_vm4, %v18715_v62, 0 }
 0xf37   : > { %v8375_v1 = vpop.xlane.xlu0 %8374 }
 0xf38   : > { %13981 = vrcp.f32 %v8375_v1 }
 0xf3b   : > { %v8378_v42 = vpop.xlane.xlu1 %8377 }
 0xf3c   : > { %13983 = vrcp.f32 %v8378_v42 }
 0xf3e   : > { %v13980_v55 = vpop.eup %13979 }
 0xf3f   : > { %v8472_v46 = vmul.f32 %v13980_v55, %v17412_v60  ;;  %v8381_v63 = vpop.xlane.xlu1 %8380  ;;  %v18716_v55 = vld [vmem:[#allocation16_spill] sm:$0xff] }
 0xf40   : > { %13985 = vrcp.f32 %v8381_v63 }
 0xf41   : > { %v8504_v27 = vpack.c.bf16 %v8472_v46, %v8472_v46  ;;  %v9657_v46 = vsel %vm3172_vm4, %v18716_v55, 0 }
 0xf42   : > { %v13982_v33 = vpop.eup %13981 }
 0xf43   : > { %v8473_v48 = vmul.f32 %v13982_v33, %v17419_v2  ;;  %v8384_v26 = vpop.xlane.xlu0 %8383  ;;  %13039 = vmatmul.mubr.msk.bf16.vlgmr.msra.gmra.mrb[0].mxu1 %vm2781_vm5, %v8504_v27 }
 0xf44   : > { %13987 = vrcp.f32 %v8384_v26  ;;  %13049 = vmatpush3.bf16.msra.mxu1 %v9265_v53  ;;  %13050 = vmatprep.mubr.msk.bf16.mxu1 %vm14222_vm2, %v18612_v52 }
 0xf45   : > { %v8505_v38 = vpack.c.bf16 %v8473_v48, %v8473_v48  ;;  %13060 = vmatprep.subr.bf16.mxu1 %v18612_v52 }
 0xf46   : > { %v13984_v60 = vpop.eup %13983 }
 0xf47   : > { %v8474_v19 = vmul.f32 %v13984_v60, %v17424_v12  ;;  %v8387_v4 = vpop.xlane.xlu0 %8386  ;;  %13045 = vmatmul.mubr.msk.bf16.vlgmr.msra.gmra.mrb[4].mxu0 %vm2781_vm5, %v8505_v38  ;;  %v18718_v38 = vld [vmem:[#allocation15_spill] sm:$0xff] }
 0xf48   : > { %13989 = vrcp.f32 %v8387_v4  ;;  %13055 = vmatpush3.bf16.msra.mxu0 %v9314_v15  ;;  %13056 = vmatprep.mubr.msk.bf16.mxu0 %vm14222_vm2, %v18612_v52  ;;  %v9755_v60 = vsel %vm3172_vm4, %v18718_v38, 0  ;;  %v18719_v15 = vld [vmem:[#allocation19_spill] sm:$0xff] }
 0xf49   : > { %v8506_v2 = vpack.c.bf16 %v8474_v19, %v8474_v19  ;;  %13066 = vmatprep.subr.bf16.mxu0 %v18612_v52 }
 0xf4a   : > { %v13986_v28 = vpop.eup %13985 }
 0xf4b   : > { %v8475_v24 = vmul.f32 %v13986_v28, %v17430_v8  ;;  %13051 = vmatmul.mubr.msk.bf16.vlgmr.msra.gmra.mrb[4].mxu1 %vm2781_vm5, %v8506_v2  ;;  %v8390_v16 = vpop.xlane.xlu1 %8389  ;;  %v18720_v28 = vld [vmem:[#allocation20_spill] sm:$0xff] }
 0xf4c   : > { %13061 = vmatpush3.bf16.msra.mxu1 %v9363_v14  ;;  %13991 = vrcp.f32 %v8390_v16  ;;  %13062 = vmatprep.mubr.msk.bf16.mxu1 %vm14222_vm2, %v18612_v52  ;;  %v18721_v14 = vld [vmem:[#allocation21_spill] sm:$0xff]  ;;  %v18722_v16 = vld [vmem:[#allocation22_spill] sm:$0xff] }
 0xf4d   : > { %v8507_v12 = vpack.c.bf16 %v8475_v24, %v8475_v24  ;;  %13072 = vmatprep.subr.bf16.mxu1 %v18612_v52 }
 0xf4e   : > { %v13988_v30 = vpop.eup %13987 }
 0xf4f   : > { %v8476_v11 = vmul.f32 %v13988_v30, %v17435_v22  ;;  %v8396_v51 = vpop.xlane.xlu0 %8395  ;;  %13057 = vmatmul.mubr.msk.bf16.vlgmr.msra.gmra.mrb[8].mxu0 %vm2781_vm5, %v8507_v12  ;;  %v8393_v8 = vpop.xlane.xlu1 %8392  ;;  %v9853_v12 = vsel %vm3172_vm4, %v18722_v16, 0 }
 0xf50   : > { %13993 = vrcp.f32 %v8396_v51  ;;  %13067 = vmatpush3.bf16.msra.mxu0 %v9412_v47  ;;  %13068 = vmatprep.mubr.msk.bf16.mxu0 %vm14222_vm2, %v18612_v52 }
 0xf51   : > { %v8508_v54 = vpack.c.bf16 %v8476_v11, %v8476_v11  ;;  %13995 = vrcp.f32 %v8393_v8  ;;  %13078 = vmatprep.subr.bf16.mxu0 %v18612_v52 }
 0xf52   : > { %v13990_v13 = vpop.eup %13989 }
 0xf53   : > { %v8477_v61 = vmul.f32 %v13990_v13, %v17440_v43  ;;  %v8399_v22 = vpop.xlane.xlu0 %8398  ;;  %13063 = vmatmul.mubr.msk.bf16.vlgmr.msra.gmra.mrb[8].mxu1 %vm2781_vm5, %v8508_v54 }
 0xf54   : > { %13073 = vmatpush3.bf16.msra.mxu1 %v9461_v41  ;;  %13074 = vmatprep.mubr.msk.bf16.mxu1 %vm14222_vm2, %v18612_v52  ;;  %13997 = vrcp.f32 %v8399_v22 }
 0xf55   : > { %v8509_v7 = vpack.c.bf16 %v8477_v61, %v8477_v61  ;;  %13084 = vmatprep.subr.bf16.mxu1 %v18612_v52 }
 0xf56   : > { %v13992_v17 = vpop.eup %13991 }
 0xf57   : > { %v8478_v21 = vmul.f32 %v13992_v17, %v17445_v32  ;;  %13069 = vmatmul.mubr.msk.bf16.vlgmr.msra.gmra.mrb[12].mxu0 %vm2781_vm5, %v8509_v7  ;;  %v8402_v43 = vpop.xlane.xlu1 %8401 }
 0xf58   : > { %13079 = vmatpush3.bf16.msra.mxu0 %v9510_v0  ;;  %13999 = vrcp.f32 %v8402_v43  ;;  %13080 = vmatprep.mubr.msk.bf16.mxu0 %vm14222_vm2, %v18612_v52 }
 0xf59   : > { %v8510_v59 = vpack.c.bf16 %v8478_v21, %v8478_v21  ;;  %13090 = vmatprep.subr.bf16.mxu0 %v18612_v52 }
 0xf5a   : > { %v13994_v9 = vpop.eup %13993 }
 0xf5b   : > { %v13996_v31 = vpop.eup %13995  ;;  %v8405_v45 = vpop.xlane.xlu0 %8404  ;;  %13075 = vmatmul.mubr.msk.bf16.vlgmr.msra.gmra.mrb[12].mxu1 %vm2781_vm5, %v8510_v59  ;;  %v8480_v57 = vmul.f32 %v13994_v9, %v17453_v29 }
 0xf5c   : > { %v8479_v32 = vmul.f32 %v13996_v31, %v17450_v25  ;;  %13085 = vmatpush3.bf16.msra.mxu1 %v9559_v56  ;;  %13086 = vmatprep.mubr.msk.bf16.mxu1 %vm14222_vm2, %v18612_v52  ;;  %14001 = vrcp.f32 %v8405_v45 }
 0xf5d   : > { %13096 = vmatprep.subr.bf16.mxu1 %v18612_v52  ;;  %v8512_v1 = vpack.c.bf16 %v8480_v57, %v8480_v57 }
 0xf5e   : > { %v8511_v20 = vpack.c.bf16 %v8479_v32, %v8479_v32  ;;  %v13998_v50 = vpop.eup %13997 }
 0xf5f   : > { %v8408_v37 = vpop.xlane.xlu1 %8407  ;;  %v8481_v29 = vmul.f32 %v13998_v50, %v17460_v5  ;;  %v8411_v42 = vpop.xlane.xlu0 %8410  ;;  %v18717_v5 = vld [vmem:[#allocation18_spill] sm:$0xff] }
 0xf60   : > { %13081 = vmatmul.mubr.msk.bf16.vlgmr.msra.gmra.mrb[16].mxu0 %vm2781_vm5, %v8511_v20  ;;  %14003 = vrcp.f32 %v8408_v37  ;;  %v9706_v53 = vsel %vm3172_vm4, %v18717_v5, 0 }
 0xf61   : > { %13091 = vmatpush3.bf16.msra.mxu0 %v9608_v34  ;;  %13092 = vmatprep.mubr.msk.bf16.mxu0 %vm14222_vm2, %v18612_v52  ;;  %14005 = vrcp.f32 %v8411_v42  ;;  %v8513_v27 = vpack.c.bf16 %v8481_v29, %v8481_v29 }
 0xf62   : > { %v14000_v25 = vpop.eup %13999  ;;  %13102 = vmatprep.subr.bf16.mxu0 %v18612_v52 }
 0xf63   : > { %13087 = vmatmul.mubr.msk.bf16.vlgmr.msra.gmra.mrb[16].mxu1 %vm2781_vm5, %v8512_v1  ;;  %v8482_v63 = vmul.f32 %v14000_v25, %v17464_v39  ;;  %v9897_v30 = vpop.permute.xlu0 %9896  ;;  %v9946_v11 = vpop.permute.xlu1 %9945 }
 0xf64   : > { %13097 = vmatpush3.bf16.msra.mxu1 %v9657_v46  ;;  %13098 = vmatprep.mubr.msk.bf16.mxu1 %vm14222_vm2, %v18612_v52  ;;  %v9902_v47 = vsel %vm3172_vm4, %v9897_v30, 0  ;;  %v9951_v9 = vsel %vm3172_vm4, %v9946_v11, 0 }
 0xf65   : > { %13108 = vmatprep.subr.bf16.mxu1 %v18612_v52  ;;  %v8514_v48 = vpack.c.bf16 %v8482_v63, %v8482_v63 }
 0xf66   : > { %v14002_v33 = vpop.eup %14001 }
 0xf67   : > { %v8483_v26 = vmul.f32 %v14002_v33, %v17468_v10  ;;  %v9804_v10 = vsel %vm3172_vm4, %v18720_v28, 0 }
 0xf68   : > { %13093 = vmatmul.mubr.msk.bf16.vlgmr.msra.gmra.mrb[20].mxu0 %vm2781_vm5, %v8513_v27 }
 0xf69   : > { %13103 = vmatpush3.bf16.msra.mxu0 %v9706_v53  ;;  %13104 = vmatprep.mubr.msk.bf16.mxu0 %vm14222_vm2, %v18612_v52  ;;  %v8515_v4 = vpack.c.bf16 %v8483_v26, %v8483_v26 }
 0xf6a   : > { %13114 = vmatprep.subr.bf16.mxu0 %v18612_v52  ;;  %v14004_v39 = vpop.eup %14003 }
 0xf6b   : > { %13099 = vmatmul.mubr.msk.bf16.vlgmr.msra.gmra.mrb[20].mxu1 %vm2781_vm5, %v8514_v48  ;;  %v8484_v19 = vmul.f32 %v14004_v39, %v18719_v15  ;;  %v14006_v2 = vpop.eup %14005 }
 0xf6c   : > { %13109 = vmatpush3.bf16.msra.mxu1 %v9755_v60  ;;  %13110 = vmatprep.mubr.msk.bf16.mxu1 %vm14222_vm2, %v18612_v52  ;;  %v8485_v24 = vmul.f32 %v14006_v2, %v18721_v14 }
 0xf6d   : > { %13120 = vmatprep.subr.bf16.mxu1 %v18612_v52  ;;  %v8516_v23 = vpack.c.bf16 %v8484_v19, %v8484_v19 }
 0xf6e   : > { %v8517_v49 = vpack.c.bf16 %v8485_v24, %v8485_v24 }
 0xf70   : > { %13105 = vmatmul.mubr.msk.bf16.vlgmr.msra.gmra.mrb[24].mxu0 %vm2781_vm5, %v8515_v4 }
 0xf71   : > { %13115 = vmatpush3.bf16.msra.mxu0 %v9804_v10  ;;  %13116 = vmatprep.mubr.msk.bf16.mxu0 %vm14222_vm2, %v18612_v52 }
 0xf72   : > { %13126 = vmatprep.subr.bf16.mxu0 %v18612_v52 }
 0xf73   : > { %13111 = vmatmul.mubr.msk.bf16.vlgmr.msra.gmra.mrb[24].mxu1 %vm2781_vm5, %v8516_v23 }
 0xf74   : > { %13121 = vmatpush3.bf16.msra.mxu1 %v9853_v12  ;;  %13122 = vmatprep.mubr.msk.bf16.mxu1 %vm14222_vm2, %v18612_v52 }
 0xf75   : > { %13132 = vmatprep.subr.bf16.mxu1 %v18612_v52 }
 0xf78   : > { %13117 = vmatmul.mubr.msk.bf16.vlgmr.msra.gmra.mrb[28].mxu0 %vm2781_vm5, %v8517_v49 }
 0xf79   : > { %13127 = vmatpush3.bf16.msra.mxu0 %v9902_v47  ;;  %13128 = vmatprep.mubr.msk.bf16.mxu0 %vm14222_vm2, %v18612_v52 }
 0xf7a   : > { %13138 = vmatprep.subr.bf16.mxu0 %v18612_v52 }
 0xf94   : > { %v8417_v51 = vpop.xlane.xlu0 %8416 }
 0xf95   : > { %14007 = vrcp.f32 %v8417_v51  ;;  %v8414_v8 = vpop.xlane.xlu1 %8413 }
 0xf96   : > { %14009 = vrcp.f32 %v8414_v8 }
 0xf98   : > { %v8423_v54 = vpop.xlane.xlu0 %8422 }
 0xf99   : > { %14011 = vrcp.f32 %v8423_v54  ;;  %v8420_v13 = vpop.xlane.xlu1 %8419 }
 0xf9a   : > { %14013 = vrcp.f32 %v8420_v13 }
 0xf9c   : > { %v9995_v17 = vpop.permute.xlu0 %9994 }
 0xf9d   : > { %v8426_v41 = vpop.xlane.xlu1 %8425  ;;  %v10000_v59 = vsel %vm3172_vm4, %v9995_v17, 0 }
 0xf9e   : > { %14015 = vrcp.f32 %v8426_v41 }
 0xf9f   : > { %v14008_v35 = vpop.eup %14007 }
 0xfa0   : > { %v14010_v61 = vpop.eup %14009  ;;  %v8487_v22 = vmul.f32 %v14008_v35, %v17507_v36 }
 0xfa1   : > { %v8486_v7 = vmul.f32 %v14010_v61, %v17512_v40  ;;  %v10044_v18 = vpop.permute.xlu1 %10043 }
 0xfa2   : > { %v8519_v58 = vpack.c.bf16 %v8487_v22, %v8487_v22  ;;  %v10049_v32 = vsel %vm3172_vm4, %v10044_v18, 0 }
 0xfa3   : > { %v14012_v0 = vpop.eup %14011  ;;  %v8518_v21 = vpack.c.bf16 %v8486_v7, %v8486_v7 }
 0xfa4   : > { %v14014_v43 = vpop.eup %14013  ;;  %13129 = vmatmul.mubr.msk.bf16.vlgmr.msra.gmra.mrb[32].mxu0 %vm2781_vm5, %v8519_v58  ;;  %v8489_v31 = vmul.f32 %v14012_v0, %v17525_v6 }
 0xfa5   : > { %13123 = vmatmul.mubr.msk.bf16.vlgmr.msra.gmra.mrb[28].mxu1 %vm2781_vm5, %v8518_v21  ;;  %13139 = vmatpush3.bf16.msra.mxu0 %v10000_v59  ;;  %v8488_v36 = vmul.f32 %v14014_v43, %v17523_v44 }
 0xfa6   : > { %13133 = vmatpush3.bf16.msra.mxu1 %v9951_v9  ;;  %13134 = vmatprep.mubr.msk.bf16.mxu1 %vm14222_vm2, %v18612_v52  ;;  %v8521_v40 = vpack.c.bf16 %v8489_v31, %v8489_v31 }
 0xfa7   : > { %13140 = vmatprep.mubr.msk.bf16.mxu0 %vm14222_vm2, %v18612_v52  ;;  %13144 = vmatprep.subr.bf16.mxu1 %v18612_v52  ;;  %v8520_v56 = vpack.c.bf16 %v8488_v36, %v8488_v36 }
 0xfa8   : > { %v14016_v45 = vpop.eup %14015 }
 0xfa9   : > { %v8490_v44 = vmul.f32 %v14016_v45, %v17538_v3 }
 0xfab   : > { %v8522_v6 = vpack.c.bf16 %v8490_v44, %v8490_v44  ;;  %v13623_v44 = vld [vmem:[%s18526_s3 + $0x10] sm:$0xff]  }
 0xfac   : > { %13141 = vmatmul.mubr.msk.bf16.vlgmr.msra.gmra.mrb[36].mxu0 %vm2781_vm5, %v8521_v40  ;;  %13150 = vmatprep.subr.bf16.mxu0 %v13623_v44 }
 0xfad   : > { %13135 = vmatmul.mubr.msk.bf16.vlgmr.msra.gmra.mrb[32].mxu1 %vm2781_vm5, %v8520_v56  ;;  %13151 = vmatpush3.bf16.msra.mxu0 %v13623_v44 }
 0xfae   : > { %13145 = vmatpush3.bf16.msra.mxu1 %v10049_v32  ;;  %13146 = vmatprep.mubr.msk.bf16.mxu1 %vm14222_vm2, %v18612_v52 }
 0xfb5   : > { %13147 = vmatmul.mubr.msk.bf16.vlgmr.msra.gmra.mrb[36].mxu1 %vm2781_vm5, %v8522_v6 }
 0xfcd   : > { %v17721_v57 = vpop.f32.mrb[232].mxu0 }
 0xfce   : > { %v12962_v20 = vpop.f32.mrb[233].mxu0 }
 0xfcf   : > { %v8569_v50 = vpop.f32.mrb[234].mxu0 }
 0xfd0   : > { %v12963_v37 = vpop.f32.mrb[235].mxu0 }
 0xfd1   : > { %v17723_v62 = vpop.f32.mrb[232].mxu1 }
 0xfd2   : > { %v12968_v34 = vpop.f32.mrb[233].mxu1 }
 0xfd3   : > { %v8618_v1 = vpop.f32.mrb[234].mxu1 }
 0xfd4   : > { %v12969_v25 = vpop.f32.mrb[235].mxu1 }
 0xfd5   : > { %v17725_v29 = vpop.f32.mrb[236].mxu0 }
 0xfd6   : > { %v12974_v42 = vpop.f32.mrb[237].mxu0 }
 0xfd7   : > { %v8667_v55 = vpop.f32.mrb[238].mxu0 }
 0xfd8   : > { %v12975_v52 = vpop.f32.mrb[239].mxu0 }
 0xfd9   : > { %v17727_v46 = vpop.f32.mrb[236].mxu1  ;;  %v13624_v52 = vld [vmem:[%s18526_s3 + $0x18] sm:$0xff]  }
 0xfda   : > { %v12980_v3 = vpop.f32.mrb[237].mxu1  ;;  %13152 = vmatprep.subr.bf16.mxu0 %v13624_v52 }
 0xfdb   : > { %v8716_v63 = vpop.f32.mrb[238].mxu1  ;;  %13153 = vmatpush3.bf16.msra.mxu0 %v13624_v52 }
 0xfdc   : > { %v12981_v27 = vpop.f32.mrb[239].mxu1 }
 0xfdd   : > { %v17729_v33 = vpop.f32.mrb[240].mxu0 }
 0xfde   : > { %v12986_v5 = vpop.f32.mrb[241].mxu0 }
 0xfdf   : > { %v8765_v53 = vpop.f32.mrb[242].mxu0 }
 0xfe0   : > { %v12987_v48 = vpop.f32.mrb[243].mxu0 }
 0xfe2   : > { %v17731_v26 = vpop.f32.mrb[240].mxu1 }
 0xfe3   : > { %v12992_v39 = vpop.f32.mrb[241].mxu1 }
 0xfe4   : > { %v8814_v38 = vpop.f32.mrb[242].mxu1 }
 0xfe5   : > { %v12993_v60 = vpop.f32.mrb[243].mxu1  ;;  %v17733_v15 = vpop.f32.mrb[244].mxu0 }
 0xfe6   : > { %v12998_v19 = vpop.f32.mrb[245].mxu0 }
 0xfe7   : > { %v8863_v4 = vpop.f32.mrb[246].mxu0 }
 0xfe8   : > { %v12999_v2 = vpop.f32.mrb[247].mxu0 }
 0xfea   : > { %v17735_v28 = vpop.f32.mrb[244].mxu1 }
 0xfeb   : > { %v13004_v10 = vpop.f32.mrb[245].mxu1 }
 0xfec   : > { %v8912_v23 = vpop.f32.mrb[246].mxu1 }
 0xfed   : > { %v13005_v14 = vpop.f32.mrb[247].mxu1  ;;  %v17737_v24 = vpop.f32.mrb[248].mxu0 }
 0xfee   : > { %v13010_v16 = vpop.f32.mrb[249].mxu0 }
 0xfef   : > { %v8961_v12 = vpop.f32.mrb[250].mxu0 }
 0xff0   : > { %v13011_v30 = vpop.f32.mrb[251].mxu0 }
 0xff2   : > { %v17739_v49 = vpop.f32.mrb[248].mxu1 }
 0xff3   : > { %v13016_v47 = vpop.f32.mrb[249].mxu1 }
 0xff4   : > { %v9010_v11 = vpop.f32.mrb[250].mxu1 }
 0xff5   : > { %v13017_v51 = vpop.f32.mrb[251].mxu1  ;;  %v17741_v8 = vpop.f32.mrb[252].mxu0 }
 0xff6   : > { %v13022_v54 = vpop.f32.mrb[253].mxu0 }
 0xff7   : > { %v9059_v13 = vpop.f32.mrb[254].mxu0 }
 0xff8   : > { %v13023_v35 = vpop.f32.mrb[255].mxu0 }
 0xffa   : > { %v17743_v41 = vpop.f32.mrb[252].mxu1 }
 0xffb   : > { %v13028_v61 = vpop.f32.mrb[253].mxu1 }
 0xffc   : > { %v9108_v22 = vpop.f32.mrb[254].mxu1 }
 0xffd   : > { %v13029_v7 = vpop.f32.mrb[255].mxu1  ;;  %v17745_v17 = vpop.f32.mrb[0].mxu0 }
 0xffe   : > { %v13034_v58 = vpop.f32.mrb[1].mxu0 }
 0xfff   : > { %v9157_v0 = vpop.f32.mrb[2].mxu0 }
0x1000   : > { %v13035_v21 = vpop.f32.mrb[3].mxu0 }
0x1016   : > { %v17747_v43 = vpop.f32.mrb[0].mxu1 }
0x1017   : > { %v13040_v59 = vpop.f32.mrb[1].mxu1 }
0x1018   : > { %v9206_v9 = vpop.f32.mrb[2].mxu1 }
0x1019   : > { %v13041_v31 = vpop.f32.mrb[3].mxu1 }
0x101a   : > { %v17749_v36 = vpop.f32.mrb[4].mxu0 }
0x101b   : > { %v13046_v40 = vpop.f32.mrb[5].mxu0 }
0x101c   : > { %v9255_v18 = vpop.f32.mrb[6].mxu0 }
0x101d   : > { %v13047_v56 = vpop.f32.mrb[7].mxu0 }
0x101e   : > { %v17751_v45 = vpop.f32.mrb[4].mxu1 }
0x101f   : > { %v13052_v32 = vpop.f32.mrb[5].mxu1 }
0x1020   : > { %v9304_v6 = vpop.f32.mrb[6].mxu1 }
0x1021   : > { %v13053_v20 = vpop.f32.mrb[7].mxu1 }
0x1022   : > { %v9350_v50 = vpop.f32.mrb[8].mxu0 }
0x1023   : > { %v13058_v37 = vpop.f32.mrb[9].mxu0 }
0x1024   : > { %v9353_v34 = vpop.f32.mrb[10].mxu0 }
0x1025   : > { %v13059_v1 = vpop.f32.mrb[11].mxu0 }
0x1026   : > { %v9399_v25 = vpop.f32.mrb[8].mxu1 }
0x1027   : > { %v13571_v42 = vpack.i.bf16 %v9399_v25, %v9350_v50  ;;  %v13064_v55 = vpop.f32.mrb[9].mxu1 }
0x1028   : > { %v9402_v3 = vpop.f32.mrb[10].mxu1 }
0x1029   : > { %v13065_v63 = vpop.f32.mrb[11].mxu1  ;;  %13572 = vrot.lane.b32.xlu0 %v13571_v42, %s18723_s26 }
0x102a   : > { %v9448_v27 = vpop.f32.mrb[12].mxu0 }
0x102b   : > { %v13070_v5 = vpop.f32.mrb[13].mxu0 }
0x102c   : > { %v9451_v53 = vpop.f32.mrb[14].mxu0 }
0x102d   : > { %v13071_v48 = vpop.f32.mrb[15].mxu0 }
0x102e   : > { %v9497_v39 = vpop.f32.mrb[12].mxu1 }
0x102f   : > { %v13576_v38 = vpack.i.bf16 %v9497_v39, %v9448_v27  ;;  %v13076_v60 = vpop.f32.mrb[13].mxu1 }
0x1030   : > { %v9500_v19 = vpop.f32.mrb[14].mxu1 }
0x1031   : > { %v13077_v4 = vpop.f32.mrb[15].mxu1  ;;  %13577 = vrot.lane.b32.xlu1 %v13576_v38, %s18723_s26 }
0x1033   : > { %v9546_v2 = vpop.f32.mrb[16].mxu0 }
0x1034   : > { %v13082_v10 = vpop.f32.mrb[17].mxu0 }
0x1035   : > { %v9549_v23 = vpop.f32.mrb[18].mxu0 }
0x1036   : > { %v13083_v14 = vpop.f32.mrb[19].mxu0  ;;  %v9595_v16 = vpop.f32.mrb[16].mxu1 }
0x1037   : > { %v13581_v12 = vpack.i.bf16 %v9595_v16, %v9546_v2  ;;  %v13088_v30 = vpop.f32.mrb[17].mxu1 }
0x1038   : > { %v9598_v47 = vpop.f32.mrb[18].mxu1 }
0x1039   : > { %v13089_v11 = vpop.f32.mrb[19].mxu1  ;;  %13582 = vrot.lane.b32.xlu0 %v13581_v12, %s18723_s26 }
0x103b   : > { %v9644_v51 = vpop.f32.mrb[20].mxu0 }
0x103c   : > { %v13094_v54 = vpop.f32.mrb[21].mxu0 }
0x103d   : > { %v9647_v13 = vpop.f32.mrb[22].mxu0 }
0x103e   : > { %v13095_v35 = vpop.f32.mrb[23].mxu0  ;;  %v9693_v61 = vpop.f32.mrb[20].mxu1 }
0x103f   : > { %v13586_v22 = vpack.i.bf16 %v9693_v61, %v9644_v51  ;;  %v13100_v7 = vpop.f32.mrb[21].mxu1 }
0x1040   : > { %v9696_v58 = vpop.f32.mrb[22].mxu1 }
0x1041   : > { %v13101_v0 = vpop.f32.mrb[23].mxu1  ;;  %13587 = vrot.lane.b32.xlu1 %v13586_v22, %s18723_s26 }
0x1043   : > { %v9742_v21 = vpop.f32.mrb[24].mxu0 }
0x1044   : > { %v13106_v59 = vpop.f32.mrb[25].mxu0 }
0x1045   : > { %v9745_v9 = vpop.f32.mrb[26].mxu0 }
0x1046   : > { %v13107_v31 = vpop.f32.mrb[27].mxu0  ;;  %v9791_v40 = vpop.f32.mrb[24].mxu1 }
0x1047   : > { %v13591_v18 = vpack.i.bf16 %v9791_v40, %v9742_v21  ;;  %v13112_v56 = vpop.f32.mrb[25].mxu1 }
0x1048   : > { %v9794_v32 = vpop.f32.mrb[26].mxu1 }
0x1049   : > { %v13113_v44 = vpop.f32.mrb[27].mxu1  ;;  %13592 = vrot.lane.b32.xlu0 %v13591_v18, %s18723_s26 }
0x104b   : > { %v9840_v6 = vpop.f32.mrb[28].mxu0 }
0x104c   : > { %v13118_v20 = vpop.f32.mrb[29].mxu0 }
0x104d   : > { %v9843_v50 = vpop.f32.mrb[30].mxu0 }
0x104e   : > { %v13119_v37 = vpop.f32.mrb[31].mxu0 }
0x1077   : > { %v9938_v34 = vpop.f32.mrb[32].mxu0 }
0x1078   : > { %v9889_v1 = vpop.f32.mrb[28].mxu1  ;;  %v13130_v25 = vpop.f32.mrb[33].mxu0 }
0x1079   : > { %v13596_v42 = vpack.i.bf16 %v9889_v1, %v9840_v6  ;;  %v13124_v55 = vpop.f32.mrb[29].mxu1  ;;  %v9941_v52 = vpop.f32.mrb[34].mxu0 }
0x107a   : > { %v9892_v3 = vpop.f32.mrb[30].mxu1  ;;  %v13131_v63 = vpop.f32.mrb[35].mxu0 }
0x107b   : > { %v13125_v27 = vpop.f32.mrb[31].mxu1  ;;  %13597 = vrot.lane.b32.xlu1 %v13596_v42, %s18723_s26 }
0x107f   : > { %v10036_v5 = vpop.f32.mrb[36].mxu0 }
0x1080   : > { %v9987_v53 = vpop.f32.mrb[32].mxu1  ;;  %v13142_v48 = vpop.f32.mrb[37].mxu0 }
0x1081   : > { %v13601_v39 = vpack.i.bf16 %v9987_v53, %v9938_v34  ;;  %v13136_v38 = vpop.f32.mrb[33].mxu1  ;;  %v10039_v60 = vpop.f32.mrb[38].mxu0 }
0x1082   : > { %v9990_v19 = vpop.f32.mrb[34].mxu1  ;;  %v13143_v4 = vpop.f32.mrb[39].mxu0 }
0x1083   : > { %v13137_v2 = vpop.f32.mrb[35].mxu1  ;;  %13602 = vrot.lane.b32.xlu0 %v13601_v39, %s18723_s26  ;;  %v18726_v4 = vld [vmem:[#allocation29_spill] sm:$0xff] }
0x1088   : > { %v10085_v10 = vpop.f32.mrb[36].mxu1 }
0x1089   : > { %v13606_v23 = vpack.i.bf16 %v10085_v10, %v10036_v5  ;;  %v13148_v14 = vpop.f32.mrb[37].mxu1 }
0x108a   : > { %v10088_v16 = vpop.f32.mrb[38].mxu1 }
0x108b   : > { %v13149_v12 = vpop.f32.mrb[39].mxu1  ;;  %13607 = vrot.lane.b32.xlu1 %v13606_v23, %s18723_s26  ;;  %v18727_v16 = vld [vmem:[#allocation27_spill] sm:$0xff]  ;;  %s18474_s26 = scalar_lea.hbm %s18532_s9, %s11927_s16 }
0x109b   : > { %v13573_v30 = vpop.permute.xlu0 %13572 }
0x109c   : > { %v13575_v47 = vunpack.i.h.bf16 %v13573_v30  ;;  %v13574_v11 = vunpack.i.l.bf16 %v13573_v30  ;;  %v18728_v30 = vld [vmem:[#allocation31_spill] sm:$0xff] }
0x109e   : > { %v10156_v51 = vsel %vm1215_vm3, %v17723_v62, %v13575_v47  ;;  %v10155_v54 = vsel %vm1215_vm3, %v17721_v57, %v13574_v11 }
0x109f   : > { %v10171_v13 = vpack.c.bf16 %v10156_v51, %v10155_v54  ;;  %v18729_v51 = vld [vmem:[#allocation43_spill] sm:$0xff] }
0x10a1   : > { %13154 = vmatprep.mubr.msk.bf16.mxu0 %vm395_vm1, %v10171_v13 }
0x10a3   : > { %v13578_v35 = vpop.permute.xlu1 %13577 }
0x10a4   : > { %v13580_v61 = vunpack.i.h.bf16 %v13578_v35  ;;  %v13579_v22 = vunpack.i.l.bf16 %v13578_v35 }
0x10a6   : > { %v10158_v7 = vsel %vm1215_vm3, %v17727_v46, %v13580_v61  ;;  %v10157_v58 = vsel %vm1215_vm3, %v17725_v29, %v13579_v22 }
0x10a7   : > { %v10172_v0 = vpack.c.bf16 %v10158_v7, %v10157_v58 }
0x10a9   : > { %13155 = vmatmul.mubr.msk.bf16.vlgmr.msra.gmra.mrb[40].mxu0 %vm395_vm1, %v10172_v0 }
0x10ab   : > { %v13583_v21 = vpop.permute.xlu0 %13582 }
0x10ac   : > { %v13585_v62 = vunpack.i.h.bf16 %v13583_v21  ;;  %v13584_v59 = vunpack.i.l.bf16 %v13583_v21 }
0x10ae   : > { %v10160_v57 = vsel %vm1215_vm3, %v17731_v26, %v13585_v62  ;;  %v10159_v9 = vsel %vm1215_vm3, %v17729_v33, %v13584_v59 }
0x10af   : > { %v10173_v31 = vpack.c.bf16 %v10160_v57, %v10159_v9 }
0x10b1   : > { %13158 = vmatprep.mubr.msk.bf16.mxu0 %vm395_vm1, %v10173_v31 }
0x10b3   : > { %v13588_v40 = vpop.permute.xlu1 %13587 }
0x10b4   : > { %v13590_v46 = vunpack.i.h.bf16 %v13588_v40  ;;  %v13589_v18 = vunpack.i.l.bf16 %v13588_v40 }
0x10b6   : > { %v10162_v29 = vsel %vm1215_vm3, %v17735_v28, %v13590_v46  ;;  %v10161_v56 = vsel %vm1215_vm3, %v17733_v15, %v13589_v18 }
0x10b7   : > { %v10174_v32 = vpack.c.bf16 %v10162_v29, %v10161_v56  ;;  %v18730_v56 = vld [vmem:[#allocation30_spill] sm:$0xff] }
0x10b9   : > { %13159 = vmatmul.mubr.msk.bf16.gmra.mrb[44].mxu0 %vm395_vm1, %v10174_v32 }
0x10bb   : > { %v13593_v44 = vpop.permute.xlu0 %13592 }
0x10bc   : > { %v13595_v26 = vunpack.i.h.bf16 %v13593_v44  ;;  %v13594_v6 = vunpack.i.l.bf16 %v13593_v44 }
0x10be   : > { %v10164_v33 = vsel %vm1215_vm3, %v17739_v49, %v13595_v26  ;;  %v10163_v20 = vsel %vm1215_vm3, %v17737_v24, %v13594_v6  ;;  %v18731_v26 = vld [vmem:[#allocation34_spill] sm:$0xff] }
0x10bf   : > { %v10175_v50 = vpack.c.bf16 %v10164_v33, %v10163_v20  ;;  %v18732_v20 = vld [vmem:[#allocation33_spill] sm:$0xff] }
0x10c1   : > { %13162 = vmatprep.mubr.msk.bf16.mxu0 %vm395_vm1, %v10175_v50 }
0x10ed   : > { %v13598_v37 = vpop.permute.xlu1 %13597 }
0x10ee   : > { %v13600_v28 = vunpack.i.h.bf16 %v13598_v37  ;;  %v13599_v34 = vunpack.i.l.bf16 %v13598_v37 }
0x10f0   : > { %v10166_v15 = vsel %vm1215_vm3, %v17743_v41, %v13600_v28  ;;  %v10165_v1 = vsel %vm1215_vm3, %v17741_v8, %v13599_v34  ;;  %v18733_v28 = vld [vmem:[#allocation28_spill] sm:$0xff] }
0x10f1   : > { %v10176_v25 = vpack.c.bf16 %v10166_v15, %v10165_v1 }
0x10f3   : > { %13163 = vmatmul.mubr.msk.bf16.gmra.mrb[48].mxu0 %vm395_vm1, %v10176_v25 }
0x10f5   : > { %v13603_v42 = vpop.permute.xlu0 %13602 }
0x10f6   : > { %v13605_v49 = vunpack.i.h.bf16 %v13603_v42  ;;  %v13604_v55 = vunpack.i.l.bf16 %v13603_v42 }
0x10f8   : > { %v10168_v24 = vsel %vm1215_vm3, %v17747_v43, %v13605_v49  ;;  %v10167_v52 = vsel %vm1215_vm3, %v17745_v17, %v13604_v55  ;;  %v17810_v43 = vld [vmem:[%s18529_s6 + $0x10] sm:$0xff]  ;;  %v18724_v17 = vld [vmem:[#allocation8_spill] sm:$0xff] }
0x10f9   : > { %v10177_v3 = vpack.c.bf16 %v10168_v24, %v10167_v52  ;;  %v18725_v48 = vsub.s32 3, %v18724_v17 }
0x10fb   : > { %13166 = vmatprep.mubr.msk.bf16.mxu0 %vm395_vm1, %v10177_v3  ;;  %v17815_v39 = vrot.slane %v17810_v43, %v18725_v48 }
0x10fd   : > { %v13608_v63 = vpop.permute.xlu1 %13607 }
0x10fe   : > { %v13610_v41 = vunpack.i.h.bf16 %v13608_v63  ;;  %v13609_v27 = vunpack.i.l.bf16 %v13608_v63 }
0x1100   : > { %v10170_v8 = vsel %vm1215_vm3, %v17751_v45, %v13610_v41  ;;  %v10169_v5 = vsel %vm1215_vm3, %v17749_v36, %v13609_v27  ;;  %v13625_v27 = vld [vmem:[%s18527_s4 + $0x10] sm:$0xff]  }
0x1101   : > { %v10178_v53 = vpack.c.bf16 %v10170_v8, %v10169_v5  ;;  %13170 = vmatprep.subr.bf16.mxu1 %v13625_v27  ;;  %v13626_v8 = vld [vmem:[%s18527_s4 + $0x18] sm:$0xff]  }
0x1102   : > { %13171 = vmatpush3.bf16.msra.mxu1 %v13625_v27 }
0x1103   : > { %13167 = vmatmul.mubr.msk.bf16.gmra.mrb[52].mxu0 %vm395_vm1, %v10178_v53  ;;  %13172 = vmatprep.subr.bf16.mxu1 %v13626_v8 }
0x1106   : > { %13173 = vmatpush3.bf16.msra.mxu1 %v13626_v8 }
0x117c   : > { %v13156_v38 = vpop.f32.mrb[40].mxu0 }
0x117d   : > { %v10267_v60 = vadd.f32 %v13156_v38, %v17815_v39  ;;  %v10258_v45 = vpop.f32.mrb[41].mxu0 }
0x117e   : > { %v10259_v19 = vadd.f32 %v10258_v45, %v17815_v39  ;;  %v13157_v36 = vpop.f32.mrb[42].mxu0  ;;  %v18734_v45 = vld [vmem:[#allocation35_spill] sm:$0xff] }
0x117f   : > { %v17820_v2 = vadd.f32 %v10267_v60, %v18726_v4  ;;  %v10270_v10 = vadd.f32 %v13157_v36, %v17815_v39  ;;  %v10261_v23 = vpop.f32.mrb[43].mxu0 }
0x1180   : > { %v10262_v14 = vadd.f32 %v10261_v23, %v17815_v39  ;;  %v17825_v12 = vadd.f32 %v10259_v19, %v18727_v16  ;;  %v18735_v23 = vld [vmem:[#allocation32_spill] sm:$0xff]  ;;  %v18736_v16 = vld [vmem:[#allocation38_spill] sm:$0xff] }
0x1181   : > { %v17828_v47 = vadd.f32 %v10270_v10, %v18728_v30  ;;  %v10343_v11 = vsel %vm395_vm1, %v17820_v2, 0.0  ;;  %v10403_v0 = vmul.f32 %v17820_v2, %v17820_v2 }
0x1182   : > { %v17833_v54 = vadd.f32 %v10262_v14, %v18729_v51  ;;  %10344 = vadd.xlane.f32.xlu0 %v10343_v11  ;;  %v10337_v61 = vsel %vm395_vm1, %v17825_v12, 0.0  ;;  %v10401_v31 = vmul.f32 %v17825_v12, %v17825_v12  ;;  %v18737_v51 = vld [vmem:[#allocation36_spill] sm:$0xff] }
0x1183   : > { %v10404_v35 = vmul.f32 %v17828_v47, %v17828_v47  ;;  %v10346_v58 = vsel %vm395_vm1, %v17828_v47, 0.0  ;;  %v10423_v9 = vsel %vm395_vm1, %v10403_v0, 0.0 }
0x1184   : > { %v10340_v13 = vsel %vm395_vm1, %v17833_v54, 0.0  ;;  %v10402_v7 = vmul.f32 %v17833_v54, %v17833_v54  ;;  %v10417_v33 = vsel %vm395_vm1, %v10401_v31, 0.0 }
0x1185   : > { %10341 = vadd.xlane.f32.xlu1 %v10340_v13  ;;  %v10426_v22 = vsel %vm395_vm1, %v10404_v35, 0.0 }
0x1186   : > { %10338 = vadd.xlane.f32.xlu0 %v10337_v61  ;;  %v10420_v62 = vsel %vm395_vm1, %v10402_v7, 0.0 }
0x1189   : > { %10427 = vadd.xlane.f32.xlu1 %v10426_v22 }
0x118a   : > { %10347 = vadd.xlane.f32.xlu0 %v10346_v58 }
0x118c   : > { %v13160_v21 = vpop.f32.mrb[44].mxu0 }
0x118d   : > { %v10283_v59 = vadd.f32 %v13160_v21, %v17815_v39  ;;  %v10274_v57 = vpop.f32.mrb[45].mxu0  ;;  %10421 = vadd.xlane.f32.xlu1 %v10420_v62 }
0x118e   : > { %v13161_v40 = vpop.f32.mrb[46].mxu0  ;;  %10424 = vadd.xlane.f32.xlu0 %v10423_v9  ;;  %v10275_v44 = vadd.f32 %v10274_v57, %v17815_v39 }
0x118f   : > { %v10286_v46 = vadd.f32 %v13161_v40, %v17815_v39  ;;  %v10277_v18 = vpop.f32.mrb[47].mxu0  ;;  %v17856_v32 = vadd.f32 %v10283_v59, %v18730_v56 }
0x1190   : > { %v10278_v29 = vadd.f32 %v10277_v18, %v17815_v39  ;;  %v17869_v34 = vadd.f32 %v10275_v44, %v18733_v28 }
0x1191   : > { %v17860_v6 = vadd.f32 %v10286_v46, %v18731_v26  ;;  %v10355_v15 = vsel %vm395_vm1, %v17856_v32, 0.0  ;;  %v10407_v49 = vmul.f32 %v17856_v32, %v17856_v32 }
0x1192   : > { %10418 = vadd.xlane.f32.xlu0 %v10417_v33  ;;  %v17864_v50 = vadd.f32 %v10278_v29, %v18732_v20  ;;  %v10349_v42 = vsel %vm395_vm1, %v17869_v34, 0.0  ;;  %v10405_v3 = vmul.f32 %v17869_v34, %v17869_v34  ;;  %v18738_v29 = vld [vmem:[#allocation39_spill] sm:$0xff] }
0x1193   : > { %v10358_v37 = vsel %vm395_vm1, %v17860_v6, 0.0  ;;  %v10408_v25 = vmul.f32 %v17860_v6, %v17860_v6  ;;  %v10435_v52 = vsel %vm395_vm1, %v10407_v49, 0.0 }
0x1194   : > { %10359 = vadd.xlane.f32.xlu1 %v10358_v37  ;;  %v10352_v1 = vsel %vm395_vm1, %v17864_v50, 0.0  ;;  %v10406_v24 = vmul.f32 %v17864_v50, %v17864_v50  ;;  %v10429_v41 = vsel %vm395_vm1, %v10405_v3, 0.0  ;;  %v18739_v37 = vld [vmem:[#allocation37_spill] sm:$0xff] }
0x1195   : > { %v10438_v55 = vsel %vm395_vm1, %v10408_v25, 0.0 }
0x1196   : > { %10356 = vadd.xlane.f32.xlu0 %v10355_v15  ;;  %v10432_v63 = vsel %vm395_vm1, %v10406_v24, 0.0  ;;  %v18740_v15 = vld [vmem:[#allocation41_spill] sm:$0xff] }
0x1198   : > { %10353 = vadd.xlane.f32.xlu1 %v10352_v1 }
0x119a   : > { %10350 = vadd.xlane.f32.xlu0 %v10349_v42  ;;  %v18741_v42 = vld [vmem:[#allocation40_spill] sm:$0xff] }
0x119c   : > { %10439 = vadd.xlane.f32.xlu1 %v10438_v55 }
0x119e   : > { %10436 = vadd.xlane.f32.xlu0 %v10435_v52 }
0x11a0   : > { %10433 = vadd.xlane.f32.xlu1 %v10432_v63 }
0x11a2   : > { %10430 = vadd.xlane.f32.xlu0 %v10429_v41 }
0x11c6   : > { %v13164_v5 = vpop.f32.mrb[48].mxu0 }
0x11c7   : > { %v10299_v53 = vadd.f32 %v13164_v5, %v17815_v39  ;;  %v10290_v48 = vpop.f32.mrb[49].mxu0 }
0x11c8   : > { %v10291_v38 = vadd.f32 %v10290_v48, %v17815_v39  ;;  %v13165_v60 = vpop.f32.mrb[50].mxu0 }
0x11c9   : > { %v17898_v19 = vadd.f32 %v10299_v53, %v18734_v45  ;;  %v10302_v36 = vadd.f32 %v13165_v60, %v17815_v39  ;;  %v10293_v4 = vpop.f32.mrb[51].mxu0 }
0x11ca   : > { %v10294_v10 = vadd.f32 %v10293_v4, %v17815_v39  ;;  %v17903_v14 = vadd.f32 %v10291_v38, %v18735_v23 }
0x11cb   : > { %v17906_v30 = vadd.f32 %v10302_v36, %v18736_v16  ;;  %v10367_v11 = vsel %vm395_vm1, %v17898_v19, 0.0  ;;  %v10411_v22 = vmul.f32 %v17898_v19, %v17898_v19 }
0x11cc   : > { %10368 = vadd.xlane.f32.xlu0 %v10367_v11  ;;  %v17911_v13 = vadd.f32 %v10294_v10, %v18737_v51  ;;  %v10361_v61 = vsel %vm395_vm1, %v17903_v14, 0.0  ;;  %v10409_v21 = vmul.f32 %v17903_v14, %v17903_v14 }
0x11cd   : > { %v10370_v35 = vsel %vm395_vm1, %v17906_v30, 0.0  ;;  %v10412_v58 = vmul.f32 %v17906_v30, %v17906_v30  ;;  %v10447_v0 = vsel %vm395_vm1, %v10411_v22, 0.0 }
0x11ce   : > { %10371 = vadd.xlane.f32.xlu1 %v10370_v35  ;;  %v10364_v7 = vsel %vm395_vm1, %v17911_v13, 0.0  ;;  %v10410_v59 = vmul.f32 %v17911_v13, %v17911_v13  ;;  %v10441_v40 = vsel %vm395_vm1, %v10409_v21, 0.0 }
0x11cf   : > { %v10450_v62 = vsel %vm395_vm1, %v10412_v58, 0.0 }
0x11d0   : > { %10362 = vadd.xlane.f32.xlu0 %v10361_v61  ;;  %v10444_v33 = vsel %vm395_vm1, %v10410_v59, 0.0 }
0x11d2   : > { %10365 = vadd.xlane.f32.xlu1 %v10364_v7 }
0x11d4   : > { %10448 = vadd.xlane.f32.xlu0 %v10447_v0 }
0x11d6   : > { %v13168_v57 = vpop.f32.mrb[52].mxu0  ;;  %10451 = vadd.xlane.f32.xlu1 %v10450_v62 }
0x11d7   : > { %v10315_v9 = vadd.f32 %v13168_v57, %v17815_v39  ;;  %v10306_v31 = vpop.f32.mrb[53].mxu0 }
0x11d8   : > { %v10307_v46 = vadd.f32 %v10306_v31, %v17815_v39  ;;  %v13169_v18 = vpop.f32.mrb[54].mxu0  ;;  %10442 = vadd.xlane.f32.xlu0 %v10441_v40 }
0x11d9   : > { %v17933_v56 = vadd.f32 %v10315_v9, %v18738_v29  ;;  %v10318_v44 = vadd.f32 %v13169_v18, %v17815_v39  ;;  %v10309_v26 = vpop.f32.mrb[55].mxu0 }
0x11da   : > { %v10310_v20 = vadd.f32 %v10309_v26, %v17815_v39  ;;  %10445 = vadd.xlane.f32.xlu1 %v10444_v33  ;;  %v17939_v28 = vadd.f32 %v10307_v46, %v18739_v37 }
0x11db   : > { %v17942_v1 = vadd.f32 %v10318_v44, %v18740_v15  ;;  %v10379_v25 = vsel %vm395_vm1, %v17933_v56, 0.0  ;;  %v10415_v41 = vmul.f32 %v17933_v56, %v17933_v56 }
0x11dc   : > { %10380 = vadd.xlane.f32.xlu0 %v10379_v25  ;;  %v17947_v49 = vadd.f32 %v10310_v20, %v18741_v42  ;;  %v10373_v39 = vsel %vm395_vm1, %v17939_v28, 0.0  ;;  %v10413_v24 = vmul.f32 %v17939_v28, %v17939_v28 }
0x11dd   : > { %v10382_v55 = vsel %vm395_vm1, %v17942_v1, 0.0  ;;  %v10416_v8 = vmul.f32 %v17942_v1, %v17942_v1  ;;  %v10459_v5 = vsel %vm395_vm1, %v10415_v41, 0.0 }
0x11de   : > { %10383 = vadd.xlane.f32.xlu1 %v10382_v55  ;;  %v10376_v52 = vsel %vm395_vm1, %v17947_v49, 0.0  ;;  %v10414_v3 = vmul.f32 %v17947_v49, %v17947_v49  ;;  %v10453_v63 = vsel %vm395_vm1, %v10413_v24, 0.0 }
0x11df   : > { %v10462_v53 = vsel %vm395_vm1, %v10416_v8, 0.0 }
0x11e0   : > { %10374 = vadd.xlane.f32.xlu0 %v10373_v39  ;;  %v10456_v27 = vsel %vm395_vm1, %v10414_v3, 0.0 }
0x11e2   : > { %10377 = vadd.xlane.f32.xlu1 %v10376_v52 }
0x11e4   : > { %10454 = vadd.xlane.f32.xlu0 %v10453_v63 }
0x11e6   : > { %10457 = vadd.xlane.f32.xlu1 %v10456_v27 }
0x11e8   : > { %10460 = vadd.xlane.f32.xlu0 %v10459_v5 }
0x11ea   : > { %10463 = vadd.xlane.f32.xlu1 %v10462_v53 }
0x120f   : > { %v10345_v48 = vpop.xlane.xlu0 %10344 }
0x1210   : > { %v10387_v10 = vmul.f32 0.03125, %v10345_v48 }
0x1212   : > { %v10342_v38 = vpop.xlane.xlu1 %10341  ;;  %v10483_v7 = vmul.f32 %v10387_v10, %v10387_v10 }
0x1213   : > { %v10339_v60 = vpop.xlane.xlu0 %10338  ;;  %v17967_v36 = vmul.f32 0.03125, %v10342_v38 }
0x1214   : > { %v17971_v58 = vmul.f32 0.03125, %v10339_v60 }
0x1215   : > { %v10482_v35 = vmul.f32 %v17967_v36, %v17967_v36 }
0x1216   : > { %v10428_v45 = vpop.xlane.xlu1 %10427  ;;  %v10481_v40 = vmul.f32 %v17971_v58, %v17971_v58 }
0x1217   : > { %v10348_v4 = vpop.xlane.xlu0 %10347  ;;  %v10468_v16 = vmul.f32 0.03125, %v10428_v45  ;;  %v18742_v45 = vsub.s32 4, %v18724_v17 }
0x1218   : > { %v10388_v23 = vmul.f32 0.03125, %v10348_v4 }
0x1219   : > { %v17990_v4 = vrot.slane %v17810_v43, %v18742_v45 }
0x121a   : > { %v10484_v11 = vmul.f32 %v10388_v23, %v10388_v23  ;;  %v10422_v51 = vpop.xlane.xlu1 %10421 }
0x121b   : > { %v10466_v61 = vmul.f32 0.03125, %v10422_v51  ;;  %v10425_v22 = vpop.xlane.xlu0 %10424  ;;  %v10532_v51 = vsub.f32 %v17828_v47, %v10388_v23  ;;  %v10529_v47 = vsub.f32 %v17825_v12, %v17971_v58 }
0x121c   : > { %v10500_v0 = vsub.f32 %v10468_v16, %v10484_v11  ;;  %v10467_v21 = vmul.f32 0.03125, %v10425_v22  ;;  %v10531_v16 = vsub.f32 %v17820_v2, %v10387_v10  ;;  %v10530_v11 = vsub.f32 %v17833_v54, %v17967_v36 }
0x121d   : > { %v10498_v62 = vsub.f32 %v10466_v61, %v10482_v35 }
0x121e   : > { %v10516_v59 = vmax.f32 %v10500_v0, 0.0  ;;  %v10499_v57 = vsub.f32 %v10467_v21, %v10483_v7 }
0x121f   : > { %v10514_v9 = vmax.f32 %v10498_v62, 0.0  ;;  %v10419_v31 = vpop.xlane.xlu0 %10418 }
0x1220   : > { %v10548_v46 = vadd.f32 1e-12, %v10516_v59  ;;  %v10515_v18 = vmax.f32 %v10499_v57, 0.0  ;;  %v10465_v29 = vmul.f32 0.03125, %v10419_v31 }
0x1221   : > { %v10546_v44 = vadd.f32 1e-12, %v10514_v9  ;;  %v10360_v26 = vpop.xlane.xlu1 %10359 }
0x1222   : > { %14017 = vrsqrt.f32 %v10548_v46  ;;  %v10547_v33 = vadd.f32 1e-12, %v10515_v18  ;;  %v10497_v20 = vsub.f32 %v10465_v29, %v10481_v40  ;;  %v17975_v55 = vmul.f32 0.03125, %v10360_v26 }
0x1223   : > { %14019 = vrsqrt.f32 %v10546_v44  ;;  %v10357_v37 = vpop.xlane.xlu0 %10356  ;;  %v18743_v44 = vsub.s32 5, %v18724_v17 }
0x1224   : > { %14021 = vrsqrt.f32 %v10547_v33  ;;  %v10513_v15 = vmax.f32 %v10497_v20, 0.0  ;;  %v17977_v24 = vmul.f32 0.03125, %v10357_v37  ;;  %v10488_v3 = vmul.f32 %v17975_v55, %v17975_v55 }
0x1225   : > { %v10354_v25 = vpop.xlane.xlu1 %10353  ;;  %v18006_v26 = vrot.slane %v17810_v43, %v18743_v44 }
0x1226   : > { %v10545_v42 = vadd.f32 1e-12, %v10513_v15  ;;  %v17981_v63 = vmul.f32 0.03125, %v10354_v25  ;;  %v10487_v53 = vmul.f32 %v17977_v24, %v17977_v24 }
0x1227   : > { %v10351_v39 = vpop.xlane.xlu0 %10350 }
0x1228   : > { %14023 = vrsqrt.f32 %v10545_v42  ;;  %v17983_v27 = vmul.f32 0.03125, %v10351_v39  ;;  %v10486_v22 = vmul.f32 %v17981_v63, %v17981_v63 }
0x1229   : > { %v10440_v52 = vpop.xlane.xlu1 %10439 }
0x122a   : > { %v10472_v41 = vmul.f32 0.03125, %v10440_v52  ;;  %v10485_v57 = vmul.f32 %v17983_v27, %v17983_v27 }
0x122b   : > { %v10437_v8 = vpop.xlane.xlu0 %10436 }
0x122c   : > { %v14018_v5 = vpop.eup %14017  ;;  %v10504_v48 = vsub.f32 %v10472_v41, %v10488_v3  ;;  %v10471_v38 = vmul.f32 0.03125, %v10437_v8 }
0x122d   : > { %v14020_v60 = vpop.eup %14019  ;;  %v10434_v35 = vpop.xlane.xlu1 %10433  ;;  %v10580_v62 = vmul.f32 %v14018_v5, %v10532_v51  ;;  %v10535_v5 = vsub.f32 %v17856_v32, %v17977_v24 }
0x122e   : > { %v14022_v61 = vpop.eup %14021  ;;  %v10520_v7 = vmax.f32 %v10504_v48, 0.0  ;;  %v10503_v0 = vsub.f32 %v10471_v38, %v10487_v53  ;;  %v10470_v21 = vmul.f32 0.03125, %v10434_v35  ;;  %v10578_v2 = vmul.f32 %v14020_v60, %v10530_v11 }
0x122f   : > { %v10579_v59 = vmul.f32 %v14022_v61, %v10531_v16  ;;  %v10431_v9 = vpop.xlane.xlu0 %10430  ;;  %v10600_v37 = vmul.f32 %v17990_v4, %v10580_v62  ;;  %v10536_v48 = vsub.f32 %v17860_v6, %v17975_v55  ;;  %v10534_v38 = vsub.f32 %v17864_v50, %v17981_v63 }
0x1230   : > { %v10552_v10 = vadd.f32 1e-12, %v10520_v7  ;;  %v10519_v31 = vmax.f32 %v10503_v0, 0.0  ;;  %v10502_v54 = vsub.f32 %v10470_v21, %v10486_v22  ;;  %v10469_v36 = vmul.f32 0.03125, %v10431_v9 }
0x1231   : > { %v10599_v40 = vmul.f32 %v17990_v4, %v10579_v59  ;;  %v10598_v20 = vmul.f32 %v17990_v4, %v10578_v2  ;;  %v18021_v52 = vadd.f32 %v18006_v26, %v10600_v37  ;;  %v10533_v11 = vsub.f32 %v17869_v34, %v17983_v27 }
0x1232   : > { %v14024_v23 = vpop.eup %14023  ;;  %v10551_v46 = vadd.f32 1e-12, %v10519_v31  ;;  %v10518_v18 = vmax.f32 %v10502_v54, 0.0  ;;  %v10501_v29 = vsub.f32 %v10469_v36, %v10485_v57  ;;  %14025 = vrsqrt.f32 %v10552_v10 }
0x1233   : > { %v10577_v33 = vmul.f32 %v14024_v23, %v10529_v47  ;;  %v18012_v25 = vadd.f32 %v18006_v26, %v10599_v40  ;;  %v18018_v43 = vadd.f32 %v18006_v26, %v10598_v20 }
0x1234   : > { %14027 = vrsqrt.f32 %v10551_v46  ;;  %v10550_v15 = vadd.f32 1e-12, %v10518_v18  ;;  %v10517_v12 = vmax.f32 %v10501_v29, 0.0 }
0x1235   : > { %v10597_v58 = vmul.f32 %v17990_v4, %v10577_v33  ;;  %v10634_v41 = vpack.c.bf16 %v18021_v52, %v18012_v25 }
0x1236   : > { %14029 = vrsqrt.f32 %v10550_v15  ;;  %v10549_v42 = vadd.f32 1e-12, %v10517_v12 }
0x1237   : > { %v18015_v39 = vadd.f32 %v18006_v26, %v10597_v58 }
0x1238   : > { %14031 = vrsqrt.f32 %v10549_v42 }
0x1239   : > { %v10633_v3 = vpack.c.bf16 %v18018_v43, %v18015_v39 }
0x123b   : > { %13174 = vmatprep.mubr.msk.bf16.mxu1 %vm395_vm1, %v10633_v3 }
0x123c   : > { %13175 = vmatmul.mubr.msk.bf16.vlgmr.msra.gmra.mrb[40].mxu1 %vm395_vm1, %v10634_v41  ;;  %v14026_v8 = vpop.eup %14025 }
0x123d   : > { %v10584_v16 = vmul.f32 %v14026_v8, %v10536_v48 }
0x123e   : > { %v14028_v53 = vpop.eup %14027 }
0x123f   : > { %v10583_v60 = vmul.f32 %v14028_v53, %v10535_v5  ;;  %v10604_v24 = vmul.f32 %v17990_v4, %v10584_v16 }
0x1240   : > { %v14030_v45 = vpop.eup %14029 }
0x1241   : > { %v10582_v51 = vmul.f32 %v14030_v45, %v10534_v38  ;;  %v10603_v61 = vmul.f32 %v17990_v4, %v10583_v60  ;;  %v18051_v34 = vadd.f32 %v18006_v26, %v10604_v24 }
0x1242   : > { %v14032_v35 = vpop.eup %14031 }
0x1243   : > { %v10581_v22 = vmul.f32 %v14032_v35, %v10533_v11  ;;  %v10602_v32 = vmul.f32 %v17990_v4, %v10582_v51  ;;  %v18042_v55 = vadd.f32 %v18006_v26, %v10603_v61 }
0x1245   : > { %v10601_v6 = vmul.f32 %v17990_v4, %v10581_v22  ;;  %v18048_v63 = vadd.f32 %v18006_v26, %v10602_v32  ;;  %v10636_v7 = vpack.c.bf16 %v18051_v34, %v18042_v55 }
0x1247   : > { %v18045_v50 = vadd.f32 %v18006_v26, %v10601_v6 }
0x1249   : > { %v10635_v27 = vpack.c.bf16 %v18048_v63, %v18045_v50 }
0x124b   : > { %13178 = vmatprep.mubr.msk.bf16.mxu1 %vm395_vm1, %v10635_v27 }
0x124c   : > { %13179 = vmatmul.mubr.msk.bf16.gmra.mrb[44].mxu1 %vm395_vm1, %v10636_v7 }
0x1259   : > { %v10369_v0 = vpop.xlane.xlu0 %10368 }
0x125a   : > { %v10395_v59 = vmul.f32 0.03125, %v10369_v0 }
0x125b   : > { %v10372_v21 = vpop.xlane.xlu1 %10371 }
0x125c   : > { %v10396_v9 = vmul.f32 0.03125, %v10372_v21  ;;  %v10491_v10 = vmul.f32 %v10395_v59, %v10395_v59 }
0x125d   : > { %v10363_v62 = vpop.xlane.xlu0 %10362 }
0x125e   : > { %v18059_v31 = vmul.f32 0.03125, %v10363_v62  ;;  %v10492_v23 = vmul.f32 %v10396_v9, %v10396_v9 }
0x125f   : > { %v10366_v57 = vpop.xlane.xlu1 %10365 }
0x1260   : > { %v18061_v36 = vmul.f32 0.03125, %v10366_v57  ;;  %v10489_v29 = vmul.f32 %v18059_v31, %v18059_v31  ;;  %v10539_v57 = vsub.f32 %v17898_v19, %v10395_v59 }
0x1261   : > { %v10449_v2 = vpop.xlane.xlu0 %10448 }
0x1262   : > { %v10475_v54 = vmul.f32 0.03125, %v10449_v2  ;;  %v10490_v37 = vmul.f32 %v18061_v36, %v18061_v36  ;;  %v10540_v2 = vsub.f32 %v17906_v30, %v10396_v9 }
0x1263   : > { %v10452_v47 = vpop.xlane.xlu1 %10451 }
0x1264   : > { %v10507_v40 = vsub.f32 %v10475_v54, %v10491_v10  ;;  %v10476_v46 = vmul.f32 0.03125, %v10452_v47 }
0x1265   : > { %v10443_v18 = vpop.xlane.xlu0 %10442 }
0x1266   : > { %v10523_v44 = vmax.f32 %v10507_v40, 0.0  ;;  %v10508_v33 = vsub.f32 %v10476_v46, %v10492_v23  ;;  %v10473_v20 = vmul.f32 0.03125, %v10443_v18  ;;  %v10537_v18 = vsub.f32 %v17903_v14, %v18059_v31 }
0x1267   : > { %v10446_v15 = vpop.xlane.xlu1 %10445 }
0x1268   : > { %v10555_v12 = vadd.f32 1e-12, %v10523_v44  ;;  %v10524_v58 = vmax.f32 %v10508_v33, 0.0  ;;  %v10505_v42 = vsub.f32 %v10473_v20, %v10489_v29  ;;  %v10474_v3 = vmul.f32 0.03125, %v10446_v15 }
0x1269   : > { %v10381_v41 = vpop.xlane.xlu0 %10380  ;;  %v10538_v15 = vsub.f32 %v17911_v13, %v18061_v36 }
0x126a   : > { %14033 = vrsqrt.f32 %v10555_v12  ;;  %v10556_v8 = vadd.f32 1e-12, %v10524_v58  ;;  %v10521_v5 = vmax.f32 %v10505_v42, 0.0  ;;  %v10506_v53 = vsub.f32 %v10474_v3, %v10490_v37 }
0x126b   : > { %v10384_v48 = vpop.xlane.xlu1 %10383  ;;  %v18067_v22 = vmul.f32 0.03125, %v10381_v41 }
0x126c   : > { %14035 = vrsqrt.f32 %v10556_v8  ;;  %v10553_v38 = vadd.f32 1e-12, %v10521_v5  ;;  %v10522_v60 = vmax.f32 %v10506_v53, 0.0  ;;  %v18069_v6 = vmul.f32 0.03125, %v10384_v48 }
0x126d   : > { %v10375_v45 = vpop.xlane.xlu0 %10374  ;;  %v10495_v47 = vmul.f32 %v18067_v22, %v18067_v22 }
0x126e   : > { %14037 = vrsqrt.f32 %v10553_v38  ;;  %v10554_v16 = vadd.f32 1e-12, %v10522_v60  ;;  %v10397_v11 = vmul.f32 0.03125, %v10375_v45  ;;  %v10496_v33 = vmul.f32 %v18069_v6, %v18069_v6 }
0x126f   : > { %v10378_v51 = vpop.xlane.xlu1 %10377 }
0x1270   : > { %14039 = vrsqrt.f32 %v10554_v16  ;;  %v10398_v35 = vmul.f32 0.03125, %v10378_v51  ;;  %v10493_v32 = vmul.f32 %v10397_v11, %v10397_v11 }
0x1271   : > { %v10455_v61 = vpop.xlane.xlu0 %10454 }
0x1272   : > { %v10477_v24 = vmul.f32 0.03125, %v10455_v61  ;;  %v10494_v0 = vmul.f32 %v10398_v35, %v10398_v35 }
0x1273   : > { %v10458_v27 = vpop.xlane.xlu1 %10457 }
0x1274   : > { %v14034_v7 = vpop.eup %14033  ;;  %v10509_v21 = vsub.f32 %v10477_v24, %v10493_v32  ;;  %v10478_v62 = vmul.f32 0.03125, %v10458_v27  ;;  %v10541_v32 = vsub.f32 %v17939_v28, %v10397_v11  ;;  %v10542_v27 = vsub.f32 %v17947_v49, %v10398_v35 }
0x1275   : > { %v10461_v10 = vpop.xlane.xlu0 %10460  ;;  %v10587_v29 = vmul.f32 %v14034_v7, %v10539_v57 }
0x1276   : > { %v14036_v54 = vpop.eup %14035  ;;  %v10525_v23 = vmax.f32 %v10509_v21, 0.0  ;;  %v10510_v40 = vsub.f32 %v10478_v62, %v10494_v0  ;;  %v10479_v46 = vmul.f32 0.03125, %v10461_v10  ;;  %v10543_v21 = vsub.f32 %v17933_v56, %v18067_v22 }
0x1277   : > { %v10588_v44 = vmul.f32 %v14036_v54, %v10540_v2  ;;  %v10464_v20 = vpop.xlane.xlu1 %10463  ;;  %v10607_v5 = vmul.f32 %v17990_v4, %v10587_v29  ;;  %v10544_v10 = vsub.f32 %v17942_v1, %v18069_v6  ;;  %v18146_v29 = vld [vmem:[%s18530_s7 + $0x1] ss:$0 sm:$0xff] }
0x1278   : > { %v14038_v19 = vpop.eup %14037  ;;  %v10557_v59 = vadd.f32 1e-12, %v10525_v23  ;;  %v10526_v30 = vmax.f32 %v10510_v40, 0.0  ;;  %v10511_v9 = vsub.f32 %v10479_v46, %v10495_v47  ;;  %v10480_v37 = vmul.f32 0.03125, %v10464_v20  ;;  %v13628_v46 = vld [vmem:[%s18528_s5 + $0x28] sm:$0xff]  }
0x1279   : > { %v10608_v12 = vmul.f32 %v17990_v4, %v10588_v44  ;;  %v10585_v58 = vmul.f32 %v14038_v19, %v10537_v18  ;;  %v18095_v16 = vadd.f32 %v18006_v26, %v10607_v5  ;;  %v13630_v18 = vld [vmem:[%s18528_s5 + $0x38] sm:$0xff]  }
0x127a   : > { %v14040_v42 = vpop.eup %14039  ;;  %14041 = vrsqrt.f32 %v10557_v59  ;;  %v10558_v14 = vadd.f32 1e-12, %v10526_v30  ;;  %v10527_v31 = vmax.f32 %v10511_v9, 0.0  ;;  %v10512_v3 = vsub.f32 %v10480_v37, %v10496_v33 }
0x127b   : > { %v10586_v41 = vmul.f32 %v14040_v42, %v10538_v15  ;;  %v10605_v8 = vmul.f32 %v17990_v4, %v10585_v58  ;;  %v18086_v13 = vadd.f32 %v18006_v26, %v10608_v12 }
0x127c   : > { %14043 = vrsqrt.f32 %v10558_v14  ;;  %v10559_v53 = vadd.f32 1e-12, %v10527_v31  ;;  %v10528_v48 = vmax.f32 %v10512_v3, 0.0 }
0x127d   : > { %v10606_v38 = vmul.f32 %v17990_v4, %v10586_v41  ;;  %v18089_v60 = vadd.f32 %v18006_v26, %v10605_v8  ;;  %v10638_v61 = vpack.c.bf16 %v18086_v13, %v18095_v16 }
0x127e   : > { %14045 = vrsqrt.f32 %v10559_v53  ;;  %v10560_v36 = vadd.f32 1e-12, %v10528_v48 }
0x127f   : > { %v18092_v45 = vadd.f32 %v18006_v26, %v10606_v38 }
0x1280   : > { %14047 = vrsqrt.f32 %v10560_v36 }
0x1281   : > { %v10637_v51 = vpack.c.bf16 %v18092_v45, %v18089_v60 }
0x1283   : > { %13182 = vmatprep.mubr.msk.bf16.mxu1 %vm395_vm1, %v10637_v51 }
0x1284   : > { %v14042_v24 = vpop.eup %14041  ;;  %13183 = vmatmul.mubr.msk.bf16.gmra.mrb[48].mxu1 %vm395_vm1, %v10638_v61 }
0x1285   : > { %v10589_v7 = vmul.f32 %v14042_v24, %v10541_v32 }
0x1286   : > { %v14044_v0 = vpop.eup %14043 }
0x1287   : > { %v10590_v62 = vmul.f32 %v14044_v0, %v10542_v27  ;;  %v10609_v57 = vmul.f32 %v17990_v4, %v10589_v7 }
0x1288   : > { %v14046_v2 = vpop.eup %14045 }
0x1289   : > { %v10591_v28 = vmul.f32 %v14046_v2, %v10543_v21  ;;  %v10610_v11 = vmul.f32 %v17990_v4, %v10590_v62  ;;  %v18113_v49 = vadd.f32 %v18006_v26, %v10609_v57 }
0x128a   : > { %v14048_v54 = vpop.eup %14047 }
0x128b   : > { %v10611_v47 = vmul.f32 %v17990_v4, %v10591_v28  ;;  %v10592_v23 = vmul.f32 %v14048_v54, %v10544_v10  ;;  %v18116_v35 = vadd.f32 %v18006_v26, %v10610_v11 }
0x128d   : > { %v10612_v56 = vmul.f32 %v17990_v4, %v10592_v23  ;;  %v10639_v22 = vpack.c.bf16 %v18116_v35, %v18113_v49  ;;  %v18122_v1 = vadd.f32 %v18006_v26, %v10611_v47  ;;  %v13627_v4 = vld [vmem:[%s18528_s5 + $0x20] sm:$0xff]  }
0x128e   : > { %13190 = vmatprep.subr.bf16.mxu0 %v13627_v4 }
0x128f   : > { %v18125_v6 = vadd.f32 %v18006_v26, %v10612_v56  ;;  %13186 = vmatprep.mubr.msk.bf16.mxu1 %vm395_vm1, %v10639_v22  ;;  %13191 = vmatpush3.bf16.msra.mxu0 %v13627_v4  ;;  %v13629_v26 = vld [vmem:[%s18528_s5 + $0x30] sm:$0xff]  }
0x1290   : > { %13192 = vmatprep.subr.bf16.mxu0 %v13628_v46 }
0x1291   : > { %v10640_v40 = vpack.c.bf16 %v18125_v6, %v18122_v1 }
0x1293   : > { %13187 = vmatmul.mubr.msk.bf16.gmra.mrb[52].mxu1 %vm395_vm1, %v10640_v40  ;;  %13193 = vmatpush3.bf16.msra.mxu0 %v13628_v46 }
0x1294   : > { %13194 = vmatprep.subr.bf16.mxu0 %v13629_v26 }
0x1297   : > { %13195 = vmatpush3.bf16.msra.mxu0 %v13629_v26 }
0x1298   : > { %13196 = vmatprep.subr.bf16.mxu0 %v13630_v18 }
0x129b   : > { %13197 = vmatpush3.bf16.msra.mxu0 %v13630_v18 }
0x130f   : > { %v13176_v44 = vpop.f32.mrb[40].mxu1 }
0x1310   : > { %v10733_v33 = vadd.f32 %v13176_v44, %v18146_v29  ;;  %v10724_v20 = vpop.f32.mrb[41].mxu1 }
0x1311   : > { %v10725_v19 = vadd.f32 %v18146_v29, %v10724_v20  ;;  %v13177_v59 = vpop.f32.mrb[42].mxu1 }
0x1312   : > { %v10805_v30 = vmul.f32 0.044715, %v10733_v33  ;;  %v10736_v9 = vadd.f32 %v13177_v59, %v18146_v29  ;;  %v10727_v37 = vpop.f32.mrb[43].mxu1  ;;  %v10789_v44 = vmul.f32 0.5, %v10733_v33 }
0x1313   : > { %v10803_v15 = vmul.f32 0.044715, %v10725_v19  ;;  %v10728_v12 = vadd.f32 %v18146_v29, %v10727_v37 }
0x1314   : > { %v10821_v58 = vmul.f32 %v10805_v30, %v10733_v33  ;;  %v10806_v42 = vmul.f32 0.044715, %v10736_v9 }
0x1315   : > { %v10819_v14 = vmul.f32 %v10803_v15, %v10725_v19  ;;  %v10804_v31 = vmul.f32 0.044715, %v10728_v12 }
0x1316   : > { %v10837_v3 = vmul.f32 %v10821_v58, %v10733_v33  ;;  %v10822_v41 = vmul.f32 %v10806_v42, %v10736_v9  ;;  %v10787_v42 = vmul.f32 0.5, %v10725_v19 }
0x1317   : > { %v10835_v8 = vmul.f32 %v10819_v14, %v10725_v19  ;;  %v10820_v5 = vmul.f32 %v10804_v31, %v10728_v12 }
0x1318   : > { %v10853_v53 = vadd.f32 %v10837_v3, %v10733_v33  ;;  %v10838_v48 = vmul.f32 %v10822_v41, %v10736_v9  ;;  %v10790_v3 = vmul.f32 0.5, %v10736_v9 }
0x1319   : > { %v10851_v38 = vadd.f32 %v10835_v8, %v10725_v19  ;;  %v10836_v36 = vmul.f32 %v10820_v5, %v10728_v12 }
0x131a   : > { %v10869_v51 = vmul.f32 0.7978846, %v10853_v53  ;;  %v10854_v61 = vadd.f32 %v10838_v48, %v10736_v9 }
0x131b   : > { %v10867_v32 = vmul.f32 0.7978846, %v10851_v38  ;;  %v10852_v24 = vadd.f32 %v10836_v36, %v10728_v12  ;;  %v10788_v38 = vmul.f32 0.5, %v10728_v12 }
0x131c   : > { %14049 = vtanh.f32 %v10869_v51  ;;  %v10870_v27 = vmul.f32 0.7978846, %v10854_v61 }
0x131d   : > { %14051 = vtanh.f32 %v10867_v32  ;;  %v10868_v7 = vmul.f32 0.7978846, %v10852_v24 }
0x131e   : > { %14053 = vtanh.f32 %v10870_v27 }
0x131f   : > { %14055 = vtanh.f32 %v10868_v7  ;;  %v13180_v0 = vpop.f32.mrb[44].mxu1 }
0x1320   : > { %v10749_v21 = vadd.f32 %v13180_v0, %v18146_v29  ;;  %v10740_v62 = vpop.f32.mrb[45].mxu1 }
0x1321   : > { %v10741_v57 = vadd.f32 %v18146_v29, %v10740_v62  ;;  %v13181_v2 = vpop.f32.mrb[46].mxu1 }
0x1322   : > { %v10809_v10 = vmul.f32 0.044715, %v10749_v21  ;;  %v10752_v28 = vadd.f32 %v13181_v2, %v18146_v29  ;;  %v10743_v11 = vpop.f32.mrb[47].mxu1 }
0x1323   : > { %v10807_v54 = vmul.f32 0.044715, %v10741_v57  ;;  %v10744_v47 = vadd.f32 %v18146_v29, %v10743_v11 }
0x1324   : > { %v10825_v23 = vmul.f32 %v10809_v10, %v10749_v21  ;;  %v10810_v56 = vmul.f32 0.044715, %v10752_v28 }
0x1325   : > { %v10823_v22 = vmul.f32 %v10807_v54, %v10741_v57  ;;  %v10808_v40 = vmul.f32 0.044715, %v10744_v47 }
0x1326   : > { %v14050_v4 = vpop.eup %14049  ;;  %v10841_v46 = vmul.f32 %v10825_v23, %v10749_v21  ;;  %v10826_v26 = vmul.f32 %v10810_v56, %v10752_v28  ;;  %v10793_v23 = vmul.f32 0.5, %v10749_v21  ;;  %v10794_v56 = vmul.f32 0.5, %v10752_v28 }
0x1327   : > { %v14052_v18 = vpop.eup %14051  ;;  %v10901_v20 = vadd.f32 1.0, %v14050_v4  ;;  %v10839_v59 = vmul.f32 %v10823_v22, %v10741_v57  ;;  %v10824_v30 = vmul.f32 %v10808_v40, %v10744_v47  ;;  %v10791_v40 = vmul.f32 0.5, %v10741_v57 }
0x1328   : > { %v14054_v37 = vpop.eup %14053  ;;  %v10857_v15 = vadd.f32 %v10841_v46, %v10749_v21  ;;  %v10842_v58 = vmul.f32 %v10826_v26, %v10752_v28  ;;  %v10899_v14 = vadd.f32 1.0, %v14052_v18  ;;  %v10792_v4 = vmul.f32 0.5, %v10744_v47 }
0x1329   : > { %v14056_v31 = vpop.eup %14055  ;;  %v10902_v41 = vadd.f32 1.0, %v14054_v37  ;;  %v10855_v8 = vadd.f32 %v10839_v59, %v10741_v57  ;;  %v10840_v5 = vmul.f32 %v10824_v30, %v10744_v47  ;;  %v10917_v51 = vmul.f32 %v10901_v20, %v10789_v44 }
0x132a   : > { %v10873_v53 = vmul.f32 0.7978846, %v10857_v15  ;;  %v10858_v48 = vadd.f32 %v10842_v58, %v10752_v28  ;;  %v10900_v36 = vadd.f32 1.0, %v14056_v31  ;;  %v10915_v27 = vmul.f32 %v10899_v14, %v10787_v42 }
0x132b   : > { %v10918_v61 = vmul.f32 %v10902_v41, %v10790_v3  ;;  %v10871_v33 = vmul.f32 0.7978846, %v10855_v8  ;;  %v10856_v32 = vadd.f32 %v10840_v5, %v10744_v47 }
0x132c   : > { %14057 = vtanh.f32 %v10873_v53  ;;  %v10874_v24 = vmul.f32 0.7978846, %v10858_v48  ;;  %v10916_v7 = vmul.f32 %v10900_v36, %v10788_v38 }
0x132d   : > { %v10932_v0 = vpack.c.bf16 %v10918_v61, %v10917_v51  ;;  %14059 = vtanh.f32 %v10871_v33  ;;  %v10872_v19 = vmul.f32 0.7978846, %v10856_v32 }
0x132e   : > { %14061 = vtanh.f32 %v10874_v24  ;;  %v10931_v9 = vpack.c.bf16 %v10916_v7, %v10915_v27 }
0x132f   : > { %14063 = vtanh.f32 %v10872_v19 }
0x1330   : > { %13198 = vmatprep.mubr.msk.bf16.mxu0 %vm5616_vm6, %v10931_v9 }
0x1331   : > { %13199 = vmatmul.mubr.msk.bf16.vlgmr.msra.gmra.mrb[56].mxu0 %vm5616_vm6, %v10932_v0 }
0x1336   : > { %v14058_v12 = vpop.eup %14057 }
0x1337   : > { %v14060_v62 = vpop.eup %14059  ;;  %v10905_v2 = vadd.f32 1.0, %v14058_v12 }
0x1338   : > { %v14062_v10 = vpop.eup %14061  ;;  %v10903_v11 = vadd.f32 1.0, %v14060_v62 }
0x1339   : > { %v14064_v54 = vpop.eup %14063  ;;  %v10906_v22 = vadd.f32 1.0, %v14062_v10  ;;  %v10921_v26 = vmul.f32 %v10905_v2, %v10793_v23 }
0x133a   : > { %v10904_v46 = vadd.f32 1.0, %v14064_v54  ;;  %v10919_v44 = vmul.f32 %v10903_v11, %v10791_v40 }
0x133b   : > { %v10922_v18 = vmul.f32 %v10906_v22, %v10794_v56 }
0x133c   : > { %v10920_v20 = vmul.f32 %v10904_v46, %v10792_v4 }
0x133d   : > { %v10934_v59 = vpack.c.bf16 %v10922_v18, %v10921_v26 }
0x133e   : > { %v10933_v30 = vpack.c.bf16 %v10920_v20, %v10919_v44 }
0x1340   : > { %13202 = vmatprep.mubr.msk.bf16.mxu0 %vm5616_vm6, %v10933_v30 }
0x1341   : > { %13203 = vmatmul.mubr.msk.bf16.gmra.mrb[60].mxu0 %vm5616_vm6, %v10934_v59 }
0x1357   : > { %v13184_v37 = vpop.f32.mrb[48].mxu1 }
0x1358   : > { %v10765_v15 = vadd.f32 %v13184_v37, %v18146_v29  ;;  %v10756_v58 = vpop.f32.mrb[49].mxu1 }
0x1359   : > { %v10757_v21 = vadd.f32 %v18146_v29, %v10756_v58  ;;  %v13185_v28 = vpop.f32.mrb[50].mxu1 }
0x135a   : > { %v10813_v57 = vmul.f32 0.044715, %v10765_v15  ;;  %v10768_v47 = vadd.f32 %v13185_v28, %v18146_v29  ;;  %v10759_v42 = vpop.f32.mrb[51].mxu1  ;;  %v10797_v28 = vmul.f32 0.5, %v10765_v15 }
0x135b   : > { %v10811_v14 = vmul.f32 0.044715, %v10757_v21  ;;  %v10760_v31 = vadd.f32 %v18146_v29, %v10759_v42 }
0x135c   : > { %v10829_v3 = vmul.f32 %v10813_v57, %v10765_v15  ;;  %v10814_v41 = vmul.f32 0.044715, %v10768_v47 }
0x135d   : > { %v10827_v8 = vmul.f32 %v10811_v14, %v10757_v21  ;;  %v10812_v5 = vmul.f32 0.044715, %v10760_v31 }
0x135e   : > { %v10845_v53 = vmul.f32 %v10829_v3, %v10765_v15  ;;  %v10830_v48 = vmul.f32 %v10814_v41, %v10768_v47 }
0x135f   : > { %v10843_v38 = vmul.f32 %v10827_v8, %v10757_v21  ;;  %v10828_v36 = vmul.f32 %v10812_v5, %v10760_v31  ;;  %v10795_v5 = vmul.f32 0.5, %v10757_v21 }
0x1360   : > { %v10861_v51 = vadd.f32 %v10845_v53, %v10765_v15  ;;  %v10846_v61 = vmul.f32 %v10830_v48, %v10768_v47  ;;  %v10798_v48 = vmul.f32 0.5, %v10768_v47 }
0x1361   : > { %v10859_v33 = vadd.f32 %v10843_v38, %v10757_v21  ;;  %v10844_v32 = vmul.f32 %v10828_v36, %v10760_v31 }
0x1362   : > { %v10877_v24 = vmul.f32 0.7978846, %v10861_v51  ;;  %v10862_v27 = vadd.f32 %v10846_v61, %v10768_v47 }
0x1363   : > { %v10875_v7 = vmul.f32 0.7978846, %v10859_v33  ;;  %v10860_v0 = vadd.f32 %v10844_v32, %v10760_v31  ;;  %v10796_v32 = vmul.f32 0.5, %v10760_v31 }
0x1364   : > { %14065 = vtanh.f32 %v10877_v24  ;;  %v10878_v19 = vmul.f32 0.7978846, %v10862_v27 }
0x1365   : > { %14067 = vtanh.f32 %v10875_v7  ;;  %v10876_v9 = vmul.f32 0.7978846, %v10860_v0 }
0x1366   : > { %14069 = vtanh.f32 %v10878_v19  ;;  %v13188_v12 = vpop.f32.mrb[52].mxu1 }
0x1367   : > { %14071 = vtanh.f32 %v10876_v9  ;;  %v10781_v62 = vadd.f32 %v13188_v12, %v18146_v29  ;;  %v10772_v2 = vpop.f32.mrb[53].mxu1 }
0x1368   : > { %v10773_v10 = vadd.f32 %v18146_v29, %v10772_v2  ;;  %v13189_v11 = vpop.f32.mrb[54].mxu1 }
0x1369   : > { %v10817_v54 = vmul.f32 0.044715, %v10781_v62  ;;  %v10784_v23 = vadd.f32 %v13189_v11, %v18146_v29  ;;  %v10775_v56 = vpop.f32.mrb[55].mxu1 }
0x136a   : > { %v10815_v22 = vmul.f32 0.044715, %v10773_v10  ;;  %v10776_v40 = vadd.f32 %v18146_v29, %v10775_v56 }
0x136b   : > { %v10833_v4 = vmul.f32 %v10817_v54, %v10781_v62  ;;  %v10818_v46 = vmul.f32 0.044715, %v10784_v23 }
0x136c   : > { %v10831_v26 = vmul.f32 %v10815_v22, %v10773_v10  ;;  %v10816_v18 = vmul.f32 0.044715, %v10776_v40  ;;  %v10801_v22 = vmul.f32 0.5, %v10781_v62 }
0x136d   : > { %v10849_v44 = vmul.f32 %v10833_v4, %v10781_v62  ;;  %v10834_v20 = vmul.f32 %v10818_v46, %v10784_v23  ;;  %v10802_v4 = vmul.f32 0.5, %v10784_v23 }
0x136e   : > { %v14066_v59 = vpop.eup %14065  ;;  %v10847_v30 = vmul.f32 %v10831_v26, %v10773_v10  ;;  %v10832_v37 = vmul.f32 %v10816_v18, %v10776_v40  ;;  %v10799_v26 = vmul.f32 0.5, %v10773_v10  ;;  %v10800_v18 = vmul.f32 0.5, %v10776_v40 }
0x136f   : > { %v14068_v58 = vpop.eup %14067  ;;  %v10909_v57 = vadd.f32 1.0, %v14066_v59  ;;  %v10865_v42 = vadd.f32 %v10849_v44, %v10781_v62  ;;  %v10850_v14 = vmul.f32 %v10834_v20, %v10784_v23  ;;  %v18744_v62 = vsub.s32 6, %v18724_v17 }
0x1370   : > { %v14070_v3 = vpop.eup %14069  ;;  %v10863_v41 = vadd.f32 %v10847_v30, %v10773_v10  ;;  %v10848_v8 = vmul.f32 %v10832_v37, %v10776_v40  ;;  %v10907_v53 = vadd.f32 1.0, %v14068_v58 }
0x1371   : > { %v14072_v29 = vpop.eup %14071  ;;  %v10910_v38 = vadd.f32 1.0, %v14070_v3  ;;  %v10881_v36 = vmul.f32 0.7978846, %v10865_v42  ;;  %v10866_v51 = vadd.f32 %v10850_v14, %v10784_v23  ;;  %v10925_v27 = vmul.f32 %v10909_v57, %v10797_v28  ;;  %v18175_v57 = vld [vmem:[%s18529_s6 + $0x10] sm:$0xff] }
0x1372   : > { %v10879_v61 = vmul.f32 0.7978846, %v10863_v41  ;;  %v10864_v33 = vadd.f32 %v10848_v8, %v10776_v40  ;;  %v10908_v24 = vadd.f32 1.0, %v14072_v29  ;;  %v10923_v19 = vmul.f32 %v10907_v53, %v10795_v5 }
0x1373   : > { %v10926_v7 = vmul.f32 %v10910_v38, %v10798_v48  ;;  %14073 = vtanh.f32 %v10881_v36  ;;  %v10882_v15 = vmul.f32 0.7978846, %v10866_v51  ;;  %v18180_v10 = vrot.slane %v18175_v57, %v18744_v62 }
0x1374   : > { %14075 = vtanh.f32 %v10879_v61  ;;  %v10880_v0 = vmul.f32 0.7978846, %v10864_v33  ;;  %v10924_v9 = vmul.f32 %v10908_v24, %v10796_v32 }
0x1375   : > { %v10936_v12 = vpack.c.bf16 %v10926_v7, %v10925_v27  ;;  %14077 = vtanh.f32 %v10882_v15 }
0x1376   : > { %14079 = vtanh.f32 %v10880_v0  ;;  %v10935_v21 = vpack.c.bf16 %v10924_v9, %v10923_v19 }
0x1378   : > { %13206 = vmatprep.mubr.msk.bf16.mxu0 %vm5616_vm6, %v10935_v21 }
0x1379   : > { %13207 = vmatmul.mubr.msk.bf16.gmra.mrb[64].mxu0 %vm5616_vm6, %v10936_v12 }
0x137d   : > { %v14074_v47 = vpop.eup %14073 }
0x137e   : > { %v14076_v2 = vpop.eup %14075  ;;  %v10913_v31 = vadd.f32 1.0, %v14074_v47 }
0x137f   : > { %v14078_v11 = vpop.eup %14077  ;;  %v10911_v54 = vadd.f32 1.0, %v14076_v2 }
0x1380   : > { %v14080_v56 = vpop.eup %14079  ;;  %v10914_v46 = vadd.f32 1.0, %v14078_v11  ;;  %v10929_v20 = vmul.f32 %v10913_v31, %v10801_v22 }
0x1381   : > { %v10912_v44 = vadd.f32 1.0, %v14080_v56  ;;  %v10927_v30 = vmul.f32 %v10911_v54, %v10799_v26 }
0x1382   : > { %v10930_v59 = vmul.f32 %v10914_v46, %v10802_v4 }
0x1383   : > { %v10928_v37 = vmul.f32 %v10912_v44, %v10800_v18 }
0x1384   : > { %v10938_v58 = vpack.c.bf16 %v10930_v59, %v10929_v20 }
0x1385   : > { %v10937_v28 = vpack.c.bf16 %v10928_v37, %v10927_v30  ;;  %v13631_v30 = vld [vmem:[%s18531_s8] sm:$0xff]   ;;  %v13632_v37 = vld [vmem:[%s18531_s8 + $0x8] sm:$0xff]  }
0x1386   : > { %13214 = vmatprep.subr.bf16.mxu1 %v13631_v30 }
0x1387   : > { %13210 = vmatprep.mubr.msk.bf16.mxu0 %vm5616_vm6, %v10937_v28  ;;  %13215 = vmatpush3.bf16.msra.mxu1 %v13631_v30 }
0x1388   : > { %13211 = vmatmul.mubr.msk.bf16.gmra.mrb[68].mxu0 %vm5616_vm6, %v10938_v58  ;;  %13216 = vmatprep.subr.bf16.mxu1 %v13632_v37 }
0x138b   : > { %13217 = vmatpush3.bf16.msra.mxu1 %v13632_v37 }
0x1404   : > { %v13200_v23 = vpop.f32.mrb[56].mxu0 }
0x1405   : > { %v11043_v40 = vadd.f32 %v13200_v23, %v18180_v10  ;;  %v11034_v42 = vpop.f32.mrb[57].mxu0 }
0x1406   : > { %v11035_v14 = vadd.f32 %v11034_v42, %v18180_v10  ;;  %v13201_v3 = vpop.f32.mrb[58].mxu0 }
0x1407   : > { %v18185_v41 = vadd.f32 %v11043_v40, %v18012_v25  ;;  %v11046_v8 = vadd.f32 %v13201_v3, %v18180_v10  ;;  %v11037_v5 = vpop.f32.mrb[59].mxu0 }
0x1408   : > { %v11038_v53 = vadd.f32 %v11037_v5, %v18180_v10  ;;  %v18190_v29 = vadd.f32 %v11035_v14, %v18015_v39 }
0x1409   : > { %v18193_v48 = vadd.f32 %v11046_v8, %v18021_v52  ;;  %v11119_v38 = vsel %vm395_vm1, %v18185_v41, 0.0  ;;  %v11179_v39 = vmul.f32 %v18185_v41, %v18185_v41 }
0x140a   : > { %11120 = vadd.xlane.f32.xlu0 %v11119_v38  ;;  %v18198_v36 = vadd.f32 %v11038_v53, %v18018_v43  ;;  %v11113_v51 = vsel %vm395_vm1, %v18190_v29, 0.0  ;;  %v11177_v33 = vmul.f32 %v18190_v29, %v18190_v29 }
0x140b   : > { %v11122_v25 = vsel %vm395_vm1, %v18193_v48, 0.0  ;;  %v11180_v61 = vmul.f32 %v18193_v48, %v18193_v48  ;;  %v11199_v43 = vsel %vm395_vm1, %v11179_v39, 0.0 }
0x140c   : > { %11123 = vadd.xlane.f32.xlu1 %v11122_v25  ;;  %v11116_v52 = vsel %vm395_vm1, %v18198_v36, 0.0  ;;  %v11178_v24 = vmul.f32 %v18198_v36, %v18198_v36  ;;  %v11193_v0 = vsel %vm395_vm1, %v11177_v33, 0.0 }
0x140d   : > { %v11202_v32 = vsel %vm395_vm1, %v11180_v61, 0.0 }
0x140e   : > { %11114 = vadd.xlane.f32.xlu0 %v11113_v51  ;;  %v11196_v2 = vsel %vm395_vm1, %v11178_v24, 0.0 }
0x1410   : > { %11117 = vadd.xlane.f32.xlu1 %v11116_v52 }
0x1412   : > { %11200 = vadd.xlane.f32.xlu0 %v11199_v43 }
0x1414   : > { %11203 = vadd.xlane.f32.xlu1 %v11202_v32  ;;  %v13204_v27 = vpop.f32.mrb[60].mxu0 }
0x1415   : > { %v11059_v7 = vadd.f32 %v13204_v27, %v18180_v10  ;;  %v11050_v15 = vpop.f32.mrb[61].mxu0 }
0x1416   : > { %v11051_v19 = vadd.f32 %v11050_v15, %v18180_v10  ;;  %11194 = vadd.xlane.f32.xlu0 %v11193_v0  ;;  %v13205_v9 = vpop.f32.mrb[62].mxu0 }
0x1417   : > { %v18220_v12 = vadd.f32 %v11059_v7, %v18042_v55  ;;  %v11062_v21 = vadd.f32 %v13205_v9, %v18180_v10  ;;  %v11053_v47 = vpop.f32.mrb[63].mxu0 }
0x1418   : > { %v11054_v31 = vadd.f32 %v11053_v47, %v18180_v10  ;;  %11197 = vadd.xlane.f32.xlu1 %v11196_v2  ;;  %v18226_v11 = vadd.f32 %v11051_v19, %v18045_v50 }
0x1419   : > { %v18229_v54 = vadd.f32 %v11062_v21, %v18051_v34  ;;  %v11131_v56 = vsel %vm395_vm1, %v18220_v12, 0.0  ;;  %v11183_v50 = vmul.f32 %v18220_v12, %v18220_v12 }
0x141a   : > { %11132 = vadd.xlane.f32.xlu0 %v11131_v56  ;;  %v18234_v55 = vadd.f32 %v11054_v31, %v18048_v63  ;;  %v11125_v4 = vsel %vm395_vm1, %v18226_v11, 0.0  ;;  %v11181_v26 = vmul.f32 %v18226_v11, %v18226_v11 }
0x141b   : > { %v11134_v22 = vsel %vm395_vm1, %v18229_v54, 0.0  ;;  %v11184_v46 = vmul.f32 %v18229_v54, %v18229_v54  ;;  %v11211_v63 = vsel %vm395_vm1, %v11183_v50, 0.0 }
0x141c   : > { %11135 = vadd.xlane.f32.xlu1 %v11134_v22  ;;  %v11128_v34 = vsel %vm395_vm1, %v18234_v55, 0.0  ;;  %v11182_v44 = vmul.f32 %v18234_v55, %v18234_v55  ;;  %v11205_v20 = vsel %vm395_vm1, %v11181_v26, 0.0 }
0x141d   : > { %v11214_v18 = vsel %vm395_vm1, %v11184_v46, 0.0 }
0x141e   : > { %11126 = vadd.xlane.f32.xlu0 %v11125_v4  ;;  %v11208_v59 = vsel %vm395_vm1, %v11182_v44, 0.0 }
0x1420   : > { %11129 = vadd.xlane.f32.xlu1 %v11128_v34 }
0x1422   : > { %11212 = vadd.xlane.f32.xlu0 %v11211_v63 }
0x1424   : > { %11215 = vadd.xlane.f32.xlu1 %v11214_v18 }
0x1426   : > { %11206 = vadd.xlane.f32.xlu0 %v11205_v20 }
0x1428   : > { %11209 = vadd.xlane.f32.xlu1 %v11208_v59 }
0x144c   : > { %v13208_v58 = vpop.f32.mrb[64].mxu0 }
0x144d   : > { %v11075_v28 = vadd.f32 %v13208_v58, %v18180_v10  ;;  %v11066_v62 = vpop.f32.mrb[65].mxu0 }
0x144e   : > { %v11067_v23 = vadd.f32 %v11066_v62, %v18180_v10  ;;  %v13209_v40 = vpop.f32.mrb[66].mxu0 }
0x144f   : > { %v18263_v42 = vadd.f32 %v11075_v28, %v18095_v16  ;;  %v11078_v14 = vadd.f32 %v13209_v40, %v18180_v10  ;;  %v11069_v3 = vpop.f32.mrb[67].mxu0 }
0x1450   : > { %v11070_v8 = vadd.f32 %v11069_v3, %v18180_v10  ;;  %v18268_v5 = vadd.f32 %v11067_v23, %v18089_v60 }
0x1451   : > { %v18271_v53 = vadd.f32 %v11078_v14, %v18086_v13  ;;  %v11143_v38 = vsel %vm395_vm1, %v18263_v42, 0.0  ;;  %v11187_v60 = vmul.f32 %v18263_v42, %v18263_v42 }
0x1452   : > { %11144 = vadd.xlane.f32.xlu0 %v11143_v38  ;;  %v18276_v25 = vadd.f32 %v11070_v8, %v18092_v45  ;;  %v11137_v51 = vsel %vm395_vm1, %v18268_v5, 0.0  ;;  %v11185_v52 = vmul.f32 %v18268_v5, %v18268_v5 }
0x1453   : > { %v11146_v16 = vsel %vm395_vm1, %v18271_v53, 0.0  ;;  %v11188_v39 = vmul.f32 %v18271_v53, %v18271_v53  ;;  %v11223_v45 = vsel %vm395_vm1, %v11187_v60, 0.0 }
0x1454   : > { %11147 = vadd.xlane.f32.xlu1 %v11146_v16  ;;  %v11140_v13 = vsel %vm395_vm1, %v18276_v25, 0.0  ;;  %v11186_v33 = vmul.f32 %v18276_v25, %v18276_v25  ;;  %v11217_v15 = vsel %vm395_vm1, %v11185_v52, 0.0 }
0x1455   : > { %v11226_v43 = vsel %vm395_vm1, %v11188_v39, 0.0 }
0x1456   : > { %11138 = vadd.xlane.f32.xlu0 %v11137_v51  ;;  %v11220_v47 = vsel %vm395_vm1, %v11186_v33, 0.0 }
0x1458   : > { %11141 = vadd.xlane.f32.xlu1 %v11140_v13 }
0x145a   : > { %11224 = vadd.xlane.f32.xlu0 %v11223_v45 }
0x145b   : > { %v13212_v61 = vpop.f32.mrb[68].mxu0 }
0x145c   : > { %v11091_v32 = vadd.f32 %v13212_v61, %v18180_v10  ;;  %11227 = vadd.xlane.f32.xlu1 %v11226_v43  ;;  %v11082_v24 = vpop.f32.mrb[69].mxu0 }
0x145d   : > { %v11083_v27 = vadd.f32 %v11082_v24, %v18180_v10  ;;  %v13213_v7 = vpop.f32.mrb[70].mxu0 }
0x145e   : > { %v18298_v0 = vadd.f32 %v11091_v32, %v18122_v1  ;;  %v11094_v19 = vadd.f32 %v13213_v7, %v18180_v10  ;;  %11218 = vadd.xlane.f32.xlu0 %v11217_v15  ;;  %v11085_v9 = vpop.f32.mrb[71].mxu0 }
0x145f   : > { %v11086_v21 = vadd.f32 %v11085_v9, %v18180_v10  ;;  %v18309_v56 = vadd.f32 %v11083_v27, %v18113_v49 }
0x1460   : > { %v18304_v2 = vadd.f32 %v11094_v19, %v18125_v6  ;;  %11221 = vadd.xlane.f32.xlu1 %v11220_v47  ;;  %v11155_v31 = vsel %vm395_vm1, %v18298_v0, 0.0 }
0x1461   : > { %v18314_v22 = vadd.f32 %v11086_v21, %v18116_v35  ;;  %v11149_v10 = vsel %vm395_vm1, %v18309_v56, 0.0  ;;  %v11189_v6 = vmul.f32 %v18309_v56, %v18309_v56  ;;  %v11191_v35 = vmul.f32 %v18298_v0, %v18298_v0 }
0x1462   : > { %11156 = vadd.xlane.f32.xlu0 %v11155_v31  ;;  %v11158_v1 = vsel %vm395_vm1, %v18304_v2, 0.0  ;;  %v11192_v46 = vmul.f32 %v18304_v2, %v18304_v2 }
0x1463   : > { %v11152_v4 = vsel %vm395_vm1, %v18314_v22, 0.0  ;;  %v11190_v49 = vmul.f32 %v18314_v22, %v18314_v22  ;;  %v11229_v50 = vsel %vm395_vm1, %v11189_v6, 0.0  ;;  %v11235_v63 = vsel %vm395_vm1, %v11191_v35, 0.0 }
0x1464   : > { %11159 = vadd.xlane.f32.xlu1 %v11158_v1  ;;  %v11238_v26 = vsel %vm395_vm1, %v11192_v46, 0.0 }
0x1465   : > { %v11232_v34 = vsel %vm395_vm1, %v11190_v49, 0.0 }
0x1466   : > { %11150 = vadd.xlane.f32.xlu0 %v11149_v10 }
0x1468   : > { %11153 = vadd.xlane.f32.xlu1 %v11152_v4 }
0x146a   : > { %11230 = vadd.xlane.f32.xlu0 %v11229_v50 }
0x146c   : > { %11233 = vadd.xlane.f32.xlu1 %v11232_v34 }
0x146e   : > { %11236 = vadd.xlane.f32.xlu0 %v11235_v63 }
0x1470   : > { %11239 = vadd.xlane.f32.xlu1 %v11238_v26 }
0x1497   : > { %v11121_v18 = vpop.xlane.xlu0 %11120 }
0x1498   : > { %v11163_v59 = vmul.f32 0.03125, %v11121_v18 }
0x1499   : > { %v11124_v44 = vpop.xlane.xlu1 %11123 }
0x149a   : > { %v11164_v37 = vmul.f32 0.03125, %v11124_v44  ;;  %v11259_v28 = vmul.f32 %v11163_v59, %v11163_v59 }
0x149b   : > { %v11115_v20 = vpop.xlane.xlu0 %11114 }
0x149c   : > { %v18332_v62 = vmul.f32 0.03125, %v11115_v20  ;;  %v11260_v3 = vmul.f32 %v11164_v37, %v11164_v37  ;;  %v18745_v20 = vsub.s32 7, %v18724_v17 }
0x149d   : > { %v11118_v30 = vpop.xlane.xlu1 %11117 }
0x149e   : > { %v18334_v40 = vmul.f32 0.03125, %v11118_v30  ;;  %v11257_v51 = vmul.f32 %v18332_v62, %v18332_v62  ;;  %v18355_v30 = vrot.slane %v18175_v57, %v18745_v20 }
0x149f   : > { %v11201_v58 = vpop.xlane.xlu0 %11200 }
0x14a0   : > { %v11243_v23 = vmul.f32 0.03125, %v11201_v58  ;;  %v11258_v45 = vmul.f32 %v18334_v40, %v18334_v40  ;;  %v11307_v58 = vsub.f32 %v18185_v41, %v11163_v59 }
0x14a1   : > { %v11204_v14 = vpop.xlane.xlu1 %11203 }
0x14a2   : > { %v11275_v8 = vsub.f32 %v11243_v23, %v11259_v28  ;;  %v11244_v38 = vmul.f32 0.03125, %v11204_v14  ;;  %v11308_v28 = vsub.f32 %v18193_v48, %v11164_v37 }
0x14a3   : > { %v11195_v16 = vpop.xlane.xlu0 %11194 }
0x14a4   : > { %v11291_v60 = vmax.f32 %v11275_v8, 0.0  ;;  %v11276_v13 = vsub.f32 %v11244_v38, %v11260_v3  ;;  %v11241_v39 = vmul.f32 0.03125, %v11195_v16 }
0x14a5   : > { %v11198_v52 = vpop.xlane.xlu1 %11197 }
0x14a6   : > { %v11323_v61 = vadd.f32 1e-12, %v11291_v60  ;;  %v11292_v43 = vmax.f32 %v11276_v13, 0.0  ;;  %v11273_v33 = vsub.f32 %v11241_v39, %v11257_v51  ;;  %v11242_v32 = vmul.f32 0.03125, %v11198_v52 }
0x14a7   : > { %v11133_v24 = vpop.xlane.xlu0 %11132  ;;  %v11305_v51 = vsub.f32 %v18190_v29, %v18332_v62 }
0x14a8   : > { %14081 = vrsqrt.f32 %v11323_v61  ;;  %v11324_v27 = vadd.f32 1e-12, %v11292_v43  ;;  %v11289_v7 = vmax.f32 %v11273_v33, 0.0  ;;  %v11274_v15 = vsub.f32 %v11242_v32, %v11258_v45 }
0x14a9   : > { %v11136_v19 = vpop.xlane.xlu1 %11135  ;;  %v18340_v1 = vmul.f32 0.03125, %v11133_v24  ;;  %v11306_v45 = vsub.f32 %v18198_v36, %v18334_v40  ;;  %v18373_v36 = vld [vmem:[%s18529_s6 + $0x18] ss:$0 sm:$0xff] }
0x14aa   : > { %14083 = vrsqrt.f32 %v11324_v27  ;;  %v11321_v9 = vadd.f32 1e-12, %v11289_v7  ;;  %v11290_v21 = vmax.f32 %v11274_v15, 0.0  ;;  %v18342_v6 = vmul.f32 0.03125, %v11136_v19 }
0x14ab   : > { %v11127_v47 = vpop.xlane.xlu0 %11126  ;;  %v11263_v49 = vmul.f32 %v18340_v1, %v18340_v1 }
0x14ac   : > { %14085 = vrsqrt.f32 %v11321_v9  ;;  %v11322_v31 = vadd.f32 1e-12, %v11290_v21  ;;  %v18346_v50 = vmul.f32 0.03125, %v11127_v47  ;;  %v11264_v26 = vmul.f32 %v18342_v6, %v18342_v6 }
0x14ad   : > { %v11130_v10 = vpop.xlane.xlu1 %11129 }
0x14ae   : > { %14087 = vrsqrt.f32 %v11322_v31  ;;  %v18348_v34 = vmul.f32 0.03125, %v11130_v10  ;;  %v11261_v3 = vmul.f32 %v18346_v50, %v18346_v50 }
0x14af   : > { %v11213_v4 = vpop.xlane.xlu0 %11212 }
0x14b0   : > { %v11247_v35 = vmul.f32 0.03125, %v11213_v4  ;;  %v11262_v57 = vmul.f32 %v18348_v34, %v18348_v34 }
0x14b1   : > { %v11216_v46 = vpop.xlane.xlu1 %11215 }
0x14b2   : > { %v14082_v63 = vpop.eup %14081  ;;  %v11279_v18 = vsub.f32 %v11247_v35, %v11263_v49  ;;  %v11248_v44 = vmul.f32 0.03125, %v11216_v46  ;;  %v11312_v35 = vsub.f32 %v18229_v54, %v18342_v6 }
0x14b3   : > { %v11207_v23 = vpop.xlane.xlu0 %11206  ;;  %v11355_v60 = vmul.f32 %v14082_v63, %v11307_v58  ;;  %v11311_v63 = vsub.f32 %v18220_v12, %v18340_v1  ;;  %v11310_v58 = vsub.f32 %v18234_v55, %v18348_v34 }
0x14b4   : > { %v14084_v14 = vpop.eup %14083  ;;  %v11295_v8 = vmax.f32 %v11279_v18, 0.0  ;;  %v11280_v38 = vsub.f32 %v11248_v44, %v11264_v26  ;;  %v11245_v16 = vmul.f32 0.03125, %v11207_v23  ;;  %v11309_v26 = vsub.f32 %v18226_v11, %v18346_v50 }
0x14b5   : > { %v11356_v17 = vmul.f32 %v14084_v14, %v11308_v28  ;;  %v11210_v13 = vpop.xlane.xlu1 %11209  ;;  %v11375_v27 = vmul.f32 %v18355_v30, %v11355_v60 }
0x14b6   : > { %v14086_v41 = vpop.eup %14085  ;;  %v11327_v59 = vadd.f32 1e-12, %v11295_v8  ;;  %v11296_v48 = vmax.f32 %v11280_v38, 0.0  ;;  %v11277_v37 = vsub.f32 %v11245_v16, %v11261_v3  ;;  %v11246_v39 = vmul.f32 0.03125, %v11210_v13 }
0x14b7   : > { %v11353_v52 = vmul.f32 %v14086_v41, %v11305_v51  ;;  %v11376_v43 = vmul.f32 %v18355_v30, %v11356_v17  ;;  %v11395_v31 = vadd.f32 %v18373_v36, %v11375_v27 }
0x14b8   : > { %v14088_v61 = vpop.eup %14087  ;;  %v11328_v33 = vadd.f32 1e-12, %v11296_v48  ;;  %v11293_v29 = vmax.f32 %v11277_v37, 0.0  ;;  %v11278_v62 = vsub.f32 %v11246_v39, %v11262_v57  ;;  %14089 = vrsqrt.f32 %v11327_v59 }
0x14b9   : > { %v11354_v32 = vmul.f32 %v14088_v61, %v11306_v45  ;;  %v11373_v24 = vmul.f32 %v18355_v30, %v11353_v52  ;;  %v11396_v19 = vadd.f32 %v18373_v36, %v11376_v43 }
0x14ba   : > { %14091 = vrsqrt.f32 %v11328_v33  ;;  %v11325_v7 = vadd.f32 1e-12, %v11293_v29  ;;  %v11294_v15 = vmax.f32 %v11278_v62, 0.0 }
0x14bb   : > { %v11374_v40 = vmul.f32 %v18355_v30, %v11354_v32  ;;  %v11393_v21 = vadd.f32 %v18373_v36, %v11373_v24  ;;  %v11410_v4 = vpack.c.bf16 %v11396_v19, %v11395_v31 }
0x14bc   : > { %14093 = vrsqrt.f32 %v11325_v7  ;;  %v11326_v9 = vadd.f32 1e-12, %v11294_v15 }
0x14bd   : > { %v11394_v47 = vadd.f32 %v18373_v36, %v11374_v40 }
0x14be   : > { %14095 = vrsqrt.f32 %v11326_v9 }
0x14bf   : > { %v11409_v10 = vpack.c.bf16 %v11394_v47, %v11393_v21 }
0x14c1   : > { %13218 = vmatprep.mubr.msk.bf16.mxu1 %vm395_vm1, %v11409_v10 }
0x14c2   : > { %13219 = vmatmul.mubr.msk.bf16.vlgmr.msra.gmra.mrb[56].mxu1 %vm395_vm1, %v11410_v4  ;;  %v14090_v49 = vpop.eup %14089 }
0x14c3   : > { %v11359_v20 = vmul.f32 %v14090_v49, %v11311_v63 }
0x14c4   : > { %v14092_v46 = vpop.eup %14091 }
0x14c5   : > { %v11360_v18 = vmul.f32 %v14092_v46, %v11312_v35  ;;  %v11379_v6 = vmul.f32 %v18355_v30, %v11359_v20 }
0x14c6   : > { %v14094_v44 = vpop.eup %14093 }
0x14c7   : > { %v11357_v28 = vmul.f32 %v14094_v44, %v11309_v26  ;;  %v11380_v14 = vmul.f32 %v18355_v30, %v11360_v18  ;;  %v11399_v8 = vadd.f32 %v18373_v36, %v11379_v6 }
0x14c8   : > { %v14096_v23 = vpop.eup %14095 }
0x14c9   : > { %v11358_v3 = vmul.f32 %v14096_v23, %v11310_v58  ;;  %v11377_v54 = vmul.f32 %v18355_v30, %v11357_v28  ;;  %v11400_v1 = vadd.f32 %v18373_v36, %v11380_v14 }
0x14cb   : > { %v11378_v12 = vmul.f32 %v18355_v30, %v11358_v3  ;;  %v11397_v11 = vadd.f32 %v18373_v36, %v11377_v54  ;;  %v11412_v34 = vpack.c.bf16 %v11400_v1, %v11399_v8 }
0x14cd   : > { %v11398_v50 = vadd.f32 %v18373_v36, %v11378_v12 }
0x14cf   : > { %v11411_v55 = vpack.c.bf16 %v11398_v50, %v11397_v11 }
0x14d1   : > { %13222 = vmatprep.mubr.msk.bf16.mxu1 %vm395_vm1, %v11411_v55 }
0x14d2   : > { %13223 = vmatmul.mubr.msk.bf16.gmra.mrb[60].mxu1 %vm395_vm1, %v11412_v34 }
0x14df   : > { %v11145_v38 = vpop.xlane.xlu0 %11144 }
0x14e0   : > { %v11171_v60 = vmul.f32 0.03125, %v11145_v38 }
0x14e1   : > { %v11148_v16 = vpop.xlane.xlu1 %11147 }
0x14e2   : > { %v11172_v57 = vmul.f32 0.03125, %v11148_v16  ;;  %v11267_v41 = vmul.f32 %v11171_v60, %v11171_v60  ;;  %v11315_v1 = vsub.f32 %v18263_v42, %v11171_v60 }
0x14e3   : > { %v11139_v51 = vpop.xlane.xlu0 %11138 }
0x14e4   : > { %v18400_v59 = vmul.f32 0.03125, %v11139_v51  ;;  %v11268_v45 = vmul.f32 %v11172_v57, %v11172_v57  ;;  %v11316_v11 = vsub.f32 %v18271_v53, %v11172_v57 }
0x14e5   : > { %v11142_v17 = vpop.xlane.xlu1 %11141 }
0x14e6   : > { %v18402_v37 = vmul.f32 0.03125, %v11142_v17  ;;  %v11265_v33 = vmul.f32 %v18400_v59, %v18400_v59  ;;  %v11313_v51 = vsub.f32 %v18268_v5, %v18400_v59 }
0x14e7   : > { %v11225_v13 = vpop.xlane.xlu0 %11224 }
0x14e8   : > { %v11251_v48 = vmul.f32 0.03125, %v11225_v13  ;;  %v11266_v24 = vmul.f32 %v18402_v37, %v18402_v37 }
0x14e9   : > { %v11228_v39 = vpop.xlane.xlu1 %11227 }
0x14ea   : > { %v11283_v52 = vsub.f32 %v11251_v48, %v11267_v41  ;;  %v11252_v61 = vmul.f32 0.03125, %v11228_v39 }
0x14eb   : > { %v11219_v43 = vpop.xlane.xlu0 %11218 }
0x14ec   : > { %v11299_v29 = vmax.f32 %v11283_v52, 0.0  ;;  %v11284_v62 = vsub.f32 %v11252_v61, %v11268_v45  ;;  %v11249_v32 = vmul.f32 0.03125, %v11219_v43  ;;  %v11314_v45 = vsub.f32 %v18276_v25, %v18402_v37 }
0x14ed   : > { %v11222_v27 = vpop.xlane.xlu1 %11221 }
0x14ee   : > { %v11331_v7 = vadd.f32 1e-12, %v11299_v29  ;;  %v11300_v15 = vmax.f32 %v11284_v62, 0.0  ;;  %v11281_v40 = vsub.f32 %v11249_v32, %v11265_v33  ;;  %v11250_v19 = vmul.f32 0.03125, %v11222_v27 }
0x14ef   : > { %v11157_v9 = vpop.xlane.xlu0 %11156 }
0x14f0   : > { %14097 = vrsqrt.f32 %v11331_v7  ;;  %v11332_v21 = vadd.f32 1e-12, %v11300_v15  ;;  %v11297_v47 = vmax.f32 %v11281_v40, 0.0  ;;  %v11282_v31 = vsub.f32 %v11250_v19, %v11266_v24 }
0x14f1   : > { %v11160_v10 = vpop.xlane.xlu1 %11159  ;;  %v18408_v20 = vmul.f32 0.03125, %v11157_v9 }
0x14f2   : > { %14099 = vrsqrt.f32 %v11332_v21  ;;  %v11329_v4 = vadd.f32 1e-12, %v11297_v47  ;;  %v11298_v49 = vmax.f32 %v11282_v31, 0.0  ;;  %v18410_v23 = vmul.f32 0.03125, %v11160_v10 }
0x14f3   : > { %v11151_v35 = vpop.xlane.xlu0 %11150  ;;  %v11271_v55 = vmul.f32 %v18408_v20, %v18408_v20 }
0x14f4   : > { %14101 = vrsqrt.f32 %v11329_v4  ;;  %v11330_v46 = vadd.f32 1e-12, %v11298_v49  ;;  %v11173_v63 = vmul.f32 0.03125, %v11151_v35  ;;  %v11272_v41 = vmul.f32 %v18410_v23, %v18410_v23 }
0x14f5   : > { %v11154_v26 = vpop.xlane.xlu1 %11153  ;;  %v11319_v35 = vsub.f32 %v18298_v0, %v18408_v20 }
0x14f6   : > { %14103 = vrsqrt.f32 %v11330_v46  ;;  %v11174_v18 = vmul.f32 0.03125, %v11154_v26  ;;  %v11269_v58 = vmul.f32 %v11173_v63, %v11173_v63  ;;  %v11317_v47 = vsub.f32 %v18309_v56, %v11173_v63 }
0x14f7   : > { %v11231_v44 = vpop.xlane.xlu0 %11230 }
0x14f8   : > { %v11253_v28 = vmul.f32 0.03125, %v11231_v44  ;;  %v11270_v54 = vmul.f32 %v11174_v18, %v11174_v18  ;;  %v11318_v10 = vsub.f32 %v18314_v22, %v11174_v18 }
0x14f9   : > { %v11234_v14 = vpop.xlane.xlu1 %11233 }
0x14fa   : > { %v14098_v3 = vpop.eup %14097  ;;  %v11285_v6 = vsub.f32 %v11253_v28, %v11269_v58  ;;  %v11254_v12 = vmul.f32 0.03125, %v11234_v14  ;;  %v11320_v58 = vsub.f32 %v18304_v2, %v18410_v23  ;;  %v11421_v23 = vld [vmem:[%s18531_s8 + $0x10] sm:$0x1] }
0x14fb   : > { %v11237_v50 = vpop.xlane.xlu0 %11236  ;;  %v11363_v17 = vmul.f32 %v14098_v3, %v11315_v1  ;;  %v18746_v1 = vld [vmem:[#allocation10_spill] sm:$0xff] }
0x14fc   : > { %v14100_v8 = vpop.eup %14099  ;;  %v11301_v34 = vmax.f32 %v11285_v6, 0.0  ;;  %v11286_v38 = vsub.f32 %v11254_v12, %v11270_v54  ;;  %v11255_v16 = vmul.f32 0.03125, %v11237_v50  ;;  %v11422_v12 = vunpack.c.l.bf16 %v11421_v23 }
0x14fd   : > { %v11364_v13 = vmul.f32 %v14100_v8, %v11316_v11  ;;  %v11240_v48 = vpop.xlane.xlu1 %11239  ;;  %v11383_v32 = vmul.f32 %v18355_v30, %v11363_v17 }
0x14fe   : > { %v14102_v42 = vpop.eup %14101  ;;  %v11333_v60 = vadd.f32 1e-12, %v11301_v34  ;;  %v11302_v53 = vmax.f32 %v11286_v38, 0.0  ;;  %v11287_v57 = vsub.f32 %v11255_v16, %v11271_v55  ;;  %v11256_v39 = vmul.f32 0.03125, %v11240_v48 }
0x14ff   : > { %v11384_v52 = vmul.f32 %v18355_v30, %v11364_v13  ;;  %v11361_v61 = vmul.f32 %v14102_v42, %v11313_v51  ;;  %v11403_v19 = vadd.f32 %v18373_v36, %v11383_v32  ;;  %v11426_v11 = vrot.slane %v11422_v12, %v18746_v1 }
0x1500   : > { %v14104_v43 = vpop.eup %14103  ;;  %14105 = vrsqrt.f32 %v11333_v60  ;;  %v11334_v5 = vadd.f32 1e-12, %v11302_v53  ;;  %v11303_v59 = vmax.f32 %v11287_v57, 0.0  ;;  %v11288_v33 = vsub.f32 %v11256_v39, %v11272_v41 }
0x1501   : > { %v11362_v29 = vmul.f32 %v14104_v43, %v11314_v45  ;;  %v11381_v62 = vmul.f32 %v18355_v30, %v11361_v61  ;;  %v11404_v25 = vadd.f32 %v18373_v36, %v11384_v52 }
0x1502   : > { %14107 = vrsqrt.f32 %v11334_v5  ;;  %v11335_v24 = vadd.f32 1e-12, %v11303_v59  ;;  %v11304_v27 = vmax.f32 %v11288_v33, 0.0 }
0x1503   : > { %v11382_v7 = vmul.f32 %v18355_v30, %v11362_v29  ;;  %v11401_v15 = vadd.f32 %v18373_v36, %v11381_v62  ;;  %v11414_v21 = vpack.c.bf16 %v11404_v25, %v11403_v19 }
0x1504   : > { %14109 = vrsqrt.f32 %v11335_v24  ;;  %v11336_v37 = vadd.f32 1e-12, %v11304_v27 }
0x1505   : > { %v11402_v40 = vadd.f32 %v18373_v36, %v11382_v7 }
0x1506   : > { %14111 = vrsqrt.f32 %v11336_v37 }
0x1507   : > { %v11413_v9 = vpack.c.bf16 %v11402_v40, %v11401_v15 }
0x1509   : > { %13226 = vmatprep.mubr.msk.bf16.mxu1 %vm395_vm1, %v11413_v9 }
0x150a   : > { %v14106_v31 = vpop.eup %14105  ;;  %13227 = vmatmul.mubr.msk.bf16.gmra.mrb[64].mxu1 %vm395_vm1, %v11414_v21 }
0x150b   : > { %v11365_v4 = vmul.f32 %v14106_v31, %v11317_v47 }
0x150c   : > { %v14108_v49 = vpop.eup %14107 }
0x150d   : > { %v11366_v46 = vmul.f32 %v14108_v49, %v11318_v10  ;;  %v11385_v26 = vmul.f32 %v18355_v30, %v11365_v4 }
0x150e   : > { %v14110_v44 = vpop.eup %14109 }
0x150f   : > { %v11367_v56 = vmul.f32 %v14110_v44, %v11319_v35  ;;  %v11386_v63 = vmul.f32 %v18355_v30, %v11366_v46  ;;  %v11405_v22 = vadd.f32 %v18373_v36, %v11385_v26 }
0x1510   : > { %v14112_v28 = vpop.eup %14111 }
0x1511   : > { %v11387_v14 = vmul.f32 %v18355_v30, %v11367_v56  ;;  %v11368_v3 = vmul.f32 %v14112_v28, %v11320_v58  ;;  %v11406_v18 = vadd.f32 %v18373_v36, %v11386_v63 }
0x1513   : > { %v11388_v0 = vmul.f32 %v18355_v30, %v11368_v3  ;;  %v11415_v20 = vpack.c.bf16 %v11406_v18, %v11405_v22  ;;  %v11407_v54 = vadd.f32 %v18373_v36, %v11387_v14 }
0x1515   : > { %v11408_v6 = vadd.f32 %v18373_v36, %v11388_v0  ;;  %13230 = vmatprep.mubr.msk.bf16.mxu1 %vm395_vm1, %v11415_v20 }
0x1517   : > { %v11416_v2 = vpack.c.bf16 %v11408_v6, %v11407_v54 }
0x1519   : > { %13231 = vmatmul.mubr.msk.bf16.gmra.mrb[68].mxu1 %vm395_vm1, %v11416_v2 }
0x1595   : > { %v13220_v50 = vpop.f32.mrb[56].mxu1 }
0x1596   : > { %v11506_v8 = vadd.f32 %v13220_v50, %v11426_v11  ;;  %v11497_v30 = vpop.f32.mrb[57].mxu1 }
0x1597   : > { %v11498_v55 = vadd.f32 %v11497_v30, %v11426_v11  ;;  %v13221_v34 = vpop.f32.mrb[58].mxu1 }
0x1598   : > { %11562 = vst [vmem:[%s18454_s14 + $0x10] sm:$0xff] %v11506_v8  ;;  %v11509_v36 = vadd.f32 %v13221_v34, %v11426_v11  ;;  %v11500_v38 = vpop.f32.mrb[59].mxu1 }
0x1599   : > { %11560 = vst [vmem:[%s18454_s14] sm:$0xff] %v11498_v55  ;;  %v11501_v16 = vadd.f32 %v11500_v38, %v11426_v11 }
0x159a   : > { %11563 = vst [vmem:[%s18454_s14 + $0x18] sm:$0xff] %v11509_v36 }
0x159b   : > { %11561 = vst [vmem:[%s18454_s14 + $0x8] sm:$0xff] %v11501_v16 }
0x15a5   : > { %v13224_v51 = vpop.f32.mrb[60].mxu1 }
0x15a6   : > { %v11522_v17 = vadd.f32 %v13224_v51, %v11426_v11  ;;  %v11513_v13 = vpop.f32.mrb[61].mxu1 }
0x15a7   : > { %v11514_v41 = vadd.f32 %v11513_v13, %v11426_v11  ;;  %v13225_v48 = vpop.f32.mrb[62].mxu1 }
0x15a8   : > { %11566 = vst [vmem:[%s18454_s14 + $0x30] sm:$0xff] %v11522_v17  ;;  %v11525_v42 = vadd.f32 %v13225_v48, %v11426_v11  ;;  %v11516_v60 = vpop.f32.mrb[63].mxu1 }
0x15a9   : > { %11564 = vst [vmem:[%s18454_s14 + $0x20] sm:$0xff] %v11514_v41  ;;  %v11517_v53 = vadd.f32 %v11516_v60, %v11426_v11 }
0x15aa   : > { %11567 = vst [vmem:[%s18454_s14 + $0x38] sm:$0xff] %v11525_v42 }
0x15ab   : > { %11565 = vst [vmem:[%s18454_s14 + $0x28] sm:$0xff] %v11517_v53 }
0x15dd   : > { %v13228_v57 = vpop.f32.mrb[64].mxu1 }
0x15de   : > { %v11538_v39 = vadd.f32 %v13228_v57, %v11426_v11  ;;  %v11529_v45 = vpop.f32.mrb[65].mxu1 }
0x15df   : > { %v11530_v52 = vadd.f32 %v11529_v45, %v11426_v11  ;;  %v13229_v61 = vpop.f32.mrb[66].mxu1 }
0x15e0   : > { %11570 = vst [vmem:[%s18454_s14 + $0x50] sm:$0xff] %v11538_v39  ;;  %v11541_v43 = vadd.f32 %v13229_v61, %v11426_v11  ;;  %v11532_v5 = vpop.f32.mrb[67].mxu1 }
0x15e1   : > { %11568 = vst [vmem:[%s18454_s14 + $0x40] sm:$0xff] %v11530_v52  ;;  %v11533_v59 = vadd.f32 %v11532_v5, %v11426_v11 }
0x15e2   : > { %11571 = vst [vmem:[%s18454_s14 + $0x58] sm:$0xff] %v11541_v43 }
0x15e3   : > { %11569 = vst [vmem:[%s18454_s14 + $0x48] sm:$0xff] %v11533_v59 }
0x15ec   : > { %v13232_v33 = vpop.f32.mrb[68].mxu1 }
0x15ed   : > { %v11554_v29 = vadd.f32 %v13232_v33, %v11426_v11  ;;  %v11545_v62 = vpop.f32.mrb[69].mxu1 }
0x15ee   : > { %v11546_v32 = vadd.f32 %v11545_v62, %v11426_v11  ;;  %v13233_v24 = vpop.f32.mrb[70].mxu1 }
0x15ef   : > { %11574 = vst [vmem:[%s18454_s14 + $0x70] sm:$0xff] %v11554_v29  ;;  %v11557_v27 = vadd.f32 %v13233_v24, %v11426_v11  ;;  %v11548_v7 = vpop.f32.mrb[71].mxu1 }
0x15f0   : > { %11572 = vst [vmem:[%s18454_s14 + $0x60] sm:$0xff] %v11546_v32  ;;  %v11549_v25 = vadd.f32 %v11548_v7, %v11426_v11 }
0x15f1   : > { %11575 = vst [vmem:[%s18454_s14 + $0x78] sm:$0xff] %v11557_v27 }
0x15f2   : > { %11573 = vst [vmem:[%s18454_s14 + $0x68] sm:$0xff] %v11549_v25 }
0x15f3   : > { %14162 = shalt.err (!%p14159_p2)
}
0x15f4   : > { %s14163_s17 = scalar_lea.hbm %s18474_s26, 2048  ;;  %s14167_s19 = scalar_lea.hbm %s18532_s9, 4096 }
0x15f5   : > { %p14164_p4 = scmp.ne.s32.totalorder %s18474_s26, %s14163_s17  ;;  %p14168_p9 = scmp.lt.u32.totalorder %s18474_s26, %s18532_s9 }
0x15f6   : > { %p14169_p1 = scmp.lt.u32.totalorder %s14167_s19, %s14163_s17  ;;  %p14171_p6 = scmp.lt.u32.totalorder %s14163_s17, %s18474_s26 }
0x15f7   : > { %p14165_p5 = pnand %p14164_p4, %p18748_p11 }
0x15f8   : > { %p14170_p3 = por %p14169_p1, %p14168_p9 }
0x15f9   : > { %p14166_p7 = pneg %p14165_p5 }
0x15fa   : > { %p14172_p12 = por %p14171_p6, %p14170_p3 }
0x15fc   : > { %p14173_p13 = pnand %p14172_p12, %p14166_p7 }
0x15fe   : > { %14176 = shalt.err (!%p14173_p13)
}
0x15ff   : > { %s14228_s25 = smov 128   ;;  %s14229_s23 = smov 8  }
0x1600   : > { %13236 = dma.vmem_to_hbm [thread:$0]  (%p18748_p11), %s18476_s24, 2048, %s18474_s26, %s11577_s13, %s14228_s25, %s14228_s25, %s14229_s23  }
0x1601 PF: > { %s11605_s27 = sand.u32 1, %s14203_s30   ;;  %p18749_p8 = scmp.ne.s32.totalorder %s18591_s22, 0 }
0x1602   : > { %p18750_p10 = scmp.ge.s32.totalorder %s14215_s12, 2  ;;  %s11606_s17 = scalar_lea.sflag [#allocation4], %s11605_s27 }
0x1604   : > { %p13243_p0 = pnand %p18750_p10, %p18749_p8 }
0x1606   : > { %14198 = dma.done.wait (!%p13243_p0), %s11606_s17, 2048  }
0x1607   : > { %14200 = vsyncadd (!%p13243_p0), %s11606_s17, 4294965248  ;;  %p22_p2 = scmp.ge.s32.totalorder %s14305_s15, 4   ;;  %s18751_s30 = smov %s14207_s10 }
0x1608   : > { %s18752_s10 = smov %s14211_s11  ;;  %s18753_s11 = smov %s14317_s18 }
0x1609   : > { %s18754_s12 = smov %s14305_s15  ;;  %24 = sbr.rel (!%p22_p2) target bundleno = 5 (0x5), region = 107 }
0x1610   :  { %11611 = vsyncpa [#allocation3], 1 }
0x1611   :  { %11613 = vsyncpa [#allocation3 + $0x1], 1 }
0x1612   :  { %11614 = vsyncpa [#allocation4], 1 }
0x1613   :  { %11616 = vsyncpa [#allocation4 + $0x1], 1 }

</bundles_post_ra>
